<compile_context>
chip_gen: v5e
topology: v5e:2x2
jax: 0.10.0
libtpu: 0.0.40
codegen_flags: <defaults>
</compile_context>

<pallas_src>
import functools

import jax
import jax.numpy as jnp
from jax.experimental import pallas as pl
from jax.experimental.pallas import tpu as pltpu

LANE = 128


def _vmem_limit_bytes():
    # v5e/v6e: 128 MiB physical VMEM per core, v7x: 64 MiB — derive instead of
    # hard-coding a value that over-subscribes v7x.
    cap = 128 * 1024 * 1024
    try:
        info = pltpu.get_tpu_info()
        cap = int(getattr(info, "vmem_capacity_bytes", cap))
    except Exception:
        pass
    return min(100 * 1024 * 1024, (cap * 3) // 4)


VMEM_LIMIT = _vmem_limit_bytes()


def _cparams(sem):
    return pltpu.CompilerParams(dimension_semantics=sem, vmem_limit_bytes=VMEM_LIMIT)


def _round_up(n, m):
    return (n + m - 1) // m * m


def _ctile(cout):
    # lane-dense 128-wide tiles when possible, otherwise one full-width block
    # (a <128-lane masked store beats 2x padded DMA + 2x wasted MXU K downstream).
    return LANE if cout % LANE == 0 else cout


# ----------------------------------------------------------------------------
# In-kernel math helpers (f32, VPU/EUP ops only)
# ----------------------------------------------------------------------------
def _erf(x):
    # Abramowitz & Stegun 7.1.26 (|err| <= 1.5e-7): exact-GELU semantics within
    # bf16 noise.  The divide goes to the EUP via approx reciprocal.
    a1, a2, a3, a4, a5 = 0.254829592, -0.284496736, 1.421413741, -1.453152027, 1.061405429
    p = 0.3275911
    ax = jnp.abs(x)
    t = pl.reciprocal(1.0 + p * ax, approx=True)
    poly = ((((a5 * t + a4) * t + a3) * t + a2) * t + a1) * t
    e = 1.0 - poly * jnp.exp(-ax * ax)
    return jnp.where(x < 0, -e, e)


def _gelu(x):
    # torch.nn.GELU() default (exact / erf form)
    return 0.5 * x * (1.0 + _erf(x * 0.7071067811865476))


def _gn_cols(y, eps=1e-5):
    # Per-column (= per-channel) normalization over rows (= spatial positions);
    # single-pass sum / sum-of-squares, biased variance, eps=1e-5 == nn.GroupNorm.
    # Valid because every GroupNorm in FFM has num_groups == num_channels.
    inv_m = 1.0 / y.shape[0]
    s = jnp.sum(y, axis=0, keepdims=True)
    ss = jnp.sum(y * y, axis=0, keepdims=True)
    mean = s * inv_m
    var = jnp.maximum(ss * inv_m - mean * mean, 0.0)
    return (y - mean) * jax.lax.rsqrt(var + eps)


# ----------------------------------------------------------------------------
# Kernel 1: C_Layer == 1x1 conv + per-channel GroupNorm + GELU, fully fused
# (the conv bias is mathematically cancelled by the GN mean subtraction -> dropped)
# ----------------------------------------------------------------------------
def _c_layer_kernel(x_ref, w_ref, g_ref, be_ref, o_ref):
    acc = jnp.dot(x_ref[0], w_ref[...], preferred_element_type=jnp.float32)
    y = _gn_cols(acc) * g_ref[...] + be_ref[...]
    o_ref[0] = _gelu(y).astype(o_ref.dtype)


def c_layer(x, p):
    """x: (B, H, W, Cin) bf16.  Returns (B, H, W, Cout) bf16 (exact channels)."""
    B, H, W, Cin = x.shape
    Cout = p["w"].shape[1]
    tn = _ctile(Cout)
    w = p["w"].astype(jnp.bfloat16)
    g = p["g"].reshape(1, Cout).astype(jnp.float32)
    be = p["be"].reshape(1, Cout).astype(jnp.float32)
    xf = x.reshape(B, H * W, Cin)
    y = pl.pallas_call(
        _c_layer_kernel,
        out_shape=jax.ShapeDtypeStruct((B, H * W, Cout), jnp.bfloat16),
        grid_spec=pltpu.PrefetchScalarGridSpec(
            num_scalar_prefetch=0,
            grid=(B, Cout // tn),
            in_specs=[
                pl.BlockSpec((1, H * W, Cin), lambda bi, ni: (bi, 0, 0)),
                pl.BlockSpec((Cin, tn), lambda bi, ni: (0, ni)),
                pl.BlockSpec((1, tn), lambda bi, ni: (0, ni)),
                pl.BlockSpec((1, tn), lambda bi, ni: (0, ni)),
            ],
            out_specs=pl.BlockSpec((1, H * W, tn), lambda bi, ni: (bi, 0, ni)),
        ),
        compiler_params=_cparams(("parallel", "parallel")),
    )(xf, w, g, be)
    return y.reshape(B, H, W, Cout)


# ----------------------------------------------------------------------------
# Kernel 2: 3x3 / stride-1 / pad-1 conv + GELU.
# The unpadded input tile is copied into a zero-initialized flat VMEM scratch with 3
# dw-shifted column groups (halo zeros == Conv2d zero padding, no HBM padded copy).
# Each kernel row dh is then ONE matmul of K = 3*Cin over a shifted 2-D view, and the
# seam columns of the flat layout are stripped while writing the output block.
# ----------------------------------------------------------------------------
def _conv3x3_gelu_kernel(x_ref, w_ref, b_ref, o_ref, xpad_ref, *, hh, ww, cin):
    wp = ww + 2
    m = hh * wp
    ni = pl.program_id(1)

    @pl.when(ni == 0)
    def _():
        # Build the padded / tap-replicated input once per batch element.
        xpad_ref[...] = jnp.zeros_like(xpad_ref)
        for dw in range(3):
            col = dw * cin
            for h in range(hh):
                row = (h + 1) * wp + 1 - dw           # static offsets
                xpad_ref[row:row + ww, col:col + cin] = x_ref[0, h].astype(xpad_ref.dtype)

    tn = o_ref.shape[-1]
    acc = jnp.zeros((m, tn), jnp.float32)
    for dh in range(3):
        lhs = xpad_ref[dh * wp:dh * wp + m, :].astype(jnp.bfloat16)
        acc = acc + jnp.dot(lhs, w_ref[dh * 3 * cin:(dh + 1) * 3 * cin, :],
                            preferred_element_type=jnp.float32)
    y = _gelu(acc + b_ref[...])                        # conv bias is live (GELU before GN)
    # strip the 2 seam columns per flat row while writing back (no HBM slice copy)
    for h in range(hh):
        o_ref[0, h] = y[h * wp:h * wp + ww, :].astype(o_ref.dtype)


def conv3x3_gelu(x, w, b):
    """x: (B, H, W, Cin) bf16; w: (3, 3, Cin, Cout) f32 (HWIO); b: (Cout,) f32."""
    B, H, W, Cin = x.shape
    assert w.shape[2] == Cin, (w.shape, Cin)
    Cout = w.shape[3]
    wp = W + 2
    Lp = _round_up((H + 2) * wp, 8)
    wf = w.reshape(9 * Cin, Cout).astype(jnp.bfloat16)   # rows ordered (dh, dw, cin)
    bf = b.reshape(1, Cout).astype(jnp.float32)
    tn = _ctile(Cout)
    y = pl.pallas_call(
        functools.partial(_conv3x3_gelu_kernel, hh=H, ww=W, cin=Cin),
        out_shape=jax.ShapeDtypeStruct((B, H, W, Cout), jnp.bfloat16),
        grid_spec=pltpu.PrefetchScalarGridSpec(
            num_scalar_prefetch=0,
            grid=(B, Cout // tn),
            in_specs=[
                pl.BlockSpec((1, H, W, Cin), lambda bi, ni: (bi, 0, 0, 0)),
                pl.BlockSpec((9 * Cin, tn), lambda bi, ni: (0, ni)),
                pl.BlockSpec((1, tn), lambda bi, ni: (0, ni)),
            ],
            out_specs=pl.BlockSpec((1, H, W, tn), lambda bi, ni: (bi, 0, 0, ni)),
            scratch_shapes=[pltpu.VMEM((Lp, 3 * Cin), jnp.float32)],
        ),
        compiler_params=_cparams(("parallel", "arbitrary")),
    )(x, wf, bf)
    return y


# ----------------------------------------------------------------------------
# Kernel 3: "forway" C_Layer with the channel concat folded into two matmuls and the
# post-pixel-shuffle GroupNorm of the up-sampled branch fused in front.  The branch-b
# GN is computed once per batch (pl.when(ni==0)) into a VMEM scratch so it is not
# recomputed per output-channel tile.  The 1x1-conv bias is cancelled by the GN mean.
# ----------------------------------------------------------------------------
def _forway_kernel(a_ref, b_ref, ng_ref, nb_ref, wa_ref, wb_ref,
                   g_ref, be_ref, o_ref, bn_ref):
    ni = pl.program_id(1)

    @pl.when(ni == 0)
    def _():
        bn = _gn_cols(b_ref[0].astype(jnp.float32)) * ng_ref[...] + nb_ref[...]
        bn_ref[...] = bn.astype(bn_ref.dtype)

    # concat([a, bn]) @ W  ==  a @ Wa + bn @ Wb
    acc = jnp.dot(a_ref[0], wa_ref[...], preferred_element_type=jnp.float32)
    acc = acc + jnp.dot(bn_ref[...], wb_ref[...], preferred_element_type=jnp.float32)
    y = _gn_cols(acc) * g_ref[...] + be_ref[...]
    o_ref[0] = _gelu(y).astype(o_ref.dtype)


def forway_fused(a, b, p):
    B, H, W, Ka = a.shape          # Ka = C1 (exact, unpadded)
    Kb = b.shape[-1]               # C2 // 2
    Cout = p["fw_wa"].shape[1]     # C1
    tn = _ctile(Cout)
    wa = p["fw_wa"].astype(jnp.bfloat16)
    wb = p["fw_wb"].astype(jnp.bfloat16)
    g = p["fw_g"].reshape(1, Cout).astype(jnp.float32)
    be = p["fw_be"].reshape(1, Cout).astype(jnp.float32)
    ng = p["norm_g"].reshape(1, Kb).astype(jnp.float32)
    nb = p["norm_b"].reshape(1, Kb).astype(jnp.float32)
    af = a.reshape(B, H * W, Ka)
    bf = b.reshape(B, H * W, Kb)
    y = pl.pallas_call(
        _forway_kernel,
        out_shape=jax.ShapeDtypeStruct((B, H * W, Cout), jnp.bfloat16),
        grid_spec=pltpu.PrefetchScalarGridSpec(
            num_scalar_prefetch=0,
            grid=(B, Cout // tn),
            in_specs=[
                pl.BlockSpec((1, H * W, Ka), lambda bi, ni: (bi, 0, 0)),
                pl.BlockSpec((1, H * W, Kb), lambda bi, ni: (bi, 0, 0)),
                pl.BlockSpec((1, Kb), lambda bi, ni: (0, 0)),
                pl.BlockSpec((1, Kb), lambda bi, ni: (0, 0)),
                pl.BlockSpec((Ka, tn), lambda bi, ni: (0, ni)),
                pl.BlockSpec((Kb, tn), lambda bi, ni: (0, ni)),
                pl.BlockSpec((1, tn), lambda bi, ni: (0, ni)),
                pl.BlockSpec((1, tn), lambda bi, ni: (0, ni)),
            ],
            out_specs=pl.BlockSpec((1, H * W, tn), lambda bi, ni: (bi, 0, ni)),
            scratch_shapes=[pltpu.VMEM((H * W, Kb), jnp.bfloat16)],
        ),
        compiler_params=_cparams(("parallel", "arbitrary")),
    )(af, bf, ng, nb, wa, wb, g, be)
    return y.reshape(B, H, W, Cout)


# ----------------------------------------------------------------------------
# Glue (pure layout permutation, stays in JAX)
# ----------------------------------------------------------------------------
def pixel_shuffle(x, r):
    # NHWC equivalent of torch.nn.PixelShuffle(r)
    B, H, W, Crr = x.shape
    C = Crr // (r * r)
    x = x.reshape(B, H, W, C, r, r).transpose(0, 1, 4, 2, 5, 3)
    return x.reshape(B, H * r, W * r, C)


# ----------------------------------------------------------------------------
# FFM forward (NCHW public interface, like the torch module)
# ----------------------------------------------------------------------------
def ffm_forward(x1_nchw, x2_nchw, params):
    x1 = jnp.transpose(x1_nchw, (0, 2, 3, 1)).astype(jnp.bfloat16)
    x2 = jnp.transpose(x2_nchw, (0, 2, 3, 1)).astype(jnp.bfloat16)
    a = c_layer(x1, params["pre1"])                         # pre_conv1
    b = c_layer(x2, params["pre2"])                         # pre_conv2
    b = conv3x3_gelu(b, params["up_w"], params["up_b"])     # Up_sample_wN conv+GELU
    # TODO(synk): folding this transpose into forway's read of b needs strided
    # channel gathers / sublane scatters; kept as one XLA transpose pass for now.
    b = pixel_shuffle(b, 2)                                 # Up_sample_wN PixelShuffle
    y = forway_fused(a, b, params)                          # norm + cat + forway
    return jnp.transpose(y, (0, 3, 1, 2)).astype(jnp.float32)


# ----------------------------------------------------------------------------
# Plain-JAX reference (includes the conv biases that the kernels drop — they are
# mathematically cancelled by GN, so this also validates that simplification)
# ----------------------------------------------------------------------------
def _ref_gn(x, g, b, eps=1e-5):
    mean = jnp.mean(x, axis=(1, 2), keepdims=True)
    var = jnp.mean((x - mean) ** 2, axis=(1, 2), keepdims=True)
    return (x - mean) * jax.lax.rsqrt(var + eps) * g + b


def ffm_reference(x1_nchw, x2_nchw, p):
    gelu = lambda t: jax.nn.gelu(t, approximate=False)
    x1 = jnp.transpose(x1_nchw, (0, 2, 3, 1))
    x2 = jnp.transpose(x2_nchw, (0, 2, 3, 1))
    a = gelu(_ref_gn(jnp.einsum("bhwc,cd->bhwd", x1, p["pre1"]["w"]) + p["pre1"]["b"],
                     p["pre1"]["g"], p["pre1"]["be"]))
    b = gelu(_ref_gn(jnp.einsum("bhwc,cd->bhwd", x2, p["pre2"]["w"]) + p["pre2"]["b"],
                     p["pre2"]["g"], p["pre2"]["be"]))
    b = jax.lax.conv_general_dilated(b, p["up_w"], (1, 1), ((1, 1), (1, 1)),
                                     dimension_numbers=("NHWC", "HWIO", "NHWC")) + p["up_b"]
    b = _ref_gn(pixel_shuffle(gelu(b), 2), p["norm_g"], p["norm_b"])
    cat = jnp.concatenate([a, b], axis=-1)
    w_full = jnp.concatenate([p["fw_wa"], p["fw_wb"]], axis=0)
    y = gelu(_ref_gn(jnp.einsum("bhwc,cd->bhwd", cat, w_full) + p["fw_b"],
                     p["fw_g"], p["fw_be"]))
    return jnp.transpose(y, (0, 3, 1, 2))


# ----------------------------------------------------------------------------
# Deterministic synthetic parameters (no checkpoint); non-zero biases / affine
# params so the GN-cancellation simplification is actually exercised by the check.
# ----------------------------------------------------------------------------
def init_params(key, c1, c2):
    ks = jax.random.split(key, 16)

    def nw(k, *s):
        return 0.05 * jax.random.normal(k, s, jnp.float32)

    def nb(k, c):
        return 0.1 * jax.random.normal(k, (c,), jnp.float32)

    return {
        "pre1": dict(w=nw(ks[0], c1, c1), b=nb(ks[1], c1),
                     g=1.0 + nb(ks[2], c1), be=nb(ks[3], c1)),
        "pre2": dict(w=nw(ks[4], c2, c2), b=nb(ks[5], c2),
                     g=1.0 + nb(ks[6], c2), be=nb(ks[7], c2)),
        "up_w": nw(ks[8], 3, 3, c2, 2 * c2), "up_b": nb(ks[9], 2 * c2),
        "norm_g": 1.0 + nb(ks[10], c2 // 2), "norm_b": nb(ks[11], c2 // 2),
        "fw_wa": nw(ks[12], c1, c1), "fw_wb": nw(ks[13], c2 // 2, c1),
        "fw_b": nb(ks[14], c1), "fw_g": 1.0 + nb(ks[15], c1), "fw_be": nb(ks[14], c1),
    }


if __name__ == "__main__":
    key = jax.random.PRNGKey(0)
    kp, k1, k2 = jax.random.split(key, 3)
    B, C1, C2, H = 2, 64, 128, 16
    params = init_params(kp, C1, C2)
    x1 = jax.random.normal(k1, (B, C1, H, H), jnp.float32)            # FFM input[0]
    x2 = jax.random.normal(k2, (B, C2, H // 2, H // 2), jnp.float32)  # FFM input[1]

    fwd = jax.jit(ffm_forward)
    y = jax.block_until_ready(fwd(x1, x2, params))
    assert y.shape == (B, C1, H, H), y.shape
    assert bool(jnp.all(jnp.isfinite(y)))

    # loose self-check vs plain-JAX f32 reference (bf16 MXU operands + bf16 outputs
    # + approx-reciprocal erf => relaxed tolerance)
    ref = ffm_reference(x1, x2, params)
    rel = jnp.linalg.norm((y - ref).ravel()) / (jnp.linalg.norm(ref.ravel()) + 1e-12)
    assert float(rel) < 0.08, float(rel)

    print("KERNEL_OK")
</pallas_src>

<mosaic_0001>
module attributes {stable_mosaic.version = 11 : i64} {
  func.func @_c_layer_kernel(%arg0: i32, %arg1: i32, %arg2: memref<1x64x128xbf16, #tpu.memory_space<vmem>>, %arg3: memref<128x128xbf16, #tpu.memory_space<vmem>>, %arg4: memref<1x128xf32, #tpu.memory_space<vmem>>, %arg5: memref<1x128xf32, #tpu.memory_space<vmem>>, %arg6: memref<1x64x128xbf16, #tpu.memory_space<vmem>>) attributes {dimension_semantics = [#tpu.dimension_semantics<parallel>, #tpu.dimension_semantics<parallel>], iteration_bounds = array<i64: 2, 1>, scalar_prefetch = 0 : i64, scratch_operands = 0 : i64, tpu.core_type = #tpu.core_type<tc>, window_params = [{transform_indices = @transform_0, window_bounds = array<i64: 1, 64, 128>}, {transform_indices = @transform_1, window_bounds = array<i64: 128, 128>}, {transform_indices = @transform_2, window_bounds = array<i64: 1, 128>}, {transform_indices = @transform_3, window_bounds = array<i64: 1, 128>}, {transform_indices = @transform_4, window_bounds = array<i64: 1, 64, 128>}]} {
    %c0 = arith.constant 0 : index
    %c0_0 = arith.constant 0 : index
    %c0_1 = arith.constant 0 : index
    %0 = vector.load %arg2[%c0, %c0_0, %c0_1] : memref<1x64x128xbf16, #tpu.memory_space<vmem>>, vector<1x64x128xbf16>
    %1 = vector.shape_cast %0 : vector<1x64x128xbf16> to vector<64x128xbf16>
    %c0_2 = arith.constant 0 : index
    %c0_3 = arith.constant 0 : index
    %2 = vector.load %arg3[%c0_2, %c0_3] : memref<128x128xbf16, #tpu.memory_space<vmem>>, vector<128x128xbf16>
    %cst = arith.constant dense<0.000000e+00> : vector<64x128xf32>
    %3 = tpu.matmul %1, %2, %cst {dimension_numbers = #tpu.dot_dimension_numbers<[1], [0], [0], [1], [0, 0, 1, 1], [], []>} : vector<64x128xbf16>, vector<128x128xbf16>, vector<64x128xf32> -> vector<64x128xf32>
    %cst_4 = arith.constant dense<0.000000e+00> : vector<128xf32>
    %4 = vector.multi_reduction <add>, %3, %cst_4 [0] : vector<64x128xf32> to vector<128xf32>
    %5 = vector.shape_cast %4 : vector<128xf32> to vector<1x128xf32>
    %6 = arith.mulf %3, %3 : vector<64x128xf32>
    %cst_5 = arith.constant dense<0.000000e+00> : vector<128xf32>
    %7 = vector.multi_reduction <add>, %6, %cst_5 [0] : vector<64x128xf32> to vector<128xf32>
    %8 = vector.shape_cast %7 : vector<128xf32> to vector<1x128xf32>
    %cst_6 = arith.constant 1.562500e-02 : f32
    %9 = vector.broadcast %cst_6 : f32 to vector<1x128xf32>
    %10 = arith.mulf %5, %9 : vector<1x128xf32>
    %cst_7 = arith.constant 1.562500e-02 : f32
    %11 = vector.broadcast %cst_7 : f32 to vector<1x128xf32>
    %12 = arith.mulf %8, %11 : vector<1x128xf32>
    %13 = arith.mulf %10, %10 : vector<1x128xf32>
    %14 = arith.subf %12, %13 : vector<1x128xf32>
    %cst_8 = arith.constant 0.000000e+00 : f32
    %15 = vector.broadcast %cst_8 : f32 to vector<1x128xf32>
    %16 = arith.maximumf %14, %15 : vector<1x128xf32>
    %17 = vector.broadcast %10 : vector<1x128xf32> to vector<64x128xf32>
    %18 = arith.subf %3, %17 : vector<64x128xf32>
    %cst_9 = arith.constant 9.99999974E-6 : f32
    %19 = vector.broadcast %cst_9 : f32 to vector<1x128xf32>
    %20 = arith.addf %16, %19 : vector<1x128xf32>
    %21 = math.rsqrt %20 : vector<1x128xf32>
    %22 = vector.broadcast %21 : vector<1x128xf32> to vector<64x128xf32>
    %23 = arith.mulf %18, %22 : vector<64x128xf32>
    %c0_10 = arith.constant 0 : index
    %c0_11 = arith.constant 0 : index
    %24 = vector.load %arg4[%c0_10, %c0_11] : memref<1x128xf32, #tpu.memory_space<vmem>>, vector<1x128xf32>
    %25 = vector.broadcast %24 : vector<1x128xf32> to vector<64x128xf32>
    %26 = arith.mulf %23, %25 : vector<64x128xf32>
    %c0_12 = arith.constant 0 : index
    %c0_13 = arith.constant 0 : index
    %27 = vector.load %arg5[%c0_12, %c0_13] : memref<1x128xf32, #tpu.memory_space<vmem>>, vector<1x128xf32>
    %28 = vector.broadcast %27 : vector<1x128xf32> to vector<64x128xf32>
    %29 = arith.addf %26, %28 : vector<64x128xf32>
    %cst_14 = arith.constant 5.000000e-01 : f32
    %30 = vector.broadcast %cst_14 : f32 to vector<64x128xf32>
    %31 = arith.mulf %30, %29 : vector<64x128xf32>
    %cst_15 = arith.constant 0.707106769 : f32
    %32 = vector.broadcast %cst_15 : f32 to vector<64x128xf32>
    %33 = arith.mulf %29, %32 : vector<64x128xf32>
    %34 = math.absf %33 : vector<64x128xf32>
    %cst_16 = arith.constant 0.327591091 : f32
    %35 = vector.broadcast %cst_16 : f32 to vector<64x128xf32>
    %36 = arith.mulf %35, %34 : vector<64x128xf32>
    %cst_17 = arith.constant 1.000000e+00 : f32
    %37 = vector.broadcast %cst_17 : f32 to vector<64x128xf32>
    %38 = arith.addf %37, %36 : vector<64x128xf32>
    %39 = tpu.reciprocal %38 {approx = true} : vector<64x128xf32> -> vector<64x128xf32>
    %cst_18 = arith.constant 1.06140542 : f32
    %40 = vector.broadcast %cst_18 : f32 to vector<64x128xf32>
    %41 = arith.mulf %40, %39 : vector<64x128xf32>
    %cst_19 = arith.constant -1.45315206 : f32
    %42 = vector.broadcast %cst_19 : f32 to vector<64x128xf32>
    %43 = arith.addf %41, %42 : vector<64x128xf32>
    %44 = arith.mulf %43, %39 : vector<64x128xf32>
    %cst_20 = arith.constant 1.42141378 : f32
    %45 = vector.broadcast %cst_20 : f32 to vector<64x128xf32>
    %46 = arith.addf %44, %45 : vector<64x128xf32>
    %47 = arith.mulf %46, %39 : vector<64x128xf32>
    %cst_21 = arith.constant -0.284496725 : f32
    %48 = vector.broadcast %cst_21 : f32 to vector<64x128xf32>
    %49 = arith.addf %47, %48 : vector<64x128xf32>
    %50 = arith.mulf %49, %39 : vector<64x128xf32>
    %cst_22 = arith.constant 0.254829586 : f32
    %51 = vector.broadcast %cst_22 : f32 to vector<64x128xf32>
    %52 = arith.addf %50, %51 : vector<64x128xf32>
    %53 = arith.mulf %52, %39 : vector<64x128xf32>
    %cst_23 = arith.constant 0.000000e+00 : f32
    %54 = vector.broadcast %cst_23 : f32 to vector<64x128xf32>
    %55 = arith.subf %54, %34 : vector<64x128xf32>
    %56 = arith.mulf %55, %34 : vector<64x128xf32>
    %57 = math.exp %56 : vector<64x128xf32>
    %58 = arith.mulf %53, %57 : vector<64x128xf32>
    %cst_24 = arith.constant 1.000000e+00 : f32
    %59 = vector.broadcast %cst_24 : f32 to vector<64x128xf32>
    %60 = arith.subf %59, %58 : vector<64x128xf32>
    %cst_25 = arith.constant 0.000000e+00 : f32
    %61 = vector.broadcast %cst_25 : f32 to vector<64x128xf32>
    %62 = arith.cmpf olt, %33, %61 : vector<64x128xf32>
    %cst_26 = arith.constant 0.000000e+00 : f32
    %63 = vector.broadcast %cst_26 : f32 to vector<64x128xf32>
    %64 = arith.subf %63, %60 : vector<64x128xf32>
    %65 = arith.select %62, %64, %60 : vector<64x128xi1>, vector<64x128xf32>
    %cst_27 = arith.constant 1.000000e+00 : f32
    %66 = vector.broadcast %cst_27 : f32 to vector<64x128xf32>
    %67 = arith.addf %66, %65 : vector<64x128xf32>
    %68 = arith.mulf %31, %67 : vector<64x128xf32>
    %69 = arith.truncf %68 : vector<64x128xf32> to vector<64x128xbf16>
    %c0_28 = arith.constant 0 : index
    %c0_29 = arith.constant 0 : index
    %c0_30 = arith.constant 0 : index
    %70 = vector.load %arg6[%c0_28, %c0_29, %c0_30] : memref<1x64x128xbf16, #tpu.memory_space<vmem>>, vector<1x64x128xbf16>
    %71 = vector.shape_cast %70 : vector<1x64x128xbf16> to vector<64x128xbf16>
    %72 = vector.shape_cast %69 : vector<64x128xbf16> to vector<1x64x128xbf16>
    tpu.vector_store %arg6[%c0_28, %c0_29, %c0_30], %72 {strides = array<i32>} : memref<1x64x128xbf16, #tpu.memory_space<vmem>>, vector<1x64x128xbf16>,
    return
  }
  func.func @transform_0(%arg0: i32, %arg1: i32) -> (i32, i32, i32) {
    %c0_i32 = arith.constant 0 : i32
    %c0_i32_0 = arith.constant 0 : i32
    %c0_i32_1 = arith.constant 0 : i32
    return %arg0, %c0_i32, %c0_i32_0 : i32, i32, i32
  }
  func.func @transform_1(%arg0: i32, %arg1: i32) -> (i32, i32) {
    %c0_i32 = arith.constant 0 : i32
    %c0_i32_0 = arith.constant 0 : i32
    return %c0_i32, %arg1 : i32, i32
  }
  func.func @transform_2(%arg0: i32, %arg1: i32) -> (i32, i32) {
    %c0_i32 = arith.constant 0 : i32
    %c0_i32_0 = arith.constant 0 : i32
    return %c0_i32, %arg1 : i32, i32
  }
  func.func @transform_3(%arg0: i32, %arg1: i32) -> (i32, i32) {
    %c0_i32 = arith.constant 0 : i32
    %c0_i32_0 = arith.constant 0 : i32
    return %c0_i32, %arg1 : i32, i32
  }
  func.func @transform_4(%arg0: i32, %arg1: i32) -> (i32, i32, i32) {
    %c0_i32 = arith.constant 0 : i32
    %c0_i32_0 = arith.constant 0 : i32
    return %arg0, %c0_i32, %arg1 : i32, i32, i32
  }
}

module attributes {stable_mosaic.version = 11 : i64} {
  func.func @_conv3x3_gelu_kernel(%arg0: i32, %arg1: i32, %arg2: memref<1x8x8x128xbf16, #tpu.memory_space<vmem>>, %arg3: memref<1152x128xbf16, #tpu.memory_space<vmem>>, %arg4: memref<1x128xf32, #tpu.memory_space<vmem>>, %arg5: memref<1x8x8x128xbf16, #tpu.memory_space<vmem>>, %arg6: memref<104x384xf32, #tpu.memory_space<vmem>>) attributes {dimension_semantics = [#tpu.dimension_semantics<parallel>, #tpu.dimension_semantics<arbitrary>], iteration_bounds = array<i64: 2, 2>, scalar_prefetch = 0 : i64, scratch_operands = 1 : i64, tpu.core_type = #tpu.core_type<tc>, window_params = [{transform_indices = @transform_0, window_bounds = array<i64: 1, 8, 8, 128>}, {transform_indices = @transform_1, window_bounds = array<i64: 1152, 128>}, {transform_indices = @transform_2, window_bounds = array<i64: 1, 128>}, {transform_indices = @transform_3, window_bounds = array<i64: 1, 8, 8, 128>}]} {
    %c0_i32 = arith.constant 0 : i32
    %0 = arith.cmpi eq, %arg1, %c0_i32 : i32
    %1 = arith.extui %0 : i1 to i32
    %c0_i32_0 = arith.constant 0 : i32
    %2 = arith.cmpi ne, %1, %c0_i32_0 : i32
    scf.if %2 {
      %cst_52 = arith.constant 0.000000e+00 : f32
      %101 = vector.broadcast %cst_52 : f32 to vector<104x384xf32>
      %c0_53 = arith.constant 0 : index
      %c0_54 = arith.constant 0 : index
      %102 = vector.load %arg6[%c0_53, %c0_54] : memref<104x384xf32, #tpu.memory_space<vmem>>, vector<104x384xf32>
      tpu.vector_store %arg6[%c0_53, %c0_54], %101 {strides = array<i32>} : memref<104x384xf32, #tpu.memory_space<vmem>>, vector<104x384xf32>,
      %c0_55 = arith.constant 0 : index
      %c0_56 = arith.constant 0 : index
      %c0_57 = arith.constant 0 : index
      %c0_58 = arith.constant 0 : index
      %103 = vector.load %arg2[%c0_55, %c0_56, %c0_57, %c0_58] : memref<1x8x8x128xbf16, #tpu.memory_space<vmem>>, vector<1x1x8x128xbf16>
      %104 = vector.shape_cast %103 : vector<1x1x8x128xbf16> to vector<8x128xbf16>
      %105 = arith.extf %104 : vector<8x128xbf16> to vector<8x128xf32>
      %c11 = arith.constant 11 : index
      %c0_59 = arith.constant 0 : index
      %106 = vector.load %arg6[%c11, %c0_59] : memref<104x384xf32, #tpu.memory_space<vmem>>, vector<8x128xf32>
      tpu.vector_store %arg6[%c11, %c0_59], %105 {strides = array<i32>} : memref<104x384xf32, #tpu.memory_space<vmem>>, vector<8x128xf32>,
      %c0_60 = arith.constant 0 : index
      %c1_61 = arith.constant 1 : index
      %c0_62 = arith.constant 0 : index
      %c0_63 = arith.constant 0 : index
      %107 = vector.load %arg2[%c0_60, %c1_61, %c0_62, %c0_63] : memref<1x8x8x128xbf16, #tpu.memory_space<vmem>>, vector<1x1x8x128xbf16>
      %108 = vector.shape_cast %107 : vector<1x1x8x128xbf16> to vector<8x128xbf16>
      %109 = arith.extf %108 : vector<8x128xbf16> to vector<8x128xf32>
      %c21 = arith.constant 21 : index
      %c0_64 = arith.constant 0 : index
      %110 = vector.load %arg6[%c21, %c0_64] : memref<104x384xf32, #tpu.memory_space<vmem>>, vector<8x128xf32>
      tpu.vector_store %arg6[%c21, %c0_64], %109 {strides = array<i32>} : memref<104x384xf32, #tpu.memory_space<vmem>>, vector<8x128xf32>,
      %c0_65 = arith.constant 0 : index
      %c2_66 = arith.constant 2 : index
      %c0_67 = arith.constant 0 : index
      %c0_68 = arith.constant 0 : index
      %111 = vector.load %arg2[%c0_65, %c2_66, %c0_67, %c0_68] : memref<1x8x8x128xbf16, #tpu.memory_space<vmem>>, vector<1x1x8x128xbf16>
      %112 = vector.shape_cast %111 : vector<1x1x8x128xbf16> to vector<8x128xbf16>
      %113 = arith.extf %112 : vector<8x128xbf16> to vector<8x128xf32>
      %c31 = arith.constant 31 : index
      %c0_69 = arith.constant 0 : index
      %114 = vector.load %arg6[%c31, %c0_69] : memref<104x384xf32, #tpu.memory_space<vmem>>, vector<8x128xf32>
      tpu.vector_store %arg6[%c31, %c0_69], %113 {strides = array<i32>} : memref<104x384xf32, #tpu.memory_space<vmem>>, vector<8x128xf32>,
      %c0_70 = arith.constant 0 : index
      %c3_71 = arith.constant 3 : index
      %c0_72 = arith.constant 0 : index
      %c0_73 = arith.constant 0 : index
      %115 = vector.load %arg2[%c0_70, %c3_71, %c0_72, %c0_73] : memref<1x8x8x128xbf16, #tpu.memory_space<vmem>>, vector<1x1x8x128xbf16>
      %116 = vector.shape_cast %115 : vector<1x1x8x128xbf16> to vector<8x128xbf16>
      %117 = arith.extf %116 : vector<8x128xbf16> to vector<8x128xf32>
      %c41 = arith.constant 41 : index
      %c0_74 = arith.constant 0 : index
      %118 = vector.load %arg6[%c41, %c0_74] : memref<104x384xf32, #tpu.memory_space<vmem>>, vector<8x128xf32>
      tpu.vector_store %arg6[%c41, %c0_74], %117 {strides = array<i32>} : memref<104x384xf32, #tpu.memory_space<vmem>>, vector<8x128xf32>,
      %c0_75 = arith.constant 0 : index
      %c4_76 = arith.constant 4 : index
      %c0_77 = arith.constant 0 : index
      %c0_78 = arith.constant 0 : index
      %119 = vector.load %arg2[%c0_75, %c4_76, %c0_77, %c0_78] : memref<1x8x8x128xbf16, #tpu.memory_space<vmem>>, vector<1x1x8x128xbf16>
      %120 = vector.shape_cast %119 : vector<1x1x8x128xbf16> to vector<8x128xbf16>
      %121 = arith.extf %120 : vector<8x128xbf16> to vector<8x128xf32>
      %c51 = arith.constant 51 : index
      %c0_79 = arith.constant 0 : index
      %122 = vector.load %arg6[%c51, %c0_79] : memref<104x384xf32, #tpu.memory_space<vmem>>, vector<8x128xf32>
      tpu.vector_store %arg6[%c51, %c0_79], %121 {strides = array<i32>} : memref<104x384xf32, #tpu.memory_space<vmem>>, vector<8x128xf32>,
      %c0_80 = arith.constant 0 : index
      %c5_81 = arith.constant 5 : index
      %c0_82 = arith.constant 0 : index
      %c0_83 = arith.constant 0 : index
      %123 = vector.load %arg2[%c0_80, %c5_81, %c0_82, %c0_83] : memref<1x8x8x128xbf16, #tpu.memory_space<vmem>>, vector<1x1x8x128xbf16>
      %124 = vector.shape_cast %123 : vector<1x1x8x128xbf16> to vector<8x128xbf16>
      %125 = arith.extf %124 : vector<8x128xbf16> to vector<8x128xf32>
      %c61 = arith.constant 61 : index
      %c0_84 = arith.constant 0 : index
      %126 = vector.load %arg6[%c61, %c0_84] : memref<104x384xf32, #tpu.memory_space<vmem>>, vector<8x128xf32>
      tpu.vector_store %arg6[%c61, %c0_84], %125 {strides = array<i32>} : memref<104x384xf32, #tpu.memory_space<vmem>>, vector<8x128xf32>,
      %c0_85 = arith.constant 0 : index
      %c6_86 = arith.constant 6 : index
      %c0_87 = arith.constant 0 : index
      %c0_88 = arith.constant 0 : index
      %127 = vector.load %arg2[%c0_85, %c6_86, %c0_87, %c0_88] : memref<1x8x8x128xbf16, #tpu.memory_space<vmem>>, vector<1x1x8x128xbf16>
      %128 = vector.shape_cast %127 : vector<1x1x8x128xbf16> to vector<8x128xbf16>
      %129 = arith.extf %128 : vector<8x128xbf16> to vector<8x128xf32>
      %c71 = arith.constant 71 : index
      %c0_89 = arith.constant 0 : index
      %130 = vector.load %arg6[%c71, %c0_89] : memref<104x384xf32, #tpu.memory_space<vmem>>, vector<8x128xf32>
      tpu.vector_store %arg6[%c71, %c0_89], %129 {strides = array<i32>} : memref<104x384xf32, #tpu.memory_space<vmem>>, vector<8x128xf32>,
      %c0_90 = arith.constant 0 : index
      %c7_91 = arith.constant 7 : index
      %c0_92 = arith.constant 0 : index
      %c0_93 = arith.constant 0 : index
      %131 = vector.load %arg2[%c0_90, %c7_91, %c0_92, %c0_93] : memref<1x8x8x128xbf16, #tpu.memory_space<vmem>>, vector<1x1x8x128xbf16>
      %132 = vector.shape_cast %131 : vector<1x1x8x128xbf16> to vector<8x128xbf16>
      %133 = arith.extf %132 : vector<8x128xbf16> to vector<8x128xf32>
      %c81 = arith.constant 81 : index
      %c0_94 = arith.constant 0 : index
      %134 = vector.load %arg6[%c81, %c0_94] : memref<104x384xf32, #tpu.memory_space<vmem>>, vector<8x128xf32>
      tpu.vector_store %arg6[%c81, %c0_94], %133 {strides = array<i32>} : memref<104x384xf32, #tpu.memory_space<vmem>>, vector<8x128xf32>,
      %c0_95 = arith.constant 0 : index
      %c0_96 = arith.constant 0 : index
      %c0_97 = arith.constant 0 : index
      %c0_98 = arith.constant 0 : index
      %135 = vector.load %arg2[%c0_95, %c0_96, %c0_97, %c0_98] : memref<1x8x8x128xbf16, #tpu.memory_space<vmem>>, vector<1x1x8x128xbf16>
      %136 = vector.shape_cast %135 : vector<1x1x8x128xbf16> to vector<8x128xbf16>
      %137 = arith.extf %136 : vector<8x128xbf16> to vector<8x128xf32>
      %c10_99 = arith.constant 10 : index
      %c128 = arith.constant 128 : index
      %138 = vector.load %arg6[%c10_99, %c128] : memref<104x384xf32, #tpu.memory_space<vmem>>, vector<8x128xf32>
      tpu.vector_store %arg6[%c10_99, %c128], %137 {strides = array<i32>} : memref<104x384xf32, #tpu.memory_space<vmem>>, vector<8x128xf32>,
      %c0_100 = arith.constant 0 : index
      %c1_101 = arith.constant 1 : index
      %c0_102 = arith.constant 0 : index
      %c0_103 = arith.constant 0 : index
      %139 = vector.load %arg2[%c0_100, %c1_101, %c0_102, %c0_103] : memref<1x8x8x128xbf16, #tpu.memory_space<vmem>>, vector<1x1x8x128xbf16>
      %140 = vector.shape_cast %139 : vector<1x1x8x128xbf16> to vector<8x128xbf16>
      %141 = arith.extf %140 : vector<8x128xbf16> to vector<8x128xf32>
      %c20_104 = arith.constant 20 : index
      %c128_105 = arith.constant 128 : index
      %142 = vector.load %arg6[%c20_104, %c128_105] : memref<104x384xf32, #tpu.memory_space<vmem>>, vector<8x128xf32>
      tpu.vector_store %arg6[%c20_104, %c128_105], %141 {strides = array<i32>} : memref<104x384xf32, #tpu.memory_space<vmem>>, vector<8x128xf32>,
      %c0_106 = arith.constant 0 : index
      %c2_107 = arith.constant 2 : index
      %c0_108 = arith.constant 0 : index
      %c0_109 = arith.constant 0 : index
      %143 = vector.load %arg2[%c0_106, %c2_107, %c0_108, %c0_109] : memref<1x8x8x128xbf16, #tpu.memory_space<vmem>>, vector<1x1x8x128xbf16>
      %144 = vector.shape_cast %143 : vector<1x1x8x128xbf16> to vector<8x128xbf16>
      %145 = arith.extf %144 : vector<8x128xbf16> to vector<8x128xf32>
      %c30 = arith.constant 30 : index
      %c128_110 = arith.constant 128 : index
      %146 = vector.load %arg6[%c30, %c128_110] : memref<104x384xf32, #tpu.memory_space<vmem>>, vector<8x128xf32>
      tpu.vector_store %arg6[%c30, %c128_110], %145 {strides = array<i32>} : memref<104x384xf32, #tpu.memory_space<vmem>>, vector<8x128xf32>,
      %c0_111 = arith.constant 0 : index
      %c3_112 = arith.constant 3 : index
      %c0_113 = arith.constant 0 : index
      %c0_114 = arith.constant 0 : index
      %147 = vector.load %arg2[%c0_111, %c3_112, %c0_113, %c0_114] : memref<1x8x8x128xbf16, #tpu.memory_space<vmem>>, vector<1x1x8x128xbf16>
      %148 = vector.shape_cast %147 : vector<1x1x8x128xbf16> to vector<8x128xbf16>
      %149 = arith.extf %148 : vector<8x128xbf16> to vector<8x128xf32>
      %c40 = arith.constant 40 : index
      %c128_115 = arith.constant 128 : index
      %150 = vector.load %arg6[%c40, %c128_115] : memref<104x384xf32, #tpu.memory_space<vmem>>, vector<8x128xf32>
      tpu.vector_store %arg6[%c40, %c128_115], %149 {strides = array<i32>} : memref<104x384xf32, #tpu.memory_space<vmem>>, vector<8x128xf32>,
      %c0_116 = arith.constant 0 : index
      %c4_117 = arith.constant 4 : index
      %c0_118 = arith.constant 0 : index
      %c0_119 = arith.constant 0 : index
      %151 = vector.load %arg2[%c0_116, %c4_117, %c0_118, %c0_119] : memref<1x8x8x128xbf16, #tpu.memory_space<vmem>>, vector<1x1x8x128xbf16>
      %152 = vector.shape_cast %151 : vector<1x1x8x128xbf16> to vector<8x128xbf16>
      %153 = arith.extf %152 : vector<8x128xbf16> to vector<8x128xf32>
      %c50 = arith.constant 50 : index
      %c128_120 = arith.constant 128 : index
      %154 = vector.load %arg6[%c50, %c128_120] : memref<104x384xf32, #tpu.memory_space<vmem>>, vector<8x128xf32>
      tpu.vector_store %arg6[%c50, %c128_120], %153 {strides = array<i32>} : memref<104x384xf32, #tpu.memory_space<vmem>>, vector<8x128xf32>,
      %c0_121 = arith.constant 0 : index
      %c5_122 = arith.constant 5 : index
      %c0_123 = arith.constant 0 : index
      %c0_124 = arith.constant 0 : index
      %155 = vector.load %arg2[%c0_121, %c5_122, %c0_123, %c0_124] : memref<1x8x8x128xbf16, #tpu.memory_space<vmem>>, vector<1x1x8x128xbf16>
      %156 = vector.shape_cast %155 : vector<1x1x8x128xbf16> to vector<8x128xbf16>
      %157 = arith.extf %156 : vector<8x128xbf16> to vector<8x128xf32>
      %c60 = arith.constant 60 : index
      %c128_125 = arith.constant 128 : index
      %158 = vector.load %arg6[%c60, %c128_125] : memref<104x384xf32, #tpu.memory_space<vmem>>, vector<8x128xf32>
      tpu.vector_store %arg6[%c60, %c128_125], %157 {strides = array<i32>} : memref<104x384xf32, #tpu.memory_space<vmem>>, vector<8x128xf32>,
      %c0_126 = arith.constant 0 : index
      %c6_127 = arith.constant 6 : index
      %c0_128 = arith.constant 0 : index
      %c0_129 = arith.constant 0 : index
      %159 = vector.load %arg2[%c0_126, %c6_127, %c0_128, %c0_129] : memref<1x8x8x128xbf16, #tpu.memory_space<vmem>>, vector<1x1x8x128xbf16>
      %160 = vector.shape_cast %159 : vector<1x1x8x128xbf16> to vector<8x128xbf16>
      %161 = arith.extf %160 : vector<8x128xbf16> to vector<8x128xf32>
      %c70 = arith.constant 70 : index
      %c128_130 = arith.constant 128 : index
      %162 = vector.load %arg6[%c70, %c128_130] : memref<104x384xf32, #tpu.memory_space<vmem>>, vector<8x128xf32>
      tpu.vector_store %arg6[%c70, %c128_130], %161 {strides = array<i32>} : memref<104x384xf32, #tpu.memory_space<vmem>>, vector<8x128xf32>,
      %c0_131 = arith.constant 0 : index
      %c7_132 = arith.constant 7 : index
      %c0_133 = arith.constant 0 : index
      %c0_134 = arith.constant 0 : index
      %163 = vector.load %arg2[%c0_131, %c7_132, %c0_133, %c0_134] : memref<1x8x8x128xbf16, #tpu.memory_space<vmem>>, vector<1x1x8x128xbf16>
      %164 = vector.shape_cast %163 : vector<1x1x8x128xbf16> to vector<8x128xbf16>
      %165 = arith.extf %164 : vector<8x128xbf16> to vector<8x128xf32>
      %c80 = arith.constant 80 : index
      %c128_135 = arith.constant 128 : index
      %166 = vector.load %arg6[%c80, %c128_135] : memref<104x384xf32, #tpu.memory_space<vmem>>, vector<8x128xf32>
      tpu.vector_store %arg6[%c80, %c128_135], %165 {strides = array<i32>} : memref<104x384xf32, #tpu.memory_space<vmem>>, vector<8x128xf32>,
      %c0_136 = arith.constant 0 : index
      %c0_137 = arith.constant 0 : index
      %c0_138 = arith.constant 0 : index
      %c0_139 = arith.constant 0 : index
      %167 = vector.load %arg2[%c0_136, %c0_137, %c0_138, %c0_139] : memref<1x8x8x128xbf16, #tpu.memory_space<vmem>>, vector<1x1x8x128xbf16>
      %168 = vector.shape_cast %167 : vector<1x1x8x128xbf16> to vector<8x128xbf16>
      %169 = arith.extf %168 : vector<8x128xbf16> to vector<8x128xf32>
      %c9 = arith.constant 9 : index
      %c256 = arith.constant 256 : index
      %170 = vector.load %arg6[%c9, %c256] : memref<104x384xf32, #tpu.memory_space<vmem>>, vector<8x128xf32>
      tpu.vector_store %arg6[%c9, %c256], %169 {strides = array<i32>} : memref<104x384xf32, #tpu.memory_space<vmem>>, vector<8x128xf32>,
      %c0_140 = arith.constant 0 : index
      %c1_141 = arith.constant 1 : index
      %c0_142 = arith.constant 0 : index
      %c0_143 = arith.constant 0 : index
      %171 = vector.load %arg2[%c0_140, %c1_141, %c0_142, %c0_143] : memref<1x8x8x128xbf16, #tpu.memory_space<vmem>>, vector<1x1x8x128xbf16>
      %172 = vector.shape_cast %171 : vector<1x1x8x128xbf16> to vector<8x128xbf16>
      %173 = arith.extf %172 : vector<8x128xbf16> to vector<8x128xf32>
      %c19 = arith.constant 19 : index
      %c256_144 = arith.constant 256 : index
      %174 = vector.load %arg6[%c19, %c256_144] : memref<104x384xf32, #tpu.memory_space<vmem>>, vector<8x128xf32>
      tpu.vector_store %arg6[%c19, %c256_144], %173 {strides = array<i32>} : memref<104x384xf32, #tpu.memory_space<vmem>>, vector<8x128xf32>,
      %c0_145 = arith.constant 0 : index
      %c2_146 = arith.constant 2 : index
      %c0_147 = arith.constant 0 : index
      %c0_148 = arith.constant 0 : index
      %175 = vector.load %arg2[%c0_145, %c2_146, %c0_147, %c0_148] : memref<1x8x8x128xbf16, #tpu.memory_space<vmem>>, vector<1x1x8x128xbf16>
      %176 = vector.shape_cast %175 : vector<1x1x8x128xbf16> to vector<8x128xbf16>
      %177 = arith.extf %176 : vector<8x128xbf16> to vector<8x128xf32>
      %c29 = arith.constant 29 : index
      %c256_149 = arith.constant 256 : index
      %178 = vector.load %arg6[%c29, %c256_149] : memref<104x384xf32, #tpu.memory_space<vmem>>, vector<8x128xf32>
      tpu.vector_store %arg6[%c29, %c256_149], %177 {strides = array<i32>} : memref<104x384xf32, #tpu.memory_space<vmem>>, vector<8x128xf32>,
      %c0_150 = arith.constant 0 : index
      %c3_151 = arith.constant 3 : index
      %c0_152 = arith.constant 0 : index
      %c0_153 = arith.constant 0 : index
      %179 = vector.load %arg2[%c0_150, %c3_151, %c0_152, %c0_153] : memref<1x8x8x128xbf16, #tpu.memory_space<vmem>>, vector<1x1x8x128xbf16>
      %180 = vector.shape_cast %179 : vector<1x1x8x128xbf16> to vector<8x128xbf16>
      %181 = arith.extf %180 : vector<8x128xbf16> to vector<8x128xf32>
      %c39 = arith.constant 39 : index
      %c256_154 = arith.constant 256 : index
      %182 = vector.load %arg6[%c39, %c256_154] : memref<104x384xf32, #tpu.memory_space<vmem>>, vector<8x128xf32>
      tpu.vector_store %arg6[%c39, %c256_154], %181 {strides = array<i32>} : memref<104x384xf32, #tpu.memory_space<vmem>>, vector<8x128xf32>,
      %c0_155 = arith.constant 0 : index
      %c4_156 = arith.constant 4 : index
      %c0_157 = arith.constant 0 : index
      %c0_158 = arith.constant 0 : index
      %183 = vector.load %arg2[%c0_155, %c4_156, %c0_157, %c0_158] : memref<1x8x8x128xbf16, #tpu.memory_space<vmem>>, vector<1x1x8x128xbf16>
      %184 = vector.shape_cast %183 : vector<1x1x8x128xbf16> to vector<8x128xbf16>
      %185 = arith.extf %184 : vector<8x128xbf16> to vector<8x128xf32>
      %c49 = arith.constant 49 : index
      %c256_159 = arith.constant 256 : index
      %186 = vector.load %arg6[%c49, %c256_159] : memref<104x384xf32, #tpu.memory_space<vmem>>, vector<8x128xf32>
      tpu.vector_store %arg6[%c49, %c256_159], %185 {strides = array<i32>} : memref<104x384xf32, #tpu.memory_space<vmem>>, vector<8x128xf32>,
      %c0_160 = arith.constant 0 : index
      %c5_161 = arith.constant 5 : index
      %c0_162 = arith.constant 0 : index
      %c0_163 = arith.constant 0 : index
      %187 = vector.load %arg2[%c0_160, %c5_161, %c0_162, %c0_163] : memref<1x8x8x128xbf16, #tpu.memory_space<vmem>>, vector<1x1x8x128xbf16>
      %188 = vector.shape_cast %187 : vector<1x1x8x128xbf16> to vector<8x128xbf16>
      %189 = arith.extf %188 : vector<8x128xbf16> to vector<8x128xf32>
      %c59 = arith.constant 59 : index
      %c256_164 = arith.constant 256 : index
      %190 = vector.load %arg6[%c59, %c256_164] : memref<104x384xf32, #tpu.memory_space<vmem>>, vector<8x128xf32>
      tpu.vector_store %arg6[%c59, %c256_164], %189 {strides = array<i32>} : memref<104x384xf32, #tpu.memory_space<vmem>>, vector<8x128xf32>,
      %c0_165 = arith.constant 0 : index
      %c6_166 = arith.constant 6 : index
      %c0_167 = arith.constant 0 : index
      %c0_168 = arith.constant 0 : index
      %191 = vector.load %arg2[%c0_165, %c6_166, %c0_167, %c0_168] : memref<1x8x8x128xbf16, #tpu.memory_space<vmem>>, vector<1x1x8x128xbf16>
      %192 = vector.shape_cast %191 : vector<1x1x8x128xbf16> to vector<8x128xbf16>
      %193 = arith.extf %192 : vector<8x128xbf16> to vector<8x128xf32>
      %c69 = arith.constant 69 : index
      %c256_169 = arith.constant 256 : index
      %194 = vector.load %arg6[%c69, %c256_169] : memref<104x384xf32, #tpu.memory_space<vmem>>, vector<8x128xf32>
      tpu.vector_store %arg6[%c69, %c256_169], %193 {strides = array<i32>} : memref<104x384xf32, #tpu.memory_space<vmem>>, vector<8x128xf32>,
      %c0_170 = arith.constant 0 : index
      %c7_171 = arith.constant 7 : index
      %c0_172 = arith.constant 0 : index
      %c0_173 = arith.constant 0 : index
      %195 = vector.load %arg2[%c0_170, %c7_171, %c0_172, %c0_173] : memref<1x8x8x128xbf16, #tpu.memory_space<vmem>>, vector<1x1x8x128xbf16>
      %196 = vector.shape_cast %195 : vector<1x1x8x128xbf16> to vector<8x128xbf16>
      %197 = arith.extf %196 : vector<8x128xbf16> to vector<8x128xf32>
      %c79 = arith.constant 79 : index
      %c256_174 = arith.constant 256 : index
      %198 = vector.load %arg6[%c79, %c256_174] : memref<104x384xf32, #tpu.memory_space<vmem>>, vector<8x128xf32>
      tpu.vector_store %arg6[%c79, %c256_174], %197 {strides = array<i32>} : memref<104x384xf32, #tpu.memory_space<vmem>>, vector<8x128xf32>,
    } else {
    }
    %cst = arith.constant 0.000000e+00 : f32
    %3 = vector.broadcast %cst : f32 to vector<80x128xf32>
    %c0 = arith.constant 0 : index
    %c0_1 = arith.constant 0 : index
    %4 = vector.load %arg6[%c0, %c0_1] : memref<104x384xf32, #tpu.memory_space<vmem>>, vector<80x384xf32>
    %5 = arith.truncf %4 : vector<80x384xf32> to vector<80x384xbf16>
    %c0_2 = arith.constant 0 : index
    %c0_3 = arith.constant 0 : index
    %6 = vector.load %arg3[%c0_2, %c0_3] : memref<1152x128xbf16, #tpu.memory_space<vmem>>, vector<384x128xbf16>
    %cst_4 = arith.constant dense<0.000000e+00> : vector<80x128xf32>
    %7 = tpu.matmul %5, %6, %cst_4 {dimension_numbers = #tpu.dot_dimension_numbers<[1], [0], [0], [1], [0, 0, 1, 1], [], []>} : vector<80x384xbf16>, vector<384x128xbf16>, vector<80x128xf32> -> vector<80x128xf32>
    %8 = arith.addf %3, %7 : vector<80x128xf32>
    %c10 = arith.constant 10 : index
    %c0_5 = arith.constant 0 : index
    %9 = vector.load %arg6[%c10, %c0_5] : memref<104x384xf32, #tpu.memory_space<vmem>>, vector<80x384xf32>
    %10 = arith.truncf %9 : vector<80x384xf32> to vector<80x384xbf16>
    %c384 = arith.constant 384 : index
    %c0_6 = arith.constant 0 : index
    %11 = vector.load %arg3[%c384, %c0_6] : memref<1152x128xbf16, #tpu.memory_space<vmem>>, vector<384x128xbf16>
    %cst_7 = arith.constant dense<0.000000e+00> : vector<80x128xf32>
    %12 = tpu.matmul %10, %11, %cst_7 {dimension_numbers = #tpu.dot_dimension_numbers<[1], [0], [0], [1], [0, 0, 1, 1], [], []>} : vector<80x384xbf16>, vector<384x128xbf16>, vector<80x128xf32> -> vector<80x128xf32>
    %13 = arith.addf %8, %12 : vector<80x128xf32>
    %c20 = arith.constant 20 : index
    %c0_8 = arith.constant 0 : index
    %14 = vector.load %arg6[%c20, %c0_8] : memref<104x384xf32, #tpu.memory_space<vmem>>, vector<80x384xf32>
    %15 = arith.truncf %14 : vector<80x384xf32> to vector<80x384xbf16>
    %c768 = arith.constant 768 : index
    %c0_9 = arith.constant 0 : index
    %16 = vector.load %arg3[%c768, %c0_9] : memref<1152x128xbf16, #tpu.memory_space<vmem>>, vector<384x128xbf16>
    %cst_10 = arith.constant dense<0.000000e+00> : vector<80x128xf32>
    %17 = tpu.matmul %15, %16, %cst_10 {dimension_numbers = #tpu.dot_dimension_numbers<[1], [0], [0], [1], [0, 0, 1, 1], [], []>} : vector<80x384xbf16>, vector<384x128xbf16>, vector<80x128xf32> -> vector<80x128xf32>
    %18 = arith.addf %13, %17 : vector<80x128xf32>
    %c0_11 = arith.constant 0 : index
    %c0_12 = arith.constant 0 : index
    %19 = vector.load %arg4[%c0_11, %c0_12] : memref<1x128xf32, #tpu.memory_space<vmem>>, vector<1x128xf32>
    %20 = vector.broadcast %19 : vector<1x128xf32> to vector<80x128xf32>
    %21 = arith.addf %18, %20 : vector<80x128xf32>
    %cst_13 = arith.constant 5.000000e-01 : f32
    %22 = vector.broadcast %cst_13 : f32 to vector<80x128xf32>
    %23 = arith.mulf %22, %21 : vector<80x128xf32>
    %cst_14 = arith.constant 0.707106769 : f32
    %24 = vector.broadcast %cst_14 : f32 to vector<80x128xf32>
    %25 = arith.mulf %21, %24 : vector<80x128xf32>
    %26 = math.absf %25 : vector<80x128xf32>
    %cst_15 = arith.constant 0.327591091 : f32
    %27 = vector.broadcast %cst_15 : f32 to vector<80x128xf32>
    %28 = arith.mulf %27, %26 : vector<80x128xf32>
    %cst_16 = arith.constant 1.000000e+00 : f32
    %29 = vector.broadcast %cst_16 : f32 to vector<80x128xf32>
    %30 = arith.addf %29, %28 : vector<80x128xf32>
    %31 = tpu.reciprocal %30 {approx = true} : vector<80x128xf32> -> vector<80x128xf32>
    %cst_17 = arith.constant 1.06140542 : f32
    %32 = vector.broadcast %cst_17 : f32 to vector<80x128xf32>
    %33 = arith.mulf %32, %31 : vector<80x128xf32>
    %cst_18 = arith.constant -1.45315206 : f32
    %34 = vector.broadcast %cst_18 : f32 to vector<80x128xf32>
    %35 = arith.addf %33, %34 : vector<80x128xf32>
    %36 = arith.mulf %35, %31 : vector<80x128xf32>
    %cst_19 = arith.constant 1.42141378 : f32
    %37 = vector.broadcast %cst_19 : f32 to vector<80x128xf32>
    %38 = arith.addf %36, %37 : vector<80x128xf32>
    %39 = arith.mulf %38, %31 : vector<80x128xf32>
    %cst_20 = arith.constant -0.284496725 : f32
    %40 = vector.broadcast %cst_20 : f32 to vector<80x128xf32>
    %41 = arith.addf %39, %40 : vector<80x128xf32>
    %42 = arith.mulf %41, %31 : vector<80x128xf32>
    %cst_21 = arith.constant 0.254829586 : f32
    %43 = vector.broadcast %cst_21 : f32 to vector<80x128xf32>
    %44 = arith.addf %42, %43 : vector<80x128xf32>
    %45 = arith.mulf %44, %31 : vector<80x128xf32>
    %cst_22 = arith.constant 0.000000e+00 : f32
    %46 = vector.broadcast %cst_22 : f32 to vector<80x128xf32>
    %47 = arith.subf %46, %26 : vector<80x128xf32>
    %48 = arith.mulf %47, %26 : vector<80x128xf32>
    %49 = math.exp %48 : vector<80x128xf32>
    %50 = arith.mulf %45, %49 : vector<80x128xf32>
    %cst_23 = arith.constant 1.000000e+00 : f32
    %51 = vector.broadcast %cst_23 : f32 to vector<80x128xf32>
    %52 = arith.subf %51, %50 : vector<80x128xf32>
    %cst_24 = arith.constant 0.000000e+00 : f32
    %53 = vector.broadcast %cst_24 : f32 to vector<80x128xf32>
    %54 = arith.cmpf olt, %25, %53 : vector<80x128xf32>
    %cst_25 = arith.constant 0.000000e+00 : f32
    %55 = vector.broadcast %cst_25 : f32 to vector<80x128xf32>
    %56 = arith.subf %55, %52 : vector<80x128xf32>
    %57 = arith.select %54, %56, %52 : vector<80x128xi1>, vector<80x128xf32>
    %cst_26 = arith.constant 1.000000e+00 : f32
    %58 = vector.broadcast %cst_26 : f32 to vector<80x128xf32>
    %59 = arith.addf %58, %57 : vector<80x128xf32>
    %60 = arith.mulf %23, %59 : vector<80x128xf32>
    %61 = vector.extract_strided_slice %60 {offsets = [0, 0], sizes = [8, 128], strides = [1, 1]} : vector<80x128xf32> to vector<8x128xf32>
    %62 = arith.truncf %61 : vector<8x128xf32> to vector<8x128xbf16>
    %c0_27 = arith.constant 0 : index
    %c0_28 = arith.constant 0 : index
    %c0_29 = arith.constant 0 : index
    %c0_30 = arith.constant 0 : index
    %63 = vector.load %arg5[%c0_27, %c0_28, %c0_29, %c0_30] : memref<1x8x8x128xbf16, #tpu.memory_space<vmem>>, vector<1x1x8x128xbf16>
    %64 = vector.shape_cast %63 : vector<1x1x8x128xbf16> to vector<8x128xbf16>
    %65 = vector.shape_cast %62 : vector<8x128xbf16> to vector<1x1x8x128xbf16>
    tpu.vector_store %arg5[%c0_27, %c0_28, %c0_29, %c0_30], %65 {strides = array<i32>} : memref<1x8x8x128xbf16, #tpu.memory_space<vmem>>, vector<1x1x8x128xbf16>,
    %66 = vector.extract_strided_slice %60 {offsets = [10, 0], sizes = [8, 128], strides = [1, 1]} : vector<80x128xf32> to vector<8x128xf32>
    %67 = arith.truncf %66 : vector<8x128xf32> to vector<8x128xbf16>
    %c0_31 = arith.constant 0 : index
    %c1 = arith.constant 1 : index
    %c0_32 = arith.constant 0 : index
    %c0_33 = arith.constant 0 : index
    %68 = vector.load %arg5[%c0_31, %c1, %c0_32, %c0_33] : memref<1x8x8x128xbf16, #tpu.memory_space<vmem>>, vector<1x1x8x128xbf16>
    %69 = vector.shape_cast %68 : vector<1x1x8x128xbf16> to vector<8x128xbf16>
    %70 = vector.shape_cast %67 : vector<8x128xbf16> to vector<1x1x8x128xbf16>
    tpu.vector_store %arg5[%c0_31, %c1, %c0_32, %c0_33], %70 {strides = array<i32>} : memref<1x8x8x128xbf16, #tpu.memory_space<vmem>>, vector<1x1x8x128xbf16>,
    %71 = vector.extract_strided_slice %60 {offsets = [20, 0], sizes = [8, 128], strides = [1, 1]} : vector<80x128xf32> to vector<8x128xf32>
    %72 = arith.truncf %71 : vector<8x128xf32> to vector<8x128xbf16>
    %c0_34 = arith.constant 0 : index
    %c2 = arith.constant 2 : index
    %c0_35 = arith.constant 0 : index
    %c0_36 = arith.constant 0 : index
    %73 = vector.load %arg5[%c0_34, %c2, %c0_35, %c0_36] : memref<1x8x8x128xbf16, #tpu.memory_space<vmem>>, vector<1x1x8x128xbf16>
    %74 = vector.shape_cast %73 : vector<1x1x8x128xbf16> to vector<8x128xbf16>
    %75 = vector.shape_cast %72 : vector<8x128xbf16> to vector<1x1x8x128xbf16>
    tpu.vector_store %arg5[%c0_34, %c2, %c0_35, %c0_36], %75 {strides = array<i32>} : memref<1x8x8x128xbf16, #tpu.memory_space<vmem>>, vector<1x1x8x128xbf16>,
    %76 = vector.extract_strided_slice %60 {offsets = [30, 0], sizes = [8, 128], strides = [1, 1]} : vector<80x128xf32> to vector<8x128xf32>
    %77 = arith.truncf %76 : vector<8x128xf32> to vector<8x128xbf16>
    %c0_37 = arith.constant 0 : index
    %c3 = arith.constant 3 : index
    %c0_38 = arith.constant 0 : index
    %c0_39 = arith.constant 0 : index
    %78 = vector.load %arg5[%c0_37, %c3, %c0_38, %c0_39] : memref<1x8x8x128xbf16, #tpu.memory_space<vmem>>, vector<1x1x8x128xbf16>
    %79 = vector.shape_cast %78 : vector<1x1x8x128xbf16> to vector<8x128xbf16>
    %80 = vector.shape_cast %77 : vector<8x128xbf16> to vector<1x1x8x128xbf16>
    tpu.vector_store %arg5[%c0_37, %c3, %c0_38, %c0_39], %80 {strides = array<i32>} : memref<1x8x8x128xbf16, #tpu.memory_space<vmem>>, vector<1x1x8x128xbf16>,
    %81 = vector.extract_strided_slice %60 {offsets = [40, 0], sizes = [8, 128], strides = [1, 1]} : vector<80x128xf32> to vector<8x128xf32>
    %82 = arith.truncf %81 : vector<8x128xf32> to vector<8x128xbf16>
    %c0_40 = arith.constant 0 : index
    %c4 = arith.constant 4 : index
    %c0_41 = arith.constant 0 : index
    %c0_42 = arith.constant 0 : index
    %83 = vector.load %arg5[%c0_40, %c4, %c0_41, %c0_42] : memref<1x8x8x128xbf16, #tpu.memory_space<vmem>>, vector<1x1x8x128xbf16>
    %84 = vector.shape_cast %83 : vector<1x1x8x128xbf16> to vector<8x128xbf16>
    %85 = vector.shape_cast %82 : vector<8x128xbf16> to vector<1x1x8x128xbf16>
    tpu.vector_store %arg5[%c0_40, %c4, %c0_41, %c0_42], %85 {strides = array<i32>} : memref<1x8x8x128xbf16, #tpu.memory_space<vmem>>, vector<1x1x8x128xbf16>,
    %86 = vector.extract_strided_slice %60 {offsets = [50, 0], sizes = [8, 128], strides = [1, 1]} : vector<80x128xf32> to vector<8x128xf32>
    %87 = arith.truncf %86 : vector<8x128xf32> to vector<8x128xbf16>
    %c0_43 = arith.constant 0 : index
    %c5 = arith.constant 5 : index
    %c0_44 = arith.constant 0 : index
    %c0_45 = arith.constant 0 : index
    %88 = vector.load %arg5[%c0_43, %c5, %c0_44, %c0_45] : memref<1x8x8x128xbf16, #tpu.memory_space<vmem>>, vector<1x1x8x128xbf16>
    %89 = vector.shape_cast %88 : vector<1x1x8x128xbf16> to vector<8x128xbf16>
    %90 = vector.shape_cast %87 : vector<8x128xbf16> to vector<1x1x8x128xbf16>
    tpu.vector_store %arg5[%c0_43, %c5, %c0_44, %c0_45], %90 {strides = array<i32>} : memref<1x8x8x128xbf16, #tpu.memory_space<vmem>>, vector<1x1x8x128xbf16>,
    %91 = vector.extract_strided_slice %60 {offsets = [60, 0], sizes = [8, 128], strides = [1, 1]} : vector<80x128xf32> to vector<8x128xf32>
    %92 = arith.truncf %91 : vector<8x128xf32> to vector<8x128xbf16>
    %c0_46 = arith.constant 0 : index
    %c6 = arith.constant 6 : index
    %c0_47 = arith.constant 0 : index
    %c0_48 = arith.constant 0 : index
    %93 = vector.load %arg5[%c0_46, %c6, %c0_47, %c0_48] : memref<1x8x8x128xbf16, #tpu.memory_space<vmem>>, vector<1x1x8x128xbf16>
    %94 = vector.shape_cast %93 : vector<1x1x8x128xbf16> to vector<8x128xbf16>
    %95 = vector.shape_cast %92 : vector<8x128xbf16> to vector<1x1x8x128xbf16>
    tpu.vector_store %arg5[%c0_46, %c6, %c0_47, %c0_48], %95 {strides = array<i32>} : memref<1x8x8x128xbf16, #tpu.memory_space<vmem>>, vector<1x1x8x128xbf16>,
    %96 = vector.extract_strided_slice %60 {offsets = [70, 0], sizes = [8, 128], strides = [1, 1]} : vector<80x128xf32> to vector<8x128xf32>
    %97 = arith.truncf %96 : vector<8x128xf32> to vector<8x128xbf16>
    %c0_49 = arith.constant 0 : index
    %c7 = arith.constant 7 : index
    %c0_50 = arith.constant 0 : index
    %c0_51 = arith.constant 0 : index
    %98 = vector.load %arg5[%c0_49, %c7, %c0_50, %c0_51] : memref<1x8x8x128xbf16, #tpu.memory_space<vmem>>, vector<1x1x8x128xbf16>
    %99 = vector.shape_cast %98 : vector<1x1x8x128xbf16> to vector<8x128xbf16>
    %100 = vector.shape_cast %97 : vector<8x128xbf16> to vector<1x1x8x128xbf16>
    tpu.vector_store %arg5[%c0_49, %c7, %c0_50, %c0_51], %100 {strides = array<i32>} : memref<1x8x8x128xbf16, #tpu.memory_space<vmem>>, vector<1x1x8x128xbf16>,
    return
  }
  func.func @transform_0(%arg0: i32, %arg1: i32) -> (i32, i32, i32, i32) {
    %c0_i32 = arith.constant 0 : i32
    %c0_i32_0 = arith.constant 0 : i32
    %c0_i32_1 = arith.constant 0 : i32
    %c0_i32_2 = arith.constant 0 : i32
    return %arg0, %c0_i32, %c0_i32_0, %c0_i32_1 : i32, i32, i32, i32
  }
  func.func @transform_1(%arg0: i32, %arg1: i32) -> (i32, i32) {
    %c0_i32 = arith.constant 0 : i32
    %c0_i32_0 = arith.constant 0 : i32
    return %c0_i32, %arg1 : i32, i32
  }
  func.func @transform_2(%arg0: i32, %arg1: i32) -> (i32, i32) {
    %c0_i32 = arith.constant 0 : i32
    %c0_i32_0 = arith.constant 0 : i32
    return %c0_i32, %arg1 : i32, i32
  }
  func.func @transform_3(%arg0: i32, %arg1: i32) -> (i32, i32, i32, i32) {
    %c0_i32 = arith.constant 0 : i32
    %c0_i32_0 = arith.constant 0 : i32
    %c0_i32_1 = arith.constant 0 : i32
    return %arg0, %c0_i32, %c0_i32_0, %arg1 : i32, i32, i32, i32
  }
}

module attributes {stable_mosaic.version = 11 : i64} {
  func.func @_c_layer_kernel(%arg0: i32, %arg1: i32, %arg2: memref<1x256x64xbf16, #tpu.memory_space<vmem>>, %arg3: memref<64x64xbf16, #tpu.memory_space<vmem>>, %arg4: memref<1x64xf32, #tpu.memory_space<vmem>>, %arg5: memref<1x64xf32, #tpu.memory_space<vmem>>, %arg6: memref<1x256x64xbf16, #tpu.memory_space<vmem>>) attributes {dimension_semantics = [#tpu.dimension_semantics<parallel>, #tpu.dimension_semantics<parallel>], iteration_bounds = array<i64: 2, 1>, scalar_prefetch = 0 : i64, scratch_operands = 0 : i64, tpu.core_type = #tpu.core_type<tc>, window_params = [{transform_indices = @transform_0, window_bounds = array<i64: 1, 256, 64>}, {transform_indices = @transform_1, window_bounds = array<i64: 64, 64>}, {transform_indices = @transform_2, window_bounds = array<i64: 1, 64>}, {transform_indices = @transform_3, window_bounds = array<i64: 1, 64>}, {transform_indices = @transform_4, window_bounds = array<i64: 1, 256, 64>}]} {
    %c0 = arith.constant 0 : index
    %c0_0 = arith.constant 0 : index
    %c0_1 = arith.constant 0 : index
    %0 = vector.load %arg2[%c0, %c0_0, %c0_1] : memref<1x256x64xbf16, #tpu.memory_space<vmem>>, vector<1x256x64xbf16>
    %1 = vector.shape_cast %0 : vector<1x256x64xbf16> to vector<256x64xbf16>
    %c0_2 = arith.constant 0 : index
    %c0_3 = arith.constant 0 : index
    %2 = vector.load %arg3[%c0_2, %c0_3] : memref<64x64xbf16, #tpu.memory_space<vmem>>, vector<64x64xbf16>
    %cst = arith.constant dense<0.000000e+00> : vector<256x64xf32>
    %3 = tpu.matmul %1, %2, %cst {dimension_numbers = #tpu.dot_dimension_numbers<[1], [0], [0], [1], [0, 0, 1, 1], [], []>} : vector<256x64xbf16>, vector<64x64xbf16>, vector<256x64xf32> -> vector<256x64xf32>
    %cst_4 = arith.constant dense<0.000000e+00> : vector<64xf32>
    %4 = vector.multi_reduction <add>, %3, %cst_4 [0] : vector<256x64xf32> to vector<64xf32>
    %5 = vector.shape_cast %4 : vector<64xf32> to vector<1x64xf32>
    %6 = arith.mulf %3, %3 : vector<256x64xf32>
    %cst_5 = arith.constant dense<0.000000e+00> : vector<64xf32>
    %7 = vector.multi_reduction <add>, %6, %cst_5 [0] : vector<256x64xf32> to vector<64xf32>
    %8 = vector.shape_cast %7 : vector<64xf32> to vector<1x64xf32>
    %cst_6 = arith.constant 3.906250e-03 : f32
    %9 = vector.broadcast %cst_6 : f32 to vector<1x64xf32>
    %10 = arith.mulf %5, %9 : vector<1x64xf32>
    %cst_7 = arith.constant 3.906250e-03 : f32
    %11 = vector.broadcast %cst_7 : f32 to vector<1x64xf32>
    %12 = arith.mulf %8, %11 : vector<1x64xf32>
    %13 = arith.mulf %10, %10 : vector<1x64xf32>
    %14 = arith.subf %12, %13 : vector<1x64xf32>
    %cst_8 = arith.constant 0.000000e+00 : f32
    %15 = vector.broadcast %cst_8 : f32 to vector<1x64xf32>
    %16 = arith.maximumf %14, %15 : vector<1x64xf32>
    %17 = vector.broadcast %10 : vector<1x64xf32> to vector<256x64xf32>
    %18 = arith.subf %3, %17 : vector<256x64xf32>
    %cst_9 = arith.constant 9.99999974E-6 : f32
    %19 = vector.broadcast %cst_9 : f32 to vector<1x64xf32>
    %20 = arith.addf %16, %19 : vector<1x64xf32>
    %21 = math.rsqrt %20 : vector<1x64xf32>
    %22 = vector.broadcast %21 : vector<1x64xf32> to vector<256x64xf32>
    %23 = arith.mulf %18, %22 : vector<256x64xf32>
    %c0_10 = arith.constant 0 : index
    %c0_11 = arith.constant 0 : index
    %24 = vector.load %arg4[%c0_10, %c0_11] : memref<1x64xf32, #tpu.memory_space<vmem>>, vector<1x64xf32>
    %25 = vector.broadcast %24 : vector<1x64xf32> to vector<256x64xf32>
    %26 = arith.mulf %23, %25 : vector<256x64xf32>
    %c0_12 = arith.constant 0 : index
    %c0_13 = arith.constant 0 : index
    %27 = vector.load %arg5[%c0_12, %c0_13] : memref<1x64xf32, #tpu.memory_space<vmem>>, vector<1x64xf32>
    %28 = vector.broadcast %27 : vector<1x64xf32> to vector<256x64xf32>
    %29 = arith.addf %26, %28 : vector<256x64xf32>
    %cst_14 = arith.constant 5.000000e-01 : f32
    %30 = vector.broadcast %cst_14 : f32 to vector<256x64xf32>
    %31 = arith.mulf %30, %29 : vector<256x64xf32>
    %cst_15 = arith.constant 0.707106769 : f32
    %32 = vector.broadcast %cst_15 : f32 to vector<256x64xf32>
    %33 = arith.mulf %29, %32 : vector<256x64xf32>
    %34 = math.absf %33 : vector<256x64xf32>
    %cst_16 = arith.constant 0.327591091 : f32
    %35 = vector.broadcast %cst_16 : f32 to vector<256x64xf32>
    %36 = arith.mulf %35, %34 : vector<256x64xf32>
    %cst_17 = arith.constant 1.000000e+00 : f32
    %37 = vector.broadcast %cst_17 : f32 to vector<256x64xf32>
    %38 = arith.addf %37, %36 : vector<256x64xf32>
    %39 = tpu.reciprocal %38 {approx = true} : vector<256x64xf32> -> vector<256x64xf32>
    %cst_18 = arith.constant 1.06140542 : f32
    %40 = vector.broadcast %cst_18 : f32 to vector<256x64xf32>
    %41 = arith.mulf %40, %39 : vector<256x64xf32>
    %cst_19 = arith.constant -1.45315206 : f32
    %42 = vector.broadcast %cst_19 : f32 to vector<256x64xf32>
    %43 = arith.addf %41, %42 : vector<256x64xf32>
    %44 = arith.mulf %43, %39 : vector<256x64xf32>
    %cst_20 = arith.constant 1.42141378 : f32
    %45 = vector.broadcast %cst_20 : f32 to vector<256x64xf32>
    %46 = arith.addf %44, %45 : vector<256x64xf32>
    %47 = arith.mulf %46, %39 : vector<256x64xf32>
    %cst_21 = arith.constant -0.284496725 : f32
    %48 = vector.broadcast %cst_21 : f32 to vector<256x64xf32>
    %49 = arith.addf %47, %48 : vector<256x64xf32>
    %50 = arith.mulf %49, %39 : vector<256x64xf32>
    %cst_22 = arith.constant 0.254829586 : f32
    %51 = vector.broadcast %cst_22 : f32 to vector<256x64xf32>
    %52 = arith.addf %50, %51 : vector<256x64xf32>
    %53 = arith.mulf %52, %39 : vector<256x64xf32>
    %cst_23 = arith.constant 0.000000e+00 : f32
    %54 = vector.broadcast %cst_23 : f32 to vector<256x64xf32>
    %55 = arith.subf %54, %34 : vector<256x64xf32>
    %56 = arith.mulf %55, %34 : vector<256x64xf32>
    %57 = math.exp %56 : vector<256x64xf32>
    %58 = arith.mulf %53, %57 : vector<256x64xf32>
    %cst_24 = arith.constant 1.000000e+00 : f32
    %59 = vector.broadcast %cst_24 : f32 to vector<256x64xf32>
    %60 = arith.subf %59, %58 : vector<256x64xf32>
    %cst_25 = arith.constant 0.000000e+00 : f32
    %61 = vector.broadcast %cst_25 : f32 to vector<256x64xf32>
    %62 = arith.cmpf olt, %33, %61 : vector<256x64xf32>
    %cst_26 = arith.constant 0.000000e+00 : f32
    %63 = vector.broadcast %cst_26 : f32 to vector<256x64xf32>
    %64 = arith.subf %63, %60 : vector<256x64xf32>
    %65 = arith.select %62, %64, %60 : vector<256x64xi1>, vector<256x64xf32>
    %cst_27 = arith.constant 1.000000e+00 : f32
    %66 = vector.broadcast %cst_27 : f32 to vector<256x64xf32>
    %67 = arith.addf %66, %65 : vector<256x64xf32>
    %68 = arith.mulf %31, %67 : vector<256x64xf32>
    %69 = arith.truncf %68 : vector<256x64xf32> to vector<256x64xbf16>
    %c0_28 = arith.constant 0 : index
    %c0_29 = arith.constant 0 : index
    %c0_30 = arith.constant 0 : index
    %70 = vector.load %arg6[%c0_28, %c0_29, %c0_30] : memref<1x256x64xbf16, #tpu.memory_space<vmem>>, vector<1x256x64xbf16>
    %71 = vector.shape_cast %70 : vector<1x256x64xbf16> to vector<256x64xbf16>
    %72 = vector.shape_cast %69 : vector<256x64xbf16> to vector<1x256x64xbf16>
    tpu.vector_store %arg6[%c0_28, %c0_29, %c0_30], %72 {strides = array<i32>} : memref<1x256x64xbf16, #tpu.memory_space<vmem>>, vector<1x256x64xbf16>,
    return
  }
  func.func @transform_0(%arg0: i32, %arg1: i32) -> (i32, i32, i32) {
    %c0_i32 = arith.constant 0 : i32
    %c0_i32_0 = arith.constant 0 : i32
    %c0_i32_1 = arith.constant 0 : i32
    return %arg0, %c0_i32, %c0_i32_0 : i32, i32, i32
  }
  func.func @transform_1(%arg0: i32, %arg1: i32) -> (i32, i32) {
    %c0_i32 = arith.constant 0 : i32
    %c0_i32_0 = arith.constant 0 : i32
    return %c0_i32, %arg1 : i32, i32
  }
  func.func @transform_2(%arg0: i32, %arg1: i32) -> (i32, i32) {
    %c0_i32 = arith.constant 0 : i32
    %c0_i32_0 = arith.constant 0 : i32
    return %c0_i32, %arg1 : i32, i32
  }
  func.func @transform_3(%arg0: i32, %arg1: i32) -> (i32, i32) {
    %c0_i32 = arith.constant 0 : i32
    %c0_i32_0 = arith.constant 0 : i32
    return %c0_i32, %arg1 : i32, i32
  }
  func.func @transform_4(%arg0: i32, %arg1: i32) -> (i32, i32, i32) {
    %c0_i32 = arith.constant 0 : i32
    %c0_i32_0 = arith.constant 0 : i32
    return %arg0, %c0_i32, %arg1 : i32, i32, i32
  }
}

module attributes {stable_mosaic.version = 11 : i64} {
  func.func @_forway_kernel(%arg0: i32, %arg1: i32, %arg2: memref<1x256x64xbf16, #tpu.memory_space<vmem>>, %arg3: memref<1x256x64xbf16, #tpu.memory_space<vmem>>, %arg4: memref<1x64xf32, #tpu.memory_space<vmem>>, %arg5: memref<1x64xf32, #tpu.memory_space<vmem>>, %arg6: memref<64x64xbf16, #tpu.memory_space<vmem>>, %arg7: memref<64x64xbf16, #tpu.memory_space<vmem>>, %arg8: memref<1x64xf32, #tpu.memory_space<vmem>>, %arg9: memref<1x64xf32, #tpu.memory_space<vmem>>, %arg10: memref<1x256x64xbf16, #tpu.memory_space<vmem>>, %arg11: memref<256x64xbf16, #tpu.memory_space<vmem>>) attributes {dimension_semantics = [#tpu.dimension_semantics<parallel>, #tpu.dimension_semantics<arbitrary>], iteration_bounds = array<i64: 2, 1>, scalar_prefetch = 0 : i64, scratch_operands = 1 : i64, tpu.core_type = #tpu.core_type<tc>, window_params = [{transform_indices = @transform_0, window_bounds = array<i64: 1, 256, 64>}, {transform_indices = @transform_1, window_bounds = array<i64: 1, 256, 64>}, {pipeline_mode = #tpu.pipeline_mode<synchronous>, transform_indices = @transform_2, window_bounds = array<i64: 1, 64>}, {pipeline_mode = #tpu.pipeline_mode<synchronous>, transform_indices = @transform_3, window_bounds = array<i64: 1, 64>}, {transform_indices = @transform_4, window_bounds = array<i64: 64, 64>}, {transform_indices = @transform_5, window_bounds = array<i64: 64, 64>}, {transform_indices = @transform_6, window_bounds = array<i64: 1, 64>}, {transform_indices = @transform_7, window_bounds = array<i64: 1, 64>}, {transform_indices = @transform_8, window_bounds = array<i64: 1, 256, 64>}]} {
    %c0_i32 = arith.constant 0 : i32
    %0 = arith.cmpi eq, %arg1, %c0_i32 : i32
    %1 = arith.extui %0 : i1 to i32
    %c0_i32_0 = arith.constant 0 : i32
    %2 = arith.cmpi ne, %1, %c0_i32_0 : i32
    scf.if %2 {
      %c0_37 = arith.constant 0 : index
      %c0_38 = arith.constant 0 : index
      %c0_39 = arith.constant 0 : index
      %80 = vector.load %arg3[%c0_37, %c0_38, %c0_39] : memref<1x256x64xbf16, #tpu.memory_space<vmem>>, vector<1x256x64xbf16>
      %81 = vector.shape_cast %80 : vector<1x256x64xbf16> to vector<256x64xbf16>
      %82 = arith.extf %81 : vector<256x64xbf16> to vector<256x64xf32>
      %cst_40 = arith.constant dense<0.000000e+00> : vector<64xf32>
      %83 = vector.multi_reduction <add>, %82, %cst_40 [0] : vector<256x64xf32> to vector<64xf32>
      %84 = vector.shape_cast %83 : vector<64xf32> to vector<1x64xf32>
      %85 = arith.mulf %82, %82 : vector<256x64xf32>
      %cst_41 = arith.constant dense<0.000000e+00> : vector<64xf32>
      %86 = vector.multi_reduction <add>, %85, %cst_41 [0] : vector<256x64xf32> to vector<64xf32>
      %87 = vector.shape_cast %86 : vector<64xf32> to vector<1x64xf32>
      %cst_42 = arith.constant 3.906250e-03 : f32
      %88 = vector.broadcast %cst_42 : f32 to vector<1x64xf32>
      %89 = arith.mulf %84, %88 : vector<1x64xf32>
      %cst_43 = arith.constant 3.906250e-03 : f32
      %90 = vector.broadcast %cst_43 : f32 to vector<1x64xf32>
      %91 = arith.mulf %87, %90 : vector<1x64xf32>
      %92 = arith.mulf %89, %89 : vector<1x64xf32>
      %93 = arith.subf %91, %92 : vector<1x64xf32>
      %cst_44 = arith.constant 0.000000e+00 : f32
      %94 = vector.broadcast %cst_44 : f32 to vector<1x64xf32>
      %95 = arith.maximumf %93, %94 : vector<1x64xf32>
      %96 = vector.broadcast %89 : vector<1x64xf32> to vector<256x64xf32>
      %97 = arith.subf %82, %96 : vector<256x64xf32>
      %cst_45 = arith.constant 9.99999974E-6 : f32
      %98 = vector.broadcast %cst_45 : f32 to vector<1x64xf32>
      %99 = arith.addf %95, %98 : vector<1x64xf32>
      %100 = math.rsqrt %99 : vector<1x64xf32>
      %101 = vector.broadcast %100 : vector<1x64xf32> to vector<256x64xf32>
      %102 = arith.mulf %97, %101 : vector<256x64xf32>
      %c0_46 = arith.constant 0 : index
      %c0_47 = arith.constant 0 : index
      %103 = vector.load %arg4[%c0_46, %c0_47] : memref<1x64xf32, #tpu.memory_space<vmem>>, vector<1x64xf32>
      %104 = vector.broadcast %103 : vector<1x64xf32> to vector<256x64xf32>
      %105 = arith.mulf %102, %104 : vector<256x64xf32>
      %c0_48 = arith.constant 0 : index
      %c0_49 = arith.constant 0 : index
      %106 = vector.load %arg5[%c0_48, %c0_49] : memref<1x64xf32, #tpu.memory_space<vmem>>, vector<1x64xf32>
      %107 = vector.broadcast %106 : vector<1x64xf32> to vector<256x64xf32>
      %108 = arith.addf %105, %107 : vector<256x64xf32>
      %109 = arith.truncf %108 : vector<256x64xf32> to vector<256x64xbf16>
      %c0_50 = arith.constant 0 : index
      %c0_51 = arith.constant 0 : index
      %110 = vector.load %arg11[%c0_50, %c0_51] : memref<256x64xbf16, #tpu.memory_space<vmem>>, vector<256x64xbf16>
      tpu.vector_store %arg11[%c0_50, %c0_51], %109 {strides = array<i32>} : memref<256x64xbf16, #tpu.memory_space<vmem>>, vector<256x64xbf16>,
    } else {
    }
    %c0 = arith.constant 0 : index
    %c0_1 = arith.constant 0 : index
    %c0_2 = arith.constant 0 : index
    %3 = vector.load %arg2[%c0, %c0_1, %c0_2] : memref<1x256x64xbf16, #tpu.memory_space<vmem>>, vector<1x256x64xbf16>
    %4 = vector.shape_cast %3 : vector<1x256x64xbf16> to vector<256x64xbf16>
    %c0_3 = arith.constant 0 : index
    %c0_4 = arith.constant 0 : index
    %5 = vector.load %arg6[%c0_3, %c0_4] : memref<64x64xbf16, #tpu.memory_space<vmem>>, vector<64x64xbf16>
    %cst = arith.constant dense<0.000000e+00> : vector<256x64xf32>
    %6 = tpu.matmul %4, %5, %cst {dimension_numbers = #tpu.dot_dimension_numbers<[1], [0], [0], [1], [0, 0, 1, 1], [], []>} : vector<256x64xbf16>, vector<64x64xbf16>, vector<256x64xf32> -> vector<256x64xf32>
    %c0_5 = arith.constant 0 : index
    %c0_6 = arith.constant 0 : index
    %7 = vector.load %arg11[%c0_5, %c0_6] : memref<256x64xbf16, #tpu.memory_space<vmem>>, vector<256x64xbf16>
    %c0_7 = arith.constant 0 : index
    %c0_8 = arith.constant 0 : index
    %8 = vector.load %arg7[%c0_7, %c0_8] : memref<64x64xbf16, #tpu.memory_space<vmem>>, vector<64x64xbf16>
    %cst_9 = arith.constant dense<0.000000e+00> : vector<256x64xf32>
    %9 = tpu.matmul %7, %8, %cst_9 {dimension_numbers = #tpu.dot_dimension_numbers<[1], [0], [0], [1], [0, 0, 1, 1], [], []>} : vector<256x64xbf16>, vector<64x64xbf16>, vector<256x64xf32> -> vector<256x64xf32>
    %10 = arith.addf %6, %9 : vector<256x64xf32>
    %cst_10 = arith.constant dense<0.000000e+00> : vector<64xf32>
    %11 = vector.multi_reduction <add>, %10, %cst_10 [0] : vector<256x64xf32> to vector<64xf32>
    %12 = vector.shape_cast %11 : vector<64xf32> to vector<1x64xf32>
    %13 = arith.mulf %10, %10 : vector<256x64xf32>
    %cst_11 = arith.constant dense<0.000000e+00> : vector<64xf32>
    %14 = vector.multi_reduction <add>, %13, %cst_11 [0] : vector<256x64xf32> to vector<64xf32>
    %15 = vector.shape_cast %14 : vector<64xf32> to vector<1x64xf32>
    %cst_12 = arith.constant 3.906250e-03 : f32
    %16 = vector.broadcast %cst_12 : f32 to vector<1x64xf32>
    %17 = arith.mulf %12, %16 : vector<1x64xf32>
    %cst_13 = arith.constant 3.906250e-03 : f32
    %18 = vector.broadcast %cst_13 : f32 to vector<1x64xf32>
    %19 = arith.mulf %15, %18 : vector<1x64xf32>
    %20 = arith.mulf %17, %17 : vector<1x64xf32>
    %21 = arith.subf %19, %20 : vector<1x64xf32>
    %cst_14 = arith.constant 0.000000e+00 : f32
    %22 = vector.broadcast %cst_14 : f32 to vector<1x64xf32>
    %23 = arith.maximumf %21, %22 : vector<1x64xf32>
    %24 = vector.broadcast %17 : vector<1x64xf32> to vector<256x64xf32>
    %25 = arith.subf %10, %24 : vector<256x64xf32>
    %cst_15 = arith.constant 9.99999974E-6 : f32
    %26 = vector.broadcast %cst_15 : f32 to vector<1x64xf32>
    %27 = arith.addf %23, %26 : vector<1x64xf32>
    %28 = math.rsqrt %27 : vector<1x64xf32>
    %29 = vector.broadcast %28 : vector<1x64xf32> to vector<256x64xf32>
    %30 = arith.mulf %25, %29 : vector<256x64xf32>
    %c0_16 = arith.constant 0 : index
    %c0_17 = arith.constant 0 : index
    %31 = vector.load %arg8[%c0_16, %c0_17] : memref<1x64xf32, #tpu.memory_space<vmem>>, vector<1x64xf32>
    %32 = vector.broadcast %31 : vector<1x64xf32> to vector<256x64xf32>
    %33 = arith.mulf %30, %32 : vector<256x64xf32>
    %c0_18 = arith.constant 0 : index
    %c0_19 = arith.constant 0 : index
    %34 = vector.load %arg9[%c0_18, %c0_19] : memref<1x64xf32, #tpu.memory_space<vmem>>, vector<1x64xf32>
    %35 = vector.broadcast %34 : vector<1x64xf32> to vector<256x64xf32>
    %36 = arith.addf %33, %35 : vector<256x64xf32>
    %cst_20 = arith.constant 5.000000e-01 : f32
    %37 = vector.broadcast %cst_20 : f32 to vector<256x64xf32>
    %38 = arith.mulf %37, %36 : vector<256x64xf32>
    %cst_21 = arith.constant 0.707106769 : f32
    %39 = vector.broadcast %cst_21 : f32 to vector<256x64xf32>
    %40 = arith.mulf %36, %39 : vector<256x64xf32>
    %41 = math.absf %40 : vector<256x64xf32>
    %cst_22 = arith.constant 0.327591091 : f32
    %42 = vector.broadcast %cst_22 : f32 to vector<256x64xf32>
    %43 = arith.mulf %42, %41 : vector<256x64xf32>
    %cst_23 = arith.constant 1.000000e+00 : f32
    %44 = vector.broadcast %cst_23 : f32 to vector<256x64xf32>
    %45 = arith.addf %44, %43 : vector<256x64xf32>
    %46 = tpu.reciprocal %45 {approx = true} : vector<256x64xf32> -> vector<256x64xf32>
    %cst_24 = arith.constant 1.06140542 : f32
    %47 = vector.broadcast %cst_24 : f32 to vector<256x64xf32>
    %48 = arith.mulf %47, %46 : vector<256x64xf32>
    %cst_25 = arith.constant -1.45315206 : f32
    %49 = vector.broadcast %cst_25 : f32 to vector<256x64xf32>
    %50 = arith.addf %48, %49 : vector<256x64xf32>
    %51 = arith.mulf %50, %46 : vector<256x64xf32>
    %cst_26 = arith.constant 1.42141378 : f32
    %52 = vector.broadcast %cst_26 : f32 to vector<256x64xf32>
    %53 = arith.addf %51, %52 : vector<256x64xf32>
    %54 = arith.mulf %53, %46 : vector<256x64xf32>
    %cst_27 = arith.constant -0.284496725 : f32
    %55 = vector.broadcast %cst_27 : f32 to vector<256x64xf32>
    %56 = arith.addf %54, %55 : vector<256x64xf32>
    %57 = arith.mulf %56, %46 : vector<256x64xf32>
    %cst_28 = arith.constant 0.254829586 : f32
    %58 = vector.broadcast %cst_28 : f32 to vector<256x64xf32>
    %59 = arith.addf %57, %58 : vector<256x64xf32>
    %60 = arith.mulf %59, %46 : vector<256x64xf32>
    %cst_29 = arith.constant 0.000000e+00 : f32
    %61 = vector.broadcast %cst_29 : f32 to vector<256x64xf32>
    %62 = arith.subf %61, %41 : vector<256x64xf32>
    %63 = arith.mulf %62, %41 : vector<256x64xf32>
    %64 = math.exp %63 : vector<256x64xf32>
    %65 = arith.mulf %60, %64 : vector<256x64xf32>
    %cst_30 = arith.constant 1.000000e+00 : f32
    %66 = vector.broadcast %cst_30 : f32 to vector<256x64xf32>
    %67 = arith.subf %66, %65 : vector<256x64xf32>
    %cst_31 = arith.constant 0.000000e+00 : f32
    %68 = vector.broadcast %cst_31 : f32 to vector<256x64xf32>
    %69 = arith.cmpf olt, %40, %68 : vector<256x64xf32>
    %cst_32 = arith.constant 0.000000e+00 : f32
    %70 = vector.broadcast %cst_32 : f32 to vector<256x64xf32>
    %71 = arith.subf %70, %67 : vector<256x64xf32>
    %72 = arith.select %69, %71, %67 : vector<256x64xi1>, vector<256x64xf32>
    %cst_33 = arith.constant 1.000000e+00 : f32
    %73 = vector.broadcast %cst_33 : f32 to vector<256x64xf32>
    %74 = arith.addf %73, %72 : vector<256x64xf32>
    %75 = arith.mulf %38, %74 : vector<256x64xf32>
    %76 = arith.truncf %75 : vector<256x64xf32> to vector<256x64xbf16>
    %c0_34 = arith.constant 0 : index
    %c0_35 = arith.constant 0 : index
    %c0_36 = arith.constant 0 : index
    %77 = vector.load %arg10[%c0_34, %c0_35, %c0_36] : memref<1x256x64xbf16, #tpu.memory_space<vmem>>, vector<1x256x64xbf16>
    %78 = vector.shape_cast %77 : vector<1x256x64xbf16> to vector<256x64xbf16>
    %79 = vector.shape_cast %76 : vector<256x64xbf16> to vector<1x256x64xbf16>
    tpu.vector_store %arg10[%c0_34, %c0_35, %c0_36], %79 {strides = array<i32>} : memref<1x256x64xbf16, #tpu.memory_space<vmem>>, vector<1x256x64xbf16>,
    return
  }
  func.func @transform_0(%arg0: i32, %arg1: i32) -> (i32, i32, i32) {
    %c0_i32 = arith.constant 0 : i32
    %c0_i32_0 = arith.constant 0 : i32
    %c0_i32_1 = arith.constant 0 : i32
    return %arg0, %c0_i32, %c0_i32_0 : i32, i32, i32
  }
  func.func @transform_1(%arg0: i32, %arg1: i32) -> (i32, i32, i32) {
    %c0_i32 = arith.constant 0 : i32
    %c0_i32_0 = arith.constant 0 : i32
    %c0_i32_1 = arith.constant 0 : i32
    return %arg0, %c0_i32, %c0_i32_0 : i32, i32, i32
  }
  func.func @transform_2(%arg0: i32, %arg1: i32) -> (i32, i32) {
    %c0_i32 = arith.constant 0 : i32
    %c0_i32_0 = arith.constant 0 : i32
    %c0_i32_1 = arith.constant 0 : i32
    return %c0_i32, %c0_i32_0 : i32, i32
  }
  func.func @transform_3(%arg0: i32, %arg1: i32) -> (i32, i32) {
    %c0_i32 = arith.constant 0 : i32
    %c0_i32_0 = arith.constant 0 : i32
    %c0_i32_1 = arith.constant 0 : i32
    return %c0_i32, %c0_i32_0 : i32, i32
  }
  func.func @transform_4(%arg0: i32, %arg1: i32) -> (i32, i32) {
    %c0_i32 = arith.constant 0 : i32
    %c0_i32_0 = arith.constant 0 : i32
    return %c0_i32, %arg1 : i32, i32
  }
  func.func @transform_5(%arg0: i32, %arg1: i32) -> (i32, i32) {
    %c0_i32 = arith.constant 0 : i32
    %c0_i32_0 = arith.constant 0 : i32
    return %c0_i32, %arg1 : i32, i32
  }
  func.func @transform_6(%arg0: i32, %arg1: i32) -> (i32, i32) {
    %c0_i32 = arith.constant 0 : i32
    %c0_i32_0 = arith.constant 0 : i32
    return %c0_i32, %arg1 : i32, i32
  }
  func.func @transform_7(%arg0: i32, %arg1: i32) -> (i32, i32) {
    %c0_i32 = arith.constant 0 : i32
    %c0_i32_0 = arith.constant 0 : i32
    return %c0_i32, %arg1 : i32, i32
  }
  func.func @transform_8(%arg0: i32, %arg1: i32) -> (i32, i32, i32) {
    %c0_i32 = arith.constant 0 : i32
    %c0_i32_0 = arith.constant 0 : i32
    return %arg0, %c0_i32, %arg1 : i32, i32, i32
  }
}

</mosaic_0001>

<bundles_post_ra>
// kernel: ffm_forward.5
= control target key start
LH: loop header
LB: loop body
LE: loop exit
PB: predicated region body
PF: predicated region fallthrough
CT: control target
= control target key end

     0   :  { %s1051_s15 = smov 0   ;;  %s1053_s16 = smov 0   ;;  %s1310_s0 = inlined_call_operand.vmem [shape: bf16[2,64,128], index: 0, kind: input, shape index: {}]   ;;  %s1311_s1 = inlined_call_operand.vmem [shape: bf16[128,128], index: 1, kind: input, shape index: {}]   ;;  %s1312_s2 = inlined_call_operand.vmem [shape: f32[1,128], index: 2, kind: input, shape index: {}]   ;;  %s1313_s3 = inlined_call_operand.vmem [shape: f32[1,128], index: 3, kind: input, shape index: {}]   ;;  %s1314_s4 = inlined_call_operand.vmem [shape: bf16[2,64,128], index: 4, kind: output, shape index: {}]  }
   0x1   :  { %s1055_s17 = smov 0  }
   0x2 LB: > { %s26_s18 = sadd.s32 1, %s1020_s16  ;;  %p826_p0 = scmp.ge.s32.totalorder %s1024_s17, 1  ;;  %s1024_s17 = sphi %s1055_s17, %s14_s17   ;;  %s1020_s16 = sphi %s1053_s16, %s1316_s16   ;;  %s1016_s15 = sphi %s1051_s15, %s1315_s15  }
   0x3   : > { %p28_p1 = scmp.ge.s32.totalorder %s26_s18, 2  ;;  %p201_p2 = scmp.lt.s32.totalorder %s1024_s17, 3 }
   0x5   : > { %s1318_s18 = smov (%p28_p1, %s26_s18), 0  ;;  %p202_p3 = pnand %p826_p0, %p201_p2 }
   0x6   : > { %p240_p4 = scmp.lt.s32.totalorder (!%p202_p3), %s1016_s15, 1 }
   0x7   : > { %205 = sbr.rel (%p202_p3) target bundleno = 298 (0x12a), region = 36 }
   0xc   : > { %v894_v0 = vld [vmem:[%s1311_s1 + $0x38] sm:$0xff]  ;;  %v893_v1 = vld [vmem:[%s1311_s1 + $0x30] sm:$0xff]  ;;  %v892_v2 = vld [vmem:[%s1311_s1 + $0x28] sm:$0xff]  ;;  %s1320_s15 = smov (!%p240_p4, %s1016_s15), 1 }
   0xd   : > { %359 = vmatpush.bf16.msra.mxu0 %v894_v0  ;;  %918 = vmatpush.bf16.msra.mxu1 %v894_v0  ;;  %v891_v3 = vld [vmem:[%s1311_s1 + $0x20] sm:$0xff]  ;;  %v890_v4 = vld [vmem:[%s1311_s1 + $0x18] sm:$0xff]  ;;  %v889_v5 = vld [vmem:[%s1311_s1 + $0x10] sm:$0xff]  ;;  %s881_s7 = sshll.u32 %s1320_s15, 5 }
   0xe   : > { %919 = vmatpush.bf16.msra.mxu2 %v894_v0  ;;  %920 = vmatpush.bf16.msra.mxu3 %v894_v0  ;;  %v888_v6 = vld [vmem:[%s1311_s1 + $0x8] sm:$0xff]  ;;  %v887_v7 = vld [vmem:[%s1311_s1] sm:$0xff]  ;;  %s244_s12 = scalar_lea.vmem %s1310_s0, %s881_s7  ;;  %s262_s23 = scalar_lea.vmem %s1314_s4, %s881_s7 }
   0xf   : > { %v883_v8 = vld [vmem:[%s244_s12] sm:$0xff]  ;;  %v884_v9 = vld [vmem:[%s244_s12 + $0x8] sm:$0xff]  ;;  %v885_v10 = vld [vmem:[%s244_s12 + $0x10] sm:$0xff] }
  0x10   : > { %v886_v11 = vld [vmem:[%s244_s12 + $0x18] sm:$0xff] }
  0x11   : > { %360 = vmatpush.bf16.msra.mxu0 %v893_v1  ;;  %921 = vmatpush.bf16.msra.mxu1 %v893_v1 }
  0x12   : > { %922 = vmatpush.bf16.msra.mxu2 %v893_v1  ;;  %923 = vmatpush.bf16.msra.mxu3 %v893_v1 }
  0x15   : > { %361 = vmatpush.bf16.msra.mxu0 %v892_v2  ;;  %924 = vmatpush.bf16.msra.mxu1 %v892_v2 }
  0x16   : > { %925 = vmatpush.bf16.msra.mxu2 %v892_v2  ;;  %926 = vmatpush.bf16.msra.mxu3 %v892_v2 }
  0x19   : > { %362 = vmatpush.bf16.msra.mxu0 %v891_v3  ;;  %927 = vmatpush.bf16.msra.mxu1 %v891_v3 }
  0x1a   : > { %928 = vmatpush.bf16.msra.mxu2 %v891_v3  ;;  %929 = vmatpush.bf16.msra.mxu3 %v891_v3 }
  0x1d   : > { %363 = vmatpush.bf16.msra.mxu0 %v890_v4  ;;  %930 = vmatpush.bf16.msra.mxu1 %v890_v4 }
  0x1e   : > { %931 = vmatpush.bf16.msra.mxu2 %v890_v4  ;;  %932 = vmatpush.bf16.msra.mxu3 %v890_v4 }
  0x21   : > { %364 = vmatpush.bf16.msra.mxu0 %v889_v5  ;;  %933 = vmatpush.bf16.msra.mxu1 %v889_v5 }
  0x22   : > { %934 = vmatpush.bf16.msra.mxu2 %v889_v5  ;;  %935 = vmatpush.bf16.msra.mxu3 %v889_v5 }
  0x25   : > { %365 = vmatpush.bf16.msra.mxu0 %v888_v6  ;;  %936 = vmatpush.bf16.msra.mxu1 %v888_v6 }
  0x26   : > { %937 = vmatpush.bf16.msra.mxu2 %v888_v6  ;;  %938 = vmatpush.bf16.msra.mxu3 %v888_v6 }
  0x29   : > { %366 = vmatpush.bf16.msra.mxu0 %v887_v7  ;;  %939 = vmatpush.bf16.msra.mxu1 %v887_v7 }
  0x2a   : > { %940 = vmatpush.bf16.msra.mxu2 %v887_v7  ;;  %941 = vmatpush.bf16.msra.mxu3 %v887_v7  ;;  %v966_v7 = vld [vmem:[%s1312_s2] ss:$0 sm:$0xff] }
  0x2c   : > { %367 = vmatmul.bf16.vlgmr.msra.gmra.mxu0 %v883_v8  ;;  %372 = vmatmul.bf16.vlgmr.msra.gmra.mxu1 %v884_v9 }
  0x2d   : > { %377 = vmatmul.bf16.vlgmr.msra.gmra.mxu2 %v885_v10  ;;  %382 = vmatmul.bf16.vlgmr.msra.gmra.mxu3 %v886_v11 }
  0xa9   : > { %v1105_v12 = vpop.f32.mrf.mxu0  ;;  %v1107_v13 = vpop.f32.mrf.mxu1 }
  0xaa   : > { %v401_v17 = vmul.f32 %v1105_v12, %v1105_v12  ;;  %v403_v21 = vmul.f32 %v1107_v13, %v1107_v13 }
  0xb0   : > { %v1109_v14 = vpop.f32.mrf.mxu2  ;;  %v1111_v15 = vpop.f32.mrf.mxu3 }
  0xb1   : > { %v1113_v16 = vpop.f32.mrf.mxu0  ;;  %v1121_v20 = vpop.f32.mrf.mxu1  ;;  %v405_v27 = vmul.f32 %v1109_v14, %v1109_v14  ;;  %v407_v35 = vmul.f32 %v1111_v15, %v1111_v15 }
  0xb2   : > { %v388_v18 = vadd.f32 %v1113_v16, %v1105_v12  ;;  %v402_v19 = vmul.f32 %v1113_v16, %v1113_v16  ;;  %v404_v25 = vmul.f32 %v1121_v20, %v1121_v20 }
  0xb4   : > { %v409_v22 = vadd.f32 %v402_v19, %v401_v17  ;;  %v389_v23 = vadd.f32 %v388_v18, %v1107_v13 }
  0xb6   : > { %v390_v24 = vadd.f32 %v389_v23, %v1121_v20  ;;  %v410_v26 = vadd.f32 %v409_v22, %v403_v21 }
  0xb8   : > { %v411_v28 = vadd.f32 %v410_v26, %v404_v25  ;;  %v380_v29 = vpop.f32.mrf.mxu2  ;;  %v391_v30 = vadd.f32 %v390_v24, %v1109_v14  ;;  %v385_v34 = vpop.f32.mrf.mxu3 }
  0xb9   : > { %v406_v32 = vmul.f32 %v380_v29, %v380_v29  ;;  %v408_v39 = vmul.f32 %v385_v34, %v385_v34 }
  0xba   : > { %v392_v31 = vadd.f32 %v391_v30, %v380_v29  ;;  %v412_v33 = vadd.f32 %v411_v28, %v405_v27 }
  0xbc   : > { %v413_v36 = vadd.f32 %v412_v33, %v406_v32  ;;  %v393_v37 = vadd.f32 %v392_v31, %v1111_v15 }
  0xbe   : > { %v394_v38 = vadd.f32 %v393_v37, %v385_v34  ;;  %v414_v40 = vadd.f32 %v413_v36, %v407_v35 }
  0xc0   : > { %v395_v41 = vrot.slane %v394_v38, 4  ;;  %v415_v42 = vadd.f32 %v414_v40, %v408_v39 }
  0xc2   : > { %v396_v43 = vadd.f32 %v395_v41, %v394_v38  ;;  %v416_v44 = vrot.slane %v415_v42, 4 }
  0xc4   : > { %v397_v45 = vrot.slane %v396_v43, 2  ;;  %v417_v46 = vadd.f32 %v416_v44, %v415_v42 }
  0xc6   : > { %v398_v47 = vadd.f32 %v397_v45, %v396_v43  ;;  %v418_v48 = vrot.slane %v417_v46, 2 }
  0xc8   : > { %v399_v49 = vrot.slane %v398_v47, 1  ;;  %v419_v50 = vadd.f32 %v418_v48, %v417_v46 }
  0xca   : > { %v400_v51 = vadd.f32 %v399_v49, %v398_v47  ;;  %v420_v52 = vrot.slane %v419_v50, 1 }
  0xcc   : > { %v421_v53 = vadd.f32 %v420_v52, %v419_v50  ;;  %v422_v54 = vmul.f32 0.015625, %v400_v51 }
  0xce   : > { %v423_v55 = vmul.f32 0.015625, %v421_v53  ;;  %v424_v56 = vmul.f32 %v422_v54, %v422_v54  ;;  %v427_v1 = vsub.f32 %v1105_v12, %v422_v54  ;;  %v428_v3 = vsub.f32 %v1113_v16, %v422_v54 }
  0xcf   : > { %v429_v4 = vsub.f32 %v1107_v13, %v422_v54  ;;  %v430_v5 = vsub.f32 %v1121_v20, %v422_v54  ;;  %v431_v6 = vsub.f32 %v1109_v14, %v422_v54  ;;  %v432_v8 = vsub.f32 %v380_v29, %v422_v54  ;;  %v967_v13 = vld [vmem:[%s1313_s3] ss:$0 sm:$0xff] }
  0xd0   : > { %v425_v57 = vsub.f32 %v423_v55, %v424_v56  ;;  %v433_v9 = vsub.f32 %v1111_v15, %v422_v54  ;;  %v434_v10 = vsub.f32 %v385_v34, %v422_v54 }
  0xd2   : > { %v426_v58 = vmax.f32 %v425_v57, 0.0 }
  0xd4   : > { %v435_v59 = vadd.f32 1e-05, %v426_v58 }
  0xd6   : > { %968 = vrsqrt.f32 %v435_v59  ;;  %vm442_vm1 = vweird.f32 %v435_v59 }
  0xdc   : > { %v969_v60 = vpop.eup %968 }
  0xdd   : > { %v437_v61 = vmul.f32 %v969_v60, %v435_v59  ;;  %vm443_vm0 = vweird.f32 %v969_v60 }
  0xde   : > { %vm444_vm2 = vmor %vm442_vm1, %vm443_vm0 }
  0xdf   : > { %v438_v62 = vmul.f32 %v969_v60, %v437_v61 }
  0xe1   : > { %v439_v63 = vmul.f32 0.5, %v438_v62 }
  0xe3   : > { %v440_v0 = vsub.f32 1.5, %v439_v63 }
  0xe5   : > { %v441_v2 = vmul.f32 %v969_v60, %v440_v0 }
  0xe7   : > { %v445_v11 = vsel %vm444_vm2, %v969_v60, %v441_v2 }
  0xe8   : > { %v446_v12 = vmul.f32 %v445_v11, %v427_v1  ;;  %v447_v17 = vmul.f32 %v445_v11, %v428_v3  ;;  %v448_v18 = vmul.f32 %v445_v11, %v429_v4  ;;  %v449_v16 = vmul.f32 %v445_v11, %v430_v5 }
  0xe9   : > { %v450_v19 = vmul.f32 %v445_v11, %v431_v6  ;;  %v451_v14 = vmul.f32 %v445_v11, %v432_v8  ;;  %v452_v20 = vmul.f32 %v445_v11, %v433_v9  ;;  %v453_v21 = vmul.f32 %v445_v11, %v434_v10 }
  0xea   : > { %v458_v22 = vmul.f32 %v966_v7, %v446_v12  ;;  %v459_v23 = vmul.f32 %v966_v7, %v447_v17  ;;  %v460_v24 = vmul.f32 %v966_v7, %v448_v18  ;;  %v461_v25 = vmul.f32 %v966_v7, %v449_v16 }
  0xeb   : > { %v462_v26 = vmul.f32 %v966_v7, %v450_v19  ;;  %v463_v15 = vmul.f32 %v966_v7, %v451_v14  ;;  %v464_v27 = vmul.f32 %v966_v7, %v452_v20  ;;  %v465_v28 = vmul.f32 %v966_v7, %v453_v21 }
  0xec   : > { %v470_v29 = vadd.f32 %v967_v13, %v458_v22  ;;  %v471_v30 = vadd.f32 %v967_v13, %v459_v23  ;;  %v472_v31 = vadd.f32 %v967_v13, %v460_v24  ;;  %v473_v32 = vadd.f32 %v967_v13, %v461_v25 }
  0xed   : > { %v474_v33 = vadd.f32 %v967_v13, %v462_v26  ;;  %v1147_v34 = vadd.f32 %v967_v13, %v463_v15  ;;  %v1149_v35 = vadd.f32 %v967_v13, %v464_v27  ;;  %v1151_v36 = vadd.f32 %v967_v13, %v465_v28 }
  0xee   : > { %v1153_v37 = vmul.f32 0.5, %v470_v29  ;;  %v1155_v38 = vmul.f32 0.5, %v471_v30  ;;  %v1157_v39 = vmul.f32 0.5, %v472_v31  ;;  %v1159_v40 = vmul.f32 0.5, %v473_v32 }
  0xef   : > { %v1161_v41 = vmul.f32 0.70710677, %v470_v29  ;;  %v1163_v42 = vmul.f32 0.70710677, %v471_v30  ;;  %v1165_v43 = vmul.f32 0.70710677, %v472_v31 }
  0xf0   : > { %v1167_v44 = vmul.f32 0.70710677, %v473_v32  ;;  %v1169_v45 = vmul.f32 0.70710677, %v474_v33  ;;  %v1172_v46 = vmul.f32 0.70710677, %v1147_v34 }
  0xf1   : > { %v1175_v47 = vmul.f32 0.70710677, %v1149_v35  ;;  %v1178_v48 = vmul.f32 0.70710677, %v1151_v36  ;;  %v494_v49 = vand.u32 2147483647, %v1161_v41 }
  0xf2   : > { %v495_v50 = vand.u32 2147483647, %v1163_v42  ;;  %v496_v51 = vand.u32 2147483647, %v1165_v43  ;;  %v497_v52 = vand.u32 2147483647, %v1167_v44 }
  0xf3   : > { %v498_v53 = vand.u32 2147483647, %v1169_v45  ;;  %v499_v54 = vand.u32 2147483647, %v1172_v46  ;;  %v500_v55 = vand.u32 2147483647, %v1175_v47 }
  0xf4   : > { %v501_v56 = vand.u32 2147483647, %v1178_v48  ;;  %v502_v57 = vmul.f32 0.3275911, %v494_v49  ;;  %v503_v58 = vmul.f32 0.3275911, %v495_v50 }
  0xf5   : > { %v504_v59 = vmul.f32 0.3275911, %v496_v51  ;;  %v505_v60 = vmul.f32 0.3275911, %v497_v52  ;;  %v506_v61 = vmul.f32 0.3275911, %v498_v53 }
  0xf6   : > { %v507_v62 = vmul.f32 0.3275911, %v499_v54  ;;  %v508_v63 = vmul.f32 0.3275911, %v500_v55  ;;  %v509_v0 = vmul.f32 0.3275911, %v501_v56 }
  0xf7   : > { %v510_v1 = vadd.f32 1.0, %v502_v57  ;;  %v511_v2 = vadd.f32 1.0, %v503_v58  ;;  %v512_v3 = vadd.f32 1.0, %v504_v59  ;;  %v513_v4 = vadd.f32 1.0, %v505_v60 }
  0xf8   : > { %v514_v5 = vadd.f32 1.0, %v506_v61  ;;  %v515_v6 = vadd.f32 1.0, %v507_v62  ;;  %v516_v7 = vadd.f32 1.0, %v508_v63  ;;  %v517_v8 = vadd.f32 1.0, %v509_v0 }
  0xf9   : > { %970 = vrcp.f32 %v510_v1  ;;  %v598_v9 = vsub.f32 0.0, %v494_v49  ;;  %v599_v10 = vsub.f32 0.0, %v495_v50  ;;  %v600_v11 = vsub.f32 0.0, %v496_v51 }
  0xfa   : > { %972 = vrcp.f32 %v511_v2  ;;  %v601_v12 = vsub.f32 0.0, %v497_v52  ;;  %v602_v17 = vsub.f32 0.0, %v498_v53  ;;  %v603_v18 = vsub.f32 0.0, %v499_v54 }
  0xfb   : > { %974 = vrcp.f32 %v512_v3  ;;  %v604_v16 = vsub.f32 0.0, %v500_v55  ;;  %v605_v13 = vsub.f32 0.0, %v501_v56  ;;  %v606_v19 = vmul.f32 %v598_v9, %v494_v49 }
  0xfc   : > { %976 = vrcp.f32 %v513_v4  ;;  %v607_v14 = vmul.f32 %v599_v10, %v495_v50  ;;  %v608_v20 = vmul.f32 %v600_v11, %v496_v51  ;;  %v609_v21 = vmul.f32 %v601_v12, %v497_v52 }
  0xfd   : > { %v1188_v22 = vmul.f32 0.5, %v474_v33  ;;  %978 = vrcp.f32 %v514_v5  ;;  %v610_v23 = vmul.f32 %v602_v17, %v498_v53  ;;  %v611_v24 = vmul.f32 %v603_v18, %v499_v54 }
  0xfe   : > { %980 = vrcp.f32 %v515_v6  ;;  %v612_v25 = vmul.f32 %v604_v16, %v500_v55  ;;  %v614_v26 = vmul.f32 1.442695, %v606_v19  ;;  %v616_v15 = vmul.f32 1.442695, %v607_v14 }
  0xff   : > { %v1190_v27 = vpop.eup %970  ;;  %v1193_v28 = vmul.f32 0.5, %v1147_v34  ;;  %982 = vrcp.f32 %v516_v7  ;;  %v613_v29 = vmul.f32 %v605_v13, %v501_v56  ;;  %v618_v30 = vmul.f32 1.442695, %v608_v20 }
 0x100   : > { %v1195_v31 = vpop.eup %972  ;;  %v1198_v32 = vmul.f32 0.5, %v1149_v35  ;;  %984 = vrcp.f32 %v517_v8  ;;  %v526_v33 = vmul.f32 1.0614054, %v1190_v27  ;;  %v620_v49 = vmul.f32 1.442695, %v609_v21 }
 0x101   : > { %v1201_v50 = vpop.eup %974  ;;  %v527_v51 = vmul.f32 1.0614054, %v1195_v31  ;;  %986 = vpow2.f32 %v614_v26  ;;  %v622_v52 = vmul.f32 1.442695, %v610_v23  ;;  %v1204_v34 = vmul.f32 1.442695, %v611_v24 }
 0x102   : > { %v1206_v53 = vpop.eup %976  ;;  %v528_v54 = vmul.f32 1.0614054, %v1201_v50  ;;  %v534_v55 = vadd.f32 -1.4531521, %v526_v33  ;;  %988 = vpow2.f32 %v616_v15  ;;  %v1209_v35 = vmul.f32 1.442695, %v612_v25 }
 0x103   : > { %v1211_v56 = vpop.eup %978  ;;  %v529_v57 = vmul.f32 1.0614054, %v1206_v53  ;;  %v535_v58 = vadd.f32 -1.4531521, %v527_v51  ;;  %990 = vpow2.f32 %v618_v30  ;;  %v1214_v59 = vmul.f32 1.442695, %v613_v29 }
 0x104   : > { %v1216_v60 = vpop.eup %980  ;;  %v530_v61 = vmul.f32 1.0614054, %v1211_v56  ;;  %v536_v62 = vadd.f32 -1.4531521, %v528_v54  ;;  %v542_v63 = vmul.f32 %v1190_v27, %v534_v55  ;;  %992 = vpow2.f32 %v620_v49 }
 0x105   : > { %v1220_v0 = vpop.eup %982  ;;  %v531_v1 = vmul.f32 1.0614054, %v1216_v60  ;;  %v537_v2 = vadd.f32 -1.4531521, %v529_v57  ;;  %v543_v3 = vmul.f32 %v1195_v31, %v535_v58  ;;  %994 = vpow2.f32 %v622_v52 }
 0x106   : > { %v1224_v4 = vpop.eup %984  ;;  %v532_v5 = vmul.f32 1.0614054, %v1220_v0  ;;  %v538_v6 = vadd.f32 -1.4531521, %v530_v61  ;;  %v544_v7 = vmul.f32 %v1201_v50, %v536_v62  ;;  %v550_v8 = vadd.f32 1.4214138, %v542_v63 }
 0x107   : > { %v1228_v9 = vpop.eup %986  ;;  %v533_v10 = vmul.f32 1.0614054, %v1224_v4  ;;  %v539_v11 = vadd.f32 -1.4531521, %v531_v1  ;;  %v545_v12 = vmul.f32 %v1206_v53, %v537_v2  ;;  %v551_v17 = vadd.f32 1.4214138, %v543_v3 }
 0x108   : > { %v989_v18 = vpop.eup %988  ;;  %v540_v16 = vadd.f32 -1.4531521, %v532_v5  ;;  %v546_v13 = vmul.f32 %v1211_v56, %v538_v6  ;;  %v552_v19 = vadd.f32 1.4214138, %v544_v7  ;;  %v558_v14 = vmul.f32 %v1190_v27, %v550_v8 }
 0x109   : > { %v991_v20 = vpop.eup %990  ;;  %v541_v21 = vadd.f32 -1.4531521, %v533_v10  ;;  %v547_v23 = vmul.f32 %v1216_v60, %v539_v11  ;;  %v553_v24 = vadd.f32 1.4214138, %v545_v12  ;;  %v559_v25 = vmul.f32 %v1195_v31, %v551_v17 }
 0x10a   : > { %v993_v26 = vpop.eup %992  ;;  %v548_v15 = vmul.f32 %v1220_v0, %v540_v16  ;;  %v554_v29 = vadd.f32 1.4214138, %v546_v13  ;;  %v560_v30 = vmul.f32 %v1201_v50, %v552_v19  ;;  %v566_v33 = vadd.f32 -0.28449672, %v558_v14 }
 0x10b   : > { %v995_v49 = vpop.eup %994  ;;  %v549_v51 = vmul.f32 %v1224_v4, %v541_v21  ;;  %v555_v52 = vadd.f32 1.4214138, %v547_v23  ;;  %v561_v54 = vmul.f32 %v1206_v53, %v553_v24  ;;  %v567_v55 = vadd.f32 -0.28449672, %v559_v25 }
 0x10c   : > { %v556_v57 = vadd.f32 1.4214138, %v548_v15  ;;  %v562_v58 = vmul.f32 %v1211_v56, %v554_v29  ;;  %v568_v61 = vadd.f32 -0.28449672, %v560_v30  ;;  %v574_v62 = vmul.f32 %v1190_v27, %v566_v33 }
 0x10d   : > { %v557_v63 = vadd.f32 1.4214138, %v549_v51  ;;  %v563_v1 = vmul.f32 %v1216_v60, %v555_v52  ;;  %v569_v2 = vadd.f32 -0.28449672, %v561_v54  ;;  %v575_v3 = vmul.f32 %v1195_v31, %v567_v55 }
 0x10e   : > { %v564_v5 = vmul.f32 %v1220_v0, %v556_v57  ;;  %v570_v6 = vadd.f32 -0.28449672, %v562_v58  ;;  %v576_v7 = vmul.f32 %v1201_v50, %v568_v61  ;;  %v582_v8 = vadd.f32 0.2548296, %v574_v62 }
 0x10f   : > { %v565_v10 = vmul.f32 %v1224_v4, %v557_v63  ;;  %v571_v11 = vadd.f32 -0.28449672, %v563_v1  ;;  %v577_v12 = vmul.f32 %v1206_v53, %v569_v2  ;;  %v583_v17 = vadd.f32 0.2548296, %v575_v3 }
 0x110   : > { %v572_v16 = vadd.f32 -0.28449672, %v564_v5  ;;  %v578_v13 = vmul.f32 %v1211_v56, %v570_v6  ;;  %v584_v19 = vadd.f32 0.2548296, %v576_v7  ;;  %v590_v14 = vmul.f32 %v1190_v27, %v582_v8 }
 0x111   : > { %v573_v21 = vadd.f32 -0.28449672, %v565_v10  ;;  %v579_v23 = vmul.f32 %v1216_v60, %v571_v11  ;;  %v585_v24 = vadd.f32 0.2548296, %v577_v12  ;;  %v591_v25 = vmul.f32 %v1195_v31, %v583_v17 }
 0x112   : > { %v580_v15 = vmul.f32 %v1220_v0, %v572_v16  ;;  %v586_v29 = vadd.f32 0.2548296, %v578_v13  ;;  %v592_v30 = vmul.f32 %v1201_v50, %v584_v19  ;;  %996 = vpow2.f32 %v1204_v34 }
 0x113   : > { %vm646_vm3 = vcmp.lt.f32.partialorder %v1161_v41, 0.0  ;;  %v581_v33 = vmul.f32 %v1224_v4, %v573_v21  ;;  %v587_v51 = vadd.f32 0.2548296, %v579_v23  ;;  %v593_v27 = vmul.f32 %v1206_v53, %v585_v24 }
 0x114   : > { %998 = vpow2.f32 %v1209_v35  ;;  %vm647_vm4 = vcmp.lt.f32.partialorder %v1163_v42, 0.0  ;;  %vm648_vm5 = vcmp.lt.f32.partialorder %v1165_v43, 0.0  ;;  %v588_v31 = vadd.f32 0.2548296, %v580_v15 }
 0x115   : > { %v594_v52 = vmul.f32 %v1211_v56, %v586_v29  ;;  %1000 = vpow2.f32 %v1214_v59  ;;  %v630_v50 = vmul.f32 %v1228_v9, %v590_v14  ;;  %v589_v34 = vadd.f32 0.2548296, %v581_v33 }
 0x116   : > { %v595_v54 = vmul.f32 %v1216_v60, %v587_v51  ;;  %v631_v55 = vmul.f32 %v989_v18, %v591_v25  ;;  %v632_v57 = vmul.f32 %v991_v20, %v592_v30  ;;  %v596_v53 = vmul.f32 %v1220_v0, %v588_v31 }
 0x117   : > { %v633_v58 = vmul.f32 %v993_v26, %v593_v27  ;;  %v634_v35 = vmul.f32 %v995_v49, %v594_v52  ;;  %v638_v61 = vsub.f32 1.0, %v630_v50  ;;  %v597_v62 = vmul.f32 %v1224_v4, %v589_v34 }
 0x118   : > { %v639_v63 = vsub.f32 1.0, %v631_v55  ;;  %v640_v1 = vsub.f32 1.0, %v632_v57  ;;  %vm649_vm6 = vcmp.lt.f32.partialorder %v1167_v44, 0.0  ;;  %v997_v56 = vpop.eup %996  ;;  %vm650_vm7 = vcmp.lt.f32.partialorder %v1169_v45, 0.0 }
 0x119   : > { %v641_v59 = vsub.f32 1.0, %v633_v58  ;;  %v642_v2 = vsub.f32 1.0, %v634_v35  ;;  %vm651_vm8 = vcmp.lt.f32.partialorder %v1172_v46, 0.0  ;;  %v635_v9 = vmul.f32 %v997_v56, %v595_v54 }
 0x11a   : > { %v999_v60 = vpop.eup %998  ;;  %vm652_vm9 = vcmp.lt.f32.partialorder %v1175_v47, 0.0  ;;  %vm653_vm10 = vcmp.lt.f32.partialorder %v1178_v48, 0.0  ;;  %v654_v0 = vsub.f32 0.0, %v638_v61  ;;  %v655_v20 = vsub.f32 0.0, %v639_v63 }
 0x11b   : > { %v1001_v18 = vpop.eup %1000  ;;  %v636_v4 = vmul.f32 %v999_v60, %v596_v53  ;;  %v656_v26 = vsub.f32 0.0, %v640_v1  ;;  %v657_v49 = vsub.f32 0.0, %v641_v59  ;;  %v643_v5 = vsub.f32 1.0, %v635_v9 }
 0x11c   : > { %v637_v3 = vmul.f32 %v1001_v18, %v597_v62  ;;  %v658_v6 = vsub.f32 0.0, %v642_v2  ;;  %v662_v7 = vsel %vm646_vm3, %v654_v0, %v638_v61  ;;  %v663_v10 = vsel %vm647_vm4, %v655_v20, %v639_v63 }
 0x11d   : > { %v644_v8 = vsub.f32 1.0, %v636_v4  ;;  %v664_v11 = vsel %vm648_vm5, %v656_v26, %v640_v1  ;;  %v665_v12 = vsel %vm649_vm6, %v657_v49, %v641_v59  ;;  %v659_v16 = vsub.f32 0.0, %v643_v5 }
 0x11e   : > { %v645_v17 = vsub.f32 1.0, %v637_v3  ;;  %v666_v13 = vsel %vm650_vm7, %v658_v6, %v642_v2  ;;  %v670_v19 = vadd.f32 1.0, %v662_v7  ;;  %v671_v41 = vadd.f32 1.0, %v663_v10 }
 0x11f   : > { %v660_v14 = vsub.f32 0.0, %v644_v8  ;;  %v672_v21 = vadd.f32 1.0, %v664_v11  ;;  %v673_v23 = vadd.f32 1.0, %v665_v12  ;;  %v667_v42 = vsel %vm651_vm8, %v659_v16, %v643_v5 }
 0x120   : > { %v661_v24 = vsub.f32 0.0, %v645_v17  ;;  %v674_v43 = vadd.f32 1.0, %v666_v13  ;;  %v678_v25 = vmul.f32 %v670_v19, %v1153_v37  ;;  %v675_v15 = vadd.f32 1.0, %v667_v42 }
 0x121   : > { %v668_v44 = vsel %vm652_vm9, %v660_v14, %v644_v8  ;;  %v679_v29 = vmul.f32 %v671_v41, %v1155_v38  ;;  %v680_v45 = vmul.f32 %v672_v21, %v1157_v39  ;;  %v681_v33 = vmul.f32 %v673_v23, %v1159_v40 }
 0x122   : > { %v669_v46 = vsel %vm653_vm10, %v661_v24, %v645_v17  ;;  %v676_v30 = vadd.f32 1.0, %v668_v44  ;;  %v682_v37 = vmul.f32 %v674_v43, %v1188_v22  ;;  %v485_v47 = vmul.f32 0.5, %v1151_v36 }
 0x123   : > { %v677_v51 = vadd.f32 1.0, %v669_v46  ;;  %v683_v38 = vmul.f32 %v675_v15, %v1193_v28  ;;  %v898_v27 = vpack.c.bf16 %v679_v29, %v678_v25  ;;  %v903_v31 = vpack.c.bf16 %v681_v33, %v680_v45 }
 0x124   : > { %v684_v39 = vmul.f32 %v676_v30, %v1198_v32 }
 0x125   : > { %v685_v52 = vmul.f32 %v677_v51, %v485_v47  ;;  %899 = vst [vmem:[%s262_s23] sm:$0xff] %v898_v27   ;;  %v908_v50 = vpack.c.bf16 %v683_v38, %v682_v37 }
 0x126   : > { %915 = vst [vmem:[%s262_s23 + $0x8] sm:$0xff] %v903_v31  }
 0x127   : > { %916 = vst [vmem:[%s262_s23 + $0x10] sm:$0xff] %v908_v50   ;;  %v913_v48 = vpack.c.bf16 %v685_v52, %v684_v39 }
 0x129   : > { %917 = vst [vmem:[%s262_s23 + $0x18] sm:$0xff] %v913_v48  }
 0x12a PF: > { %s14_s17 = sadd.s32 1, %s1024_s17   ;;  %s1315_s15 = smov %s1020_s16 }
 0x12b   : > { %p11_p5 = scmp.ge.s32.totalorder %s14_s17, 4   ;;  %s1316_s16 = smov %s1318_s18 }
 0x12d   :  { %13 = sbr.rel (!%p11_p5) target bundleno = 2 (0x2), region = 75 }

// kernel: ffm_forward.6
= control target key start
LH: loop header
LB: loop body
LE: loop exit
PB: predicated region body
PF: predicated region fallthrough
CT: control target
= control target key end

     0   :  { %s3339_s12 = smov 0   ;;  %s3341_s13 = smov 0   ;;  %s4253_s0 = inlined_call_operand.vmem [shape: bf16[2,8,8,128], index: 0, kind: input, shape index: {}]   ;;  %s4254_s1 = inlined_call_operand.vmem [shape: bf16[1152,256], index: 1, kind: input, shape index: {}]   ;;  %s4255_s2 = inlined_call_operand.vmem [shape: f32[1,256], index: 2, kind: input, shape index: {}]   ;;  %s4256_s3 = inlined_call_operand.vmem [shape: bf16[2,8,8,256], index: 3, kind: output, shape index: {}]  }
   0x1   :  { %s3343_s14 = smov 0   ;;  %s3345_s15 = smov 0  }
   0x2   :  { %s3347_s16 = smov 0   ;;  %s3349_s17 = smov 0  }
   0x3   :  { %s3351_s18 = smov 0   ;;  %s3353_s19 = smov 0  }
   0x4   :  { %s3355_s20 = smov 0  }
   0x5 LB: > { %s2704_s21 = sadd.s32 4294967295, %s3316_s20   ;;  %s22_s22 = sadd.s32 1, %s3308_s18  ;;  %s3316_s20 = sphi %s3355_s20, %s13_s20   ;;  %s3312_s19 = sphi %s3353_s19, %s4271_s19   ;;  %s3308_s18 = sphi %s3351_s18, %s4270_s18   ;;  %s3304_s17 = sphi %s3349_s17, %s4269_s17   ;;  %s3300_s16 = sphi %s3347_s16, %s4268_s16   ;;  %s3296_s15 = sphi %s3345_s15, %s4267_s15   ;;  %s3292_s14 = sphi %s3343_s14, %s4266_s14   ;;  %s3288_s13 = sphi %s3341_s13, %s4265_s13   ;;  %s3284_s12 = sphi %s3339_s12, %s4264_s12  }
   0x6   : > { %p23_p0 = scmp.ge.s32.totalorder %s22_s22, 2  ;;  %s25_s23 = sadd.s32 1, %s3312_s19 }
   0x7   : > { %s58_s24 = sadd.s32 1, %s3296_s15  ;;  %p65_p1 = scmp.ne.s32.totalorder %s3296_s15, %s3292_s14 }
   0x8   : > { %s4273_s22 = smov (%p23_p0, %s22_s22), 0  ;;  %s4275_s23 = smov (!%p23_p0, %s25_s23), %s3312_s19 }
   0x9   : > { %s55_s25 = ssub.s32 %s3308_s18, %s4273_s22  ;;  %p66_p2 = scmp.eq.s32.totalorder %s3316_s20, 0 }
   0xa   : > { %p27_p3 = scmp.ge.s32.totalorder %s4275_s23, 2  ;;  %p56_p4 = scmp.eq.s32.totalorder %s55_s25, 0 }
   0xb   : > { %p67_p5 = por %p66_p2, %p65_p1  ;;  %s112_s26 = sadd.s32 1, %s3288_s13 }
   0xc   : > { %s4277_s23 = smov (%p27_p3, %s4275_s23), 0  ;;  %p122_p6 = scmp.ne.s32.totalorder %s3288_s13, %s3284_s12 }
   0xd   : > { %s3400_s27 = scalar_select %p56_p4, %s3296_s15, %s58_s24  }
   0xe   : > { %s107_s28 = ssub.s32 %s3312_s19, %s4277_s23  ;;  %p123_p7 = scmp.eq.s32.totalorder %s2704_s21, 3 }
   0xf   : > { %s109_s29 = sor.u32 %s107_s28, %s55_s25  ;;  %p2707_p10 = scmp.ge.s32.totalorder %s3316_s20, 4 }
  0x10   : > { %p110_p8 = scmp.eq.s32.totalorder %s109_s29, 0  ;;  %p3406_p9 = por %p123_p7, %p122_p6 }
  0x11   : > { %145 = sbr.rel (%p2707_p10) target bundleno = 171 (0xab), region = 16 }
  0x12   : > { %s3411_s4 = scalar_select %p110_p8, %s3288_s13, %s112_s26  }
  0x16   : > { %156 = sbr.rel (!%p67_p5) target bundleno = 171 (0xab), region = 24  ;;  %s158_s5 = sand.u32 (%p67_p5), 1, %s3296_s15  }
  0x17   : > { %s2708_s6 = sshll.u32 (%p67_p5), %s3308_s18, 2  ;;  %s3130_s7 = smul.u32 (%p67_p5), 576, %s158_s5 }
  0x18   : > { %s3419_s10 = scalar_lea.vmem (%p67_p5), %s4254_s1, %s2708_s6 }
  0x19   : > { %v179_v0 = vld [vmem:[%s3419_s10] sm:$0xf] (%p67_p5)  ;;  %v181_v1 = vld [vmem:[%s3419_s10 + $0x8] sm:$0xf] (%p67_p5)  ;;  %v183_v2 = vld [vmem:[%s3419_s10 + $0x10] sm:$0xf] (%p67_p5) }
  0x1a   : > { %s3424_s11 = scalar_lea.vmem (%p67_p5), [#allocation3], %s3130_s7  ;;  %v185_v3 = vld [vmem:[%s3419_s10 + $0x18] sm:$0xf] (%p67_p5)  ;;  %v187_v4 = vld [vmem:[%s3419_s10 + $0x20] sm:$0xf] (%p67_p5) }
  0x1b   : > { %180 = vst [vmem:[%s3424_s11] sm:$0xf] %v179_v0  ;;  %v189_v5 = vld [vmem:[%s3419_s10 + $0x28] sm:$0xf]  ;;  %v191_v6 = vld [vmem:[%s3419_s10 + $0x30] sm:$0xf] }
  0x1c   : > { %182 = vst [vmem:[%s3424_s11 + $0x4] sm:$0xf] %v181_v1  ;;  %v193_v7 = vld [vmem:[%s3419_s10 + $0x38] sm:$0xf]  ;;  %v195_v8 = vld [vmem:[%s3419_s10 + $0x40] sm:$0xf] }
  0x1d   : > { %184 = vst [vmem:[%s3424_s11 + $0x8] sm:$0xf] %v183_v2  ;;  %v197_v9 = vld [vmem:[%s3419_s10 + $0x48] sm:$0xf]  ;;  %v199_v10 = vld [vmem:[%s3419_s10 + $0x50] sm:$0xf] }
  0x1e   : > { %186 = vst [vmem:[%s3424_s11 + $0xc] sm:$0xf] %v185_v3  ;;  %v201_v11 = vld [vmem:[%s3419_s10 + $0x58] sm:$0xf]  ;;  %v203_v12 = vld [vmem:[%s3419_s10 + $0x60] sm:$0xf] }
  0x1f   : > { %188 = vst [vmem:[%s3424_s11 + $0x10] sm:$0xf] %v187_v4  ;;  %v205_v13 = vld [vmem:[%s3419_s10 + $0x68] sm:$0xf]  ;;  %v207_v14 = vld [vmem:[%s3419_s10 + $0x70] sm:$0xf] }
  0x20   : > { %190 = vst [vmem:[%s3424_s11 + $0x14] sm:$0xf] %v189_v5  ;;  %v209_v15 = vld [vmem:[%s3419_s10 + $0x78] sm:$0xf]  ;;  %v211_v16 = vld [vmem:[%s3419_s10 + $0x80] sm:$0xf] }
  0x21   : > { %192 = vst [vmem:[%s3424_s11 + $0x18] sm:$0xf] %v191_v6  ;;  %v213_v17 = vld [vmem:[%s3419_s10 + $0x88] sm:$0xf]  ;;  %v215_v18 = vld [vmem:[%s3419_s10 + $0x90] sm:$0xf] }
  0x22   : > { %194 = vst [vmem:[%s3424_s11 + $0x1c] sm:$0xf] %v193_v7  ;;  %v217_v19 = vld [vmem:[%s3419_s10 + $0x98] sm:$0xf]  ;;  %v219_v20 = vld [vmem:[%s3419_s10 + $0xa0] sm:$0xf] }
  0x23   : > { %196 = vst [vmem:[%s3424_s11 + $0x20] sm:$0xf] %v195_v8  ;;  %v221_v21 = vld [vmem:[%s3419_s10 + $0xa8] sm:$0xf]  ;;  %v223_v22 = vld [vmem:[%s3419_s10 + $0xb0] sm:$0xf] }
  0x24   : > { %198 = vst [vmem:[%s3424_s11 + $0x24] sm:$0xf] %v197_v9  ;;  %v225_v23 = vld [vmem:[%s3419_s10 + $0xb8] sm:$0xf]  ;;  %v227_v24 = vld [vmem:[%s3419_s10 + $0xc0] sm:$0xf] }
  0x25   : > { %200 = vst [vmem:[%s3424_s11 + $0x28] sm:$0xf] %v199_v10  ;;  %v229_v25 = vld [vmem:[%s3419_s10 + $0xc8] sm:$0xf]  ;;  %v231_v26 = vld [vmem:[%s3419_s10 + $0xd0] sm:$0xf] }
  0x26   : > { %202 = vst [vmem:[%s3424_s11 + $0x2c] sm:$0xf] %v201_v11  ;;  %v233_v27 = vld [vmem:[%s3419_s10 + $0xd8] sm:$0xf]  ;;  %v235_v28 = vld [vmem:[%s3419_s10 + $0xe0] sm:$0xf] }
  0x27   : > { %204 = vst [vmem:[%s3424_s11 + $0x30] sm:$0xf] %v203_v12  ;;  %v237_v29 = vld [vmem:[%s3419_s10 + $0xe8] sm:$0xf]  ;;  %v239_v30 = vld [vmem:[%s3419_s10 + $0xf0] sm:$0xf] }
  0x28   : > { %206 = vst [vmem:[%s3424_s11 + $0x34] sm:$0xf] %v205_v13  ;;  %v241_v31 = vld [vmem:[%s3419_s10 + $0xf8] sm:$0xf]  ;;  %v243_v32 = vld [vmem:[%s3419_s10 + $0x100] sm:$0xf] }
  0x29   : > { %208 = vst [vmem:[%s3424_s11 + $0x38] sm:$0xf] %v207_v14  ;;  %v245_v33 = vld [vmem:[%s3419_s10 + $0x108] sm:$0xf]  ;;  %v247_v34 = vld [vmem:[%s3419_s10 + $0x110] sm:$0xf] }
  0x2a   : > { %210 = vst [vmem:[%s3424_s11 + $0x3c] sm:$0xf] %v209_v15  ;;  %v249_v35 = vld [vmem:[%s3419_s10 + $0x118] sm:$0xf]  ;;  %v251_v36 = vld [vmem:[%s3419_s10 + $0x120] sm:$0xf] }
  0x2b   : > { %212 = vst [vmem:[%s3424_s11 + $0x40] sm:$0xf] %v211_v16  ;;  %v253_v37 = vld [vmem:[%s3419_s10 + $0x128] sm:$0xf]  ;;  %v255_v38 = vld [vmem:[%s3419_s10 + $0x130] sm:$0xf] }
  0x2c   : > { %214 = vst [vmem:[%s3424_s11 + $0x44] sm:$0xf] %v213_v17  ;;  %v257_v39 = vld [vmem:[%s3419_s10 + $0x138] sm:$0xf]  ;;  %v259_v40 = vld [vmem:[%s3419_s10 + $0x140] sm:$0xf] }
  0x2d   : > { %216 = vst [vmem:[%s3424_s11 + $0x48] sm:$0xf] %v215_v18  ;;  %v261_v41 = vld [vmem:[%s3419_s10 + $0x148] sm:$0xf]  ;;  %v263_v42 = vld [vmem:[%s3419_s10 + $0x150] sm:$0xf] }
  0x2e   : > { %218 = vst [vmem:[%s3424_s11 + $0x4c] sm:$0xf] %v217_v19  ;;  %v265_v43 = vld [vmem:[%s3419_s10 + $0x158] sm:$0xf]  ;;  %v267_v44 = vld [vmem:[%s3419_s10 + $0x160] sm:$0xf] }
  0x2f   : > { %220 = vst [vmem:[%s3424_s11 + $0x50] sm:$0xf] %v219_v20  ;;  %v269_v45 = vld [vmem:[%s3419_s10 + $0x168] sm:$0xf]  ;;  %v271_v46 = vld [vmem:[%s3419_s10 + $0x170] sm:$0xf] }
  0x30   : > { %222 = vst [vmem:[%s3424_s11 + $0x54] sm:$0xf] %v221_v21  ;;  %v273_v47 = vld [vmem:[%s3419_s10 + $0x178] sm:$0xf]  ;;  %v275_v48 = vld [vmem:[%s3419_s10 + $0x180] sm:$0xf] }
  0x31   : > { %224 = vst [vmem:[%s3424_s11 + $0x58] sm:$0xf] %v223_v22  ;;  %v277_v49 = vld [vmem:[%s3419_s10 + $0x188] sm:$0xf]  ;;  %v279_v50 = vld [vmem:[%s3419_s10 + $0x190] sm:$0xf] }
  0x32   : > { %226 = vst [vmem:[%s3424_s11 + $0x5c] sm:$0xf] %v225_v23  ;;  %v281_v51 = vld [vmem:[%s3419_s10 + $0x198] sm:$0xf]  ;;  %v283_v52 = vld [vmem:[%s3419_s10 + $0x1a0] sm:$0xf] }
  0x33   : > { %228 = vst [vmem:[%s3424_s11 + $0x60] sm:$0xf] %v227_v24  ;;  %v285_v53 = vld [vmem:[%s3419_s10 + $0x1a8] sm:$0xf]  ;;  %v287_v54 = vld [vmem:[%s3419_s10 + $0x1b0] sm:$0xf] }
  0x34   : > { %230 = vst [vmem:[%s3424_s11 + $0x64] sm:$0xf] %v229_v25  ;;  %v289_v55 = vld [vmem:[%s3419_s10 + $0x1b8] sm:$0xf]  ;;  %v291_v56 = vld [vmem:[%s3419_s10 + $0x1c0] sm:$0xf] }
  0x35   : > { %232 = vst [vmem:[%s3424_s11 + $0x68] sm:$0xf] %v231_v26  ;;  %v293_v57 = vld [vmem:[%s3419_s10 + $0x1c8] sm:$0xf]  ;;  %v295_v58 = vld [vmem:[%s3419_s10 + $0x1d0] sm:$0xf] }
  0x36   : > { %234 = vst [vmem:[%s3424_s11 + $0x6c] sm:$0xf] %v233_v27  ;;  %v297_v59 = vld [vmem:[%s3419_s10 + $0x1d8] sm:$0xf]  ;;  %v299_v60 = vld [vmem:[%s3419_s10 + $0x1e0] sm:$0xf] }
  0x37   : > { %236 = vst [vmem:[%s3424_s11 + $0x70] sm:$0xf] %v235_v28  ;;  %v301_v61 = vld [vmem:[%s3419_s10 + $0x1e8] sm:$0xf]  ;;  %v303_v62 = vld [vmem:[%s3419_s10 + $0x1f0] sm:$0xf] }
  0x38   : > { %238 = vst [vmem:[%s3424_s11 + $0x74] sm:$0xf] %v237_v29  ;;  %v305_v63 = vld [vmem:[%s3419_s10 + $0x1f8] sm:$0xf]  ;;  %v307_v0 = vld [vmem:[%s3419_s10 + $0x200] sm:$0xf] }
  0x39   : > { %240 = vst [vmem:[%s3424_s11 + $0x78] sm:$0xf] %v239_v30  ;;  %v309_v1 = vld [vmem:[%s3419_s10 + $0x208] sm:$0xf]  ;;  %v311_v2 = vld [vmem:[%s3419_s10 + $0x210] sm:$0xf] }
  0x3a   : > { %242 = vst [vmem:[%s3424_s11 + $0x7c] sm:$0xf] %v241_v31  ;;  %v313_v3 = vld [vmem:[%s3419_s10 + $0x218] sm:$0xf]  ;;  %v315_v4 = vld [vmem:[%s3419_s10 + $0x220] sm:$0xf] }
  0x3b   : > { %244 = vst [vmem:[%s3424_s11 + $0x80] sm:$0xf] %v243_v32  ;;  %v317_v5 = vld [vmem:[%s3419_s10 + $0x228] sm:$0xf]  ;;  %v319_v6 = vld [vmem:[%s3419_s10 + $0x230] sm:$0xf] }
  0x3c   : > { %246 = vst [vmem:[%s3424_s11 + $0x84] sm:$0xf] %v245_v33  ;;  %v321_v7 = vld [vmem:[%s3419_s10 + $0x238] sm:$0xf]  ;;  %v323_v8 = vld [vmem:[%s3419_s10 + $0x240] sm:$0xf] }
  0x3d   : > { %248 = vst [vmem:[%s3424_s11 + $0x88] sm:$0xf] %v247_v34  ;;  %v325_v9 = vld [vmem:[%s3419_s10 + $0x248] sm:$0xf]  ;;  %v327_v10 = vld [vmem:[%s3419_s10 + $0x250] sm:$0xf] }
  0x3e   : > { %250 = vst [vmem:[%s3424_s11 + $0x8c] sm:$0xf] %v249_v35  ;;  %v329_v11 = vld [vmem:[%s3419_s10 + $0x258] sm:$0xf]  ;;  %v331_v12 = vld [vmem:[%s3419_s10 + $0x260] sm:$0xf] }
  0x3f   : > { %252 = vst [vmem:[%s3424_s11 + $0x90] sm:$0xf] %v251_v36  ;;  %v333_v13 = vld [vmem:[%s3419_s10 + $0x268] sm:$0xf]  ;;  %v335_v14 = vld [vmem:[%s3419_s10 + $0x270] sm:$0xf] }
  0x40   : > { %254 = vst [vmem:[%s3424_s11 + $0x94] sm:$0xf] %v253_v37  ;;  %v337_v15 = vld [vmem:[%s3419_s10 + $0x278] sm:$0xf]  ;;  %v339_v16 = vld [vmem:[%s3419_s10 + $0x280] sm:$0xf] }
  0x41   : > { %256 = vst [vmem:[%s3424_s11 + $0x98] sm:$0xf] %v255_v38  ;;  %v341_v17 = vld [vmem:[%s3419_s10 + $0x288] sm:$0xf]  ;;  %v343_v18 = vld [vmem:[%s3419_s10 + $0x290] sm:$0xf] }
  0x42   : > { %258 = vst [vmem:[%s3424_s11 + $0x9c] sm:$0xf] %v257_v39  ;;  %v345_v19 = vld [vmem:[%s3419_s10 + $0x298] sm:$0xf]  ;;  %v347_v20 = vld [vmem:[%s3419_s10 + $0x2a0] sm:$0xf] }
  0x43   : > { %260 = vst [vmem:[%s3424_s11 + $0xa0] sm:$0xf] %v259_v40  ;;  %v349_v21 = vld [vmem:[%s3419_s10 + $0x2a8] sm:$0xf]  ;;  %v351_v22 = vld [vmem:[%s3419_s10 + $0x2b0] sm:$0xf] }
  0x44   : > { %262 = vst [vmem:[%s3424_s11 + $0xa4] sm:$0xf] %v261_v41  ;;  %v353_v23 = vld [vmem:[%s3419_s10 + $0x2b8] sm:$0xf]  ;;  %v355_v24 = vld [vmem:[%s3419_s10 + $0x2c0] sm:$0xf] }
  0x45   : > { %264 = vst [vmem:[%s3424_s11 + $0xa8] sm:$0xf] %v263_v42  ;;  %v357_v25 = vld [vmem:[%s3419_s10 + $0x2c8] sm:$0xf]  ;;  %v359_v26 = vld [vmem:[%s3419_s10 + $0x2d0] sm:$0xf] }
  0x46   : > { %266 = vst [vmem:[%s3424_s11 + $0xac] sm:$0xf] %v265_v43  ;;  %v361_v27 = vld [vmem:[%s3419_s10 + $0x2d8] sm:$0xf]  ;;  %v363_v28 = vld [vmem:[%s3419_s10 + $0x2e0] sm:$0xf] }
  0x47   : > { %268 = vst [vmem:[%s3424_s11 + $0xb0] sm:$0xf] %v267_v44  ;;  %v365_v29 = vld [vmem:[%s3419_s10 + $0x2e8] sm:$0xf]  ;;  %v367_v30 = vld [vmem:[%s3419_s10 + $0x2f0] sm:$0xf] }
  0x48   : > { %270 = vst [vmem:[%s3424_s11 + $0xb4] sm:$0xf] %v269_v45  ;;  %v369_v31 = vld [vmem:[%s3419_s10 + $0x2f8] sm:$0xf]  ;;  %v371_v32 = vld [vmem:[%s3419_s10 + $0x300] sm:$0xf] }
  0x49   : > { %272 = vst [vmem:[%s3424_s11 + $0xb8] sm:$0xf] %v271_v46  ;;  %v373_v33 = vld [vmem:[%s3419_s10 + $0x308] sm:$0xf]  ;;  %v375_v34 = vld [vmem:[%s3419_s10 + $0x310] sm:$0xf] }
  0x4a   : > { %274 = vst [vmem:[%s3424_s11 + $0xbc] sm:$0xf] %v273_v47  ;;  %v377_v35 = vld [vmem:[%s3419_s10 + $0x318] sm:$0xf]  ;;  %v379_v36 = vld [vmem:[%s3419_s10 + $0x320] sm:$0xf] }
  0x4b   : > { %276 = vst [vmem:[%s3424_s11 + $0xc0] sm:$0xf] %v275_v48  ;;  %v381_v37 = vld [vmem:[%s3419_s10 + $0x328] sm:$0xf]  ;;  %v383_v38 = vld [vmem:[%s3419_s10 + $0x330] sm:$0xf] }
  0x4c   : > { %278 = vst [vmem:[%s3424_s11 + $0xc4] sm:$0xf] %v277_v49  ;;  %v385_v39 = vld [vmem:[%s3419_s10 + $0x338] sm:$0xf]  ;;  %v387_v40 = vld [vmem:[%s3419_s10 + $0x340] sm:$0xf] }
  0x4d   : > { %280 = vst [vmem:[%s3424_s11 + $0xc8] sm:$0xf] %v279_v50  ;;  %v389_v41 = vld [vmem:[%s3419_s10 + $0x348] sm:$0xf]  ;;  %v391_v42 = vld [vmem:[%s3419_s10 + $0x350] sm:$0xf] }
  0x4e   : > { %282 = vst [vmem:[%s3424_s11 + $0xcc] sm:$0xf] %v281_v51  ;;  %v393_v43 = vld [vmem:[%s3419_s10 + $0x358] sm:$0xf]  ;;  %v395_v44 = vld [vmem:[%s3419_s10 + $0x360] sm:$0xf] }
  0x4f   : > { %284 = vst [vmem:[%s3424_s11 + $0xd0] sm:$0xf] %v283_v52  ;;  %v397_v45 = vld [vmem:[%s3419_s10 + $0x368] sm:$0xf]  ;;  %v399_v46 = vld [vmem:[%s3419_s10 + $0x370] sm:$0xf] }
  0x50   : > { %286 = vst [vmem:[%s3424_s11 + $0xd4] sm:$0xf] %v285_v53  ;;  %v401_v47 = vld [vmem:[%s3419_s10 + $0x378] sm:$0xf]  ;;  %v403_v48 = vld [vmem:[%s3419_s10 + $0x380] sm:$0xf] }
  0x51   : > { %288 = vst [vmem:[%s3424_s11 + $0xd8] sm:$0xf] %v287_v54  ;;  %v405_v49 = vld [vmem:[%s3419_s10 + $0x388] sm:$0xf]  ;;  %v407_v50 = vld [vmem:[%s3419_s10 + $0x390] sm:$0xf] }
  0x52   : > { %290 = vst [vmem:[%s3424_s11 + $0xdc] sm:$0xf] %v289_v55  ;;  %v409_v51 = vld [vmem:[%s3419_s10 + $0x398] sm:$0xf]  ;;  %v411_v52 = vld [vmem:[%s3419_s10 + $0x3a0] sm:$0xf] }
  0x53   : > { %292 = vst [vmem:[%s3424_s11 + $0xe0] sm:$0xf] %v291_v56  ;;  %v413_v53 = vld [vmem:[%s3419_s10 + $0x3a8] sm:$0xf]  ;;  %v415_v54 = vld [vmem:[%s3419_s10 + $0x3b0] sm:$0xf] }
  0x54   : > { %294 = vst [vmem:[%s3424_s11 + $0xe4] sm:$0xf] %v293_v57  ;;  %v417_v55 = vld [vmem:[%s3419_s10 + $0x3b8] sm:$0xf]  ;;  %v419_v56 = vld [vmem:[%s3419_s10 + $0x3c0] sm:$0xf] }
  0x55   : > { %296 = vst [vmem:[%s3424_s11 + $0xe8] sm:$0xf] %v295_v58  ;;  %v421_v57 = vld [vmem:[%s3419_s10 + $0x3c8] sm:$0xf]  ;;  %v423_v58 = vld [vmem:[%s3419_s10 + $0x3d0] sm:$0xf] }
  0x56   : > { %298 = vst [vmem:[%s3424_s11 + $0xec] sm:$0xf] %v297_v59  ;;  %v425_v59 = vld [vmem:[%s3419_s10 + $0x3d8] sm:$0xf] }
  0x57   : > { %300 = vst [vmem:[%s3424_s11 + $0xf0] sm:$0xf] %v299_v60  ;;  %v427_v60 = vld [vmem:[%s3419_s10 + $0x3e0] sm:$0xf] }
  0x58   : > { %302 = vst [vmem:[%s3424_s11 + $0xf4] sm:$0xf] %v301_v61  ;;  %v429_v61 = vld [vmem:[%s3419_s10 + $0x3e8] sm:$0xf] }
  0x59   : > { %304 = vst [vmem:[%s3424_s11 + $0xf8] sm:$0xf] %v303_v62  ;;  %v431_v62 = vld [vmem:[%s3419_s10 + $0x3f0] sm:$0xf] }
  0x5a   : > { %306 = vst [vmem:[%s3424_s11 + $0xfc] sm:$0xf] %v305_v63  ;;  %v433_v63 = vld [vmem:[%s3419_s10 + $0x3f8] sm:$0xf] }
  0x5b   : > { %308 = vst [vmem:[%s3424_s11 + $0x100] sm:$0xf] %v307_v0  ;;  %v435_v0 = vld [vmem:[%s3419_s10 + $0x400] sm:$0xf] }
  0x5c   : > { %310 = vst [vmem:[%s3424_s11 + $0x104] sm:$0xf] %v309_v1  ;;  %v437_v1 = vld [vmem:[%s3419_s10 + $0x408] sm:$0xf] }
  0x5d   : > { %312 = vst [vmem:[%s3424_s11 + $0x108] sm:$0xf] %v311_v2  ;;  %v439_v2 = vld [vmem:[%s3419_s10 + $0x410] sm:$0xf] }
  0x5e   : > { %314 = vst [vmem:[%s3424_s11 + $0x10c] sm:$0xf] %v313_v3  ;;  %v441_v3 = vld [vmem:[%s3419_s10 + $0x418] sm:$0xf] }
  0x5f   : > { %316 = vst [vmem:[%s3424_s11 + $0x110] sm:$0xf] %v315_v4  ;;  %v443_v4 = vld [vmem:[%s3419_s10 + $0x420] sm:$0xf] }
  0x60   : > { %318 = vst [vmem:[%s3424_s11 + $0x114] sm:$0xf] %v317_v5  ;;  %v445_v5 = vld [vmem:[%s3419_s10 + $0x428] sm:$0xf] }
  0x61   : > { %320 = vst [vmem:[%s3424_s11 + $0x118] sm:$0xf] %v319_v6  ;;  %v447_v6 = vld [vmem:[%s3419_s10 + $0x430] sm:$0xf] }
  0x62   : > { %322 = vst [vmem:[%s3424_s11 + $0x11c] sm:$0xf] %v321_v7  ;;  %v449_v7 = vld [vmem:[%s3419_s10 + $0x438] sm:$0xf] }
  0x63   : > { %324 = vst [vmem:[%s3424_s11 + $0x120] sm:$0xf] %v323_v8  ;;  %v451_v8 = vld [vmem:[%s3419_s10 + $0x440] sm:$0xf] }
  0x64   : > { %326 = vst [vmem:[%s3424_s11 + $0x124] sm:$0xf] %v325_v9  ;;  %v453_v9 = vld [vmem:[%s3419_s10 + $0x448] sm:$0xf] }
  0x65   : > { %328 = vst [vmem:[%s3424_s11 + $0x128] sm:$0xf] %v327_v10  ;;  %v455_v10 = vld [vmem:[%s3419_s10 + $0x450] sm:$0xf] }
  0x66   : > { %330 = vst [vmem:[%s3424_s11 + $0x12c] sm:$0xf] %v329_v11  ;;  %v457_v11 = vld [vmem:[%s3419_s10 + $0x458] sm:$0xf] }
  0x67   : > { %332 = vst [vmem:[%s3424_s11 + $0x130] sm:$0xf] %v331_v12  ;;  %v459_v12 = vld [vmem:[%s3419_s10 + $0x460] sm:$0xf] }
  0x68   : > { %334 = vst [vmem:[%s3424_s11 + $0x134] sm:$0xf] %v333_v13  ;;  %v461_v13 = vld [vmem:[%s3419_s10 + $0x468] sm:$0xf] }
  0x69   : > { %336 = vst [vmem:[%s3424_s11 + $0x138] sm:$0xf] %v335_v14  ;;  %v463_v14 = vld [vmem:[%s3419_s10 + $0x470] sm:$0xf] }
  0x6a   : > { %338 = vst [vmem:[%s3424_s11 + $0x13c] sm:$0xf] %v337_v15  ;;  %v465_v15 = vld [vmem:[%s3419_s10 + $0x478] sm:$0xf] }
  0x6b   : > { %340 = vst [vmem:[%s3424_s11 + $0x140] sm:$0xf] %v339_v16 }
  0x6c   : > { %342 = vst [vmem:[%s3424_s11 + $0x144] sm:$0xf] %v341_v17 }
  0x6d   : > { %344 = vst [vmem:[%s3424_s11 + $0x148] sm:$0xf] %v343_v18 }
  0x6e   : > { %346 = vst [vmem:[%s3424_s11 + $0x14c] sm:$0xf] %v345_v19 }
  0x6f   : > { %348 = vst [vmem:[%s3424_s11 + $0x150] sm:$0xf] %v347_v20 }
  0x70   : > { %350 = vst [vmem:[%s3424_s11 + $0x154] sm:$0xf] %v349_v21 }
  0x71   : > { %352 = vst [vmem:[%s3424_s11 + $0x158] sm:$0xf] %v351_v22 }
  0x72   : > { %354 = vst [vmem:[%s3424_s11 + $0x15c] sm:$0xf] %v353_v23 }
  0x73   : > { %356 = vst [vmem:[%s3424_s11 + $0x160] sm:$0xf] %v355_v24 }
  0x74   : > { %358 = vst [vmem:[%s3424_s11 + $0x164] sm:$0xf] %v357_v25 }
  0x75   : > { %360 = vst [vmem:[%s3424_s11 + $0x168] sm:$0xf] %v359_v26 }
  0x76   : > { %362 = vst [vmem:[%s3424_s11 + $0x16c] sm:$0xf] %v361_v27 }
  0x77   : > { %364 = vst [vmem:[%s3424_s11 + $0x170] sm:$0xf] %v363_v28 }
  0x78   : > { %366 = vst [vmem:[%s3424_s11 + $0x174] sm:$0xf] %v365_v29 }
  0x79   : > { %368 = vst [vmem:[%s3424_s11 + $0x178] sm:$0xf] %v367_v30 }
  0x7a   : > { %370 = vst [vmem:[%s3424_s11 + $0x17c] sm:$0xf] %v369_v31 }
  0x7b   : > { %372 = vst [vmem:[%s3424_s11 + $0x180] sm:$0xf] %v371_v32 }
  0x7c   : > { %374 = vst [vmem:[%s3424_s11 + $0x184] sm:$0xf] %v373_v33 }
  0x7d   : > { %376 = vst [vmem:[%s3424_s11 + $0x188] sm:$0xf] %v375_v34 }
  0x7e   : > { %378 = vst [vmem:[%s3424_s11 + $0x18c] sm:$0xf] %v377_v35 }
  0x7f   : > { %380 = vst [vmem:[%s3424_s11 + $0x190] sm:$0xf] %v379_v36 }
  0x80   : > { %382 = vst [vmem:[%s3424_s11 + $0x194] sm:$0xf] %v381_v37 }
  0x81   : > { %384 = vst [vmem:[%s3424_s11 + $0x198] sm:$0xf] %v383_v38 }
  0x82   : > { %386 = vst [vmem:[%s3424_s11 + $0x19c] sm:$0xf] %v385_v39 }
  0x83   : > { %388 = vst [vmem:[%s3424_s11 + $0x1a0] sm:$0xf] %v387_v40 }
  0x84   : > { %390 = vst [vmem:[%s3424_s11 + $0x1a4] sm:$0xf] %v389_v41 }
  0x85   : > { %392 = vst [vmem:[%s3424_s11 + $0x1a8] sm:$0xf] %v391_v42 }
  0x86   : > { %394 = vst [vmem:[%s3424_s11 + $0x1ac] sm:$0xf] %v393_v43 }
  0x87   : > { %396 = vst [vmem:[%s3424_s11 + $0x1b0] sm:$0xf] %v395_v44 }
  0x88   : > { %398 = vst [vmem:[%s3424_s11 + $0x1b4] sm:$0xf] %v397_v45 }
  0x89   : > { %400 = vst [vmem:[%s3424_s11 + $0x1b8] sm:$0xf] %v399_v46 }
  0x8a   : > { %402 = vst [vmem:[%s3424_s11 + $0x1bc] sm:$0xf] %v401_v47 }
  0x8b   : > { %404 = vst [vmem:[%s3424_s11 + $0x1c0] sm:$0xf] %v403_v48 }
  0x8c   : > { %406 = vst [vmem:[%s3424_s11 + $0x1c4] sm:$0xf] %v405_v49 }
  0x8d   : > { %408 = vst [vmem:[%s3424_s11 + $0x1c8] sm:$0xf] %v407_v50 }
  0x8e   : > { %410 = vst [vmem:[%s3424_s11 + $0x1cc] sm:$0xf] %v409_v51 }
  0x8f   : > { %412 = vst [vmem:[%s3424_s11 + $0x1d0] sm:$0xf] %v411_v52 }
  0x90   : > { %414 = vst [vmem:[%s3424_s11 + $0x1d4] sm:$0xf] %v413_v53 }
  0x91   : > { %416 = vst [vmem:[%s3424_s11 + $0x1d8] sm:$0xf] %v415_v54 }
  0x92   : > { %418 = vst [vmem:[%s3424_s11 + $0x1dc] sm:$0xf] %v417_v55 }
  0x93   : > { %420 = vst [vmem:[%s3424_s11 + $0x1e0] sm:$0xf] %v419_v56 }
  0x94   : > { %422 = vst [vmem:[%s3424_s11 + $0x1e4] sm:$0xf] %v421_v57 }
  0x95   : > { %424 = vst [vmem:[%s3424_s11 + $0x1e8] sm:$0xf] %v423_v58 }
  0x96   : > { %426 = vst [vmem:[%s3424_s11 + $0x1ec] sm:$0xf] %v425_v59 }
  0x97   : > { %428 = vst [vmem:[%s3424_s11 + $0x1f0] sm:$0xf] %v427_v60 }
  0x98   : > { %430 = vst [vmem:[%s3424_s11 + $0x1f4] sm:$0xf] %v429_v61 }
  0x99   : > { %432 = vst [vmem:[%s3424_s11 + $0x1f8] sm:$0xf] %v431_v62 }
  0x9a   : > { %434 = vst [vmem:[%s3424_s11 + $0x1fc] sm:$0xf] %v433_v63 }
  0x9b   : > { %436 = vst [vmem:[%s3424_s11 + $0x200] sm:$0xf] %v435_v0 }
  0x9c   : > { %438 = vst [vmem:[%s3424_s11 + $0x204] sm:$0xf] %v437_v1 }
  0x9d   : > { %440 = vst [vmem:[%s3424_s11 + $0x208] sm:$0xf] %v439_v2 }
  0x9e   : > { %442 = vst [vmem:[%s3424_s11 + $0x20c] sm:$0xf] %v441_v3 }
  0x9f   : > { %444 = vst [vmem:[%s3424_s11 + $0x210] sm:$0xf] %v443_v4 }
  0xa0   : > { %446 = vst [vmem:[%s3424_s11 + $0x214] sm:$0xf] %v445_v5 }
  0xa1   : > { %448 = vst [vmem:[%s3424_s11 + $0x218] sm:$0xf] %v447_v6 }
  0xa2   : > { %450 = vst [vmem:[%s3424_s11 + $0x21c] sm:$0xf] %v449_v7 }
  0xa3   : > { %452 = vst [vmem:[%s3424_s11 + $0x220] sm:$0xf] %v451_v8 }
  0xa4   : > { %454 = vst [vmem:[%s3424_s11 + $0x224] sm:$0xf] %v453_v9 }
  0xa5   : > { %456 = vst [vmem:[%s3424_s11 + $0x228] sm:$0xf] %v455_v10 }
  0xa6   : > { %458 = vst [vmem:[%s3424_s11 + $0x22c] sm:$0xf] %v457_v11 }
  0xa7   : > { %460 = vst [vmem:[%s3424_s11 + $0x230] sm:$0xf] %v459_v12 }
  0xa8   : > { %462 = vst [vmem:[%s3424_s11 + $0x234] sm:$0xf] %v461_v13 }
  0xa9   : > { %464 = vst [vmem:[%s3424_s11 + $0x238] sm:$0xf] %v463_v14 }
  0xaa   : > { %466 = vst [vmem:[%s3424_s11 + $0x23c] sm:$0xf] %v465_v15 }
  0xab PF: > { %p2709_p11 = scmp.ge.s32.totalorder %s3316_s20, 1  ;;  %p783_p12 = scmp.lt.s32.totalorder %s3316_s20, 5 }
  0xad   : > { %p784_p13 = pnand %p2709_p11, %p783_p12 }
  0xae   : > { %s790_s21 = sand.u32 (!%p784_p13), 1, %s3292_s14   ;;  %s817_s24 = sand.u32 (!%p784_p13), 1, %s3284_s12  }
  0xaf   : > { %787 = sbr.rel (%p784_p13) target bundleno = 689 (0x2b1), region = 69  ;;  %s2710_s26 = sshll.u32 (!%p784_p13), %s817_s24, 5 }
  0xb0   : > { %s3131_s25 = smul.u32 (!%p784_p13), 576, %s790_s21  ;;  %p820_p0 = scmp.lt.s32.totalorder (!%p784_p13), %s3304_s17, 1 }
  0xb1   : > { %p825_p1 = scmp.lt.s32.totalorder (!%p784_p13), %s3300_s16, 1  ;;  %s3732_s12 = scalar_lea.vmem (!%p784_p13), [#allocation4], %s2710_s26 }
  0xb2   : > { %s3730_s14 = scalar_lea.vmem (!%p784_p13), [#allocation3], %s3131_s25  ;;  %p2713_p2 = scmp.ne.s32.totalorder (!%p784_p13), %s3300_s16, 0 }
  0xb4   : > { %s821_s28 = scalar_select %p820_p0, %s3304_s17, 1 }
  0xb5   : > { %s3719_s29 = scalar_select %p825_p1, %s3300_s16, 1 }
  0xb6   : > { %s3041_s5 = sshll.u32 %s821_s28, 5  ;;  %831 = sbr.rel (%p2713_p2) target bundleno = 271 (0x10f), region = 77 }
  0xb7   : > { %s3724_s8 = scalar_lea.vmem %s4253_s0, %s3041_s5  ;;  %s827_s11 = scalar_lea.vmem %s4255_s2, %s3719_s29 }
  0xbb   : > { %v3318_v16 = vmov 0.0   ;;  %v871_v17 = vld [vmem:[%s3724_s8] sm:$0xff]   ;;  %v2715_v19 = vld [vmem:[%s3724_s8 + $0x8] sm:$0xff]   ;;  %v2717_v23 = vld [vmem:[%s3724_s8 + $0x10] sm:$0xff]  }
  0xbc   : > { %835 = vst [vmem:[#allocation2 + $0x48] sm:$0xff] %v3318_v16  ;;  %v872_v18 = vunpack.c.l.bf16 %v871_v17  ;;  %v880_v20 = vunpack.c.h.bf16 %v871_v17  ;;  %v888_v22 = vunpack.c.l.bf16 %v2715_v19  ;;  %v896_v25 = vunpack.c.h.bf16 %v2715_v19  ;;  %v2719_v28 = vld [vmem:[%s3724_s8 + $0x18] sm:$0xff]   ;;  %v934_v33 = vld [vmem:[%s3724_s8] sm:$0xff]   ;;  %v2722_v38 = vld [vmem:[%s3724_s8 + $0x8] sm:$0xff]  }
  0xbd   : > { %832 = vst [vmem:[#allocation2 + $0xb0] sm:$0xff] %v3318_v16  ;;  %v904_v27 = vunpack.c.l.bf16 %v2717_v23  ;;  %v912_v30 = vunpack.c.h.bf16 %v2717_v23  ;;  %v920_v32 = vunpack.c.l.bf16 %v2719_v28  ;;  %v928_v35 = vunpack.c.h.bf16 %v2719_v28  ;;  %v2724_v43 = vld [vmem:[%s3724_s8 + $0x10] sm:$0xff]   ;;  %v2726_v47 = vld [vmem:[%s3724_s8 + $0x18] sm:$0xff]   ;;  %v982_v52 = vld [vmem:[%s3724_s8] sm:$0xff]  }
  0xbe   : > { %833 = vst [vmem:[#allocation2 + $0xd0] sm:$0xff] %v3318_v16  ;;  %v874_v21 = vrot.slane %v872_v18, 5  ;;  %v882_v24 = vrot.slane %v880_v20, 3  ;;  %v890_v26 = vrot.slane %v888_v22, 1  ;;  %v898_v29 = vrot.slane %v896_v25, 7  ;;  %v2729_v56 = vld [vmem:[%s3724_s8 + $0x8] sm:$0xff]  }
  0xbf   : > { %834 = vst [vmem:[#allocation2 + $0x10] sm:$0xff] %v3318_v16  ;;  %v906_v31 = vrot.slane %v904_v27, 5  ;;  %v914_v34 = vrot.slane %v912_v30, 3  ;;  %v922_v36 = vrot.slane %v920_v32, 1  ;;  %v935_v37 = vunpack.c.l.bf16 %v934_v33  ;;  %v2731_v61 = vld [vmem:[%s3724_s8 + $0x10] sm:$0xff]   ;;  %v2733_v2 = vld [vmem:[%s3724_s8 + $0x18] sm:$0xff]  }
  0xc0   : > { %836 = vst [vmem:[#allocation2 + $0x120] sm:$0xff] %v3318_v16  ;;  %v930_v39 = vrot.slane %v928_v35, 7  ;;  %v942_v40 = vunpack.c.h.bf16 %v934_v33  ;;  %v949_v42 = vunpack.c.l.bf16 %v2722_v38  ;;  %v959_v45 = vunpack.c.l.bf16 %v2724_v43 }
  0xc1   : > { %837 = vst [vmem:[#allocation2 + $0x38] sm:$0xff] %v3318_v16  ;;  %v937_v41 = vrot.slane %v935_v37, 6  ;;  %v966_v48 = vunpack.c.h.bf16 %v2724_v43  ;;  %v956_v49 = vunpack.c.h.bf16 %v2722_v38  ;;  %v973_v51 = vunpack.c.l.bf16 %v2726_v47 }
  0xc2   : > { %838 = vst [vmem:[#allocation2 + $0xf8] sm:$0xff] %v3318_v16  ;;  %v944_v44 = vrot.slane %v942_v40, 4  ;;  %v951_v46 = vrot.slane %v949_v42, 2  ;;  %v961_v50 = vrot.slane %v959_v45, 6  ;;  %v983_v54 = vunpack.c.l.bf16 %v982_v52 }
  0xc3   : > { %839 = vst [vmem:[#allocation2 + $0x100] sm:$0xff] %v3318_v16  ;;  %v968_v53 = vrot.slane %v966_v48, 4  ;;  %v975_v55 = vrot.slane %v973_v51, 2  ;;  %v990_v57 = vunpack.c.h.bf16 %v982_v52  ;;  %v980_v58 = vunpack.c.h.bf16 %v2726_v47 }
  0xc4   : > { %840 = vst [vmem:[#allocation2 + $0x80] sm:$0xff] %v3318_v16  ;;  %v985_v59 = vrot.slane %v983_v54, 7  ;;  %v997_v60 = vunpack.c.l.bf16 %v2729_v56  ;;  %v1004_v63 = vunpack.c.h.bf16 %v2729_v56  ;;  %v1011_v1 = vunpack.c.l.bf16 %v2731_v61 }
  0xc5   : > { %841 = vst [vmem:[#allocation2 + $0x108] sm:$0xff] %v3318_v16  ;;  %v992_v62 = vrot.slane %v990_v57, 5  ;;  %v1018_v4 = vunpack.c.h.bf16 %v2731_v61  ;;  %v1025_v6 = vunpack.c.l.bf16 %v2733_v2  ;;  %v1032_v8 = vunpack.c.h.bf16 %v2733_v2 }
  0xc6   : > { %842 = vst [vmem:[#allocation2 + $0xe8] sm:$0xff] %v3318_v16  ;;  %v999_v0 = vrot.slane %v997_v60, 3  ;;  %v1006_v3 = vrot.slane %v1004_v63, 1  ;;  %v1013_v5 = vrot.slane %v1011_v1, 7 }
  0xc7   : > { %843 = vst [vmem:[#allocation2 + $0x28] sm:$0xff] %v3318_v16  ;;  %v1020_v7 = vrot.slane %v1018_v4, 5  ;;  %v1027_v9 = vrot.slane %v1025_v6, 3  ;;  %v1034_v10 = vrot.slane %v1032_v8, 1 }
  0xc8   : > { %844 = vst [vmem:[#allocation2 + $0xc0] sm:$0xff] %v3318_v16 }
  0xc9   : > { %845 = vst [vmem:[#allocation2 + $0x68] sm:$0xff] %v3318_v16 }
  0xca   : > { %846 = vst [vmem:[#allocation2 + $0x118] sm:$0xff] %v3318_v16 }
  0xcb   : > { %847 = vst [vmem:[#allocation2 + $0x20] sm:$0xff] %v3318_v16 }
  0xcc   : > { %849 = vst [vmem:[#allocation2 + $0xc8] sm:$0xff] %v3318_v16 }
  0xcd   : > { %850 = vst [vmem:[#allocation2 + $0x90] sm:$0xff] %v3318_v16 }
  0xce   : > { %851 = vst [vmem:[#allocation2 + $0xa0] sm:$0xff] %v3318_v16 }
  0xcf   : > { %852 = vst [vmem:[#allocation2 + $0x88] sm:$0xff] %v3318_v16 }
  0xd0   : > { %853 = vst [vmem:[#allocation2 + $0xd8] sm:$0xff] %v3318_v16 }
  0xd1   : > { %854 = vst [vmem:[#allocation2 + $0x40] sm:$0xff] %v3318_v16 }
  0xd2   : > { %855 = vst [vmem:[#allocation2 + $0xb8] sm:$0xff] %v3318_v16 }
  0xd3   : > { %856 = vst [vmem:[#allocation2 + $0x110] sm:$0xff] %v3318_v16 }
  0xd4   : > { %857 = vst [vmem:[#allocation2 + $0x8] sm:$0xff] %v3318_v16 }
  0xd5   : > { %858 = vst [vmem:[#allocation2 + $0x98] sm:$0xff] %v3318_v16 }
  0xd6   : > { %859 = vst [vmem:[#allocation2 + $0x60] sm:$0xff] %v3318_v16 }
  0xd7   : > { %860 = vst [vmem:[#allocation2 + $0x128] sm:$0xff] %v3318_v16 }
  0xd8   : > { %861 = vst [vmem:[#allocation2 + $0x130] sm:$0xff] %v3318_v16 }
  0xd9   : > { %862 = vst [vmem:[#allocation2 + $0xe0] sm:$0xff] %v3318_v16 }
  0xda   : > { %864 = vst [vmem:[#allocation2 + $0x70] sm:$0xff] %v3318_v16 }
  0xdb   : > { %865 = vst [vmem:[#allocation2 + $0xf0] sm:$0xff] %v3318_v16 }
  0xdc   : > { %866 = vst [vmem:[#allocation2 + $0x78] sm:$0xff] %v3318_v16 }
  0xdd   : > { %867 = vst [vmem:[#allocation2 + $0x30] sm:$0xff] %v3318_v16 }
  0xde   : > { %868 = vst [vmem:[#allocation2 + $0xa8] sm:$0xff] %v3318_v16 }
  0xdf   : > { %869 = vst [vmem:[#allocation2] sm:$0xff] %v3318_v16 }
  0xe0   : > { %870 = vst [vmem:[#allocation2 + $0x58] sm:$0xff] %v3318_v16 }
  0xe1   : > { %876 = vst [vmem:[#allocation2 + $0x48] sm:$0xf8] %v874_v21 }
  0xe2   : > { %877 = vst [vmem:[#allocation2 + $0xf8] sm:$0x7] %v874_v21 }
  0xe3   : > { %884 = vst [vmem:[#allocation2 + $0xf8] sm:$0xe0] %v882_v24 }
  0xe4   : > { %885 = vst [vmem:[#allocation2 + $0x108] sm:$0x1f] %v882_v24 }
  0xe5   : > { %892 = vst [vmem:[#allocation2 + $0x108] sm:$0x80] %v890_v26 }
  0xe6   : > { %893 = vst [vmem:[#allocation2 + $0xc0] sm:$0x7f] %v890_v26 }
  0xe7   : > { %900 = vst [vmem:[#allocation2 + $0x20] sm:$0xfe] %v898_v29 }
  0xe8   : > { %901 = vst [vmem:[#allocation2 + $0x90] sm:$0x1] %v898_v29 }
  0xe9   : > { %908 = vst [vmem:[#allocation2 + $0x90] sm:$0xf8] %v906_v31 }
  0xea   : > { %909 = vst [vmem:[#allocation2 + $0xd8] sm:$0x7] %v906_v31 }
  0xeb   : > { %916 = vst [vmem:[#allocation2 + $0xd8] sm:$0xe0] %v914_v34 }
  0xec   : > { %917 = vst [vmem:[#allocation2 + $0x110] sm:$0x1f] %v914_v34 }
  0xed   : > { %924 = vst [vmem:[#allocation2 + $0x110] sm:$0x80] %v922_v36 }
  0xee   : > { %925 = vst [vmem:[#allocation2 + $0x60] sm:$0x7f] %v922_v36 }
  0xef   : > { %932 = vst [vmem:[#allocation2 + $0xe0] sm:$0xfe] %v930_v39 }
  0xf0   : > { %933 = vst [vmem:[#allocation2 + $0xf0] sm:$0x1] %v930_v39 }
  0xf1   : > { %939 = vst [vmem:[#allocation2 + $0x120] sm:$0xfc] %v937_v41 }
  0xf2   : > { %940 = vst [vmem:[#allocation2 + $0x100] sm:$0x3] %v937_v41 }
  0xf3   : > { %946 = vst [vmem:[#allocation2 + $0x100] sm:$0xf0] %v944_v44 }
  0xf4   : > { %947 = vst [vmem:[#allocation2 + $0xe8] sm:$0xf] %v944_v44 }
  0xf5   : > { %953 = vst [vmem:[#allocation2 + $0xe8] sm:$0xc0] %v951_v46 }
  0xf6   : > { %954 = vst [vmem:[#allocation2 + $0x68] sm:$0x3f] %v951_v46 }
  0xf7   : > { %957 = vst [vmem:[#allocation2 + $0x18] sm:$0xff] %v956_v49 }
  0xf8   : > { %963 = vst [vmem:[#allocation2 + $0xa0] sm:$0xfc] %v961_v50 }
  0xf9   : > { %964 = vst [vmem:[#allocation2 + $0x40] sm:$0x3] %v961_v50 }
  0xfa   : > { %970 = vst [vmem:[#allocation2 + $0x40] sm:$0xf0] %v968_v53 }
  0xfb   : > { %971 = vst [vmem:[#allocation2 + $0x8] sm:$0xf] %v968_v53 }
  0xfc   : > { %977 = vst [vmem:[#allocation2 + $0x8] sm:$0xc0] %v975_v55 }
  0xfd   : > { %978 = vst [vmem:[#allocation2 + $0x128] sm:$0x3f] %v975_v55 }
  0xfe   : > { %981 = vst [vmem:[#allocation2 + $0x50] sm:$0xff] %v980_v58 }
  0xff   : > { %987 = vst [vmem:[#allocation2 + $0x38] sm:$0xfe] %v985_v59 }
 0x100   : > { %988 = vst [vmem:[#allocation2 + $0x80] sm:$0x1] %v985_v59 }
 0x101   : > { %994 = vst [vmem:[#allocation2 + $0x80] sm:$0xf8] %v992_v62 }
 0x102   : > { %995 = vst [vmem:[#allocation2 + $0x28] sm:$0x7] %v992_v62 }
 0x103   : > { %1001 = vst [vmem:[#allocation2 + $0x28] sm:$0xe0] %v999_v0 }
 0x104   : > { %1002 = vst [vmem:[#allocation2 + $0x118] sm:$0x1f] %v999_v0 }
 0x105   : > { %1008 = vst [vmem:[#allocation2 + $0x118] sm:$0x80] %v1006_v3 }
 0x106   : > { %1009 = vst [vmem:[#allocation2 + $0xc8] sm:$0x7f] %v1006_v3 }
 0x107   : > { %1015 = vst [vmem:[#allocation2 + $0x88] sm:$0xfe] %v1013_v5 }
 0x108   : > { %1016 = vst [vmem:[#allocation2 + $0xb8] sm:$0x1] %v1013_v5 }
 0x109   : > { %1022 = vst [vmem:[#allocation2 + $0xb8] sm:$0xf8] %v1020_v7 }
 0x10a   : > { %1023 = vst [vmem:[#allocation2 + $0x98] sm:$0x7] %v1020_v7 }
 0x10b   : > { %1029 = vst [vmem:[#allocation2 + $0x98] sm:$0xe0] %v1027_v9 }
 0x10c   : > { %1030 = vst [vmem:[#allocation2 + $0x130] sm:$0x1f] %v1027_v9 }
 0x10d   : > { %1036 = vst [vmem:[#allocation2 + $0x130] sm:$0x80] %v1034_v10 }
 0x10e   : > { %1037 = vst [vmem:[#allocation2 + $0x70] sm:$0x7f] %v1034_v10 }
 0x10f PF: > { %v3073_v11 = vld [vmem:[%s3730_s14 + $0xf8] sm:$0xff]  ;;  %v3072_v12 = vld [vmem:[%s3730_s14 + $0xf0] sm:$0xff]  ;;  %v3071_v15 = vld [vmem:[%s3730_s14 + $0xe8] sm:$0xff]  ;;  %vm1224_vm0 = vcmask 1046528   ;;  %vm1882_vm1 = vcmask 1045504   ;;  %vm2467_vm6 = vcmask 1042432  }
 0x110   : > { %1417 = vmatpush.bf16.msra.mxu0 %v3073_v11  ;;  %3114 = vmatpush.bf16.msra.mxu1 %v3073_v11  ;;  %v3049_v13 = vld [vmem:[%s3730_s14 + $0x38] sm:$0xff]  ;;  %v3048_v14 = vld [vmem:[%s3730_s14 + $0x30] sm:$0xff]  ;;  %v3047_v16 = vld [vmem:[%s3730_s14 + $0x28] sm:$0xff]  ;;  %vm2468_vm7 = vcmask 1046532   ;;  %vm2479_vm8 = vcmask 1041408   ;;  %vm2480_vm10 = vcmask 1045508  }
 0x111   : > { %3115 = vmatpush.bf16.msra.mxu2 %v3073_v11  ;;  %1663 = vmatpush.bf16.msra.mxu3 %v3049_v13  ;;  %v3070_v17 = vld [vmem:[%s3730_s14 + $0xe0] sm:$0xff]  ;;  %v3069_v19 = vld [vmem:[%s3730_s14 + $0xd8] sm:$0xff]  ;;  %v3068_v20 = vld [vmem:[%s3730_s14 + $0xd0] sm:$0xff]  ;;  %vm2491_vm13 = vcmask 1040384   ;;  %vm2492_vm14 = vcmask 1044484   ;;  %s3037_s25 = sshll.u32 (%p3406_p9), %s3304_s17, 4 }
 0x112   : > { %v3046_v18 = vld [vmem:[%s3730_s14 + $0x20] sm:$0xff]  ;;  %v3045_v21 = vld [vmem:[%s3730_s14 + $0x18] sm:$0xff]  ;;  %v3760_v23 = vld [vmem:[#allocation2 + $0x108] sm:$0xff]  ;;  %s2541_s26 = sadd.s32 (%p3406_p9), %s3300_s16, %s3037_s25 }
 0x113   : > { %v3758_v22 = vld [vmem:[#allocation2 + $0xf8] sm:$0xff]  ;;  %v3762_v24 = vld [vmem:[#allocation2 + $0xc0] sm:$0xff]  ;;  %v1131_v25 = vld [vmem:[#allocation2 + $0x48] sm:$0xfc]  ;;  %s3038_s28 = sshll.u32 (%p3406_p9), %s2541_s26, 2 }
 0x114   : > { %1418 = vmatpush.bf16.msra.mxu0 %v3072_v12  ;;  %3116 = vmatpush.bf16.msra.mxu1 %v3072_v12  ;;  %v3764_v26 = vld [vmem:[#allocation2 + $0x20] sm:$0xff]  ;;  %v3766_v27 = vld [vmem:[#allocation2 + $0x90] sm:$0xff]  ;;  %v3768_v28 = vld [vmem:[#allocation2 + $0xd8] sm:$0xff]  ;;  %v1143_v34 = vpack.c.bf16 %v3762_v24, %v3760_v23  ;;  %v1140_v36 = vpack.c.bf16 %v3758_v22, %v1131_v25  ;;  %s2543_s30 = scalar_lea.vmem (%p3406_p9), %s4256_s3, %s3038_s28 }
 0x115   : > { %3117 = vmatpush.bf16.msra.mxu2 %v3072_v12  ;;  %1664 = vmatpush.bf16.msra.mxu3 %v3048_v14  ;;  %v3770_v29 = vld [vmem:[#allocation2 + $0x110] sm:$0xff]  ;;  %v3772_v30 = vld [vmem:[#allocation2 + $0x60] sm:$0xff]  ;;  %v3044_v33 = vld [vmem:[%s3730_s14 + $0x10] sm:$0xff]  ;;  %v1146_v37 = vpack.c.bf16 %v3766_v27, %v3764_v26 }
 0x116   : > { %v3774_v31 = vld [vmem:[#allocation2 + $0xe0] sm:$0xff]  ;;  %v1137_v32 = vld [vmem:[#allocation2 + $0xf0] sm:$0x3]  ;;  %v1149_v38 = vpack.c.bf16 %v3770_v29, %v3768_v28  ;;  %v3066_v42 = vld [vmem:[%s3730_s14 + $0xc0] sm:$0xff]  ;;  %v1225_v43 = vrot.slane %v1140_v36, 1  ;;  %v1226_v44 = vrot.slane %v1143_v34, 1 }
 0x117   : > { %v3067_v35 = vld [vmem:[%s3730_s14 + $0xc8] sm:$0xff]  ;;  %v1152_v39 = vpack.c.bf16 %v3774_v31, %v3772_v30  ;;  %v1155_v40 = vpack.c.bf16 %v1137_v32, %v1137_v32  ;;  %v1234_v45 = vrot.slane %v1146_v37, 1  ;;  %v3081_v47 = vld [vmem:[%s3730_s14 + $0x138] sm:$0xff]  ;;  %v3042_v54 = vld [vmem:[%s3730_s14] sm:$0xff] }
 0x118   : > { %1419 = vmatpush.bf16.msra.mxu0 %v3071_v15  ;;  %3118 = vmatpush.bf16.msra.mxu1 %v3071_v15  ;;  %v3043_v41 = vld [vmem:[%s3730_s14 + $0x8] sm:$0xff]  ;;  %v1240_v46 = vrot.slane %v1149_v38, 1  ;;  %v3089_v50 = vld [vmem:[%s3730_s14 + $0x178] sm:$0xff]  ;;  %v1227_v52 = vsel %vm1224_vm0, %v1225_v43, %v1226_v44  ;;  %v1041_v56 = vld [vmem:[#allocation2 + $0x48] sm:$0xff] }
 0x119   : > { %3119 = vmatpush.bf16.msra.mxu2 %v3071_v15  ;;  %1665 = vmatpush.bf16.msra.mxu3 %v3047_v16  ;;  %v1246_v48 = vrot.slane %v1152_v39, 1  ;;  %v1252_v49 = vrot.slane %v1155_v40, 1  ;;  %v3057_v51 = vld [vmem:[%s3730_s14 + $0x78] sm:$0xff]  ;;  %v3080_v58 = vld [vmem:[%s3730_s14 + $0x130] sm:$0xff]  ;;  %v3079_v63 = vld [vmem:[%s3730_s14 + $0x128] sm:$0xff]  ;;  %v1235_v9 = vsel %vm1224_vm0, %v1226_v44, %v1234_v45 }
 0x11a   : > { %v1241_v53 = vsel %vm1224_vm0, %v1234_v45, %v1240_v46  ;;  %v1038_v55 = vld [vmem:[#allocation2 + $0xb0] sm:$0xff]  ;;  %v3088_v60 = vld [vmem:[%s3730_s14 + $0x170] sm:$0xff]  ;;  %v3087_v1 = vld [vmem:[%s3730_s14 + $0x168] sm:$0xff] }
 0x11b   : > { %v1253_v57 = vsel %vm1224_vm0, %v1246_v48, %v1252_v49  ;;  %v3105_v59 = vld [vmem:[%s3730_s14 + $0x1f8] sm:$0xff]  ;;  %v3056_v61 = vld [vmem:[%s3730_s14 + $0x70] sm:$0xff]  ;;  %v1068_v62 = vpack.c.bf16 %v1041_v56, %v1038_v55  ;;  %v3055_v2 = vld [vmem:[%s3730_s14 + $0x68] sm:$0xff]  ;;  %v1247_v10 = vsel %vm1224_vm0, %v1240_v46, %v1246_v48 }
 0x11c   : > { %1420 = vmatpush.bf16.msra.mxu0 %v3070_v17  ;;  %3120 = vmatpush.bf16.msra.mxu1 %v3070_v17  ;;  %v3104_v0 = vld [vmem:[%s3730_s14 + $0x1f0] sm:$0xff]  ;;  %v3078_v3 = vld [vmem:[%s3730_s14 + $0x120] sm:$0xff]  ;;  %v3077_v6 = vld [vmem:[%s3730_s14 + $0x118] sm:$0xff] }
 0x11d   : > { %3121 = vmatpush.bf16.msra.mxu2 %v3070_v17  ;;  %1666 = vmatpush.bf16.msra.mxu3 %v3046_v18  ;;  %v3086_v4 = vld [vmem:[%s3730_s14 + $0x160] sm:$0xff]  ;;  %v3085_v7 = vld [vmem:[%s3730_s14 + $0x158] sm:$0xff]  ;;  %v3084_v11 = vld [vmem:[%s3730_s14 + $0x150] sm:$0xff]  ;;  %v1071_v18 = vpack.c.bf16 %v3760_v23, %v3758_v22 }
 0x11e   : > { %v3054_v5 = vld [vmem:[%s3730_s14 + $0x60] sm:$0xff]  ;;  %v3053_v8 = vld [vmem:[%s3730_s14 + $0x58] sm:$0xff]  ;;  %v3076_v12 = vld [vmem:[%s3730_s14 + $0x110] sm:$0xff] }
 0x11f   : > { %v3052_v13 = vld [vmem:[%s3730_s14 + $0x50] sm:$0xff]  ;;  %v3815_v14 = vld [vmem:[#allocation2 + $0x80] sm:$0xff]  ;;  %v3819_v16 = vld [vmem:[#allocation2 + $0x118] sm:$0xff] }
 0x120   : > { %1421 = vmatpush.bf16.msra.mxu0 %v3069_v19  ;;  %3122 = vmatpush.bf16.msra.mxu1 %v3069_v19  ;;  %v3817_v15 = vld [vmem:[#allocation2 + $0x28] sm:$0xff]  ;;  %v1133_v17 = vld [vmem:[#allocation2 + $0x38] sm:$0xfc]  ;;  %v3051_v22 = vld [vmem:[%s3730_s14 + $0x48] sm:$0xff] }
 0x121   : > { %3123 = vmatpush.bf16.msra.mxu2 %v3069_v19  ;;  %1667 = vmatpush.bf16.msra.mxu3 %v3045_v21  ;;  %v3103_v19 = vld [vmem:[%s3730_s14 + $0x1e8] sm:$0xff]  ;;  %v3827_v25 = vld [vmem:[#allocation2 + $0xe8] sm:$0xff]  ;;  %v3102_v34 = vld [vmem:[%s3730_s14 + $0x1e0] sm:$0xff]  ;;  %v1142_v36 = vpack.c.bf16 %v3815_v14, %v1133_v17  ;;  %v1145_v37 = vpack.c.bf16 %v3819_v16, %v3817_v15 }
 0x122   : > { %v3825_v21 = vld [vmem:[#allocation2 + $0x100] sm:$0xff]  ;;  %v3829_v32 = vld [vmem:[#allocation2 + $0x68] sm:$0xff]  ;;  %v3074_v40 = vld [vmem:[%s3730_s14 + $0x100] sm:$0xff] }
 0x123   : > { %v1144_v39 = vpack.c.bf16 %v3829_v32, %v3827_v25  ;;  %v1232_v43 = vrot.slane %v1145_v37, 1  ;;  %v3050_v44 = vld [vmem:[%s3730_s14 + $0x40] sm:$0xff]  ;;  %v3097_v45 = vld [vmem:[%s3730_s14 + $0x1b8] sm:$0xff]  ;;  %v3096_v55 = vld [vmem:[%s3730_s14 + $0x1b0] sm:$0xff] }
 0x124   : > { %1422 = vmatpush.bf16.msra.mxu0 %v3068_v20  ;;  %3124 = vmatpush.bf16.msra.mxu1 %v3068_v20  ;;  %v3065_v46 = vld [vmem:[%s3730_s14 + $0xb8] sm:$0xff]  ;;  %v3064_v56 = vld [vmem:[%s3730_s14 + $0xb0] sm:$0xff]  ;;  %v3099_v37 = vld [vmem:[%s3730_s14 + $0x1c8] sm:$0xff] }
 0x125   : > { %3125 = vmatpush.bf16.msra.mxu2 %v3068_v20  ;;  %1668 = vmatpush.bf16.msra.mxu3 %v3044_v33  ;;  %v3075_v20 = vld [vmem:[%s3730_s14 + $0x108] sm:$0xff]  ;;  %v1229_v48 = vrot.slane %v1144_v39, 1  ;;  %v1039_v49 = vld [vmem:[#allocation2 + $0xd0] sm:$0xff]  ;;  %v3092_v17 = vld [vmem:[%s3730_s14 + $0x190] sm:$0xff] }
 0x126   : > { %v1132_v33 = vld [vmem:[#allocation2 + $0x120] sm:$0xfc]  ;;  %vm4126_vm9 = vmor %vm2467_vm6, %vm2468_vm7 }
 0x127   : > { %v1141_v38 = vpack.c.bf16 %v3825_v21, %v1132_v33  ;;  %v1060_v33 = vld [vmem:[#allocation2 + $0x40] sm:$0xff]  ;;  %vm4154_vm11 = vmor %vm2479_vm8, %vm2480_vm10 }
 0x128   : > { %1423 = vmatpush.bf16.msra.mxu0 %v3067_v35  ;;  %3126 = vmatpush.bf16.msra.mxu1 %v3067_v35  ;;  %vm4180_vm15 = vmor %vm2491_vm13, %vm2492_vm14 }
 0x129   : > { %3127 = vmatpush.bf16.msra.mxu2 %v3067_v35  ;;  %1669 = vmatpush.bf16.msra.mxu3 %v3043_v41  ;;  %v3083_v35 = vld [vmem:[%s3730_s14 + $0x148] sm:$0xff]  ;;  %v3082_v41 = vld [vmem:[%s3730_s14 + $0x140] sm:$0xff] }
 0x12c   : > { %1424 = vmatpush.bf16.msra.mxu0 %v3066_v42  ;;  %3128 = vmatpush.bf16.msra.mxu1 %v3066_v42 }
 0x12d   : > { %3129 = vmatpush.bf16.msra.mxu2 %v3066_v42  ;;  %1670 = vmatpush.bf16.msra.mxu3 %v3042_v54  ;;  %v1231_v42 = vrot.slane %v1142_v36, 1  ;;  %v3091_v36 = vld [vmem:[%s3730_s14 + $0x188] sm:$0xff] }
 0x12f   : > { %1425 = vmatmul.bf16.vlgmr.msra.gmra.mxu0 %v1227_v52  ;;  %1435 = vmatmul.bf16.vlgmr.msra.gmra.mxu1 %v1241_v53  ;;  %v1233_v52 = vsel %vm1224_vm0, %v1231_v42, %v1232_v43 }
 0x130   : > { %1451 = vmatpush.bf16.msrb.mxu1 %v3081_v47  ;;  %1697 = vmatpush.bf16.msrb.mxu0 %v3057_v51  ;;  %v1228_v47 = vrot.slane %v1141_v38, 1  ;;  %v3113_v51 = vld [vmem:[%s3730_s14 + $0x238] sm:$0xff] }
 0x131   : > { %1485 = vmatpush.bf16.msrb.mxu2 %v3089_v50  ;;  %2109 = vmatpush.bf16.msrb.mxu3 %v3105_v59  ;;  %v1042_v50 = vld [vmem:[#allocation2 + $0x120] sm:$0xff]  ;;  %v3853_v59 = vld [vmem:[#allocation2 + $0x88] sm:$0xff] }
 0x132   : > { %1445 = vmatmul.bf16.vlgmr.msra.gmra.mxu2 %v1253_v57  ;;  %1671 = vmatmul.bf16.vlgmr.msra.gmra.mxu3 %v1068_v62  ;;  %v1069_v53 = vpack.c.bf16 %v1042_v50, %v1039_v49  ;;  %v1230_v54 = vsel %vm1224_vm0, %v1228_v47, %v1229_v48  ;;  %v3112_v57 = vld [vmem:[%s3730_s14 + $0x230] sm:$0xff]  ;;  %v3063_v62 = vld [vmem:[%s3730_s14 + $0xa8] sm:$0xff]  ;;  %v3914_v50 = vld [vmem:[#allocation2 + $0x50] sm:$0xff] }
 0x133   : > { %v3107_v47 = vld [vmem:[%s3730_s14 + $0x208] sm:$0xff]  ;;  %v1066_v49 = vld [vmem:[#allocation2 + $0x128] sm:$0xff] }
 0x134   : > { %1452 = vmatpush.bf16.msrb.mxu1 %v3080_v58  ;;  %1698 = vmatpush.bf16.msrb.mxu0 %v3056_v61  ;;  %v3851_v58 = vld [vmem:[#allocation2 + $0xc8] sm:$0xff]  ;;  %v3095_v61 = vld [vmem:[%s3730_s14 + $0x1a8] sm:$0xff] }
 0x135   : > { %1486 = vmatpush.bf16.msrb.mxu2 %v3088_v60  ;;  %2110 = vmatpush.bf16.msrb.mxu3 %v3104_v0  ;;  %v3857_v60 = vpack.c.bf16 %v3764_v26, %v3762_v24  ;;  %v1054_v0 = vld [vmem:[#allocation2 + $0x18] sm:$0xff] }
 0x136   : > { %v3094_v26 = vld [vmem:[%s3730_s14 + $0x1a0] sm:$0xff] }
 0x138   : > { %1453 = vmatpush.bf16.msrb.mxu1 %v3079_v63  ;;  %1699 = vmatpush.bf16.msrb.mxu0 %v3055_v2  ;;  %v3101_v63 = vld [vmem:[%s3730_s14 + $0x1d8] sm:$0xff]  ;;  %v3111_v2 = vld [vmem:[%s3730_s14 + $0x228] sm:$0xff] }
 0x139   : > { %1487 = vmatpush.bf16.msrb.mxu2 %v3087_v1  ;;  %2111 = vmatpush.bf16.msrb.mxu3 %v3103_v19  ;;  %v3862_v1 = vld [vmem:[#allocation2 + $0xa0] sm:$0xff]  ;;  %v3881_v19 = vld [vmem:[#allocation2 + $0xb8] sm:$0xff] }
 0x13a   : > { %v1147_v24 = vpack.c.bf16 %v3862_v1, %v1054_v0 }
 0x13c   : > { %1454 = vmatpush.bf16.msrb.mxu1 %v3078_v3  ;;  %1700 = vmatpush.bf16.msrb.mxu0 %v3054_v5  ;;  %v1148_v3 = vpack.c.bf16 %v3853_v59, %v3851_v58  ;;  %v3110_v5 = vld [vmem:[%s3730_s14 + $0x220] sm:$0xff] }
 0x13d   : > { %1488 = vmatpush.bf16.msrb.mxu2 %v3086_v4  ;;  %2112 = vmatpush.bf16.msrb.mxu3 %v3102_v34  ;;  %v3062_v4 = vld [vmem:[%s3730_s14 + $0xa0] sm:$0xff]  ;;  %v3060_v34 = vld [vmem:[%s3730_s14 + $0x90] sm:$0xff] }
 0x13f   : > { %1430 = vmatmul.bf16.gmra.mxu0 %v1235_v9  ;;  %1440 = vmatmul.bf16.gmra.mxu1 %v1247_v10  ;;  %v1072_v10 = vpack.c.bf16 %v3827_v25, %v3825_v21  ;;  %v3887_v21 = vpack.c.bf16 %v3768_v28, %v3766_v27 }
 0x140   : > { %1455 = vmatpush.bf16.msrb.mxu1 %v3077_v6  ;;  %1701 = vmatpush.bf16.msrb.mxu0 %v3053_v8  ;;  %v1238_v6 = vrot.slane %v1148_v3, 1  ;;  %v3093_v8 = vld [vmem:[%s3730_s14 + $0x198] sm:$0xff] }
 0x141   : > { %1489 = vmatpush.bf16.msrb.mxu2 %v3085_v7  ;;  %2113 = vmatpush.bf16.msrb.mxu3 %v3101_v63  ;;  %v1236_v7 = vrot.slane %v1147_v24, 1  ;;  %v1138_v24 = vld [vmem:[#allocation2 + $0x78] sm:$0x3] }
 0x142   : > { %1676 = vmatmul.bf16.gmra.mxu3 %v1071_v18  ;;  %v1239_v9 = vsel %vm1224_vm0, %v1232_v43, %v1238_v6  ;;  %v3100_v18 = vld [vmem:[%s3730_s14 + $0x1d0] sm:$0xff]  ;;  %v3902_v43 = vld [vmem:[#allocation2 + $0x130] sm:$0xff] }
 0x144   : > { %1456 = vmatpush.bf16.msrb.mxu1 %v3076_v12  ;;  %1702 = vmatpush.bf16.msrb.mxu0 %v3052_v13  ;;  %v3061_v12 = vld [vmem:[%s3730_s14 + $0x98] sm:$0xff] }
 0x145   : > { %1490 = vmatpush.bf16.msrb.mxu2 %v3084_v11  ;;  %v1237_v11 = vsel %vm1224_vm0, %v1229_v48, %v1236_v7  ;;  %v3109_v13 = vld [vmem:[%s3730_s14 + $0x218] sm:$0xff]  ;;  %2114 = vmatpush.bf16.msrb.mxu3 %v3100_v18  ;;  %v3098_v48 = vld [vmem:[%s3730_s14 + $0x1c0] sm:$0xff] }
 0x148   : > { %1457 = vmatpush.bf16.msrb.mxu1 %v3075_v20  ;;  %1703 = vmatpush.bf16.msrb.mxu0 %v3051_v22  ;;  %v3883_v20 = vld [vmem:[#allocation2 + $0x98] sm:$0xff]  ;;  %v3891_v22 = vld [vmem:[#allocation2 + $0x8] sm:$0xff] }
 0x149   : > { %1491 = vmatpush.bf16.msrb.mxu2 %v3083_v35  ;;  %v3108_v35 = vld [vmem:[%s3730_s14 + $0x210] sm:$0xff]  ;;  %v1151_v38 = vpack.c.bf16 %v3883_v20, %v3881_v19  ;;  %v1150_v39 = vpack.c.bf16 %v3891_v22, %v1060_v33  ;;  %2115 = vmatpush.bf16.msrb.mxu3 %v3099_v37 }
 0x14b   : > { %v1244_v27 = vrot.slane %v1151_v38, 1  ;;  %v1242_v28 = vrot.slane %v1150_v39, 1 }
 0x14c   : > { %1458 = vmatpush.bf16.msrb.mxu1 %v3074_v40  ;;  %1704 = vmatpush.bf16.msrb.mxu0 %v3050_v44  ;;  %v3904_v44 = vld [vmem:[#allocation2 + $0x70] sm:$0xff] }
 0x14d   : > { %1492 = vmatpush.bf16.msrb.mxu2 %v3082_v41  ;;  %v1245_v40 = vsel %vm1224_vm0, %v1238_v6, %v1244_v27  ;;  %v1075_v41 = vpack.c.bf16 %v1054_v0, %v3829_v32  ;;  %v1243_v42 = vsel %vm1224_vm0, %v1236_v7, %v1242_v28  ;;  %v3090_v32 = vld [vmem:[%s3730_s14 + $0x180] sm:$0xff]  ;;  %2116 = vmatpush.bf16.msrb.mxu3 %v3098_v48  ;;  %v1892_v7 = vrot.slane %v3887_v21, 2 }
 0x14f   : > { %1459 = vmatmul.bf16.vlgmr.msrb.gmra.mxu1 %v1230_v54  ;;  %1705 = vmatmul.bf16.vlgmr.msrb.gmra.mxu0 %v1069_v53  ;;  %v1154_v53 = vpack.c.bf16 %v3904_v44, %v3902_v43  ;;  %v1887_v0 = vrot.slane %v1075_v41, 2 }
 0x150   : > { %1731 = vmatpush.bf16.msra.mxu1 %v3065_v46  ;;  %2143 = vmatpush.bf16.msra.mxu0 %v3113_v51  ;;  %v3059_v46 = vld [vmem:[%s3730_s14 + $0x88] sm:$0xff]  ;;  %v3058_v51 = vld [vmem:[%s3730_s14 + $0x80] sm:$0xff] }
 0x151   : > { %2075 = vmatpush.bf16.msra.mxu2 %v3097_v45  ;;  %v3908_v45 = vpack.c.bf16 %v3772_v30, %v3770_v29  ;;  %v1153_v29 = vpack.c.bf16 %v3914_v50, %v1066_v49  ;;  %v1766_v30 = vld [vmem:[#allocation2 + $0x100] sm:$0xf0]  ;;  %v1250_v54 = vrot.slane %v1154_v53, 1 }
 0x152   : > { %1493 = vmatmul.bf16.vlgmr.msrb.gmra.mxu2 %v1233_v52  ;;  %1681 = vmatmul.bf16.gmra.mxu3 %v3857_v60  ;;  %v3106_v52 = vld [vmem:[%s3730_s14 + $0x200] sm:$0xff] }
 0x153   : > { %v1898_v38 = vrot.slane %v3908_v45, 2 }
 0x154   : > { %1732 = vmatpush.bf16.msra.mxu1 %v3064_v56  ;;  %2144 = vmatpush.bf16.msra.mxu0 %v3112_v57  ;;  %v1799_v56 = vpack.c.bf16 %v3827_v25, %v1766_v30  ;;  %v1251_v57 = vsel %vm1224_vm0, %v1244_v27, %v1250_v54 }
 0x155   : > { %2076 = vmatpush.bf16.msra.mxu2 %v3096_v55  ;;  %v1248_v55 = vrot.slane %v1153_v29, 1 }
 0x156   : > { %v1886_v63 = vrot.slane %v1799_v56, 2 }
 0x158   : > { %1733 = vmatpush.bf16.msra.mxu1 %v3063_v62  ;;  %2145 = vmatpush.bf16.msra.mxu0 %v3111_v2  ;;  %v1249_v62 = vsel %vm1224_vm0, %v1242_v28, %v1248_v55  ;;  %v1139_v2 = vld [vmem:[#allocation2 + $0x30] sm:$0x3]  ;;  %v1888_v3 = vsel %vm1882_vm1, %v1886_v63, %v1887_v0 }
 0x159   : > { %2077 = vmatpush.bf16.msra.mxu2 %v3095_v61  ;;  %v1078_v61 = vpack.c.bf16 %v1060_v33, %v3862_v1  ;;  %v1884_v1 = vrot.slane %v3857_v60, 2 }
 0x15c   : > { %1734 = vmatpush.bf16.msra.mxu1 %v3062_v4  ;;  %2146 = vmatpush.bf16.msra.mxu0 %v3110_v5  ;;  %v1156_v4 = vpack.c.bf16 %v1138_v24, %v1138_v24 }
 0x15d   : > { %2078 = vmatpush.bf16.msra.mxu2 %v3094_v26  ;;  %v1157_v26 = vpack.c.bf16 %v1139_v2, %v1139_v2 }
 0x15e   : > { %v1254_v5 = vrot.slane %v1156_v4, 1 }
 0x15f   : > { %1464 = vmatmul.bf16.gmra.mxu1 %v1237_v11  ;;  %1710 = vmatmul.bf16.gmra.mxu0 %v1072_v10  ;;  %v1256_v25 = vrot.slane %v1157_v26, 1  ;;  %v1894_v10 = vrot.slane %v1078_v61, 2  ;;  %v1893_v11 = vsel %vm1882_vm1, %v1884_v1, %v1892_v7 }
 0x160   : > { %1735 = vmatpush.bf16.msra.mxu1 %v3061_v12  ;;  %2147 = vmatpush.bf16.msra.mxu0 %v3109_v13  ;;  %v1765_v12 = vld [vmem:[#allocation2 + $0xf8] sm:$0xf0] }
 0x161   : > { %2079 = vmatpush.bf16.msra.mxu2 %v3093_v8  ;;  %v1257_v6 = vsel %vm1224_vm0, %v1250_v54, %v1256_v25  ;;  %v1081_v8 = vpack.c.bf16 %v1066_v49, %v3891_v22  ;;  %v1895_v13 = vsel %vm1882_vm1, %v1887_v0, %v1894_v10  ;;  %v1798_v18 = vpack.c.bf16 %v3760_v23, %v1765_v12 }
 0x162   : > { %1498 = vmatmul.bf16.gmra.mxu2 %v1239_v9  ;;  %1686 = vmatmul.bf16.gmra.mxu3 %v3887_v21  ;;  %v1255_v9 = vsel %vm1224_vm0, %v1248_v55, %v1254_v5  ;;  %v1803_v21 = vpack.c.bf16 %v3851_v58, %v3819_v16  ;;  %v1899_v23 = vsel %vm1882_vm1, %v1892_v7, %v1898_v38  ;;  %v1795_v7 = vld [vmem:[#allocation2 + $0xa8] sm:$0xf] }
 0x163   : > { %v1883_v33 = vrot.slane %v1798_v18, 2  ;;  %v1900_v28 = vrot.slane %v1081_v8, 2  ;;  %v1806_v58 = vpack.c.bf16 %v3881_v19, %v3853_v59 }
 0x164   : > { %1736 = vmatpush.bf16.msra.mxu1 %v3060_v34  ;;  %2148 = vmatpush.bf16.msra.mxu0 %v3108_v35  ;;  %v1040_v34 = vld [vmem:[#allocation2 + $0x10] sm:$0xff]  ;;  %v1043_v35 = vld [vmem:[#allocation2 + $0x38] sm:$0xff] }
 0x165   : > { %2080 = vmatpush.bf16.msra.mxu2 %v3092_v17  ;;  %v1767_v17 = vld [vmem:[#allocation2 + $0x80] sm:$0xf0]  ;;  %v1885_v37 = vsel %vm1882_vm1, %v1883_v33, %v1884_v1  ;;  %v1070_v39 = vpack.c.bf16 %v1043_v35, %v1040_v34  ;;  %v1901_v16 = vsel %vm1882_vm1, %v1894_v10, %v1900_v28  ;;  %v1813_v10 = vpack.c.bf16 %v1795_v7, %v1795_v7 }
 0x166   : > { %v1800_v60 = vpack.c.bf16 %v3817_v15, %v1767_v17 }
 0x168   : > { %1737 = vmatpush.bf16.msra.mxu1 %v3059_v46  ;;  %2149 = vmatpush.bf16.msra.mxu0 %v3107_v47  ;;  %v1889_v22 = vrot.slane %v1800_v60, 2 }
 0x169   : > { %2081 = vmatpush.bf16.msra.mxu2 %v3091_v36  ;;  %v1890_v36 = vrot.slane %v1803_v21, 2 }
 0x16b   : > { %v1891_v27 = vsel %vm1882_vm1, %v1889_v22, %v1890_v36 }
 0x16c   : > { %1738 = vmatpush.bf16.msra.mxu1 %v3058_v51  ;;  %2150 = vmatpush.bf16.msra.mxu0 %v3106_v52  ;;  %v1796_v51 = vld [vmem:[#allocation2] sm:$0xf] }
 0x16d   : > { %2082 = vmatpush.bf16.msra.mxu2 %v3090_v32  ;;  %v1814_v52 = vpack.c.bf16 %v1796_v51, %v1796_v51 }
 0x16f   : > { %1469 = vmatmul.bf16.gmra.mxu1 %v1243_v42  ;;  %1715 = vmatmul.bf16.gmra.mxu0 %v1075_v41  ;;  %v1896_v41 = vrot.slane %v1806_v58, 2  ;;  %v1912_v54 = vrot.slane %v1814_v52, 2 }
 0x171   : > { %v1897_v48 = vsel %vm1882_vm1, %v1890_v36, %v1896_v41 }
 0x172   : > { %1503 = vmatmul.bf16.gmra.mxu2 %v1245_v40  ;;  %1691 = vmatmul.bf16.gmra.mxu3 %v3908_v45  ;;  %v1793_v40 = vld [vmem:[#allocation2 + $0x78] sm:$0xff]  ;;  %v1073_v45 = vpack.c.bf16 %v3817_v15, %v3815_v14 }
 0x173   : > { %v1811_v42 = vpack.c.bf16 %v1793_v40, %v3914_v50  ;;  %v1809_v50 = vpack.c.bf16 %v3902_v43, %v3883_v20  ;;  %v1794_v20 = vld [vmem:[#allocation2 + $0x30] sm:$0xff] }
 0x174   : > { %v1812_v0 = vpack.c.bf16 %v1794_v20, %v3904_v44  ;;  %v1797_v44 = vld [vmem:[#allocation2 + $0x58] sm:$0xf] }
 0x175   : > { %v1906_v49 = vrot.slane %v1811_v42, 2  ;;  %v1902_v15 = vrot.slane %v1809_v50, 2  ;;  %v1815_v17 = vpack.c.bf16 %v1797_v44, %v1797_v44 }
 0x176   : > { %v1908_v26 = vrot.slane %v1812_v0, 2 }
 0x177   : > { %v1907_v32 = vsel %vm1882_vm1, %v1900_v28, %v1906_v49  ;;  %v1903_v30 = vsel %vm1882_vm1, %v1896_v41, %v1902_v15  ;;  %v1914_v35 = vrot.slane %v1815_v17, 2 }
 0x17f   : > { %1474 = vmatmul.bf16.gmra.mxu1 %v1249_v62  ;;  %1720 = vmatmul.bf16.gmra.mxu0 %v1078_v61  ;;  %v1913_v61 = vsel %vm1882_vm1, %v1906_v49, %v1912_v54 }
 0x182   : > { %1508 = vmatmul.bf16.gmra.mxu2 %v1251_v57  ;;  %2117 = vmatmul.bf16.vlgmr.msrb.gmra.mxu3 %v1888_v3  ;;  %v1792_v57 = vld [vmem:[#allocation2 + $0xf0] sm:$0xff] }
 0x183   : > { %v1810_v43 = vpack.c.bf16 %v1792_v57, %v3774_v31 }
 0x185   : > { %v1904_v2 = vrot.slane %v1810_v43, 2 }
 0x187   : > { %v1905_v4 = vsel %vm1882_vm1, %v1898_v38, %v1904_v2 }
 0x18f   : > { %1479 = vmatmul.bf16.gmra.mxu1 %v1255_v9  ;;  %1725 = vmatmul.bf16.gmra.mxu0 %v1081_v8 }
 0x192   : > { %1513 = vmatmul.bf16.gmra.mxu2 %v1257_v6  ;;  %2122 = vmatmul.bf16.gmra.mxu3 %v1895_v13  ;;  %v1909_v6 = vsel %vm1882_vm1, %v1902_v15, %v1908_v26 }
 0x19f   : > { %1739 = vmatmul.bf16.vlgmr.msra.gmra.mxu1 %v1070_v39  ;;  %2151 = vmatmul.bf16.vlgmr.msra.gmra.mxu0 %v1891_v27  ;;  %v1915_v27 = vsel %vm1882_vm1, %v1908_v26, %v1914_v35 }
 0x1a2   : > { %2083 = vmatmul.bf16.vlgmr.msra.gmra.mxu2 %v1885_v37  ;;  %2127 = vmatmul.bf16.gmra.mxu3 %v1901_v16 }
 0x1ac   : > { %v1426_v46 = vpop.f32.mrf.mxu0  ;;  %v3948_v47 = vpop.f32.mrf.mxu1 }
 0x1af   : > { %1744 = vmatmul.bf16.gmra.mxu1 %v1073_v45  ;;  %2156 = vmatmul.bf16.gmra.mxu0 %v1897_v48 }
 0x1b2   : > { %2088 = vmatmul.bf16.gmra.mxu2 %v1893_v11  ;;  %2132 = vmatmul.bf16.gmra.mxu3 %v1907_v32 }
 0x1b4   : > { %v1428_v59 = vpop.f32.mrf.mxu0  ;;  %v3952_v19 = vpop.f32.mrf.mxu1 }
 0x1b5   : > { %v1672_v14 = vpop.f32.mrf.mxu3  ;;  %v3959_v55 = vpop.f32.mrf.mxu2 }
 0x1bc   : > { %v1431_v53 = vpop.f32.mrf.mxu0  ;;  %v3956_v29 = vpop.f32.mrf.mxu1 }
 0x1bd   : > { %v1674_v56 = vpop.f32.mrf.mxu3  ;;  %v3966_v24 = vpop.f32.mrf.mxu2 }
 0x1bf   : > { %1749 = vmatmul.bf16.gmra.mxu1 %v1803_v21  ;;  %2161 = vmatmul.bf16.gmra.mxu0 %v1903_v30  ;;  %v1910_v21 = vrot.slane %v1813_v10, 2 }
 0x1c1   : > { %v1911_v36 = vsel %vm1882_vm1, %v1904_v2, %v1910_v21 }
 0x1c2   : > { %2093 = vmatmul.bf16.gmra.mxu2 %v1899_v23  ;;  %2137 = vmatmul.bf16.gmra.mxu3 %v1913_v61 }
 0x1c4   : > { %v1433_v62 = vpop.f32.mrf.mxu0  ;;  %v3963_v63 = vpop.f32.mrf.mxu1 }
 0x1c5   : > { %v1677_v3 = vpop.f32.mrf.mxu3 }
 0x1cc   : > { %v1460_v25 = vpop.f32.mrf.mxu1  ;;  %v1706_v5 = vpop.f32.mrf.mxu0 }
 0x1cd   : > { %v1461_v1 = vadd.f32 %v1460_v25, %v1426_v46  ;;  %v1679_v31 = vpop.f32.mrf.mxu3 }
 0x1cf   : > { %1754 = vmatmul.bf16.gmra.mxu1 %v1806_v58  ;;  %2166 = vmatmul.bf16.gmra.mxu0 %v1909_v6 }
 0x1d2   : > { %2098 = vmatmul.bf16.gmra.mxu2 %v1905_v4 }
 0x1d4   : > { %v1462_v12 = vpop.f32.mrf.mxu1  ;;  %v1708_v13 = vpop.f32.mrf.mxu0 }
 0x1d5   : > { %v1494_v8 = vpop.f32.mrf.mxu2  ;;  %v1463_v18 = vadd.f32 %v1462_v12, %v1428_v59  ;;  %v1682_v33 = vpop.f32.mrf.mxu3 }
 0x1d6   : > { %v1495_v9 = vadd.f32 %v1494_v8, %v1461_v1 }
 0x1d8   : > { %v1673_v11 = vadd.f32 %v1672_v14, %v1495_v9 }
 0x1da   : > { %v3970_v60 = vadd.f32 %v1706_v5, %v1673_v11 }
 0x1dc   : > { %v1465_v38 = vpop.f32.mrf.mxu1  ;;  %v1711_v39 = vpop.f32.mrf.mxu0 }
 0x1dd   : > { %v1496_v34 = vpop.f32.mrf.mxu2  ;;  %v1466_v28 = vadd.f32 %v1465_v38, %v1431_v53  ;;  %v1684_v16 = vpop.f32.mrf.mxu3 }
 0x1de   : > { %v1497_v22 = vadd.f32 %v1496_v34, %v1463_v18 }
 0x1df   : > { %1759 = vmatmul.bf16.gmra.mxu1 %v1809_v50  ;;  %2171 = vmatmul.bf16.gmra.mxu0 %v1915_v27 }
 0x1e0   : > { %v1675_v37 = vadd.f32 %v1674_v56, %v1497_v22 }
 0x1e2   : > { %2103 = vmatmul.bf16.gmra.mxu2 %v1911_v36  ;;  %v3974_v23 = vadd.f32 %v1708_v13, %v1675_v37 }
 0x1e4   : > { %v1467_v42 = vpop.f32.mrf.mxu1  ;;  %v1713_v45 = vpop.f32.mrf.mxu0 }
 0x1e5   : > { %v1499_v58 = vpop.f32.mrf.mxu2  ;;  %v1468_v46 = vadd.f32 %v1467_v42, %v1433_v62  ;;  %v1687_v59 = vpop.f32.mrf.mxu3 }
 0x1e6   : > { %v1500_v40 = vadd.f32 %v1499_v58, %v1466_v28 }
 0x1e8   : > { %v1678_v41 = vadd.f32 %v1677_v3, %v1500_v40 }
 0x1ea   : > { %v3976_v48 = vadd.f32 %v1711_v39, %v1678_v41 }
 0x1ec   : > { %v1470_v14 = vpop.f32.mrf.mxu1  ;;  %v1716_v15 = vpop.f32.mrf.mxu0 }
 0x1ed   : > { %v1501_v49 = vpop.f32.mrf.mxu2  ;;  %v1471_v52 = vadd.f32 %v1470_v14, %v3948_v47  ;;  %v1689_v56 = vpop.f32.mrf.mxu3 }
 0x1ee   : > { %v1502_v32 = vadd.f32 %v1501_v49, %v1468_v46 }
 0x1f0   : > { %v1680_v51 = vadd.f32 %v1679_v31, %v1502_v32 }
 0x1f2   : > { %v3979_v53 = vadd.f32 %v1713_v45, %v1680_v51 }
 0x1f4   : > { %v1472_v57 = vpop.f32.mrf.mxu1  ;;  %v1718_v61 = vpop.f32.mrf.mxu0 }
 0x1f5   : > { %v1504_v50 = vpop.f32.mrf.mxu2  ;;  %v1473_v20 = vadd.f32 %v1472_v57, %v3952_v19  ;;  %v1692_v47 = vpop.f32.mrf.mxu3 }
 0x1f6   : > { %v1505_v30 = vadd.f32 %v1504_v50, %v1471_v52 }
 0x1f8   : > { %v1683_v54 = vadd.f32 %v1682_v33, %v1505_v30 }
 0x1fa   : > { %v3982_v43 = vadd.f32 %v1716_v15, %v1683_v54 }
 0x1fc   : > { %v1475_v3 = vpop.f32.mrf.mxu1  ;;  %v1721_v26 = vpop.f32.mrf.mxu0 }
 0x1fd   : > { %v1506_v62 = vpop.f32.mrf.mxu2  ;;  %v1476_v4 = vadd.f32 %v1475_v3, %v3956_v29  ;;  %v1694_v9 = vpop.f32.mrf.mxu3 }
 0x1fe   : > { %v1507_v0 = vadd.f32 %v1506_v62, %v1473_v20 }
 0x200   : > { %v1685_v2 = vadd.f32 %v1684_v16, %v1507_v0 }
 0x202   : > { %v3985_v25 = vadd.f32 %v1718_v61, %v1685_v2 }
 0x204   : > { %v1477_v31 = vpop.f32.mrf.mxu1  ;;  %v1723_v7 = vpop.f32.mrf.mxu0 }
 0x205   : > { %v1509_v5 = vpop.f32.mrf.mxu2  ;;  %v1478_v8 = vadd.f32 %v1477_v31, %v3963_v63  ;;  %v2118_v33 = vpop.f32.mrf.mxu3 }
 0x206   : > { %v1510_v6 = vadd.f32 %v1509_v5, %v1476_v4 }
 0x208   : > { %v1688_v1 = vadd.f32 %v1687_v59, %v1510_v6 }
 0x20a   : > { %v3988_v19 = vadd.f32 %v1721_v26, %v1688_v1 }
 0x20c   : > { %v1480_v12 = vpop.f32.mrf.mxu1  ;;  %v1726_v13 = vpop.f32.mrf.mxu0 }
 0x20d   : > { %v1511_v44 = vpop.f32.mrf.mxu2  ;;  %v1481_v29 = vadd.f32 %v1480_v12, %v3959_v55  ;;  %v2120_v27 = vpop.f32.mrf.mxu3 }
 0x20e   : > { %v1512_v10 = vadd.f32 %v1511_v44, %v1478_v8 }
 0x210   : > { %v1690_v11 = vadd.f32 %v1689_v56, %v1512_v10 }
 0x212   : > { %v3991_v17 = vadd.f32 %v1723_v7, %v1690_v11 }
 0x214   : > { %v1482_v35 = vpop.f32.mrf.mxu1  ;;  %v1728_v22 = vpop.f32.mrf.mxu0 }
 0x215   : > { %v1514_v18 = vpop.f32.mrf.mxu2  ;;  %v1483_v63 = vadd.f32 %v1482_v35, %v3966_v24  ;;  %v4004_v24 = vld [vmem:[%s827_s11] ss:$0 sm:$0xff]  ;;  %v2123_v32 = vpop.f32.mrf.mxu3 }
 0x216   : > { %v1515_v21 = vadd.f32 %v1514_v18, %v1481_v29 }
 0x218   : > { %v1693_v34 = vadd.f32 %v1692_v47, %v1515_v21 }
 0x21a   : > { %v3994_v36 = vadd.f32 %v1726_v13, %v1693_v34 }
 0x21c   : > { %v1740_v28 = vpop.f32.mrf.mxu1  ;;  %v2152_v16 = vpop.f32.mrf.mxu0 }
 0x21d   : > { %v1516_v37 = vpop.f32.mrf.mxu2  ;;  %v1741_v41 = vadd.f32 %v1740_v28, %v3970_v60  ;;  %v2125_v62 = vpop.f32.mrf.mxu3 }
 0x21e   : > { %v1517_v38 = vadd.f32 %v1516_v37, %v1483_v63 }
 0x220   : > { %v1695_v39 = vadd.f32 %v1694_v9, %v1517_v38 }
 0x222   : > { %v3996_v55 = vadd.f32 %v1728_v22, %v1695_v39 }
 0x224   : > { %v1742_v45 = vpop.f32.mrf.mxu1  ;;  %v2154_v46 = vpop.f32.mrf.mxu0 }
 0x225   : > { %v2084_v58 = vpop.f32.mrf.mxu2  ;;  %v1743_v52 = vadd.f32 %v1742_v45, %v3974_v23  ;;  %v2128_v13 = vpop.f32.mrf.mxu3 }
 0x226   : > { %v2119_v40 = vadd.f32 %v2118_v33, %v2084_v58 }
 0x228   : > { %v2153_v42 = vadd.f32 %v2152_v16, %v2119_v40 }
 0x22a   : > { %v2177_v49 = vadd.f32 %v2153_v42, %v1741_v41 }
 0x22c   : > { %v4007_v59 = vadd.f32 %v4004_v24, %v2177_v49  ;;  %v1745_v30 = vpop.f32.mrf.mxu1  ;;  %v2157_v54 = vpop.f32.mrf.mxu0 }
 0x22d   : > { %v2086_v51 = vpop.f32.mrf.mxu2  ;;  %v1746_v23 = vadd.f32 %v1745_v30, %v3976_v48 }
 0x22e   : > { %v4010_v14 = vmul.f32 0.70710677, %v4007_v59  ;;  %v2121_v15 = vadd.f32 %v2120_v27, %v2086_v51 }
 0x230   : > { %v2221_v60 = vand.u32 2147483647, %v4010_v14  ;;  %v2155_v50 = vadd.f32 %v2154_v46, %v2121_v15  ;;  %vm2411_vm2 = vcmp.lt.f32.partialorder %v4010_v14, 0.0 }
 0x232   : > { %v2231_v56 = vmul.f32 0.3275911, %v2221_v60  ;;  %v2178_v57 = vadd.f32 %v2155_v50, %v1743_v52  ;;  %v2351_v6 = vsub.f32 0.0, %v2221_v60  ;;  %v2130_v52 = vpop.f32.mrf.mxu3 }
 0x234   : > { %v2241_v61 = vadd.f32 1.0, %v2231_v56  ;;  %v4015_v20 = vadd.f32 %v4004_v24, %v2178_v57  ;;  %v1747_v47 = vpop.f32.mrf.mxu1  ;;  %v2159_v5 = vpop.f32.mrf.mxu0  ;;  %v2361_v11 = vmul.f32 %v2351_v6, %v2221_v60 }
 0x235   : > { %v2089_v0 = vpop.f32.mrf.mxu2  ;;  %v1748_v18 = vadd.f32 %v1747_v47, %v3979_v53 }
 0x236   : > { %3206 = vrcp.f32 %v2241_v61  ;;  %v4018_v2 = vmul.f32 0.70710677, %v4015_v20  ;;  %v2124_v3 = vadd.f32 %v2123_v32, %v2089_v0  ;;  %v2371_v63 = vmul.f32 1.442695, %v2361_v11 }
 0x238   : > { %v2222_v26 = vand.u32 2147483647, %v4018_v2  ;;  %v2158_v4 = vadd.f32 %v2157_v54, %v2124_v3  ;;  %vm2412_vm3 = vcmp.lt.f32.partialorder %v4018_v2, 0.0 }
 0x23a   : > { %v2232_v1 = vmul.f32 0.3275911, %v2222_v26  ;;  %v2179_v31 = vadd.f32 %v2158_v4, %v1746_v23  ;;  %v2352_v28 = vsub.f32 0.0, %v2222_v26 }
 0x23c   : > { %v3207_v7 = vpop.eup %3206  ;;  %v2242_v8 = vadd.f32 1.0, %v2232_v1  ;;  %v4023_v44 = vadd.f32 %v4004_v24, %v2179_v31  ;;  %v1750_v35 = vpop.f32.mrf.mxu1  ;;  %v2362_v32 = vmul.f32 %v2352_v28, %v2222_v26 }
 0x23d   : > { %v2261_v9 = vmul.f32 1.0614054, %v3207_v7  ;;  %v2091_v10 = vpop.f32.mrf.mxu2  ;;  %v2162_v22 = vpop.f32.mrf.mxu0  ;;  %v1751_v15 = vadd.f32 %v1750_v35, %v3982_v43 }
 0x23e   : > { %3208 = vrcp.f32 %v2242_v8  ;;  %v2126_v12 = vadd.f32 %v2125_v62, %v2091_v10  ;;  %v4026_v48 = vmul.f32 0.70710677, %v4023_v44  ;;  %v2373_v23 = vmul.f32 1.442695, %v2362_v32 }
 0x23f   : > { %v2271_v29 = vadd.f32 -1.4531521, %v2261_v9  ;;  %3210 = vpow2.f32 %v2371_v63  ;;  %v2133_v63 = vpop.f32.mrf.mxu3 }
 0x240   : > { %v2160_v21 = vadd.f32 %v2159_v5, %v2126_v12  ;;  %v2223_v34 = vand.u32 2147483647, %v4026_v48  ;;  %vm2413_vm4 = vcmp.lt.f32.partialorder %v4026_v48, 0.0 }
 0x241   : > { %v2281_v33 = vmul.f32 %v3207_v7, %v2271_v29 }
 0x242   : > { %v2180_v37 = vadd.f32 %v2160_v21, %v1748_v18  ;;  %v2233_v39 = vmul.f32 0.3275911, %v2223_v34  ;;  %v2353_v4 = vsub.f32 0.0, %v2223_v34 }
 0x243   : > { %v2291_v38 = vadd.f32 1.4214138, %v2281_v33 }
 0x244   : > { %v4030_v27 = vpop.eup %3208  ;;  %v4033_v16 = vadd.f32 %v4004_v24, %v2180_v37  ;;  %v2243_v53 = vadd.f32 1.0, %v2233_v39  ;;  %v1752_v54 = vpop.f32.mrf.mxu1 }
 0x245   : > { %v2301_v58 = vmul.f32 %v3207_v7, %v2291_v38  ;;  %v2262_v40 = vmul.f32 1.0614054, %v4030_v27  ;;  %v2094_v41 = vpop.f32.mrf.mxu2  ;;  %v2164_v61 = vpop.f32.mrf.mxu0  ;;  %v1753_v35 = vadd.f32 %v1752_v54, %v3985_v25  ;;  %v2201_v38 = vmul.f32 0.5, %v4007_v59 }
 0x246   : > { %v4037_v42 = vmul.f32 0.70710677, %v4033_v16  ;;  %v2129_v45 = vadd.f32 %v2128_v13, %v2094_v41  ;;  %3212 = vrcp.f32 %v2243_v53  ;;  %v3211_v3 = vpop.eup %3210  ;;  %v2363_v13 = vmul.f32 %v2353_v4, %v2223_v34 }
 0x247   : > { %v2311_v46 = vadd.f32 -0.28449672, %v2301_v58  ;;  %v2272_v49 = vadd.f32 -1.4531521, %v2262_v40 }
 0x248   : > { %v2224_v51 = vand.u32 2147483647, %v4037_v42  ;;  %v2163_v60 = vadd.f32 %v2162_v22, %v2129_v45  ;;  %v2375_v53 = vmul.f32 1.442695, %v2363_v13  ;;  %vm2414_vm5 = vcmp.lt.f32.partialorder %v4037_v42, 0.0 }
 0x249   : > { %v2321_v50 = vmul.f32 %v3207_v7, %v2311_v46  ;;  %v2282_v30 = vmul.f32 %v4030_v27, %v2272_v49 }
 0x24a   : > { %v2234_v56 = vmul.f32 0.3275911, %v2224_v51  ;;  %v2181_v57 = vadd.f32 %v2163_v60, %v1751_v15  ;;  %v2354_v33 = vsub.f32 0.0, %v2224_v51 }
 0x24b   : > { %v2331_v62 = vadd.f32 0.2548296, %v2321_v50  ;;  %v2292_v0 = vadd.f32 1.4214138, %v2282_v30 }
 0x24c   : > { %v2244_v47 = vadd.f32 1.0, %v2234_v56  ;;  %v4043_v26 = vadd.f32 %v4004_v24, %v2181_v57  ;;  %v4045_v5 = vpop.eup %3212  ;;  %v1755_v37 = vpop.f32.mrf.mxu1  ;;  %v2364_v50 = vmul.f32 %v2354_v33, %v2224_v51 }
 0x24d   : > { %v2341_v43 = vmul.f32 %v3207_v7, %v2331_v62  ;;  %v2302_v6 = vmul.f32 %v4030_v27, %v2292_v0  ;;  %v2096_v1 = vpop.f32.mrf.mxu2  ;;  %v2263_v31 = vmul.f32 1.0614054, %v4045_v5  ;;  %v2167_v45 = vpop.f32.mrf.mxu0 }
 0x24e   : > { %3214 = vrcp.f32 %v2244_v47  ;;  %v4050_v10 = vmul.f32 0.70710677, %v4043_v26  ;;  %v2131_v11 = vadd.f32 %v2130_v52, %v2096_v1  ;;  %v2377_v4 = vmul.f32 1.442695, %v2364_v50 }
 0x24f   : > { %v2391_v8 = vmul.f32 %v3211_v3, %v2341_v43  ;;  %v2312_v9 = vadd.f32 -0.28449672, %v2302_v6  ;;  %3216 = vpow2.f32 %v2373_v23  ;;  %v2273_v12 = vadd.f32 -1.4531521, %v2263_v31 }
 0x250   : > { %v4054_v7 = vand.u32 2147483647, %v4050_v10  ;;  %v2165_v22 = vadd.f32 %v2164_v61, %v2131_v11  ;;  %v1756_v47 = vadd.f32 %v1755_v37, %v3988_v19  ;;  %v2135_v11 = vpop.f32.mrf.mxu3  ;;  %vm2415_vm12 = vcmp.lt.f32.partialorder %v4050_v10, 0.0 }
 0x251   : > { %v2401_v29 = vsub.f32 1.0, %v2391_v8  ;;  %v2322_v18 = vmul.f32 %v4030_v27, %v2312_v9  ;;  %v2283_v21 = vmul.f32 %v4045_v5, %v2273_v12 }
 0x252   : > { %v2235_v34 = vmul.f32 0.3275911, %v4054_v7  ;;  %v2182_v41 = vadd.f32 %v2165_v22, %v1753_v35  ;;  %v2355_v1 = vsub.f32 0.0, %v4054_v7 }
 0x253   : > { %v2421_v39 = vsub.f32 0.0, %v2401_v29  ;;  %v2332_v28 = vadd.f32 0.2548296, %v2322_v18  ;;  %v2293_v40 = vadd.f32 1.4214138, %v2283_v21 }
 0x254   : > { %v4060_v58 = vpop.eup %3214  ;;  %v2245_v32 = vadd.f32 1.0, %v2235_v34  ;;  %v4067_v30 = vadd.f32 %v4004_v24, %v2182_v41  ;;  %v1757_v12 = vpop.f32.mrf.mxu1  ;;  %v2203_v41 = vmul.f32 0.5, %v4023_v44 }
 0x255   : > { %v2431_v46 = vsel %vm2411_vm2, %v2421_v39, %v2401_v29  ;;  %v2342_v25 = vmul.f32 %v4030_v27, %v2332_v28  ;;  %v2264_v49 = vmul.f32 1.0614054, %v4060_v58  ;;  %v2099_v15 = vpop.f32.mrf.mxu2  ;;  %v3217_v59 = vpop.eup %3216  ;;  %v2303_v52 = vmul.f32 %v4045_v5, %v2293_v40 }
 0x256   : > { %v2441_v60 = vadd.f32 1.0, %v2431_v46  ;;  %3218 = vrcp.f32 %v2245_v32  ;;  %v2134_v56 = vadd.f32 %v2133_v63, %v2099_v15  ;;  %v4071_v0 = vmul.f32 0.70710677, %v4067_v30  ;;  %v2169_v63 = vpop.f32.mrf.mxu0 }
 0x257   : > { %v2392_v14 = vmul.f32 %v3217_v59, %v2342_v25  ;;  %v2274_v54 = vadd.f32 -1.4531521, %v2264_v49  ;;  %v2313_v61 = vadd.f32 -0.28449672, %v2303_v52  ;;  %3220 = vpow2.f32 %v2375_v53 }
 0x258   : > { %v2451_v57 = vmul.f32 %v2441_v60, %v2201_v38  ;;  %v2168_v3 = vadd.f32 %v2167_v45, %v2134_v56  ;;  %v4079_v8 = vand.u32 2147483647, %v4071_v0  ;;  %v2202_v29 = vmul.f32 0.5, %v4015_v20 }
 0x259   : > { %v2402_v27 = vsub.f32 1.0, %v2392_v14  ;;  %v2284_v62 = vmul.f32 %v4060_v58, %v2274_v54  ;;  %v2323_v51 = vmul.f32 %v4045_v5, %v2313_v61  ;;  %3222 = vpow2.f32 %v2377_v4 }
 0x25a   : > { %v2461_v23 = vpack.c.bf16 %v2451_v57, %v2451_v57  ;;  %v2183_v9 = vadd.f32 %v2168_v3, %v1756_v47  ;;  %v2236_v22 = vmul.f32 0.3275911, %v4079_v8  ;;  %v2365_v38 = vmul.f32 %v2355_v1, %v4054_v7  ;;  %v2138_v3 = vpop.f32.mrf.mxu3 }
 0x25b   : > { %v2422_v43 = vsub.f32 0.0, %v2402_v27  ;;  %v2294_v6 = vadd.f32 1.4214138, %v2284_v62  ;;  %v2333_v31 = vadd.f32 0.2548296, %v2323_v51  ;;  %v4099_v7 = vmul.f32 0.5, %v4033_v16 }
 0x25c   : > { %2462 = vst [vmem:[%s3732_s12] sm:$0xf] %v2461_v23  ;;  %v4081_v13 = vpop.eup %3218  ;;  %v4090_v39 = vadd.f32 %v4004_v24, %v2183_v9  ;;  %v2246_v53 = vadd.f32 1.0, %v2236_v22  ;;  %v2379_v32 = vmul.f32 1.442695, %v2365_v38  ;;  %v1758_v14 = vadd.f32 %v1757_v12, %v3991_v17  ;;  %v1760_v23 = vpop.f32.mrf.mxu1 }
 0x25d   : > { %v2432_v18 = vsel %vm2412_vm3, %v2422_v43, %v2402_v27  ;;  %v2304_v19 = vmul.f32 %v4060_v58, %v2294_v6  ;;  %v2101_v21 = vpop.f32.mrf.mxu2  ;;  %v3221_v33 = vpop.eup %3220  ;;  %v2343_v35 = vmul.f32 %v4045_v5, %v2333_v31  ;;  %v2265_v2 = vmul.f32 1.0614054, %v4081_v13 }
 0x25e   : > { %v2136_v20 = vadd.f32 %v2135_v11, %v2101_v21  ;;  %v2442_v28 = vadd.f32 1.0, %v2432_v18  ;;  %v4096_v45 = vmul.f32 0.70710677, %v4090_v39  ;;  %3224 = vrcp.f32 %v2246_v53  ;;  %v2172_v48 = vpop.f32.mrf.mxu0 }
 0x25f   : > { %v2314_v37 = vadd.f32 -0.28449672, %v2304_v19  ;;  %v2393_v34 = vmul.f32 %v3221_v33, %v2343_v35  ;;  %v2275_v40 = vadd.f32 -1.4531521, %v2265_v2  ;;  %v3223_v59 = vpop.eup %3222  ;;  %v2356_v27 = vsub.f32 0.0, %v4079_v8 }
 0x260   : > { %v4103_v15 = vand.u32 2147483647, %v4096_v45  ;;  %v2170_v44 = vadd.f32 %v2169_v63, %v2136_v20  ;;  %v2452_v60 = vmul.f32 %v2442_v28, %v2202_v29  ;;  %3226 = vpow2.f32 %v2379_v32 }
 0x261   : > { %v2324_v5 = vmul.f32 %v4060_v58, %v2314_v37  ;;  %v2403_v46 = vsub.f32 1.0, %v2393_v34  ;;  %v2285_v25 = vmul.f32 %v4081_v13, %v2275_v40  ;;  %v2366_v29 = vmul.f32 %v2356_v27, %v4079_v8 }
 0x262   : > { %v2237_v54 = vmul.f32 0.3275911, %v4103_v15  ;;  %v2184_v62 = vadd.f32 %v2170_v44, %v1758_v14  ;;  %v2357_v37 = vsub.f32 0.0, %v4103_v15  ;;  %v1761_v40 = vadd.f32 %v1760_v23, %v3994_v36 }
 0x263   : > { %v2334_v49 = vadd.f32 0.2548296, %v2324_v5  ;;  %v2423_v52 = vsub.f32 0.0, %v2403_v46  ;;  %v2295_v50 = vadd.f32 1.4214138, %v2285_v25  ;;  %vm2416_vm0 = vcmp.lt.f32.partialorder %v4071_v0, 0.0 }
 0x264   : > { %v2247_v17 = vadd.f32 1.0, %v2237_v54  ;;  %v4113_v47 = vpop.eup %3224  ;;  %v4116_v6 = vadd.f32 %v4004_v24, %v2184_v62  ;;  %v2381_v44 = vmul.f32 1.442695, %v2366_v29  ;;  %vm2417_vm1 = vcmp.lt.f32.partialorder %v4096_v45, 0.0 }
 0x265   : > { %v2344_v16 = vmul.f32 %v4060_v58, %v2334_v49  ;;  %v2104_v56 = vpop.f32.mrf.mxu2  ;;  %v2433_v57 = vsel %vm2413_vm4, %v2423_v52, %v2403_v46  ;;  %v2305_v61 = vmul.f32 %v4081_v13, %v2295_v50  ;;  %v2463_v58 = vpack.c.bf16 %v2452_v60, %v2452_v60  ;;  %v2140_v50 = vpop.f32.mrf.mxu3 }
 0x266   : > { %v2443_v51 = vadd.f32 1.0, %v2433_v57  ;;  %v2139_v1 = vadd.f32 %v2138_v3, %v2104_v56  ;;  %v2266_v11 = vmul.f32 1.0614054, %v4113_v47  ;;  %3228 = vrcp.f32 %v2247_v17  ;;  %v3227_v8 = vpop.eup %3226  ;;  %v2174_v62 = vpop.f32.mrf.mxu0 }
 0x267   : > { %v2394_v4 = vmul.f32 %v3223_v59, %v2344_v16  ;;  %v2315_v43 = vadd.f32 -0.28449672, %v2305_v61  ;;  %v4122_v18 = vmul.f32 0.70710677, %v4116_v6  ;;  %v3023_v2 = vrot.slane %v2463_v58, 9 }
 0x268   : > { %v2453_v31 = vmul.f32 %v2443_v51, %v2203_v41  ;;  %v2276_v33 = vadd.f32 -1.4531521, %v2266_v11  ;;  %v2173_v35 = vadd.f32 %v2172_v48, %v2139_v1  ;;  %v2367_v16 = vmul.f32 %v2357_v37, %v4103_v15 }
 0x269   : > { %v2404_v9 = vsub.f32 1.0, %v2394_v4  ;;  %v2325_v12 = vmul.f32 %v4081_v13, %v2315_v43  ;;  %v4132_v38 = vand.u32 2147483647, %v4122_v18  ;;  %vm2418_vm2 = vcmp.lt.f32.partialorder %v4122_v18, 0.0 }
 0x26a   : > { %v2464_v19 = vpack.c.bf16 %v2453_v31, %v2453_v31  ;;  %v2286_v34 = vmul.f32 %v4113_v47, %v2276_v33  ;;  %v2185_v42 = vadd.f32 %v2173_v35, %v1761_v40 }
 0x26b   : > { %v2424_v21 = vsub.f32 0.0, %v2404_v9  ;;  %v2335_v63 = vadd.f32 0.2548296, %v2325_v12  ;;  %v2238_v5 = vmul.f32 0.3275911, %v4132_v38  ;;  %v2205_v12 = vmul.f32 0.5, %v4043_v26 }
 0x26c   : > { %v2472_v20 = vrot.slane %v2464_v19, 5  ;;  %v4140_v25 = vpop.eup %3228  ;;  %v2296_v32 = vadd.f32 1.4214138, %v2286_v34  ;;  %v4150_v54 = vadd.f32 %v4004_v24, %v2185_v42  ;;  %v3025_v51 = vrot.slane %v2464_v19, 10 }
 0x26d   : > { %v2434_v28 = vsel %vm2414_vm5, %v2424_v21, %v2404_v9  ;;  %v2345_v41 = vmul.f32 %v4081_v13, %v2335_v63  ;;  %v2106_v46 = vpop.f32.mrf.mxu2  ;;  %v2267_v36 = vmul.f32 1.0614054, %v4140_v25  ;;  %v2248_v52 = vadd.f32 1.0, %v2238_v5  ;;  %v1762_v13 = vpop.f32.mrf.mxu1 }
 0x26e   : > { %v2444_v53 = vadd.f32 1.0, %v2434_v28  ;;  %v2473_v49 = vsel %vm4126_vm9, %v3023_v2, %v2472_v20  ;;  %v2306_v14 = vmul.f32 %v4113_v47, %v2296_v32  ;;  %v2141_v56 = vadd.f32 %v2140_v50, %v2106_v46 }
 0x26f   : > { %3024 = vst [vmem:[%s3732_s12 + $0x4] sm:$0xf] %v2473_v49  ;;  %v2395_v60 = vmul.f32 %v3227_v8, %v2345_v41  ;;  %v2277_v27 = vadd.f32 -1.4531521, %v2267_v36  ;;  %3230 = vrcp.f32 %v2248_v52  ;;  %v1763_v15 = vadd.f32 %v1762_v13, %v3996_v55 }
 0x270   : > { %v2454_v59 = vmul.f32 %v2444_v53, %v4099_v7  ;;  %v2316_v3 = vadd.f32 -0.28449672, %v2306_v14  ;;  %3232 = vpow2.f32 %v2381_v44  ;;  %v2175_v23 = vadd.f32 %v2174_v62, %v2141_v56  ;;  %v2560_v7 = vld [vmem:[%s3732_s12] sm:$0xf] (%p3406_p9) }
 0x271   : > { %v2405_v61 = vsub.f32 1.0, %v2395_v60  ;;  %v2287_v58 = vmul.f32 %v4140_v25, %v2277_v27  ;;  %v4163_v48 = vmul.f32 0.70710677, %v4150_v54  ;;  %v2383_v55 = vmul.f32 1.442695, %v2367_v16  ;;  %2561 = vst [vmem:[%s2543_s30] sm:$0xf] (%p3406_p9), %v2560_v7 }
 0x272   : > { %v2477_v57 = vpack.c.bf16 %v2454_v59, %v2454_v59  ;;  %v2326_v43 = vmul.f32 %v4113_v47, %v2316_v3  ;;  %v2186_v1 = vadd.f32 %v2175_v23, %v1763_v15  ;;  %v2358_v35 = vsub.f32 0.0, %v4132_v38 }
 0x273   : > { %v2425_v17 = vsub.f32 0.0, %v2405_v61  ;;  %v2297_v11 = vadd.f32 1.4214138, %v2287_v58  ;;  %v2229_v2 = vand.u32 2147483647, %v4163_v48  ;;  %3234 = vpow2.f32 %v2383_v55 }
 0x274   : > { %v2484_v4 = vrot.slane %v2477_v57, 6  ;;  %v2336_v19 = vadd.f32 0.2548296, %v2326_v43  ;;  %v4170_v21 = vadd.f32 %v4004_v24, %v2186_v1  ;;  %v3027_v41 = vrot.slane %v2477_v57, 11 }
 0x275   : > { %v2435_v9 = vsel %vm2415_vm12, %v2425_v17, %v2405_v61  ;;  %v3231_v10 = vpop.eup %3230  ;;  %v2307_v33 = vmul.f32 %v4140_v25, %v2297_v11  ;;  %v2239_v28 = vmul.f32 0.3275911, %v2229_v2  ;;  %v2206_v27 = vmul.f32 0.5, %v4067_v30 }
 0x276   : > { %v2485_v31 = vsel %vm4154_vm11, %v3025_v51, %v2484_v4  ;;  %v2445_v29 = vadd.f32 1.0, %v2435_v9  ;;  %v3233_v63 = vpop.eup %3232  ;;  %v2346_v8 = vmul.f32 %v4113_v47, %v2336_v19  ;;  %v2268_v20 = vmul.f32 1.0614054, %v3231_v10 }
 0x277   : > { %3026 = vst [vmem:[%s3732_s12 + $0x8] sm:$0xf] %v2485_v31  ;;  %v2317_v26 = vadd.f32 -0.28449672, %v2307_v33  ;;  %v4177_v53 = vmul.f32 0.70710677, %v4170_v21  ;;  %v2368_v47 = vmul.f32 %v2358_v35, %v4132_v38 }
 0x278   : > { %v2455_v37 = vmul.f32 %v2445_v29, %v2205_v12  ;;  %v2396_v24 = vmul.f32 %v3233_v63, %v2346_v8  ;;  %v2278_v40 = vadd.f32 -1.4531521, %v2268_v20  ;;  %v2249_v49 = vadd.f32 1.0, %v2239_v28 }
 0x279   : > { %v2327_v46 = vmul.f32 %v4140_v25, %v2317_v26  ;;  %v2230_v59 = vand.u32 2147483647, %v4177_v53  ;;  %v3235_v14 = vpop.eup %3234  ;;  %v2385_v16 = vmul.f32 1.442695, %v2368_v47  ;;  %v2359_v17 = vsub.f32 0.0, %v2229_v2 }
 0x27a   : > { %v2489_v34 = vpack.c.bf16 %v2455_v37, %v2455_v37  ;;  %v2406_v44 = vsub.f32 1.0, %v2396_v24  ;;  %v2288_v42 = vmul.f32 %v3231_v10, %v2278_v40  ;;  %3236 = vrcp.f32 %v2249_v49 }
 0x27b   : > { %v2337_v60 = vadd.f32 0.2548296, %v2327_v46  ;;  %v2240_v13 = vmul.f32 0.3275911, %v2230_v59  ;;  %v2369_v30 = vmul.f32 %v2359_v17, %v2229_v2  ;;  %v2360_v29 = vsub.f32 0.0, %v2230_v59 }
 0x27c   : > { %v2496_v32 = vrot.slane %v2489_v34, 7  ;;  %v2426_v52 = vsub.f32 0.0, %v2406_v44  ;;  %v2298_v50 = vadd.f32 1.4214138, %v2288_v42  ;;  %v2207_v24 = vmul.f32 0.5, %v4090_v39 }
 0x27d   : > { %v2347_v38 = vmul.f32 %v4140_v25, %v2337_v60  ;;  %v2250_v61 = vadd.f32 1.0, %v2240_v13  ;;  %v2387_v8 = vmul.f32 1.442695, %v2369_v30  ;;  %v2370_v34 = vmul.f32 %v2360_v29, %v2230_v59 }
 0x27e   : > { %v2497_v36 = vsel %vm4180_vm15, %v3027_v41, %v2496_v32  ;;  %v2436_v56 = vsel %vm2416_vm0, %v2426_v52, %v2406_v44  ;;  %v2308_v57 = vmul.f32 %v3231_v10, %v2298_v50  ;;  %v2208_v32 = vmul.f32 0.5, %v4116_v6 }
 0x27f   : > { %3028 = vst [vmem:[%s3732_s12 + $0xc] sm:$0xf] %v2497_v36  ;;  %v2446_v62 = vadd.f32 1.0, %v2436_v56  ;;  %v2397_v3 = vmul.f32 %v3235_v14, %v2347_v38  ;;  %3238 = vrcp.f32 %v2250_v61  ;;  %v2389_v49 = vmul.f32 1.442695, %v2370_v34 }
 0x280   : > { %v2318_v15 = vadd.f32 -0.28449672, %v2308_v57  ;;  %v3237_v23 = vpop.eup %3236  ;;  %3240 = vpow2.f32 %v2385_v16  ;;  %vm2419_vm3 = vcmp.lt.f32.partialorder %v4163_v48, 0.0  ;;  %vm2420_vm4 = vcmp.lt.f32.partialorder %v4177_v53, 0.0  ;;  %v2564_v53 = vld [vmem:[%s3732_s12 + $0x8] sm:$0xf] (%p3406_p9) }
 0x281   : > { %v2456_v51 = vmul.f32 %v2446_v62, %v2206_v27  ;;  %v2407_v4 = vsub.f32 1.0, %v2397_v3  ;;  %v2269_v0 = vmul.f32 1.0614054, %v3237_v23  ;;  %3242 = vpow2.f32 %v2387_v8  ;;  %2565 = vst [vmem:[%s2543_s30 + $0x10] sm:$0xf] (%p3406_p9), %v2564_v53 }
 0x282   : > { %v2328_v58 = vmul.f32 %v3231_v10, %v2318_v15  ;;  %3244 = vpow2.f32 %v2389_v49 }
 0x283   : > { %v2501_v43 = vpack.c.bf16 %v2456_v51, %v2456_v51  ;;  %v2427_v25 = vsub.f32 0.0, %v2407_v4  ;;  %v2279_v31 = vadd.f32 -1.4531521, %v2269_v0 }
 0x284   : > { %v2338_v1 = vadd.f32 0.2548296, %v2328_v58 }
 0x285   : > { %3029 = vst [vmem:[%s3732_s12 + $0x10] sm:$0xf] %v2501_v43  ;;  %v3239_v9 = vpop.eup %3238  ;;  %v2437_v11 = vsel %vm2417_vm1, %v2427_v25, %v2407_v4  ;;  %v2289_v12 = vmul.f32 %v3237_v23, %v2279_v31  ;;  %v2210_v43 = vmul.f32 0.5, %v4170_v21  ;;  %v2562_v21 = vld [vmem:[%s3732_s12 + $0x4] sm:$0xf] (%p3406_p9) }
 0x286   : > { %v2348_v55 = vmul.f32 %v3231_v10, %v2338_v1  ;;  %v3241_v19 = vpop.eup %3240  ;;  %v2270_v33 = vmul.f32 1.0614054, %v3239_v9  ;;  %v2447_v37 = vadd.f32 1.0, %v2437_v11  ;;  %v2566_v5 = vld [vmem:[%s3732_s12 + $0xc] sm:$0xf] (%p3406_p9) }
 0x287   : > { %v2299_v63 = vadd.f32 1.4214138, %v2289_v12  ;;  %v3243_v50 = vpop.eup %3242  ;;  %2563 = vst [vmem:[%s2543_s30 + $0x8] sm:$0xf] (%p3406_p9), %v2562_v21 }
 0x288   : > { %v2398_v35 = vmul.f32 %v3241_v19, %v2348_v55  ;;  %v2280_v20 = vadd.f32 -1.4531521, %v2270_v33  ;;  %v2457_v41 = vmul.f32 %v2447_v37, %v2207_v24  ;;  %v3245_v27 = vpop.eup %3244  ;;  %2567 = vst [vmem:[%s2543_s30 + $0x18] sm:$0xf] (%p3406_p9), %v2566_v5 }
 0x289   : > { %v2309_v28 = vmul.f32 %v3237_v23, %v2299_v63 }
 0x28a   : > { %v2408_v26 = vsub.f32 1.0, %v2398_v35  ;;  %v2290_v40 = vmul.f32 %v3239_v9, %v2280_v20  ;;  %v2504_v36 = vpack.c.bf16 %v2457_v41, %v2457_v41 }
 0x28b   : > { %v2319_v2 = vadd.f32 -0.28449672, %v2309_v28 }
 0x28c   : > { %v2428_v45 = vsub.f32 0.0, %v2408_v26  ;;  %v2300_v10 = vadd.f32 1.4214138, %v2290_v40  ;;  %v3030_v38 = vrot.slane %v2504_v36, 9  ;;  %v2568_v12 = vld [vmem:[%s3732_s12 + $0x10] sm:$0xf] (%p3406_p9) }
 0x28d   : > { %v2329_v47 = vmul.f32 %v3237_v23, %v2319_v2  ;;  %2569 = vst [vmem:[%s2543_s30 + $0x20] sm:$0xf] (%p3406_p9), %v2568_v12 }
 0x28e   : > { %v2438_v46 = vsel %vm2418_vm2, %v2428_v45, %v2408_v26  ;;  %v2310_v42 = vmul.f32 %v3239_v9, %v2300_v10 }
 0x28f   : > { %v2448_v44 = vadd.f32 1.0, %v2438_v46  ;;  %v2339_v60 = vadd.f32 0.2548296, %v2329_v47 }
 0x290   : > { %v2320_v39 = vadd.f32 -0.28449672, %v2310_v42 }
 0x291   : > { %v2458_v59 = vmul.f32 %v2448_v44, %v2208_v32  ;;  %v2349_v52 = vmul.f32 %v3237_v23, %v2339_v60  ;;  %v2209_v23 = vmul.f32 0.5, %v4150_v54 }
 0x292   : > { %v2330_v14 = vmul.f32 %v3239_v9, %v2320_v39 }
 0x293   : > { %v2505_v13 = vpack.c.bf16 %v2458_v59, %v2458_v59  ;;  %v2399_v18 = vmul.f32 %v3243_v50, %v2349_v52 }
 0x294   : > { %v2340_v56 = vadd.f32 0.2548296, %v2330_v14 }
 0x295   : > { %v2510_v16 = vrot.slane %v2505_v13, 5  ;;  %v2409_v57 = vsub.f32 1.0, %v2399_v18  ;;  %v3032_v1 = vrot.slane %v2505_v13, 10 }
 0x296   : > { %v2350_v61 = vmul.f32 %v3239_v9, %v2340_v56 }
 0x297   : > { %v2511_v6 = vsel %vm4126_vm9, %v3030_v38, %v2510_v16  ;;  %v2429_v62 = vsub.f32 0.0, %v2409_v57 }
 0x298   : > { %3031 = vst [vmem:[%s3732_s12 + $0x14] sm:$0xf] %v2511_v6  ;;  %v2400_v3 = vmul.f32 %v3245_v27, %v2350_v61 }
 0x299   : > { %v2439_v15 = vsel %vm2419_vm3, %v2429_v62, %v2409_v57 }
 0x29a   : > { %v2449_v51 = vadd.f32 1.0, %v2439_v15  ;;  %v2410_v4 = vsub.f32 1.0, %v2400_v3 }
 0x29c   : > { %v2459_v17 = vmul.f32 %v2449_v51, %v2209_v23  ;;  %v2430_v58 = vsub.f32 0.0, %v2410_v4 }
 0x29e   : > { %v2515_v22 = vpack.c.bf16 %v2459_v17, %v2459_v17  ;;  %v2440_v0 = vsel %vm2420_vm4, %v2430_v58, %v2410_v4 }
 0x29f   : > { %v2450_v25 = vadd.f32 1.0, %v2440_v0  ;;  %v2570_v29 = vld [vmem:[%s3732_s12 + $0x14] sm:$0xf] (%p3406_p9) }
 0x2a0   : > { %v2519_v31 = vrot.slane %v2515_v22, 6  ;;  %v3034_v9 = vrot.slane %v2515_v22, 11  ;;  %2571 = vst [vmem:[%s2543_s30 + $0x28] sm:$0xf] (%p3406_p9), %v2570_v29 }
 0x2a1   : > { %v2460_v48 = vmul.f32 %v2450_v25, %v2210_v43 }
 0x2a2   : > { %v2520_v30 = vsel %vm4154_vm11, %v3032_v1, %v2519_v31 }
 0x2a3   : > { %3033 = vst [vmem:[%s3732_s12 + $0x18] sm:$0xf] %v2520_v30  ;;  %v2524_v54 = vpack.c.bf16 %v2460_v48, %v2460_v48 }
 0x2a4   : > { %2539 = sbr.rel (!%p3406_p9) target bundleno = 689 (0x2b1), region = 81 }
 0x2a5   : > { %v2528_v11 = vrot.slane %v2524_v54, 7 }
 0x2a7   : > { %v2529_v55 = vsel %vm4180_vm15, %v3034_v9, %v2528_v11 }
 0x2a8   : > { %3035 = vst [vmem:[%s3732_s12 + $0x1c] sm:$0xf] %v2529_v55 }
 0x2aa   : > { %v2572_v19 = vld [vmem:[%s3732_s12 + $0x18] sm:$0xf] }
 0x2ab   : > { %2573 = vst [vmem:[%s2543_s30 + $0x30] sm:$0xf] %v2572_v19 }
 0x2af   : > { %v2574_v33 = vld [vmem:[%s3732_s12 + $0x1c] sm:$0xf] }
 0x2b0   : > { %2575 = vst [vmem:[%s2543_s30 + $0x38] sm:$0xf] %v2574_v33 }
 0x2b1 PF: > { %s13_s20 = sadd.s32 1, %s3316_s20   ;;  %s4264_s12 = smov %s3288_s13 }
 0x2b2   : > { %p10_p3 = scmp.ge.s32.totalorder %s13_s20, 6   ;;  %s4265_s13 = smov %s3411_s4 }
 0x2b3   : > { %s4266_s14 = smov %s3296_s15  ;;  %s4267_s15 = smov %s3400_s27 }
 0x2b4   : > { %s4268_s16 = smov %s3308_s18  ;;  %s4269_s17 = smov %s3312_s19 }
 0x2b5   : > { %s4270_s18 = smov %s4273_s22  ;;  %s4271_s19 = smov %s4277_s23 }
 0x2b6   :  { %12 = sbr.rel (!%p10_p3) target bundleno = 5 (0x5), region = 173 }

// kernel: ffm_forward.4
= control target key start
LH: loop header
LB: loop body
LE: loop exit
PB: predicated region body
PF: predicated region fallthrough
CT: control target
= control target key end

     0   :  { %s2231_s15 = smov 0   ;;  %s2233_s16 = smov 0   ;;  %s3860_s0 = inlined_call_operand.vmem [shape: bf16[2,256,64], index: 0, kind: input, shape index: {}]   ;;  %s3861_s1 = inlined_call_operand.vmem [shape: bf16[64,64], index: 1, kind: input, shape index: {}]   ;;  %s3862_s2 = inlined_call_operand.vmem [shape: f32[1,64], index: 2, kind: input, shape index: {}]   ;;  %s3863_s3 = inlined_call_operand.vmem [shape: f32[1,64], index: 3, kind: input, shape index: {}]   ;;  %s3864_s4 = inlined_call_operand.vmem [shape: bf16[2,256,64], index: 4, kind: output, shape index: {}]  }
   0x1   :  { %s2235_s17 = smov 0  }
   0x2 LB: > { %s26_s18 = sadd.s32 1, %s2200_s16  ;;  %p1889_p0 = scmp.ge.s32.totalorder %s2204_s17, 1  ;;  %s2204_s17 = sphi %s2235_s17, %s14_s17   ;;  %s2200_s16 = sphi %s2233_s16, %s4459_s16   ;;  %s2196_s15 = sphi %s2231_s15, %s4458_s15  }
   0x3   : > { %p28_p1 = scmp.ge.s32.totalorder %s26_s18, 2  ;;  %p201_p2 = scmp.lt.s32.totalorder %s2204_s17, 3 }
   0x5   : > { %s4461_s18 = smov (%p28_p1, %s26_s18), 0  ;;  %p202_p3 = pnand %p1889_p0, %p201_p2 }
   0x7   : > { %205 = sbr.rel (%p202_p3) target bundleno = 621 (0x26d), region = 36 }
   0xc   : > { %v2013_v0 = vld [vmem:[%s3861_s1 + $0x18] sm:$0xff]  ;;  %p240_p4 = scmp.lt.s32.totalorder %s2196_s15, 1  ;;  %v2012_v1 = vld [vmem:[%s3861_s1 + $0x10] sm:$0xff]  ;;  %v2011_v2 = vld [vmem:[%s3861_s1 + $0x8] sm:$0xff]  ;;  %vm408_vm0 = vcmask 523264  }
   0xd   : > { %461 = vmatpush.bf16.msra.mxu0 %v2013_v0  ;;  %2014 = vmatpush.bf16.msra.mxu1 %v2013_v0  ;;  %v2010_v3 = vld [vmem:[%s3861_s1] sm:$0xff] }
   0xe   : > { %s4463_s15 = smov (!%p240_p4, %s2196_s15), 1  ;;  %2015 = vmatpush.bf16.msra.mxu2 %v2013_v0  ;;  %2016 = vmatpush.bf16.msra.mxu3 %v2013_v0 }
   0xf   : > { %s1992_s25 = sshll.u32 %s4463_s15, 7 }
  0x10   : > { %s2269_s30 = scalar_lea.vmem %s3860_s0, %s1992_s25  ;;  %s3653_s11 = scalar_lea.vmem %s3864_s4, %s1992_s25 }
  0x11   : > { %462 = vmatpush.bf16.msra.mxu0 %v2012_v1  ;;  %2017 = vmatpush.bf16.msra.mxu1 %v2012_v1  ;;  %v1994_v4 = vld [vmem:[%s2269_s30] sm:$0xff]  ;;  %v1995_v8 = vld [vmem:[%s2269_s30 + $0x8] sm:$0xff]  ;;  %v1996_v12 = vld [vmem:[%s2269_s30 + $0x10] sm:$0xff] }
  0x12   : > { %2018 = vmatpush.bf16.msra.mxu2 %v2012_v1  ;;  %2019 = vmatpush.bf16.msra.mxu3 %v2012_v1  ;;  %v1998_v5 = vld [vmem:[%s2269_s30 + $0x20] sm:$0xff]  ;;  %v1999_v9 = vld [vmem:[%s2269_s30 + $0x28] sm:$0xff]  ;;  %v2000_v13 = vld [vmem:[%s2269_s30 + $0x30] sm:$0xff] }
  0x13   : > { %v2002_v6 = vld [vmem:[%s2269_s30 + $0x40] sm:$0xff]  ;;  %v2003_v10 = vld [vmem:[%s2269_s30 + $0x48] sm:$0xff]  ;;  %v2004_v14 = vld [vmem:[%s2269_s30 + $0x50] sm:$0xff] }
  0x14   : > { %v2006_v7 = vld [vmem:[%s2269_s30 + $0x60] sm:$0xff]  ;;  %v2007_v11 = vld [vmem:[%s2269_s30 + $0x68] sm:$0xff]  ;;  %v2008_v15 = vld [vmem:[%s2269_s30 + $0x70] sm:$0xff] }
  0x15   : > { %463 = vmatpush.bf16.msra.mxu0 %v2011_v2  ;;  %2020 = vmatpush.bf16.msra.mxu1 %v2011_v2  ;;  %v1997_v16 = vld [vmem:[%s2269_s30 + $0x18] sm:$0xff] }
  0x16   : > { %2021 = vmatpush.bf16.msra.mxu2 %v2011_v2  ;;  %2022 = vmatpush.bf16.msra.mxu3 %v2011_v2  ;;  %v2001_v17 = vld [vmem:[%s2269_s30 + $0x38] sm:$0xff] }
  0x17   : > { %v2005_v18 = vld [vmem:[%s2269_s30 + $0x58] sm:$0xff] }
  0x18   : > { %v2009_v19 = vld [vmem:[%s2269_s30 + $0x78] sm:$0xff] }
  0x19   : > { %464 = vmatpush.bf16.msra.mxu0 %v2010_v3  ;;  %2023 = vmatpush.bf16.msra.mxu1 %v2010_v3 }
  0x1a   : > { %2024 = vmatpush.bf16.msra.mxu2 %v2010_v3  ;;  %2025 = vmatpush.bf16.msra.mxu3 %v2010_v3 }
  0x1c   : > { %1974 = vmatmul.msk.bf16.vlgmr.msra.gmra.mxu0 %vm408_vm0, %v1994_v4  ;;  %1978 = vmatmul.msk.bf16.vlgmr.msra.gmra.mxu1 %vm408_vm0, %v1998_v5 }
  0x1d   : > { %1982 = vmatmul.msk.bf16.vlgmr.msra.gmra.mxu2 %vm408_vm0, %v2002_v6  ;;  %1986 = vmatmul.msk.bf16.vlgmr.msra.gmra.mxu3 %vm408_vm0, %v2006_v7 }
  0x2c   : > { %1975 = vmatmul.msk.bf16.gmra.mxu0 %vm408_vm0, %v1995_v8  ;;  %1979 = vmatmul.msk.bf16.gmra.mxu1 %vm408_vm0, %v1999_v9 }
  0x2d   : > { %1983 = vmatmul.msk.bf16.gmra.mxu2 %vm408_vm0, %v2003_v10  ;;  %1987 = vmatmul.msk.bf16.gmra.mxu3 %vm408_vm0, %v2007_v11 }
  0x3c   : > { %1976 = vmatmul.msk.bf16.gmra.mxu0 %vm408_vm0, %v1996_v12  ;;  %1980 = vmatmul.msk.bf16.gmra.mxu1 %vm408_vm0, %v2000_v13 }
  0x3d   : > { %1984 = vmatmul.msk.bf16.gmra.mxu2 %vm408_vm0, %v2004_v14  ;;  %1988 = vmatmul.msk.bf16.gmra.mxu3 %vm408_vm0, %v2008_v15 }
  0x4c   : > { %1977 = vmatmul.msk.bf16.gmra.mxu0 %vm408_vm0, %v1997_v16  ;;  %1981 = vmatmul.msk.bf16.gmra.mxu1 %vm408_vm0, %v2001_v17 }
  0x4d   : > { %1985 = vmatmul.msk.bf16.gmra.mxu2 %vm408_vm0, %v2005_v18  ;;  %1989 = vmatmul.msk.bf16.gmra.mxu3 %vm408_vm0, %v2009_v19 }
  0x99   : > { %v2303_v20 = vpop.f32.mrf.mxu0  ;;  %v2305_v21 = vpop.f32.mrf.mxu1 }
  0x9a   : > { %v615_v36 = vmul.f32 %v2303_v20, %v2303_v20  ;;  %v546_v40 = vsel %vm408_vm0, %v2303_v20, 0.0  ;;  %v623_v9 = vmul.f32 %v2305_v21, %v2305_v21  ;;  %v561_v15 = vsel %vm408_vm0, %v2305_v21, 0.0 }
  0x9c   : > { %v647_v45 = vsel %vm408_vm0, %v615_v36, 0.0  ;;  %v662_v36 = vsel %vm408_vm0, %v623_v9, 0.0 }
  0xa0   : > { %v2311_v24 = vpop.f32.mrf.mxu2  ;;  %v2331_v34 = vpop.f32.mrf.mxu3 }
  0xa1   : > { %v2307_v22 = vpop.f32.mrf.mxu0  ;;  %v2309_v23 = vpop.f32.mrf.mxu1 }
  0xa2   : > { %v616_v35 = vmul.f32 %v2307_v22, %v2307_v22  ;;  %v547_v37 = vsel %vm408_vm0, %v2307_v22, 0.0  ;;  %v624_v16 = vmul.f32 %v2309_v23, %v2309_v23 }
  0xa3   : > { %v548_v44 = vadd.f32 %v547_v37, %v546_v40  ;;  %v563_v37 = vsel %vm408_vm0, %v2309_v23, 0.0 }
  0xa4   : > { %v648_v41 = vsel %vm408_vm0, %v616_v35, 0.0 }
  0xa5   : > { %v649_v49 = vadd.f32 %v648_v41, %v647_v45 }
  0xa8   : > { %v2319_v28 = vpop.f32.mrf.mxu2  ;;  %v2365_v58 = vpop.f32.mrf.mxu3 }
  0xa9   : > { %v2313_v25 = vpop.f32.mrf.mxu0  ;;  %v2315_v26 = vpop.f32.mrf.mxu1 }
  0xaa   : > { %v617_v38 = vmul.f32 %v2313_v25, %v2313_v25  ;;  %v549_v42 = vsel %vm408_vm0, %v2313_v25, 0.0 }
  0xab   : > { %v550_v50 = vadd.f32 %v549_v42, %v548_v44  ;;  %v664_v42 = vsel %vm408_vm0, %v624_v16, 0.0 }
  0xac   : > { %v650_v46 = vsel %vm408_vm0, %v617_v38, 0.0  ;;  %v625_v38 = vmul.f32 %v2315_v26, %v2315_v26 }
  0xad   : > { %v651_v56 = vadd.f32 %v650_v46, %v649_v49 }
  0xb0   : > { %v2325_v31 = vpop.f32.mrf.mxu2  ;;  %v2393_v35 = vpop.f32.mrf.mxu3 }
  0xb1   : > { %v2317_v27 = vpop.f32.mrf.mxu0  ;;  %v2321_v29 = vpop.f32.mrf.mxu1 }
  0xb2   : > { %v618_v43 = vmul.f32 %v2317_v27, %v2317_v27  ;;  %v551_v47 = vsel %vm408_vm0, %v2317_v27, 0.0  ;;  %v626_v44 = vmul.f32 %v2321_v29, %v2321_v29  ;;  %v567_v49 = vsel %vm408_vm0, %v2321_v29, 0.0 }
  0xb3   : > { %v552_v57 = vadd.f32 %v551_v47, %v550_v50 }
  0xb4   : > { %v652_v53 = vsel %vm408_vm0, %v618_v43, 0.0  ;;  %v565_v43 = vsel %vm408_vm0, %v2315_v26, 0.0 }
  0xb5   : > { %v653_v62 = vadd.f32 %v652_v53, %v651_v56 }
  0xb8   : > { %v2341_v39 = vpop.f32.mrf.mxu2 }
  0xb9   : > { %v2323_v30 = vpop.f32.mrf.mxu0  ;;  %v2327_v32 = vpop.f32.mrf.mxu1 }
  0xba   : > { %v619_v48 = vmul.f32 %v2323_v30, %v2323_v30  ;;  %v553_v54 = vsel %vm408_vm0, %v2323_v30, 0.0  ;;  %v627_v50 = vmul.f32 %v2327_v32, %v2327_v32  ;;  %v569_v56 = vsel %vm408_vm0, %v2327_v32, 0.0 }
  0xbb   : > { %v554_v63 = vadd.f32 %v553_v54, %v552_v57 }
  0xbc   : > { %v654_v59 = vsel %vm408_vm0, %v619_v48, 0.0  ;;  %v666_v48 = vsel %vm408_vm0, %v625_v38, 0.0 }
  0xbd   : > { %v655_v2 = vadd.f32 %v654_v59, %v653_v62  ;;  %v670_v62 = vsel %vm408_vm0, %v627_v50, 0.0 }
  0xc0   : > { %v2375_v4 = vpop.f32.mrf.mxu2 }
  0xc1   : > { %v2329_v33 = vpop.f32.mrf.mxu0  ;;  %v2358_v52 = vpop.f32.mrf.mxu1 }
  0xc2   : > { %v620_v55 = vmul.f32 %v2329_v33, %v2329_v33  ;;  %v555_v60 = vsel %vm408_vm0, %v2329_v33, 0.0  ;;  %v628_v57 = vmul.f32 %v2358_v52, %v2358_v52 }
  0xc3   : > { %v556_v3 = vadd.f32 %v555_v60, %v554_v63  ;;  %v571_v63 = vsel %vm408_vm0, %v2358_v52, 0.0 }
  0xc4   : > { %v656_v0 = vsel %vm408_vm0, %v620_v55, 0.0  ;;  %v668_v55 = vsel %vm408_vm0, %v626_v44, 0.0 }
  0xc5   : > { %v657_v6 = vadd.f32 %v656_v0, %v655_v2 }
  0xc8   : > { %v2405_v47 = vpop.f32.mrf.mxu2 }
  0xc9   : > { %v2356_v51 = vpop.f32.mrf.mxu0  ;;  %v2386_v14 = vpop.f32.mrf.mxu1 }
  0xca   : > { %v621_v61 = vmul.f32 %v2356_v51, %v2356_v51  ;;  %v557_v1 = vsel %vm408_vm0, %v2356_v51, 0.0  ;;  %v629_v0 = vmul.f32 %v2386_v14, %v2386_v14 }
  0xcb   : > { %v558_v7 = vadd.f32 %v557_v1, %v556_v3  ;;  %v2424_v3 = vpop.f32.mrf.mxu3 }
  0xcc   : > { %v658_v5 = vsel %vm408_vm0, %v621_v61, 0.0 }
  0xcd   : > { %v659_v12 = vadd.f32 %v658_v5, %v657_v6  ;;  %v672_v5 = vsel %vm408_vm0, %v628_v57, 0.0  ;;  %v573_v6 = vsel %vm408_vm0, %v2386_v14, 0.0 }
  0xd1   : > { %v2378_v8 = vpop.f32.mrf.mxu0  ;;  %v2417_v61 = vpop.f32.mrf.mxu1 }
  0xd2   : > { %v559_v10 = vsel %vm408_vm0, %v2378_v8, 0.0  ;;  %v622_v11 = vmul.f32 %v2378_v8, %v2378_v8 }
  0xd3   : > { %v560_v13 = vadd.f32 %v559_v10, %v558_v7  ;;  %v630_v7 = vmul.f32 %v2417_v61, %v2417_v61 }
  0xd4   : > { %v660_v17 = vsel %vm408_vm0, %v622_v11, 0.0  ;;  %v631_v11 = vmul.f32 %v2311_v24, %v2311_v24 }
  0xd5   : > { %v562_v18 = vadd.f32 %v561_v15, %v560_v13  ;;  %v661_v19 = vadd.f32 %v660_v17, %v659_v12  ;;  %v674_v12 = vsel %vm408_vm0, %v629_v0, 0.0  ;;  %v575_v13 = vsel %vm408_vm0, %v2417_v61, 0.0  ;;  %v2436_v17 = vpop.f32.mrf.mxu2 }
  0xd7   : > { %v564_v40 = vadd.f32 %v563_v37, %v562_v18  ;;  %v663_v41 = vadd.f32 %v662_v36, %v661_v19  ;;  %v577_v18 = vsel %vm408_vm0, %v2311_v24, 0.0  ;;  %v632_v19 = vmul.f32 %v2319_v28, %v2319_v28 }
  0xd8   : > { %v676_v36 = vsel %vm408_vm0, %v630_v7, 0.0  ;;  %v637_v7 = vmul.f32 %v2436_v17, %v2436_v17 }
  0xd9   : > { %v566_v45 = vadd.f32 %v565_v43, %v564_v40  ;;  %v665_v46 = vadd.f32 %v664_v42, %v663_v41  ;;  %v678_v40 = vsel %vm408_vm0, %v631_v11, 0.0  ;;  %v579_v41 = vsel %vm408_vm0, %v2319_v28, 0.0 }
  0xda   : > { %v633_v42 = vmul.f32 %v2325_v31, %v2325_v31 }
  0xdb   : > { %v667_v53 = vadd.f32 %v666_v48, %v665_v46  ;;  %v568_v54 = vadd.f32 %v567_v49, %v566_v45  ;;  %v680_v45 = vsel %vm408_vm0, %v632_v19, 0.0  ;;  %v581_v46 = vsel %vm408_vm0, %v2325_v31, 0.0 }
  0xdc   : > { %v634_v48 = vmul.f32 %v2341_v39, %v2341_v39  ;;  %v690_v19 = vsel %vm408_vm0, %v637_v7, 0.0 }
  0xdd   : > { %v570_v59 = vadd.f32 %v569_v56, %v568_v54  ;;  %v669_v60 = vadd.f32 %v668_v55, %v667_v53  ;;  %v2453_v53 = vpop.f32.mrf.mxu3  ;;  %v682_v54 = vsel %vm408_vm0, %v633_v42, 0.0  ;;  %v583_v55 = vsel %vm408_vm0, %v2341_v39, 0.0 }
  0xde   : > { %v635_v56 = vmul.f32 %v2375_v4, %v2375_v4  ;;  %v640_v42 = vmul.f32 %v2365_v58, %v2365_v58  ;;  %v601_v7 = vsel %vm408_vm0, %v2453_v53, 0.0 }
  0xdf   : > { %v572_v1 = vadd.f32 %v571_v63, %v570_v59  ;;  %v671_v2 = vadd.f32 %v670_v62, %v669_v60  ;;  %v684_v60 = vsel %vm408_vm0, %v634_v48, 0.0  ;;  %v585_v62 = vsel %vm408_vm0, %v2375_v4, 0.0 }
  0xe0   : > { %v636_v63 = vmul.f32 %v2405_v47, %v2405_v47  ;;  %v595_v48 = vsel %vm408_vm0, %v2365_v58, 0.0 }
  0xe1   : > { %v574_v9 = vadd.f32 %v573_v6, %v572_v1  ;;  %v673_v10 = vadd.f32 %v672_v5, %v671_v2  ;;  %v2465_v2 = vpop.f32.mrf.mxu2  ;;  %v686_v5 = vsel %vm408_vm0, %v635_v56, 0.0  ;;  %v587_v6 = vsel %vm408_vm0, %v2405_v47, 0.0 }
  0xe2   : > { %v688_v11 = vsel %vm408_vm0, %v636_v63, 0.0  ;;  %v597_v56 = vsel %vm408_vm0, %v2393_v35, 0.0  ;;  %v642_v63 = vmul.f32 %v2424_v3, %v2424_v3 }
  0xe3   : > { %v675_v15 = vadd.f32 %v674_v12, %v673_v10  ;;  %v576_v16 = vadd.f32 %v575_v13, %v574_v9  ;;  %v589_v12 = vsel %vm408_vm0, %v2436_v17, 0.0  ;;  %v638_v13 = vmul.f32 %v2465_v2, %v2465_v2 }
  0xe5   : > { %v578_v37 = vadd.f32 %v577_v18, %v576_v16  ;;  %v677_v38 = vadd.f32 %v676_v36, %v675_v15  ;;  %v639_v18 = vmul.f32 %v2331_v34, %v2331_v34  ;;  %v591_v36 = vsel %vm408_vm0, %v2465_v2, 0.0 }
  0xe7   : > { %v580_v43 = vadd.f32 %v579_v41, %v578_v37  ;;  %v679_v44 = vadd.f32 %v678_v40, %v677_v38  ;;  %v2482_v40 = vpop.f32.mrf.mxu3  ;;  %v593_v41 = vsel %vm408_vm0, %v2331_v34, 0.0 }
  0xe9   : > { %v582_v49 = vadd.f32 %v581_v46, %v580_v43  ;;  %v681_v50 = vadd.f32 %v680_v45, %v679_v44  ;;  %v692_v43 = vsel %vm408_vm0, %v638_v13, 0.0  ;;  %v694_v46 = vsel %vm408_vm0, %v639_v18, 0.0 }
  0xea   : > { %v603_v13 = vsel %vm408_vm0, %v2482_v40, 0.0 }
  0xeb   : > { %v683_v57 = vadd.f32 %v682_v54, %v681_v50  ;;  %v584_v59 = vadd.f32 %v583_v55, %v582_v49  ;;  %v641_v49 = vmul.f32 %v2393_v35, %v2393_v35  ;;  %v696_v55 = vsel %vm408_vm0, %v640_v42, 0.0 }
  0xed   : > { %v586_v0 = vadd.f32 %v585_v62, %v584_v59  ;;  %v685_v1 = vadd.f32 %v684_v60, %v683_v57  ;;  %v698_v60 = vsel %vm408_vm0, %v641_v49, 0.0  ;;  %v599_v62 = vsel %vm408_vm0, %v2424_v3, 0.0 }
  0xef   : > { %v588_v9 = vadd.f32 %v587_v6, %v586_v0  ;;  %v687_v10 = vadd.f32 %v686_v5, %v685_v1  ;;  %v2502_v5 = vpop.f32.mrf.mxu3  ;;  %v700_v6 = vsel %vm408_vm0, %v642_v63, 0.0 }
  0xf1   : > { %v689_v15 = vadd.f32 %v688_v11, %v687_v10  ;;  %v590_v16 = vadd.f32 %v589_v12, %v588_v9  ;;  %v643_v9 = vmul.f32 %v2453_v53, %v2453_v53 }
  0xf3   : > { %v691_v37 = vadd.f32 %v690_v19, %v689_v15  ;;  %v592_v38 = vadd.f32 %v591_v36, %v590_v16  ;;  %v702_v12 = vsel %vm408_vm0, %v643_v9, 0.0  ;;  %v644_v15 = vmul.f32 %v2482_v40, %v2482_v40 }
  0xf4   : > { %v605_v36 = vsel %vm408_vm0, %v2502_v5, 0.0 }
  0xf5   : > { %v594_v44 = vadd.f32 %v593_v41, %v592_v38  ;;  %v693_v45 = vadd.f32 %v692_v43, %v691_v37  ;;  %v704_v19 = vsel %vm408_vm0, %v644_v15, 0.0  ;;  %v645_v37 = vmul.f32 %v2502_v5, %v2502_v5 }
  0xf7   : > { %v596_v50 = vadd.f32 %v595_v48, %v594_v44  ;;  %v695_v54 = vadd.f32 %v694_v46, %v693_v45  ;;  %v2519_v42 = vpop.f32.mrf.mxu3  ;;  %v706_v43 = vsel %vm408_vm0, %v645_v37, 0.0 }
  0xf8   : > { %v607_v44 = vsel %vm408_vm0, %v2519_v42, 0.0  ;;  %v646_v45 = vmul.f32 %v2519_v42, %v2519_v42 }
  0xf9   : > { %v598_v57 = vadd.f32 %v597_v56, %v596_v50  ;;  %v697_v59 = vadd.f32 %v696_v55, %v695_v54 }
  0xfa   : > { %v708_v49 = vsel %vm408_vm0, %v646_v45, 0.0 }
  0xfb   : > { %v699_v0 = vadd.f32 %v698_v60, %v697_v59  ;;  %v600_v1 = vadd.f32 %v599_v62, %v598_v57 }
  0xfd   : > { %v602_v10 = vadd.f32 %v601_v7, %v600_v1  ;;  %v701_v11 = vadd.f32 %v700_v6, %v699_v0 }
  0xff   : > { %v604_v16 = vadd.f32 %v603_v13, %v602_v10  ;;  %v703_v18 = vadd.f32 %v702_v12, %v701_v11 }
 0x101   : > { %v705_v38 = vadd.f32 %v704_v19, %v703_v18  ;;  %v606_v41 = vadd.f32 %v605_v36, %v604_v16 }
 0x103   : > { %v707_v46 = vadd.f32 %v706_v43, %v705_v38  ;;  %v608_v48 = vadd.f32 %v607_v44, %v606_v41 }
 0x105   : > { %v609_v50 = vrot.slane %v608_v48, 4  ;;  %v709_v54 = vadd.f32 %v708_v49, %v707_v46 }
 0x107   : > { %v610_v55 = vadd.f32 %v609_v50, %v608_v48  ;;  %v710_v56 = vrot.slane %v709_v54, 4 }
 0x109   : > { %v611_v57 = vrot.slane %v610_v55, 2  ;;  %v711_v59 = vadd.f32 %v710_v56, %v709_v54 }
 0x10b   : > { %v612_v60 = vadd.f32 %v611_v57, %v610_v55  ;;  %v712_v62 = vrot.slane %v711_v59, 2 }
 0x10d   : > { %v613_v63 = vrot.slane %v612_v60, 1  ;;  %v713_v0 = vadd.f32 %v712_v62, %v711_v59 }
 0x10f   : > { %v614_v1 = vadd.f32 %v613_v63, %v612_v60  ;;  %v714_v6 = vrot.slane %v713_v0, 1 }
 0x111   : > { %v715_v7 = vadd.f32 %v714_v6, %v713_v0  ;;  %v2527_v9 = vmul.f32 0.00390625, %v614_v1 }
 0x113   : > { %v717_v10 = vmul.f32 0.00390625, %v715_v7  ;;  %v718_v11 = vmul.f32 %v2527_v9, %v2527_v9  ;;  %v721_v38 = vsub.f32 %v2303_v20, %v2527_v9  ;;  %v722_v41 = vsub.f32 %v2307_v22, %v2527_v9 }
 0x114   : > { %v723_v43 = vsub.f32 %v2313_v25, %v2527_v9  ;;  %v724_v44 = vsub.f32 %v2317_v27, %v2527_v9  ;;  %v725_v45 = vsub.f32 %v2323_v30, %v2527_v9  ;;  %v726_v46 = vsub.f32 %v2329_v33, %v2527_v9 }
 0x115   : > { %v719_v12 = vsub.f32 %v717_v10, %v718_v11  ;;  %v727_v48 = vsub.f32 %v2356_v51, %v2527_v9  ;;  %v728_v20 = vsub.f32 %v2378_v8, %v2527_v9  ;;  %v729_v22 = vsub.f32 %v2305_v21, %v2527_v9 }
 0x116   : > { %v730_v25 = vsub.f32 %v2309_v23, %v2527_v9  ;;  %v731_v27 = vsub.f32 %v2315_v26, %v2527_v9  ;;  %v732_v30 = vsub.f32 %v2321_v29, %v2527_v9  ;;  %v733_v33 = vsub.f32 %v2327_v32, %v2527_v9 }
 0x117   : > { %v720_v13 = vmax.f32 %v719_v12, 0.0  ;;  %v734_v51 = vsub.f32 %v2358_v52, %v2527_v9  ;;  %v735_v21 = vsub.f32 %v2386_v14, %v2527_v9  ;;  %v736_v8 = vsub.f32 %v2417_v61, %v2527_v9 }
 0x118   : > { %v737_v23 = vsub.f32 %v2311_v24, %v2527_v9  ;;  %v738_v26 = vsub.f32 %v2319_v28, %v2527_v9  ;;  %v739_v29 = vsub.f32 %v2325_v31, %v2527_v9  ;;  %v740_v32 = vsub.f32 %v2341_v39, %v2527_v9 }
 0x119   : > { %v753_v15 = vadd.f32 1e-05, %v720_v13  ;;  %v741_v52 = vsub.f32 %v2375_v4, %v2527_v9  ;;  %v742_v14 = vsub.f32 %v2405_v47, %v2527_v9  ;;  %v743_v61 = vsub.f32 %v2436_v17, %v2527_v9 }
 0x11a   : > { %v744_v28 = vsub.f32 %v2465_v2, %v2527_v9  ;;  %v745_v31 = vsub.f32 %v2331_v34, %v2527_v9  ;;  %v746_v39 = vsub.f32 %v2365_v58, %v2527_v9  ;;  %v747_v50 = vsub.f32 %v2393_v35, %v2527_v9 }
 0x11b   : > { %2052 = vrsqrt.f32 %v753_v15  ;;  %vm760_vm2 = vweird.f32 %v753_v15  ;;  %v748_v4 = vsub.f32 %v2424_v3, %v2527_v9  ;;  %v749_v47 = vsub.f32 %v2453_v53, %v2527_v9 }
 0x11c   : > { %v750_v17 = vsub.f32 %v2482_v40, %v2527_v9  ;;  %v751_v2 = vsub.f32 %v2502_v5, %v2527_v9  ;;  %v752_v34 = vsub.f32 %v2519_v42, %v2527_v9  ;;  %v2050_v42 = vld [vmem:[%s3862_s2] ss:$0 sm:$0xff] }
 0x121   : > { %v2053_v16 = vpop.eup %2052 }
 0x122   : > { %v755_v18 = vmul.f32 %v2053_v16, %v753_v15  ;;  %vm761_vm1 = vweird.f32 %v2053_v16 }
 0x123   : > { %vm762_vm3 = vmor %vm760_vm2, %vm761_vm1 }
 0x124   : > { %v756_v19 = vmul.f32 %v2053_v16, %v755_v18 }
 0x126   : > { %v757_v36 = vmul.f32 0.5, %v756_v19 }
 0x128   : > { %v758_v37 = vsub.f32 1.5, %v757_v36 }
 0x12a   : > { %v759_v49 = vmul.f32 %v2053_v16, %v758_v37 }
 0x12c   : > { %v763_v24 = vsel %vm762_vm3, %v2053_v16, %v759_v49 }
 0x12d   : > { %v764_v54 = vmul.f32 %v763_v24, %v721_v38  ;;  %v765_v58 = vmul.f32 %v763_v24, %v722_v41  ;;  %v766_v55 = vmul.f32 %v763_v24, %v723_v43  ;;  %v767_v56 = vmul.f32 %v763_v24, %v724_v44 }
 0x12e   : > { %v768_v35 = vmul.f32 %v763_v24, %v725_v45  ;;  %v769_v57 = vmul.f32 %v763_v24, %v726_v46  ;;  %v770_v59 = vmul.f32 %v763_v24, %v727_v48  ;;  %v771_v3 = vmul.f32 %v763_v24, %v728_v20 }
 0x12f   : > { %v772_v60 = vmul.f32 %v763_v24, %v729_v22  ;;  %v773_v62 = vmul.f32 %v763_v24, %v730_v25  ;;  %v774_v53 = vmul.f32 %v763_v24, %v731_v27  ;;  %v775_v63 = vmul.f32 %v763_v24, %v732_v30 }
 0x130   : > { %v776_v0 = vmul.f32 %v763_v24, %v733_v33  ;;  %v777_v40 = vmul.f32 %v763_v24, %v734_v51  ;;  %v778_v1 = vmul.f32 %v763_v24, %v735_v21  ;;  %v779_v6 = vmul.f32 %v763_v24, %v736_v8 }
 0x131   : > { %v780_v5 = vmul.f32 %v763_v24, %v737_v23  ;;  %v781_v7 = vmul.f32 %v763_v24, %v738_v26  ;;  %v782_v10 = vmul.f32 %v763_v24, %v739_v29  ;;  %v783_v9 = vmul.f32 %v763_v24, %v740_v32 }
 0x132   : > { %v784_v11 = vmul.f32 %v763_v24, %v741_v52  ;;  %v785_v12 = vmul.f32 %v763_v24, %v742_v14  ;;  %v786_v13 = vmul.f32 %v763_v24, %v743_v61  ;;  %v787_v15 = vmul.f32 %v763_v24, %v744_v28  ;;  %v2601_v14 = vld [vmem:[%s3863_s3] ss:$0 sm:$0xff] }
 0x133   : > { %v788_v16 = vmul.f32 %v763_v24, %v745_v31  ;;  %v789_v18 = vmul.f32 %v763_v24, %v746_v39  ;;  %v790_v19 = vmul.f32 %v763_v24, %v747_v50  ;;  %v791_v36 = vmul.f32 %v763_v24, %v748_v4 }
 0x134   : > { %v792_v37 = vmul.f32 %v763_v24, %v749_v47  ;;  %v793_v38 = vmul.f32 %v763_v24, %v750_v17  ;;  %v794_v41 = vmul.f32 %v763_v24, %v751_v2  ;;  %v795_v43 = vmul.f32 %v763_v24, %v752_v34 }
 0x135   : > { %v800_v44 = vmul.f32 %v2050_v42, %v764_v54  ;;  %v801_v45 = vmul.f32 %v2050_v42, %v765_v58  ;;  %v802_v46 = vmul.f32 %v2050_v42, %v766_v55  ;;  %v803_v48 = vmul.f32 %v2050_v42, %v767_v56 }
 0x136   : > { %v804_v20 = vmul.f32 %v2050_v42, %v768_v35  ;;  %v805_v22 = vmul.f32 %v2050_v42, %v769_v57  ;;  %v806_v49 = vmul.f32 %v2050_v42, %v770_v59  ;;  %v807_v25 = vmul.f32 %v2050_v42, %v771_v3 }
 0x137   : > { %v808_v27 = vmul.f32 %v2050_v42, %v772_v60  ;;  %v809_v30 = vmul.f32 %v2050_v42, %v773_v62  ;;  %v810_v33 = vmul.f32 %v2050_v42, %v774_v53  ;;  %v811_v51 = vmul.f32 %v2050_v42, %v775_v63 }
 0x138   : > { %v812_v21 = vmul.f32 %v2050_v42, %v776_v0  ;;  %v813_v8 = vmul.f32 %v2050_v42, %v777_v40  ;;  %v814_v23 = vmul.f32 %v2050_v42, %v778_v1  ;;  %v815_v26 = vmul.f32 %v2050_v42, %v779_v6 }
 0x139   : > { %v816_v29 = vmul.f32 %v2050_v42, %v780_v5  ;;  %v817_v32 = vmul.f32 %v2050_v42, %v781_v7  ;;  %v818_v52 = vmul.f32 %v2050_v42, %v782_v10  ;;  %v819_v61 = vmul.f32 %v2050_v42, %v783_v9 }
 0x13a   : > { %v820_v24 = vmul.f32 %v2050_v42, %v784_v11  ;;  %v821_v28 = vmul.f32 %v2050_v42, %v785_v12  ;;  %v822_v31 = vmul.f32 %v2050_v42, %v786_v13  ;;  %v823_v39 = vmul.f32 %v2050_v42, %v787_v15 }
 0x13b   : > { %v824_v50 = vmul.f32 %v2050_v42, %v788_v16  ;;  %v825_v4 = vmul.f32 %v2050_v42, %v789_v18  ;;  %v826_v47 = vmul.f32 %v2050_v42, %v790_v19  ;;  %v827_v17 = vmul.f32 %v2050_v42, %v791_v36 }
 0x13c   : > { %v2603_v2 = vmul.f32 %v2050_v42, %v792_v37  ;;  %v2605_v34 = vmul.f32 %v2050_v42, %v793_v38  ;;  %v2607_v54 = vmul.f32 %v2050_v42, %v794_v41  ;;  %v2609_v58 = vmul.f32 %v2050_v42, %v795_v43 }
 0x13d   : > { %v836_v55 = vadd.f32 %v2601_v14, %v800_v44  ;;  %v837_v56 = vadd.f32 %v2601_v14, %v801_v45  ;;  %v838_v35 = vadd.f32 %v2601_v14, %v802_v46  ;;  %v839_v57 = vadd.f32 %v2601_v14, %v803_v48 }
 0x13e   : > { %v840_v59 = vadd.f32 %v2601_v14, %v804_v20  ;;  %v841_v3 = vadd.f32 %v2601_v14, %v805_v22  ;;  %v842_v60 = vadd.f32 %v2601_v14, %v806_v49  ;;  %v843_v62 = vadd.f32 %v2601_v14, %v807_v25 }
 0x13f   : > { %v844_v53 = vadd.f32 %v2601_v14, %v808_v27  ;;  %v845_v63 = vadd.f32 %v2601_v14, %v809_v30  ;;  %v846_v0 = vadd.f32 %v2601_v14, %v810_v33  ;;  %v847_v40 = vadd.f32 %v2601_v14, %v811_v51 }
 0x140   : > { %v848_v1 = vadd.f32 %v2601_v14, %v812_v21  ;;  %v849_v6 = vadd.f32 %v2601_v14, %v813_v8  ;;  %v850_v5 = vadd.f32 %v2601_v14, %v814_v23  ;;  %v851_v7 = vadd.f32 %v2601_v14, %v815_v26 }
 0x141   : > { %v852_v10 = vadd.f32 %v2601_v14, %v816_v29  ;;  %v853_v42 = vadd.f32 %v2601_v14, %v817_v32  ;;  %v854_v9 = vadd.f32 %v2601_v14, %v818_v52  ;;  %v855_v11 = vadd.f32 %v2601_v14, %v819_v61 }
 0x142   : > { %v856_v12 = vadd.f32 %v2601_v14, %v820_v24  ;;  %v857_v13 = vadd.f32 %v2601_v14, %v821_v28  ;;  %v858_v15 = vadd.f32 %v2601_v14, %v822_v31  ;;  %v2635_v16 = vadd.f32 %v2601_v14, %v823_v39 }
 0x143   : > { %v2638_v18 = vadd.f32 %v2601_v14, %v824_v50  ;;  %v2641_v19 = vadd.f32 %v2601_v14, %v825_v4  ;;  %v2643_v36 = vmul.f32 0.5, %v836_v55  ;;  %v2645_v37 = vmul.f32 0.5, %v837_v56 }
 0x144   : > { %v2647_v38 = vmul.f32 0.5, %v838_v35  ;;  %v2649_v41 = vmul.f32 0.5, %v839_v57  ;;  %v2651_v43 = vmul.f32 0.5, %v840_v59  ;;  %v2653_v44 = vmul.f32 0.5, %v841_v3 }
 0x145   : > { %4078 = vst [vmem:[#allocation2_spill] sm:$0xff] %v2643_v36  ;;  %v2655_v45 = vmul.f32 0.5, %v842_v60  ;;  %v2657_v46 = vmul.f32 0.5, %v843_v62  ;;  %v2659_v48 = vmul.f32 0.5, %v844_v53  ;;  %v2661_v20 = vmul.f32 0.5, %v845_v63 }
 0x146   : > { %4079 = vst [vmem:[#allocation3_spill] sm:$0xff] %v2645_v37  ;;  %v2663_v22 = vmul.f32 0.5, %v846_v0  ;;  %v2665_v49 = vmul.f32 0.5, %v847_v40  ;;  %v2667_v25 = vmul.f32 0.5, %v848_v1  ;;  %v2669_v27 = vmul.f32 0.5, %v849_v6 }
 0x147   : > { %4080 = vst [vmem:[#allocation4_spill] sm:$0xff] %v2647_v38  ;;  %v2671_v30 = vmul.f32 0.5, %v850_v5  ;;  %v2673_v33 = vmul.f32 0.5, %v851_v7  ;;  %v2675_v51 = vmul.f32 0.5, %v852_v10  ;;  %v2677_v21 = vmul.f32 0.5, %v853_v42 }
 0x148   : > { %4081 = vst [vmem:[#allocation5_spill] sm:$0xff] %v2649_v41  ;;  %v2679_v8 = vmul.f32 0.5, %v854_v9  ;;  %v2681_v23 = vmul.f32 0.5, %v855_v11  ;;  %v2683_v26 = vmul.f32 0.5, %v856_v12  ;;  %v2685_v29 = vmul.f32 0.5, %v857_v13 }
 0x149   : > { %4082 = vst [vmem:[#allocation6_spill] sm:$0xff] %v2651_v43  ;;  %v2687_v32 = vmul.f32 0.5, %v858_v15  ;;  %v2689_v52 = vmul.f32 0.70710677, %v836_v55  ;;  %v2691_v61 = vmul.f32 0.70710677, %v837_v56  ;;  %v2694_v24 = vadd.f32 %v2601_v14, %v826_v47 }
 0x14a   : > { %4083 = vst [vmem:[#allocation7_spill] sm:$0xff] %v2653_v44  ;;  %v2696_v28 = vmul.f32 0.70710677, %v838_v35  ;;  %v2698_v31 = vmul.f32 0.70710677, %v839_v57  ;;  %v2703_v50 = vadd.f32 %v2601_v14, %v827_v17  ;;  %v2713_v56 = vadd.f32 %v2601_v14, %v2603_v2 }
 0x14b   : > { %4084 = vst [vmem:[#allocation8_spill] sm:$0xff] %v2655_v45  ;;  %v2700_v39 = vmul.f32 0.70710677, %v840_v59  ;;  %v2705_v4 = vmul.f32 0.70710677, %v841_v3  ;;  %v2723_v17 = vadd.f32 %v2601_v14, %v2605_v34  ;;  %v2733_v2 = vadd.f32 %v2601_v14, %v2607_v54 }
 0x14c   : > { %4085 = vst [vmem:[#allocation9_spill] sm:$0xff] %v2657_v46  ;;  %v2709_v55 = vmul.f32 0.70710677, %v843_v62  ;;  %v2715_v47 = vmul.f32 0.70710677, %v844_v53  ;;  %v2743_v34 = vadd.f32 %v2601_v14, %v2609_v58 }
 0x14d   : > { %4086 = vst [vmem:[#allocation10_spill] sm:$0xff] %v2659_v48  ;;  %v2717_v35 = vmul.f32 0.70710677, %v845_v63  ;;  %v2719_v57 = vmul.f32 0.70710677, %v846_v0 }
 0x14e   : > { %4087 = vst [vmem:[#allocation11_spill] sm:$0xff] %v2661_v20  ;;  %v2725_v59 = vmul.f32 0.70710677, %v847_v40  ;;  %v2727_v3 = vmul.f32 0.70710677, %v848_v1 }
 0x14f   : > { %4088 = vst [vmem:[#allocation12_spill] sm:$0xff] %v2663_v22  ;;  %v2735_v62 = vmul.f32 0.70710677, %v850_v5  ;;  %v2737_v53 = vmul.f32 0.70710677, %v851_v7 }
 0x150   : > { %4089 = vst [vmem:[#allocation13_spill] sm:$0xff] %v2665_v49  ;;  %v2739_v63 = vmul.f32 0.70710677, %v852_v10  ;;  %v2745_v0 = vmul.f32 0.70710677, %v853_v42 }
 0x151   : > { %4090 = vst [vmem:[#allocation14_spill] sm:$0xff] %v2667_v25  ;;  %v2747_v40 = vmul.f32 0.70710677, %v854_v9  ;;  %v2749_v1 = vmul.f32 0.70710677, %v855_v11 }
 0x152   : > { %4091 = vst [vmem:[#allocation15_spill] sm:$0xff] %v2669_v27  ;;  %v2753_v54 = vmul.f32 0.70710677, %v857_v13  ;;  %v2755_v5 = vmul.f32 0.70710677, %v858_v15 }
 0x153   : > { %4092 = vst [vmem:[#allocation16_spill] sm:$0xff] %v2671_v30  ;;  %v2758_v7 = vmul.f32 0.70710677, %v2635_v16  ;;  %v2761_v10 = vmul.f32 0.70710677, %v2638_v18 }
 0x154   : > { %4093 = vst [vmem:[#allocation17_spill] sm:$0xff] %v2673_v33  ;;  %v2764_v14 = vmul.f32 0.70710677, %v2641_v19  ;;  %v2767_v58 = vmul.f32 0.70710677, %v2694_v24 }
 0x155   : > { %4094 = vst [vmem:[#allocation18_spill] sm:$0xff] %v2675_v51  ;;  %v2770_v42 = vmul.f32 0.70710677, %v2703_v50  ;;  %v2773_v9 = vmul.f32 0.70710677, %v2713_v56 }
 0x156   : > { %4095 = vst [vmem:[#allocation19_spill] sm:$0xff] %v2677_v21  ;;  %v2776_v11 = vmul.f32 0.70710677, %v2723_v17  ;;  %v2782_v13 = vmul.f32 0.70710677, %v2743_v34 }
 0x157   : > { %4096 = vst [vmem:[#allocation20_spill] sm:$0xff] %v2679_v8  ;;  %v2785_v15 = vand.u32 2147483647, %v2689_v52  ;;  %v2812_v8 = vand.u32 2147483647, %v2717_v35 }
 0x158   : > { %4097 = vst [vmem:[#allocation21_spill] sm:$0xff] %v2681_v23  ;;  %v2809_v23 = vand.u32 2147483647, %v2715_v47  ;;  %v2815_v21 = vand.u32 2147483647, %v2719_v57 }
 0x159   : > { %4098 = vst [vmem:[#allocation22_spill] sm:$0xff] %v2683_v26  ;;  %v2806_v26 = vand.u32 2147483647, %v2709_v55  ;;  %v2818_v51 = vand.u32 2147483647, %v2725_v59 }
 0x15a   : > { %4099 = vst [vmem:[#allocation23_spill] sm:$0xff] %v2685_v29  ;;  %v2707_v29 = vmul.f32 0.70710677, %v842_v60  ;;  %v2729_v60 = vmul.f32 0.70710677, %v849_v6 }
 0x15b   : > { %4100 = vst [vmem:[#allocation24_spill] sm:$0xff] %v2687_v32  ;;  %v2751_v6 = vmul.f32 0.70710677, %v856_v12  ;;  %v2779_v12 = vmul.f32 0.70710677, %v2733_v2 }
 0x15c   : > { %4101 = vst [vmem:[#allocation25_spill] sm:$0xff] %v2689_v52  ;;  %v2788_v32 = vand.u32 2147483647, %v2691_v61  ;;  %v2821_v33 = vand.u32 2147483647, %v2727_v3 }
 0x15d   : > { %4102 = vst [vmem:[#allocation26_spill] sm:$0xff] %v2691_v61  ;;  %v2824_v30 = vand.u32 2147483647, %v2729_v60  ;;  %v2827_v27 = vand.u32 2147483647, %v2735_v62 }
 0x15e   : > { %4103 = vst [vmem:[#allocation27_spill] sm:$0xff] %v2696_v28  ;;  %v2830_v25 = vand.u32 2147483647, %v2737_v53  ;;  %v2833_v49 = vand.u32 2147483647, %v2739_v63 }
 0x15f   : > { %4104 = vst [vmem:[#allocation28_spill] sm:$0xff] %v2698_v31  ;;  %v2836_v22 = vand.u32 2147483647, %v2745_v0  ;;  %v2839_v20 = vand.u32 2147483647, %v2747_v40 }
 0x160   : > { %4105 = vst [vmem:[#allocation29_spill] sm:$0xff] %v2700_v39  ;;  %v2842_v48 = vand.u32 2147483647, %v2749_v1  ;;  %v2845_v46 = vand.u32 2147483647, %v2751_v6 }
 0x161   : > { %4106 = vst [vmem:[#allocation30_spill] sm:$0xff] %v2703_v50  ;;  %v2791_v50 = vand.u32 2147483647, %v2696_v28  ;;  %v2848_v45 = vand.u32 2147483647, %v2753_v54 }
 0x162   : > { %4107 = vst [vmem:[#allocation31_spill] sm:$0xff] %v2705_v4  ;;  %v2851_v44 = vand.u32 2147483647, %v2755_v5  ;;  %v2854_v43 = vand.u32 2147483647, %v2758_v7 }
 0x163   : > { %4108 = vst [vmem:[#allocation32_spill] sm:$0xff] %v2707_v29  ;;  %v2857_v41 = vand.u32 2147483647, %v2761_v10  ;;  %v2860_v38 = vand.u32 2147483647, %v2764_v14 }
 0x164   : > { %4109 = vst [vmem:[#allocation33_spill] sm:$0xff] %v2709_v55  ;;  %v2881_v37 = vand.u32 2147483647, %v2782_v13 }
 0x165   : > { %4110 = vst [vmem:[#allocation34_spill] sm:$0xff] %v2713_v56  ;;  %v2794_v56 = vand.u32 2147483647, %v2698_v31 }
 0x166   : > { %4111 = vst [vmem:[#allocation35_spill] sm:$0xff] %v2715_v47 }
 0x167   : > { %4112 = vst [vmem:[#allocation36_spill] sm:$0xff] %v2717_v35  ;;  %v983_v35 = vmul.f32 0.3275911, %v2842_v48 }
 0x168   : > { %4113 = vst [vmem:[#allocation37_spill] sm:$0xff] %v2719_v57 }
 0x169   : > { %4114 = vst [vmem:[#allocation38_spill] sm:$0xff] %v2723_v17  ;;  %v2797_v17 = vand.u32 2147483647, %v2700_v39 }
 0x16a   : > { %4115 = vst [vmem:[#allocation39_spill] sm:$0xff] %v2725_v59 }
 0x16b   : > { %4116 = vst [vmem:[#allocation40_spill] sm:$0xff] %v2727_v3  ;;  %v976_v3 = vmul.f32 0.3275911, %v2821_v33 }
 0x16c   : > { %4117 = vst [vmem:[#allocation41_spill] sm:$0xff] %v2729_v60  ;;  %v2900_v60 = vmul.f32 0.5, %v2694_v24  ;;  %v980_v24 = vmul.f32 0.3275911, %v2833_v49 }
 0x16d   : > { %4118 = vst [vmem:[#allocation42_spill] sm:$0xff] %v2733_v2  ;;  %v2800_v2 = vand.u32 2147483647, %v2705_v4  ;;  %v989_v4 = vmul.f32 0.3275911, %v2860_v38  ;;  %v1008_v28 = vadd.f32 1.0, %v976_v3 }
 0x16e   : > { %4119 = vst [vmem:[#allocation43_spill] sm:$0xff] %v2735_v62  ;;  %v972_v62 = vmul.f32 0.3275911, %v2809_v23  ;;  %v1015_v3 = vadd.f32 1.0, %v983_v35 }
 0x16f   : > { %4120 = vst [vmem:[#allocation44_spill] sm:$0xff] %v2737_v53 }
 0x170   : > { %4121 = vst [vmem:[#allocation45_spill] sm:$0xff] %v2739_v63  ;;  %v1004_v55 = vadd.f32 1.0, %v972_v62 }
 0x171   : > { %4122 = vst [vmem:[#allocation46_spill] sm:$0xff] %v2743_v34  ;;  %v2803_v34 = vand.u32 2147483647, %v2707_v29 }
 0x172   : > { %4123 = vst [vmem:[#allocation47_spill] sm:$0xff] %v2745_v0  ;;  %v968_v0 = vmul.f32 0.3275911, %v2797_v17 }
 0x173   : > { %4124 = vst [vmem:[#allocation48_spill] sm:$0xff] %v2747_v40  ;;  %v2871_v40 = vand.u32 2147483647, %v2773_v9  ;;  %v970_v63 = vmul.f32 0.3275911, %v2803_v34 }
 0x174   : > { %4125 = vst [vmem:[#allocation49_spill] sm:$0xff] %v2749_v1  ;;  %v964_v1 = vmul.f32 0.3275911, %v2785_v15  ;;  %v1000_v59 = vadd.f32 1.0, %v968_v0  ;;  %v985_v0 = vmul.f32 0.3275911, %v2848_v45 }
 0x175   : > { %4126 = vst [vmem:[#allocation50_spill] sm:$0xff] %v2751_v6  ;;  %v2864_v6 = vand.u32 2147483647, %v2767_v58 }
 0x176   : > { %4127 = vst [vmem:[#allocation51_spill] sm:$0xff] %v2753_v54  ;;  %v2867_v54 = vand.u32 2147483647, %v2770_v42  ;;  %v996_v36 = vadd.f32 1.0, %v964_v1  ;;  %v974_v1 = vmul.f32 0.3275911, %v2815_v21 }
 0x177   : > { %4128 = vst [vmem:[#allocation52_spill] sm:$0xff] %v2755_v5  ;;  %v965_v5 = vmul.f32 0.3275911, %v2788_v32  ;;  %v990_v39 = vmul.f32 0.3275911, %v2864_v6 }
 0x178   : > { %4129 = vst [vmem:[#allocation53_spill] sm:$0xff] %v2758_v7  ;;  %v2874_v7 = vand.u32 2147483647, %v2776_v11  ;;  %2054 = vrcp.f32 %v996_v36  ;;  %v984_v36 = vmul.f32 0.3275911, %v2845_v46 }
 0x179   : > { %4130 = vst [vmem:[#allocation54_spill] sm:$0xff] %v2761_v10  ;;  %v966_v10 = vmul.f32 0.3275911, %v2791_v50  ;;  %v997_v53 = vadd.f32 1.0, %v965_v5  ;;  %v977_v5 = vmul.f32 0.3275911, %v2824_v30 }
 0x17a   : > { %4131 = vst [vmem:[#allocation55_spill] sm:$0xff] %v2764_v14  ;;  %v2878_v14 = vand.u32 2147483647, %v2779_v12 }
 0x17b   : > { %4132 = vst [vmem:[#allocation56_spill] sm:$0xff] %v2767_v58  ;;  %v967_v58 = vmul.f32 0.3275911, %v2794_v56  ;;  %2056 = vrcp.f32 %v997_v53  ;;  %v986_v53 = vmul.f32 0.3275911, %v2851_v44  ;;  %v1009_v52 = vadd.f32 1.0, %v977_v5 }
 0x17c   : > { %4133 = vst [vmem:[#allocation57_spill] sm:$0xff] %v2770_v42  ;;  %v2885_v42 = vmul.f32 0.5, %v2635_v16  ;;  %v973_v16 = vmul.f32 0.3275911, %v2812_v8 }
 0x17d   : > { %4134 = vst [vmem:[#allocation58_spill] sm:$0xff] %v2773_v9  ;;  %v969_v9 = vmul.f32 0.3275911, %v2800_v2 }
 0x17e   : > { %4135 = vst [vmem:[#allocation59_spill] sm:$0xff] %v2776_v11  ;;  %v2890_v11 = vmul.f32 0.5, %v2638_v18  ;;  %v975_v18 = vmul.f32 0.3275911, %v2818_v51  ;;  %v1005_v29 = vadd.f32 1.0, %v973_v16 }
 0x17f   : > { %4136 = vst [vmem:[#allocation60_spill] sm:$0xff] %v2779_v12  ;;  %v971_v12 = vmul.f32 0.3275911, %v2806_v26  ;;  %v1001_v57 = vadd.f32 1.0, %v969_v9  ;;  %v987_v9 = vmul.f32 0.3275911, %v2854_v43 }
 0x180   : > { %4137 = vst [vmem:[#allocation61_spill] sm:$0xff] %v2782_v13  ;;  %v2895_v13 = vmul.f32 0.5, %v2641_v19  ;;  %v978_v19 = vmul.f32 0.3275911, %v2827_v27  ;;  %v1007_v62 = vadd.f32 1.0, %v975_v18 }
 0x181   : > { %4138 = vst [vmem:[#allocation62_spill] sm:$0xff] %v2785_v15  ;;  %v1003_v47 = vadd.f32 1.0, %v971_v12  ;;  %v1006_v12 = vadd.f32 1.0, %v974_v1  ;;  %v993_v16 = vmul.f32 0.3275911, %v2874_v7 }
 0x182   : > { %4139 = vst [vmem:[#allocation63_spill] sm:$0xff] %v2788_v32  ;;  %v995_v1 = vmul.f32 0.3275911, %v2881_v37  ;;  %v1010_v18 = vadd.f32 1.0, %v978_v19 }
 0x183   : > { %4140 = vst [vmem:[#allocation64_spill] sm:$0xff] %v2791_v50 }
 0x184   : > { %4141 = vst [vmem:[#allocation65_spill] sm:$0xff] %v2794_v56 }
 0x185   : > { %4142 = vst [vmem:[#allocation66_spill] sm:$0xff] %v2797_v17 }
 0x186   : > { %4143 = vst [vmem:[#allocation67_spill] sm:$0xff] %v2800_v2 }
 0x187   : > { %4144 = vst [vmem:[#allocation68_spill] sm:$0xff] %v2803_v34 }
 0x188   : > { %4145 = vst [vmem:[#allocation69_spill] sm:$0xff] %v2806_v26 }
 0x189   : > { %4146 = vst [vmem:[#allocation70_spill] sm:$0xff] %v2809_v23 }
 0x18a   : > { %4147 = vst [vmem:[#allocation71_spill] sm:$0xff] %v2812_v8 }
 0x18b   : > { %4148 = vst [vmem:[#allocation72_spill] sm:$0xff] %v2815_v21 }
 0x18c   : > { %4149 = vst [vmem:[#allocation73_spill] sm:$0xff] %v2818_v51 }
 0x18d   : > { %4150 = vst [vmem:[#allocation74_spill] sm:$0xff] %v2821_v33 }
 0x18e   : > { %4151 = vst [vmem:[#allocation75_spill] sm:$0xff] %v2824_v30 }
 0x18f   : > { %4152 = vst [vmem:[#allocation76_spill] sm:$0xff] %v2827_v27 }
 0x190   : > { %4153 = vst [vmem:[#allocation77_spill] sm:$0xff] %v2830_v25 }
 0x191   : > { %4154 = vst [vmem:[#allocation78_spill] sm:$0xff] %v2833_v49 }
 0x192   : > { %4155 = vst [vmem:[#allocation79_spill] sm:$0xff] %v2836_v22 }
 0x193   : > { %4156 = vst [vmem:[#allocation80_spill] sm:$0xff] %v2839_v20 }
 0x194   : > { %4157 = vst [vmem:[#allocation81_spill] sm:$0xff] %v2842_v48 }
 0x195   : > { %4158 = vst [vmem:[#allocation82_spill] sm:$0xff] %v2845_v46 }
 0x196   : > { %4159 = vst [vmem:[#allocation83_spill] sm:$0xff] %v2848_v45 }
 0x197   : > { %4160 = vst [vmem:[#allocation84_spill] sm:$0xff] %v2851_v44 }
 0x198   : > { %4161 = vst [vmem:[#allocation85_spill] sm:$0xff] %v2854_v43  ;;  %v1018_v43 = vadd.f32 1.0, %v986_v53 }
 0x199   : > { %4162 = vst [vmem:[#allocation86_spill] sm:$0xff] %v2857_v41 }
 0x19a   : > { %4163 = vst [vmem:[#allocation87_spill] sm:$0xff] %v2860_v38 }
 0x19b   : > { %4164 = vst [vmem:[#allocation88_spill] sm:$0xff] %v2864_v6 }
 0x19c   : > { %4165 = vst [vmem:[#allocation89_spill] sm:$0xff] %v2867_v54 }
 0x19d   : > { %4166 = vst [vmem:[#allocation90_spill] sm:$0xff] %v2871_v40 }
 0x19e   : > { %4167 = vst [vmem:[#allocation91_spill] sm:$0xff] %v2874_v7 }
 0x19f   : > { %4168 = vst [vmem:[#allocation92_spill] sm:$0xff] %v2878_v14 }
 0x1a0   : > { %4169 = vst [vmem:[#allocation93_spill] sm:$0xff] %v2881_v37 }
 0x1a1   : > { %4170 = vst [vmem:[#allocation94_spill] sm:$0xff] %v2885_v42  ;;  %v998_v42 = vadd.f32 1.0, %v966_v10  ;;  %v981_v10 = vmul.f32 0.3275911, %v2836_v22 }
 0x1a2   : > { %4171 = vst [vmem:[#allocation95_spill] sm:$0xff] %v2890_v11  ;;  %v999_v11 = vadd.f32 1.0, %v967_v58  ;;  %v982_v58 = vmul.f32 0.3275911, %v2839_v20 }
 0x1a3   : > { %4172 = vst [vmem:[#allocation96_spill] sm:$0xff] %v2895_v13  ;;  %v979_v13 = vmul.f32 0.3275911, %v2830_v25  ;;  %2058 = vrcp.f32 %v998_v42  ;;  %v988_v42 = vmul.f32 0.3275911, %v2857_v41  ;;  %v1016_v41 = vadd.f32 1.0, %v984_v36 }
 0x1a4   : > { %4173 = vst [vmem:[#allocation97_spill] sm:$0xff] %v2900_v60  ;;  %v1002_v60 = vadd.f32 1.0, %v970_v63  ;;  %2060 = vrcp.f32 %v999_v11  ;;  %v2916_v63 = vpop.eup %2054  ;;  %v1014_v7 = vadd.f32 1.0, %v982_v58 }
 0x1a5   : > { %2062 = vrcp.f32 %v1000_v59  ;;  %4174 = vst [vmem:[#allocation98_spill] sm:$0xff] %v2916_v63  ;;  %v2920_v11 = vpop.eup %2056  ;;  %v991_v59 = vmul.f32 0.3275911, %v2867_v54  ;;  %v1012_v54 = vadd.f32 1.0, %v980_v24  ;;  %v1020_v37 = vadd.f32 1.0, %v988_v42 }
 0x1a6   : > { %2064 = vrcp.f32 %v1001_v57  ;;  %v992_v57 = vmul.f32 0.3275911, %v2871_v40  ;;  %v1013_v40 = vadd.f32 1.0, %v981_v10  ;;  %v1021_v24 = vadd.f32 1.0, %v989_v4 }
 0x1a7   : > { %2066 = vrcp.f32 %v1002_v60  ;;  %v994_v60 = vmul.f32 0.3275911, %v2878_v14  ;;  %v1017_v14 = vadd.f32 1.0, %v985_v0  ;;  %v1022_v10 = vadd.f32 1.0, %v990_v39 }
 0x1a8   : > { %2068 = vrcp.f32 %v1003_v47  ;;  %v1011_v47 = vadd.f32 1.0, %v979_v13  ;;  %v1060_v13 = vmul.f32 1.0614054, %v2916_v63  ;;  %v1061_v35 = vmul.f32 1.0614054, %v2920_v11 }
 0x1a9   : > { %v2924_v31 = vpop.eup %2058  ;;  %2070 = vrcp.f32 %v1004_v55  ;;  %v1023_v36 = vadd.f32 1.0, %v991_v59  ;;  %v2946_v0 = vadd.f32 1.0, %v992_v57  ;;  %v1026_v57 = vadd.f32 1.0, %v994_v60 }
 0x1aa   : > { %4175 = vst [vmem:[#allocation99_spill] sm:$0xff] %v2924_v31  ;;  %v2928_v61 = vpop.eup %2060  ;;  %2072 = vrcp.f32 %v1005_v29  ;;  %v1019_v29 = vadd.f32 1.0, %v987_v9  ;;  %v1092_v59 = vadd.f32 -1.4531521, %v1060_v13 }
 0x1ab   : > { %4176 = vst [vmem:[#allocation100_spill] sm:$0xff] %v2928_v61  ;;  %v2932_v6 = vpop.eup %2062  ;;  %2074 = vrcp.f32 %v1006_v12  ;;  %v1063_v9 = vmul.f32 1.0614054, %v2928_v61 }
 0x1ac   : > { %4177 = vst [vmem:[#allocation101_spill] sm:$0xff] %v2932_v6  ;;  %v2934_v38 = vpop.eup %2064  ;;  %2076 = vrcp.f32 %v1007_v62  ;;  %v1064_v39 = vmul.f32 1.0614054, %v2932_v6 }
 0x1ad   : > { %4178 = vst [vmem:[#allocation102_spill] sm:$0xff] %v2934_v38  ;;  %v2936_v55 = vpop.eup %2066  ;;  %2078 = vrcp.f32 %v1008_v28  ;;  %v1062_v28 = vmul.f32 1.0614054, %v2924_v31  ;;  %v1065_v42 = vmul.f32 1.0614054, %v2934_v38 }
 0x1ae   : > { %v2938_v5 = vpop.eup %2068  ;;  %2080 = vrcp.f32 %v1009_v52  ;;  %v2951_v52 = vadd.f32 1.0, %v993_v16  ;;  %v1066_v12 = vmul.f32 1.0614054, %v2936_v55  ;;  %v1095_v13 = vadd.f32 -1.4531521, %v1063_v9 }
 0x1af   : > { %4179 = vst [vmem:[#allocation103_spill] sm:$0xff] %v2938_v5  ;;  %v2941_v19 = vpop.eup %2070  ;;  %2082 = vrcp.f32 %v1010_v18  ;;  %v1067_v16 = vmul.f32 1.0614054, %v2938_v5  ;;  %v1093_v18 = vadd.f32 -1.4531521, %v1061_v35  ;;  %v2971_v35 = vmul.f32 %v2916_v63, %v1092_v59 }
 0x1b0   : > { %4180 = vst [vmem:[#allocation104_spill] sm:$0xff] %v2941_v19  ;;  %v2944_v58 = vpop.eup %2072  ;;  %2084 = vrcp.f32 %v1011_v47  ;;  %v1027_v47 = vadd.f32 1.0, %v995_v1  ;;  %v1068_v44 = vmul.f32 1.0614054, %v2941_v19  ;;  %v1094_v45 = vadd.f32 -1.4531521, %v1062_v28 }
 0x1b1   : > { %4181 = vst [vmem:[#allocation105_spill] sm:$0xff] %v2944_v58  ;;  %v2949_v53 = vpop.eup %2074  ;;  %2086 = vrcp.f32 %v1012_v54  ;;  %v1069_v46 = vmul.f32 1.0614054, %v2944_v58  ;;  %v1096_v48 = vadd.f32 -1.4531521, %v1064_v39 }
 0x1b2   : > { %4182 = vst [vmem:[#allocation106_spill] sm:$0xff] %v2949_v53  ;;  %v2955_v4 = vpop.eup %2076  ;;  %2088 = vrcp.f32 %v1013_v40  ;;  %v1098_v60 = vadd.f32 -1.4531521, %v1066_v12  ;;  %v1099_v28 = vadd.f32 -1.4531521, %v1067_v16  ;;  %v2983_v39 = vmul.f32 %v2924_v31, %v1094_v45 }
 0x1b3   : > { %4183 = vst [vmem:[#allocation107_spill] sm:$0xff] %v2955_v4  ;;  %v2959_v62 = vpop.eup %2078  ;;  %2090 = vrcp.f32 %v1014_v7  ;;  %v1097_v7 = vadd.f32 -1.4531521, %v1065_v42  ;;  %v1071_v9 = vmul.f32 1.0614054, %v2955_v4  ;;  %v2991_v59 = vmul.f32 %v2932_v6, %v1096_v48 }
 0x1b4   : > { %4184 = vst [vmem:[#allocation108_spill] sm:$0xff] %v2959_v62  ;;  %v2962_v54 = vpop.eup %2080  ;;  %2092 = vrcp.f32 %v1015_v3  ;;  %v1070_v3 = vmul.f32 1.0614054, %v2949_v53  ;;  %v1101_v12 = vadd.f32 -1.4531521, %v1069_v46  ;;  %v3000_v45 = vmul.f32 %v2936_v55, %v1098_v60 }
 0x1b5   : > { %4185 = vst [vmem:[#allocation109_spill] sm:$0xff] %v2962_v54  ;;  %v2965_v40 = vpop.eup %2082  ;;  %2094 = vrcp.f32 %v1016_v41  ;;  %v2977_v41 = vmul.f32 %v2920_v11, %v1093_v18  ;;  %v3006_v48 = vmul.f32 %v2938_v5, %v1099_v28  ;;  %v1103_v49 = vadd.f32 -1.4531521, %v1071_v9 }
 0x1b6   : > { %4186 = vst [vmem:[#allocation110_spill] sm:$0xff] %v2965_v40  ;;  %v2968_v20 = vpop.eup %2084  ;;  %2096 = vrcp.f32 %v1017_v14  ;;  %v1100_v14 = vadd.f32 -1.4531521, %v1068_v44  ;;  %v2997_v44 = vmul.f32 %v2934_v38, %v1097_v7  ;;  %v1102_v46 = vadd.f32 -1.4531521, %v1070_v3 }
 0x1b7   : > { %4187 = vst [vmem:[#allocation111_spill] sm:$0xff] %v2968_v20  ;;  %v2973_v1 = vpop.eup %2086  ;;  %2098 = vrcp.f32 %v1018_v43  ;;  %v2988_v43 = vmul.f32 %v2928_v61, %v1095_v13  ;;  %v3020_v28 = vmul.f32 %v2944_v58, %v1101_v12  ;;  %v1135_v26 = vmul.f32 %v2955_v4, %v1103_v49 }
 0x1b8   : > { %4188 = vst [vmem:[#allocation112_spill] sm:$0xff] %v2973_v1  ;;  %v2979_v22 = vpop.eup %2088  ;;  %2100 = vrcp.f32 %v1019_v29  ;;  %v1072_v29 = vmul.f32 1.0614054, %v2959_v62  ;;  %v3012_v7 = vmul.f32 %v2941_v19, %v1100_v14  ;;  %v1076_v3 = vmul.f32 1.0614054, %v2973_v1 }
 0x1b9   : > { %4189 = vst [vmem:[#allocation113_spill] sm:$0xff] %v2979_v22  ;;  %v2985_v42 = vpop.eup %2090  ;;  %2102 = vrcp.f32 %v1020_v37  ;;  %v1073_v37 = vmul.f32 1.0614054, %v2962_v54  ;;  %v3031_v33 = vmul.f32 %v2949_v53, %v1102_v46 }
 0x1ba   : > { %4190 = vst [vmem:[#allocation114_spill] sm:$0xff] %v2985_v42  ;;  %v2993_v16 = vpop.eup %2092  ;;  %2104 = vrcp.f32 %v1021_v24  ;;  %v1074_v24 = vmul.f32 1.0614054, %v2965_v40  ;;  %v1078_v9 = vmul.f32 1.0614054, %v2985_v42 }
 0x1bb   : > { %4191 = vst [vmem:[#allocation115_spill] sm:$0xff] %v2993_v16  ;;  %v3002_v18 = vpop.eup %2094  ;;  %2106 = vrcp.f32 %v1022_v10  ;;  %v1075_v10 = vmul.f32 1.0614054, %v2968_v20  ;;  %v1104_v14 = vadd.f32 -1.4531521, %v1072_v29 }
 0x1bc   : > { %4192 = vst [vmem:[#allocation116_spill] sm:$0xff] %v3002_v18  ;;  %v3008_v13 = vpop.eup %2096  ;;  %2108 = vrcp.f32 %v1023_v36  ;;  %v1077_v36 = vmul.f32 1.0614054, %v2979_v22  ;;  %v1105_v30 = vadd.f32 -1.4531521, %v1073_v37 }
 0x1bd   : > { %4193 = vst [vmem:[#allocation117_spill] sm:$0xff] %v3008_v13  ;;  %v3014_v60 = vpop.eup %2098  ;;  %2110 = vrcp.f32 %v2946_v0  ;;  %v1079_v0 = vmul.f32 1.0614054, %v2993_v16  ;;  %v1080_v51 = vmul.f32 1.0614054, %v3002_v18 }
 0x1be   : > { %4194 = vst [vmem:[#allocation118_spill] sm:$0xff] %v3014_v60  ;;  %v3022_v25 = vpop.eup %2100  ;;  %2112 = vrcp.f32 %v2951_v52  ;;  %v1081_v52 = vmul.f32 1.0614054, %v3008_v13  ;;  %v1106_v21 = vadd.f32 -1.4531521, %v1074_v24 }
 0x1bf   : > { %4195 = vst [vmem:[#allocation119_spill] sm:$0xff] %v3022_v25  ;;  %v3027_v27 = vpop.eup %2102  ;;  %2114 = vrcp.f32 %v1026_v57  ;;  %v1082_v29 = vmul.f32 1.0614054, %v3014_v60  ;;  %v1107_v23 = vadd.f32 -1.4531521, %v1075_v10  ;;  %v1137_v10 = vmul.f32 %v2962_v54, %v1105_v30 }
 0x1c0   : > { %4196 = vst [vmem:[#allocation120_spill] sm:$0xff] %v3027_v27  ;;  %v3033_v12 = vpop.eup %2104  ;;  %2116 = vrcp.f32 %v1027_v47  ;;  %v1108_v57 = vadd.f32 -1.4531521, %v1076_v3  ;;  %v1083_v46 = vmul.f32 1.0614054, %v3022_v25  ;;  %v1136_v47 = vmul.f32 %v2959_v62, %v1104_v14 }
 0x1c1   : > { %4197 = vst [vmem:[#allocation121_spill] sm:$0xff] %v3033_v12  ;;  %v3037_v8 = vpop.eup %2106  ;;  %v1109_v34 = vadd.f32 -1.4531521, %v1077_v36  ;;  %v1110_v2 = vadd.f32 -1.4531521, %v1078_v9  ;;  %v1138_v36 = vmul.f32 %v2965_v40, %v1106_v21  ;;  %v1139_v4 = vmul.f32 %v2968_v20, %v1107_v23 }
 0x1c2   : > { %4198 = vst [vmem:[#allocation122_spill] sm:$0xff] %v3037_v8  ;;  %v3041_v37 = vpop.eup %2108  ;;  %v1084_v24 = vmul.f32 1.0614054, %v3027_v27  ;;  %v1085_v56 = vmul.f32 1.0614054, %v3033_v12  ;;  %v1140_v53 = vmul.f32 %v2973_v1, %v1108_v57 }
 0x1c3   : > { %4199 = vst [vmem:[#allocation123_spill] sm:$0xff] %v3041_v37  ;;  %v3045_v17 = vpop.eup %2110  ;;  %v1111_v50 = vadd.f32 -1.4531521, %v1079_v0  ;;  %v1086_v49 = vmul.f32 1.0614054, %v3037_v8  ;;  %v1141_v58 = vmul.f32 %v2979_v22, %v1109_v34 }
 0x1c4   : > { %4200 = vst [vmem:[#allocation124_spill] sm:$0xff] %v3045_v17  ;;  %v3050_v3 = vpop.eup %2112  ;;  %v1112_v32 = vadd.f32 -1.4531521, %v1080_v51  ;;  %v1113_v15 = vadd.f32 -1.4531521, %v1081_v52  ;;  %v1142_v51 = vmul.f32 %v2985_v42, %v1110_v2 }
 0x1c5   : > { %4201 = vst [vmem:[#allocation125_spill] sm:$0xff] %v3050_v3  ;;  %v3054_v9 = vpop.eup %2114  ;;  %v1087_v14 = vmul.f32 1.0614054, %v3041_v37  ;;  %v1114_v62 = vadd.f32 -1.4531521, %v1082_v29  ;;  %v1143_v19 = vmul.f32 %v2993_v16, %v1111_v50 }
 0x1c6   : > { %4202 = vst [vmem:[#allocation126_spill] sm:$0xff] %v3054_v9  ;;  %v3059_v0 = vpop.eup %2116  ;;  %v1088_v30 = vmul.f32 1.0614054, %v3045_v17  ;;  %v1115_v54 = vadd.f32 -1.4531521, %v1083_v46  ;;  %v1144_v57 = vmul.f32 %v3002_v18, %v1112_v32  ;;  %v1145_v1 = vmul.f32 %v3008_v13, %v1113_v15 }
 0x1c7   : > { %v1089_v21 = vmul.f32 1.0614054, %v3050_v3  ;;  %v1116_v52 = vadd.f32 -1.4531521, %v1084_v24  ;;  %v1117_v40 = vadd.f32 -1.4531521, %v1085_v56  ;;  %v1146_v34 = vmul.f32 %v3014_v60, %v1114_v62 }
 0x1c8   : > { %v1090_v29 = vmul.f32 1.0614054, %v3054_v9  ;;  %v1118_v23 = vadd.f32 -1.4531521, %v1086_v49  ;;  %v1091_v20 = vmul.f32 1.0614054, %v3059_v0  ;;  %v1147_v24 = vmul.f32 %v3022_v25, %v1115_v54 }
 0x1c9   : > { %v1119_v46 = vadd.f32 -1.4531521, %v1087_v14  ;;  %v1156_v2 = vadd.f32 1.4214138, %v2971_v35  ;;  %v1120_v42 = vadd.f32 -1.4531521, %v1088_v30  ;;  %v1148_v49 = vmul.f32 %v3027_v27, %v1116_v52 }
 0x1ca   : > { %v1157_v56 = vadd.f32 1.4214138, %v2977_v41  ;;  %v1158_v50 = vadd.f32 1.4214138, %v2983_v39  ;;  %v1121_v16 = vadd.f32 -1.4531521, %v1089_v21  ;;  %v1149_v32 = vmul.f32 %v3033_v12, %v1117_v40 }
 0x1cb   : > { %v1159_v15 = vadd.f32 1.4214138, %v2988_v43  ;;  %v1122_v13 = vadd.f32 -1.4531521, %v1090_v29  ;;  %v1150_v14 = vmul.f32 %v3037_v8, %v1118_v23  ;;  %v1160_v62 = vadd.f32 1.4214138, %v2991_v59 }
 0x1cc   : > { %v1161_v35 = vadd.f32 1.4214138, %v2997_v44  ;;  %v1123_v30 = vadd.f32 -1.4531521, %v1091_v20  ;;  %v1151_v54 = vmul.f32 %v3041_v37, %v1119_v46  ;;  %v1162_v41 = vadd.f32 1.4214138, %v3000_v45 }
 0x1cd   : > { %v1163_v39 = vadd.f32 1.4214138, %v3006_v48  ;;  %v1152_v21 = vmul.f32 %v3045_v17, %v1120_v42  ;;  %v1164_v40 = vadd.f32 1.4214138, %v3012_v7  ;;  %v1165_v43 = vadd.f32 1.4214138, %v3020_v28 }
 0x1ce   : > { %v1166_v52 = vadd.f32 1.4214138, %v3031_v33  ;;  %v1153_v29 = vmul.f32 %v3050_v3, %v1121_v16  ;;  %v1167_v59 = vadd.f32 1.4214138, %v1135_v26  ;;  %v1168_v23 = vadd.f32 1.4214138, %v1136_v47 }
 0x1cf   : > { %v1169_v44 = vadd.f32 1.4214138, %v1137_v10  ;;  %v1154_v20 = vmul.f32 %v3054_v9, %v1122_v13  ;;  %v1170_v46 = vadd.f32 1.4214138, %v1138_v36  ;;  %v1171_v37 = vadd.f32 1.4214138, %v1139_v4 }
 0x1d0   : > { %v1172_v45 = vadd.f32 1.4214138, %v1140_v53  ;;  %v1155_v48 = vmul.f32 %v3059_v0, %v1123_v30  ;;  %v1173_v8 = vadd.f32 1.4214138, %v1141_v58  ;;  %v1174_v42 = vadd.f32 1.4214138, %v1142_v51 }
 0x1d1   : > { %v1175_v17 = vadd.f32 1.4214138, %v1143_v19  ;;  %v1176_v7 = vadd.f32 1.4214138, %v1144_v57  ;;  %v1177_v12 = vadd.f32 1.4214138, %v1145_v1  ;;  %v1188_v33 = vmul.f32 %v2916_v63, %v1156_v2 }
 0x1d2   : > { %v1178_v28 = vadd.f32 1.4214138, %v1146_v34  ;;  %v1179_v27 = vadd.f32 1.4214138, %v1147_v24  ;;  %v1180_v16 = vadd.f32 1.4214138, %v1148_v49  ;;  %v1189_v47 = vmul.f32 %v2920_v11, %v1157_v56 }
 0x1d3   : > { %v1181_v26 = vadd.f32 1.4214138, %v1149_v32  ;;  %v1182_v10 = vadd.f32 1.4214138, %v1150_v14  ;;  %v1183_v13 = vadd.f32 1.4214138, %v1151_v54  ;;  %v1190_v53 = vmul.f32 %v2924_v31, %v1158_v50 }
 0x1d4   : > { %v1184_v36 = vadd.f32 1.4214138, %v1152_v21  ;;  %v1185_v4 = vadd.f32 1.4214138, %v1153_v29  ;;  %v1186_v30 = vadd.f32 1.4214138, %v1154_v20  ;;  %v1191_v19 = vmul.f32 %v2928_v61, %v1159_v15 }
 0x1d5   : > { %v1187_v58 = vadd.f32 1.4214138, %v1155_v48  ;;  %v1192_v1 = vmul.f32 %v2932_v6, %v1160_v62  ;;  %v1193_v51 = vmul.f32 %v2934_v38, %v1161_v35  ;;  %v1194_v57 = vmul.f32 %v2936_v55, %v1162_v41  ;;  %v4203_v2 = vld [vmem:[#allocation104_spill] sm:$0xff]  ;;  %v4204_v56 = vld [vmem:[#allocation105_spill] sm:$0xff]  ;;  %v4205_v32 = vld [vmem:[#allocation106_spill] sm:$0xff] }
 0x1d6   : > { %v1195_v34 = vmul.f32 %v2938_v5, %v1163_v39  ;;  %v1196_v24 = vmul.f32 %v4203_v2, %v1164_v40  ;;  %v1197_v49 = vmul.f32 %v4204_v56, %v1165_v43  ;;  %v1198_v14 = vmul.f32 %v4205_v32, %v1166_v52  ;;  %v4206_v50 = vld [vmem:[#allocation107_spill] sm:$0xff]  ;;  %v4207_v21 = vld [vmem:[#allocation108_spill] sm:$0xff]  ;;  %v4208_v20 = vld [vmem:[#allocation109_spill] sm:$0xff] }
 0x1d7   : > { %v1199_v54 = vmul.f32 %v4206_v50, %v1167_v59  ;;  %v1200_v29 = vmul.f32 %v4207_v21, %v1168_v23  ;;  %v1201_v15 = vmul.f32 %v4208_v20, %v1169_v44  ;;  %v4209_v48 = vld [vmem:[#allocation110_spill] sm:$0xff]  ;;  %v4210_v6 = vld [vmem:[#allocation111_spill] sm:$0xff]  ;;  %v4211_v38 = vld [vmem:[#allocation112_spill] sm:$0xff]  ;;  %v1205_v39 = vmul.f32 %v2979_v22, %v1173_v8 }
 0x1d8   : > { %v1202_v62 = vmul.f32 %v4209_v48, %v1170_v46  ;;  %v1203_v35 = vmul.f32 %v4210_v6, %v1171_v37  ;;  %v1204_v41 = vmul.f32 %v4211_v38, %v1172_v45  ;;  %v4212_v5 = vld [vmem:[#allocation114_spill] sm:$0xff]  ;;  %v4213_v2 = vld [vmem:[#allocation115_spill] sm:$0xff]  ;;  %v1208_v52 = vmul.f32 %v3002_v18, %v1176_v7  ;;  %v4214_v32 = vld [vmem:[#allocation117_spill] sm:$0xff] }
 0x1d9   : > { %v1206_v40 = vmul.f32 %v4212_v5, %v1174_v42  ;;  %v1207_v43 = vmul.f32 %v4213_v2, %v1175_v17  ;;  %v1209_v59 = vmul.f32 %v4214_v32, %v1177_v12  ;;  %v1210_v23 = vmul.f32 %v3014_v60, %v1178_v28  ;;  %v4215_v46 = vld [vmem:[#allocation120_spill] sm:$0xff]  ;;  %v4216_v37 = vld [vmem:[#allocation121_spill] sm:$0xff]  ;;  %v4217_v38 = vld [vmem:[#allocation122_spill] sm:$0xff] }
 0x1da   : > { %v1220_v21 = vadd.f32 -0.28449672, %v1188_v33  ;;  %v1211_v44 = vmul.f32 %v3022_v25, %v1179_v27  ;;  %v1212_v48 = vmul.f32 %v4215_v46, %v1180_v16  ;;  %v1213_v6 = vmul.f32 %v4216_v37, %v1181_v26  ;;  %v4218_v22 = vld [vmem:[#allocation123_spill] sm:$0xff]  ;;  %v4219_v5 = vld [vmem:[#allocation124_spill] sm:$0xff] }
 0x1db   : > { %v1221_v45 = vadd.f32 -0.28449672, %v1189_v47  ;;  %v1214_v8 = vmul.f32 %v4217_v38, %v1182_v10  ;;  %v1215_v42 = vmul.f32 %v4218_v22, %v1183_v13  ;;  %v1216_v17 = vmul.f32 %v4219_v5, %v1184_v36 }
 0x1dc   : > { %v1222_v2 = vadd.f32 -0.28449672, %v1190_v53  ;;  %v1217_v7 = vmul.f32 %v3050_v3, %v1185_v4  ;;  %v1218_v12 = vmul.f32 %v3054_v9, %v1186_v30  ;;  %v1219_v28 = vmul.f32 %v3059_v0, %v1187_v58 }
 0x1dd   : > { %v1223_v33 = vadd.f32 -0.28449672, %v1191_v19  ;;  %v1224_v27 = vadd.f32 -0.28449672, %v1192_v1  ;;  %v1225_v25 = vadd.f32 -0.28449672, %v1193_v51  ;;  %v1252_v26 = vmul.f32 %v2916_v63, %v1220_v21 }
 0x1de   : > { %v1226_v16 = vadd.f32 -0.28449672, %v1194_v57  ;;  %v1227_v47 = vadd.f32 -0.28449672, %v1195_v34  ;;  %v1228_v37 = vadd.f32 -0.28449672, %v1196_v24  ;;  %v1253_v13 = vmul.f32 %v2920_v11, %v1221_v45 }
 0x1df   : > { %v1229_v10 = vadd.f32 -0.28449672, %v1197_v49  ;;  %v1230_v22 = vadd.f32 -0.28449672, %v1198_v14  ;;  %v1231_v36 = vadd.f32 -0.28449672, %v1199_v54  ;;  %v1254_v4 = vmul.f32 %v2924_v31, %v1222_v2 }
 0x1e0   : > { %v1232_v53 = vadd.f32 -0.28449672, %v1200_v29  ;;  %v1233_v3 = vadd.f32 -0.28449672, %v1201_v15  ;;  %v1234_v30 = vadd.f32 -0.28449672, %v1202_v62  ;;  %v1255_v58 = vmul.f32 %v2928_v61, %v1223_v33 }
 0x1e1   : > { %v1235_v9 = vadd.f32 -0.28449672, %v1203_v35  ;;  %v1236_v19 = vadd.f32 -0.28449672, %v1204_v41  ;;  %v1237_v1 = vadd.f32 -0.28449672, %v1205_v39  ;;  %v1258_v2 = vmul.f32 %v2936_v55, %v1226_v16 }
 0x1e2   : > { %v1238_v51 = vadd.f32 -0.28449672, %v1206_v40  ;;  %v4220_v57 = vld [vmem:[#allocation101_spill] sm:$0xff]  ;;  %v1239_v34 = vadd.f32 -0.28449672, %v1207_v43  ;;  %v4221_v63 = vld [vmem:[#allocation102_spill] sm:$0xff] }
 0x1e3   : > { %v1256_v21 = vmul.f32 %v4220_v57, %v1224_v27  ;;  %v1240_v24 = vadd.f32 -0.28449672, %v1208_v52  ;;  %v1241_v49 = vadd.f32 -0.28449672, %v1209_v59  ;;  %v1257_v45 = vmul.f32 %v4221_v63, %v1225_v25  ;;  %v4222_v31 = vld [vmem:[#allocation103_spill] sm:$0xff]  ;;  %v4223_v61 = vld [vmem:[#allocation104_spill] sm:$0xff] }
 0x1e4   : > { %v1242_v14 = vadd.f32 -0.28449672, %v1210_v23  ;;  %v1243_v54 = vadd.f32 -0.28449672, %v1211_v44  ;;  %v1244_v29 = vadd.f32 -0.28449672, %v1212_v48  ;;  %v1259_v33 = vmul.f32 %v4222_v31, %v1227_v47 }
 0x1e5   : > { %v1245_v15 = vadd.f32 -0.28449672, %v1213_v6  ;;  %v1246_v62 = vadd.f32 -0.28449672, %v1214_v8  ;;  %v1247_v35 = vadd.f32 -0.28449672, %v1215_v42  ;;  %v1260_v27 = vmul.f32 %v4223_v61, %v1228_v37 }
 0x1e6   : > { %v1248_v41 = vadd.f32 -0.28449672, %v1216_v17  ;;  %v1249_v39 = vadd.f32 -0.28449672, %v1217_v7  ;;  %v1250_v40 = vadd.f32 -0.28449672, %v1218_v12  ;;  %v1261_v52 = vmul.f32 %v4204_v56, %v1229_v10 }
 0x1e7   : > { %v1251_v43 = vadd.f32 -0.28449672, %v1219_v28  ;;  %v4224_v59 = vld [vmem:[#allocation106_spill] sm:$0xff]  ;;  %v1263_v23 = vmul.f32 %v4206_v50, %v1231_v36  ;;  %v4225_v48 = vld [vmem:[#allocation108_spill] sm:$0xff]  ;;  %v1265_v6 = vmul.f32 %v4208_v20, %v1233_v3  ;;  %v4227_v16 = vld [vmem:[#allocation111_spill] sm:$0xff]  ;;  %v1273_v36 = vmul.f32 %v4214_v32, %v1241_v49 }
 0x1e8   : > { %v1262_v25 = vmul.f32 %v4224_v59, %v1230_v22  ;;  %v1264_v44 = vmul.f32 %v4225_v48, %v1232_v53  ;;  %v4226_v8 = vld [vmem:[#allocation110_spill] sm:$0xff]  ;;  %v1267_v47 = vmul.f32 %v4227_v16, %v1235_v9  ;;  %v4228_v17 = vld [vmem:[#allocation112_spill] sm:$0xff]  ;;  %v4229_v12 = vld [vmem:[#allocation113_spill] sm:$0xff]  ;;  %v1272_v22 = vmul.f32 %v3002_v18, %v1240_v24 }
 0x1e9   : > { %v1266_v42 = vmul.f32 %v4226_v8, %v1234_v30  ;;  %v1268_v7 = vmul.f32 %v4228_v17, %v1236_v19  ;;  %v1269_v31 = vmul.f32 %v4229_v12, %v1237_v1  ;;  %v4230_v37 = vld [vmem:[#allocation114_spill] sm:$0xff]  ;;  %v4231_v61 = vld [vmem:[#allocation115_spill] sm:$0xff]  ;;  %v1274_v53 = vmul.f32 %v3014_v60, %v1242_v14  ;;  %v4233_v8 = vld [vmem:[#allocation121_spill] sm:$0xff] }
 0x1ea   : > { %v1270_v28 = vmul.f32 %v4230_v37, %v1238_v51  ;;  %v1271_v10 = vmul.f32 %v4231_v61, %v1239_v34  ;;  %v4232_v48 = vld [vmem:[#allocation119_spill] sm:$0xff]  ;;  %v1276_v30 = vmul.f32 %v4215_v46, %v1244_v29  ;;  %v1277_v9 = vmul.f32 %v4233_v8, %v1245_v15  ;;  %v4235_v34 = vld [vmem:[#allocation125_spill] sm:$0xff]  ;;  %v4236_v18 = vld [vmem:[#allocation126_spill] sm:$0xff] }
 0x1eb   : > { %v1275_v3 = vmul.f32 %v4232_v48, %v1243_v54  ;;  %v1278_v19 = vmul.f32 %v4217_v38, %v1246_v62  ;;  %v1284_v17 = vadd.f32 0.2548296, %v1252_v26  ;;  %v4234_v1 = vld [vmem:[#allocation123_spill] sm:$0xff]  ;;  %v1280_v51 = vmul.f32 %v4219_v5, %v1248_v41  ;;  %v4237_v38 = vld [vmem:[#allocation98_spill] sm:$0xff] }
 0x1ec   : > { %v1279_v12 = vmul.f32 %v4234_v1, %v1247_v35  ;;  %v1281_v61 = vmul.f32 %v4235_v34, %v1249_v39  ;;  %v1285_v24 = vadd.f32 0.2548296, %v1253_v13  ;;  %v1282_v49 = vmul.f32 %v4236_v18, %v1250_v40  ;;  %v4238_v40 = vld [vmem:[#allocation99_spill] sm:$0xff] }
 0x1ed   : > { %v1286_v32 = vadd.f32 0.2548296, %v1254_v4  ;;  %v1287_v14 = vadd.f32 0.2548296, %v1255_v58  ;;  %v1288_v60 = vadd.f32 0.2548296, %v1256_v21  ;;  %v1283_v54 = vmul.f32 %v3059_v0, %v1251_v43 }
 0x1ee   : > { %v1289_v29 = vadd.f32 0.2548296, %v1257_v45  ;;  %v1290_v46 = vadd.f32 0.2548296, %v1258_v2  ;;  %v1291_v15 = vadd.f32 0.2548296, %v1259_v33  ;;  %v3156_v35 = vmul.f32 %v4237_v38, %v1284_v17 }
 0x1ef   : > { %v1292_v8 = vadd.f32 0.2548296, %v1260_v27  ;;  %v1293_v62 = vadd.f32 0.2548296, %v1261_v52  ;;  %v1294_v26 = vadd.f32 0.2548296, %v1262_v25  ;;  %v3159_v13 = vmul.f32 %v2920_v11, %v1285_v24 }
 0x1f0   : > { %v1295_v41 = vadd.f32 0.2548296, %v1263_v23  ;;  %v1296_v5 = vadd.f32 0.2548296, %v1264_v44  ;;  %v1297_v39 = vadd.f32 0.2548296, %v1265_v6  ;;  %v3162_v43 = vmul.f32 %v4238_v40, %v1286_v32 }
 0x1f1   : > { %v1298_v4 = vadd.f32 0.2548296, %v1266_v42  ;;  %v1299_v58 = vadd.f32 0.2548296, %v1267_v47  ;;  %v1300_v21 = vadd.f32 0.2548296, %v1268_v7  ;;  %v3168_v44 = vmul.f32 %v4220_v57, %v1288_v60 }
 0x1f2   : > { %v1301_v45 = vadd.f32 0.2548296, %v1269_v31  ;;  %v1302_v2 = vadd.f32 0.2548296, %v1270_v28  ;;  %v1303_v33 = vadd.f32 0.2548296, %v1271_v10  ;;  %v3171_v47 = vmul.f32 %v4221_v63, %v1289_v29 }
 0x1f3   : > { %v4239_v27 = vld [vmem:[#allocation100_spill] sm:$0xff]  ;;  %v1304_v38 = vadd.f32 0.2548296, %v1272_v22  ;;  %v1305_v25 = vadd.f32 0.2548296, %v1273_v36  ;;  %v3174_v7 = vmul.f32 %v2936_v55, %v1290_v46  ;;  %v4240_v36 = vld [vmem:[#allocation103_spill] sm:$0xff]  ;;  %v3186_v63 = vmul.f32 %v4224_v59, %v1294_v26 }
 0x1f4   : > { %v3165_v52 = vmul.f32 %v4239_v27, %v1287_v14  ;;  %v1306_v23 = vadd.f32 0.2548296, %v1274_v53  ;;  %v1307_v11 = vadd.f32 0.2548296, %v1275_v3  ;;  %v1308_v6 = vadd.f32 0.2548296, %v1276_v30 }
 0x1f5   : > { %v1309_v42 = vadd.f32 0.2548296, %v1277_v9  ;;  %v1310_v32 = vadd.f32 0.2548296, %v1278_v19  ;;  %v1311_v17 = vadd.f32 0.2548296, %v1279_v12  ;;  %v3177_v53 = vmul.f32 %v4240_v36, %v1291_v15 }
 0x1f6   : > { %v1312_v31 = vadd.f32 0.2548296, %v1280_v51  ;;  %v1313_v28 = vadd.f32 0.2548296, %v1281_v61  ;;  %v1314_v10 = vadd.f32 0.2548296, %v1282_v49  ;;  %v3183_v3 = vmul.f32 %v4204_v56, %v1293_v62 }
 0x1f7   : > { %v1315_v22 = vadd.f32 0.2548296, %v1283_v54  ;;  %v4241_v60 = vld [vmem:[#allocation104_spill] sm:$0xff]  ;;  %v3189_v12 = vmul.f32 %v4206_v50, %v1295_v41  ;;  %v3195_v61 = vmul.f32 %v4208_v20, %v1297_v39  ;;  %v4243_v30 = vld [vmem:[#allocation110_spill] sm:$0xff]  ;;  %v3202_v56 = vmul.f32 %v4227_v16, %v1299_v58  ;;  %v4247_v24 = vld [vmem:[#allocation113_spill] sm:$0xff] }
 0x1f8   : > { %v3180_v57 = vmul.f32 %v4241_v60, %v1292_v8  ;;  %v4242_v55 = vld [vmem:[#allocation108_spill] sm:$0xff]  ;;  %v3198_v9 = vmul.f32 %v4243_v30, %v1298_v4  ;;  %v4244_v8 = vld [vmem:[#allocation62_spill] sm:$0xff]  ;;  %v3208_v50 = vmul.f32 %v4247_v24, %v1301_v45  ;;  %v4249_v49 = vld [vmem:[#allocation63_spill] sm:$0xff]  ;;  %v3212_v14 = vmul.f32 %v4230_v37, %v1302_v2 }
 0x1f9   : > { %v3192_v46 = vmul.f32 %v4242_v55, %v1296_v5  ;;  %v1348_v19 = vsub.f32 0.0, %v4244_v8  ;;  %v4245_v51 = vld [vmem:[#allocation112_spill] sm:$0xff]  ;;  %v1349_v5 = vsub.f32 0.0, %v4249_v49  ;;  %v4251_v20 = vld [vmem:[#allocation115_spill] sm:$0xff]  ;;  %v4256_v26 = vld [vmem:[#allocation117_spill] sm:$0xff]  ;;  %v3228_v58 = vmul.f32 %v4232_v48, %v1307_v11 }
 0x1fa   : > { %v3205_v59 = vmul.f32 %v4245_v51, %v1300_v21  ;;  %4248 = vst [vmem:[#allocation107_spill] sm:$0xff] %v3208_v50  ;;  %v3215_v54 = vmul.f32 %v4251_v20, %v1303_v33  ;;  %v4253_v29 = vld [vmem:[#allocation116_spill] sm:$0xff]  ;;  %v3222_v41 = vmul.f32 %v4256_v26, %v1305_v25  ;;  %v4258_v39 = vld [vmem:[#allocation118_spill] sm:$0xff]  ;;  %v4261_v21 = vld [vmem:[#allocation65_spill] sm:$0xff] }
 0x1fb   : > { %4250 = vst [vmem:[#allocation109_spill] sm:$0xff] %v3212_v14  ;;  %v3218_v15 = vmul.f32 %v4253_v29, %v1304_v38  ;;  %v4255_v62 = vld [vmem:[#allocation64_spill] sm:$0xff]  ;;  %v3225_v4 = vmul.f32 %v4258_v39, %v1306_v23  ;;  %v1351_v37 = vsub.f32 0.0, %v4261_v21  ;;  %v4264_v2 = vld [vmem:[#allocation121_spill] sm:$0xff]  ;;  %v4266_v27 = vld [vmem:[#allocation66_spill] sm:$0xff]  ;;  %v1380_v36 = vmul.f32 %v1348_v19, %v4244_v8 }
 0x1fc   : > { %4246 = vst [vmem:[#allocation105_spill] sm:$0xff] %v3205_v59  ;;  %v1350_v16 = vsub.f32 0.0, %v4255_v62  ;;  %v4262_v40 = vld [vmem:[#allocation120_spill] sm:$0xff]  ;;  %v3235_v33 = vmul.f32 %v4264_v2, %v1309_v42  ;;  %v1352_v38 = vsub.f32 0.0, %v4266_v27  ;;  %v4267_v25 = vld [vmem:[#allocation122_spill] sm:$0xff]  ;;  %v3243_v23 = vmul.f32 %v4234_v1, %v1311_v17  ;;  %v4270_v48 = vld [vmem:[#allocation67_spill] sm:$0xff] }
 0x1fd   : > { %4252 = vst [vmem:[#allocation101_spill] sm:$0xff] %v3215_v54  ;;  %v3232_v45 = vmul.f32 %v4262_v40, %v1308_v6  ;;  %v3240_v60 = vmul.f32 %v4267_v25, %v1310_v32  ;;  %v1353_v11 = vsub.f32 0.0, %v4270_v48  ;;  %v1381_v55 = vmul.f32 %v1349_v5, %v4249_v49  ;;  %v4271_v30 = vld [vmem:[#allocation124_spill] sm:$0xff]  ;;  %v4277_v17 = vld [vmem:[#allocation69_spill] sm:$0xff]  ;;  %v4278_v5 = vld [vmem:[#allocation70_spill] sm:$0xff] }
 0x1fe   : > { %4254 = vst [vmem:[#allocation102_spill] sm:$0xff] %v3218_v15  ;;  %v3248_v6 = vmul.f32 %v4271_v30, %v1312_v31  ;;  %v3251_v42 = vmul.f32 %v4235_v34, %v1313_v28  ;;  %v4274_v51 = vld [vmem:[#allocation68_spill] sm:$0xff]  ;;  %v1382_v8 = vmul.f32 %v1350_v16, %v4255_v62  ;;  %v3256_v32 = vmul.f32 %v4236_v18, %v1314_v10  ;;  %v4279_v20 = vld [vmem:[#allocation71_spill] sm:$0xff]  ;;  %v4281_v62 = vld [vmem:[#allocation73_spill] sm:$0xff] }
 0x1ff   : > { %4257 = vst [vmem:[#allocation106_spill] sm:$0xff] %v3222_v41  ;;  %v1354_v24 = vsub.f32 0.0, %v4274_v51  ;;  %v3259_v1 = vmul.f32 %v3059_v0, %v1315_v22  ;;  %v1355_v19 = vsub.f32 0.0, %v4277_v17  ;;  %v1383_v49 = vmul.f32 %v1351_v37, %v4261_v21  ;;  %v4280_v26 = vld [vmem:[#allocation72_spill] sm:$0xff]  ;;  %v4282_v0 = vld [vmem:[#allocation74_spill] sm:$0xff]  ;;  %v4283_v40 = vld [vmem:[#allocation75_spill] sm:$0xff] }
 0x200   : > { %4259 = vst [vmem:[#allocation111_spill] sm:$0xff] %v3225_v4  ;;  %v1356_v31 = vsub.f32 0.0, %v4278_v5  ;;  %v1357_v29 = vsub.f32 0.0, %v4279_v20  ;;  %v1384_v34 = vmul.f32 %v1352_v38, %v4266_v27  ;;  %v1412_v28 = vmul.f32 1.442695, %v1380_v36  ;;  %v4284_v25 = vld [vmem:[#allocation76_spill] sm:$0xff] }
 0x201   : > { %4260 = vst [vmem:[#allocation114_spill] sm:$0xff] %v3228_v58  ;;  %v1358_v39 = vsub.f32 0.0, %v4280_v26  ;;  %v1359_v16 = vsub.f32 0.0, %v4281_v62  ;;  %v1385_v18 = vmul.f32 %v1353_v11, %v4270_v48  ;;  %v1414_v10 = vmul.f32 1.442695, %v1381_v55  ;;  %v4286_v36 = vld [vmem:[#allocation78_spill] sm:$0xff] }
 0x202   : > { %4263 = vst [vmem:[#allocation119_spill] sm:$0xff] %v3232_v45  ;;  %v1360_v22 = vsub.f32 0.0, %v4282_v0  ;;  %v1361_v2 = vsub.f32 0.0, %v4283_v40  ;;  %v1386_v21 = vmul.f32 %v1354_v24, %v4274_v51  ;;  %v1416_v37 = vmul.f32 1.442695, %v1382_v8  ;;  %v4287_v11 = vld [vmem:[#allocation79_spill] sm:$0xff] }
 0x203   : > { %4265 = vst [vmem:[#allocation123_spill] sm:$0xff] %v3235_v33  ;;  %v1362_v30 = vsub.f32 0.0, %v4284_v25  ;;  %v1387_v27 = vmul.f32 %v1355_v19, %v4277_v17  ;;  %v1418_v38 = vmul.f32 1.442695, %v1383_v49  ;;  %2118 = vpow2.f32 %v1412_v28  ;;  %v4288_v24 = vld [vmem:[#allocation80_spill] sm:$0xff]  ;;  %v4289_v17 = vld [vmem:[#allocation81_spill] sm:$0xff] }
 0x204   : > { %4268 = vst [vmem:[#allocation125_spill] sm:$0xff] %v3240_v60  ;;  %v1420_v48 = vmul.f32 1.442695, %v1384_v34  ;;  %v1365_v55 = vsub.f32 0.0, %v4287_v11  ;;  %2120 = vpow2.f32 %v1414_v10  ;;  %v1422_v51 = vmul.f32 1.442695, %v1385_v18 }
 0x205   : > { %4269 = vst [vmem:[#allocation126_spill] sm:$0xff] %v3243_v23  ;;  %v1389_v23 = vmul.f32 %v1357_v29, %v4279_v20  ;;  %v1366_v8 = vsub.f32 0.0, %v4288_v24  ;;  %v1390_v60 = vmul.f32 %v1358_v39, %v4280_v26  ;;  %2122 = vpow2.f32 %v1416_v37  ;;  %v4291_v29 = vld [vmem:[#allocation83_spill] sm:$0xff] }
 0x206   : > { %4272 = vst [vmem:[#allocation98_spill] sm:$0xff] %v3248_v6  ;;  %v1388_v6 = vmul.f32 %v1356_v31, %v4278_v5  ;;  %v1424_v33 = vmul.f32 1.442695, %v1386_v21  ;;  %v1367_v19 = vsub.f32 0.0, %v4289_v17  ;;  %v1391_v49 = vmul.f32 %v1359_v16, %v4281_v62  ;;  %v4290_v31 = vld [vmem:[#allocation82_spill] sm:$0xff]  ;;  %v4292_v21 = vld [vmem:[#allocation84_spill] sm:$0xff] }
 0x207   : > { %4273 = vst [vmem:[#allocation99_spill] sm:$0xff] %v3251_v42  ;;  %v1364_v42 = vsub.f32 0.0, %v4286_v36  ;;  %2124 = vpow2.f32 %v1418_v38  ;;  %v1426_v5 = vmul.f32 1.442695, %v1387_v27  ;;  %v1368_v34 = vsub.f32 0.0, %v4290_v31  ;;  %v4293_v38 = vld [vmem:[#allocation85_spill] sm:$0xff] }
 0x208   : > { %4275 = vst [vmem:[#allocation100_spill] sm:$0xff] %v3256_v32  ;;  %v1392_v28 = vmul.f32 %v1360_v22, %v4282_v0  ;;  %2126 = vpow2.f32 %v1420_v48  ;;  %v1428_v20 = vmul.f32 1.442695, %v1388_v6  ;;  %v1369_v18 = vsub.f32 0.0, %v4291_v29 }
 0x209   : > { %4276 = vst [vmem:[#allocation103_spill] sm:$0xff] %v3259_v1  ;;  %v4285_v1 = vld [vmem:[#allocation77_spill] sm:$0xff]  ;;  %v1393_v10 = vmul.f32 %v1361_v2, %v4283_v40  ;;  %2128 = vpow2.f32 %v1422_v51  ;;  %v1430_v26 = vmul.f32 1.442695, %v1389_v23  ;;  %v3287_v39 = vpop.eup %2118  ;;  %v1370_v37 = vsub.f32 0.0, %v4292_v21  ;;  %v4294_v40 = vld [vmem:[#allocation86_spill] sm:$0xff] }
 0x20a   : > { %v1363_v32 = vsub.f32 0.0, %v4285_v1  ;;  %v1394_v62 = vmul.f32 %v1362_v30, %v4284_v25  ;;  %2130 = vpow2.f32 %v1424_v33  ;;  %v1432_v16 = vmul.f32 1.442695, %v1390_v60  ;;  %v3291_v27 = vpop.eup %2120  ;;  %v4295_v33 = vld [vmem:[#allocation87_spill] sm:$0xff] }
 0x20b   : > { %v1371_v0 = vsub.f32 0.0, %v4293_v38  ;;  %2132 = vpow2.f32 %v1426_v5  ;;  %v1434_v22 = vmul.f32 1.442695, %v1391_v49  ;;  %v3295_v48 = vpop.eup %2122  ;;  %v1372_v23 = vsub.f32 0.0, %v4294_v40 }
 0x20c   : > { %v1395_v6 = vmul.f32 %v1363_v32, %v4285_v1  ;;  %v1396_v2 = vmul.f32 %v1364_v42, %v4286_v36  ;;  %2134 = vpow2.f32 %v1428_v20  ;;  %v1436_v51 = vmul.f32 1.442695, %v1392_v28  ;;  %v4296_v32 = vld [vmem:[#allocation88_spill] sm:$0xff]  ;;  %v4297_v42 = vld [vmem:[#allocation89_spill] sm:$0xff] }
 0x20d   : > { %v3299_v45 = vpop.eup %2124  ;;  %v1373_v60 = vsub.f32 0.0, %v4295_v33  ;;  %v1397_v25 = vmul.f32 %v1365_v55, %v4287_v11  ;;  %2136 = vpow2.f32 %v1430_v26  ;;  %v1438_v30 = vmul.f32 1.442695, %v1393_v10  ;;  %v4298_v11 = vld [vmem:[#allocation90_spill] sm:$0xff] }
 0x20e   : > { %v3303_v58 = vpop.eup %2126  ;;  %v1374_v1 = vsub.f32 0.0, %v4296_v32  ;;  %v1398_v49 = vmul.f32 %v1366_v8, %v4288_v24  ;;  %2138 = vpow2.f32 %v1432_v16  ;;  %v1440_v5 = vmul.f32 1.442695, %v1394_v62  ;;  %v4299_v24 = vld [vmem:[#allocation91_spill] sm:$0xff] }
 0x20f   : > { %v3307_v4 = vpop.eup %2128  ;;  %v1375_v36 = vsub.f32 0.0, %v4297_v42  ;;  %v1399_v28 = vmul.f32 %v1367_v19, %v4289_v17  ;;  %2140 = vpow2.f32 %v1434_v22  ;;  %v1442_v20 = vmul.f32 1.442695, %v1395_v6  ;;  %v4300_v17 = vld [vmem:[#allocation92_spill] sm:$0xff] }
 0x210   : > { %v3311_v41 = vpop.eup %2130  ;;  %v1376_v55 = vsub.f32 0.0, %v4298_v11  ;;  %v1400_v10 = vmul.f32 %v1368_v34, %v4290_v31  ;;  %2142 = vpow2.f32 %v1436_v51  ;;  %v1444_v26 = vmul.f32 1.442695, %v1396_v2  ;;  %v4301_v31 = vld [vmem:[#allocation93_spill] sm:$0xff] }
 0x211   : > { %v3315_v15 = vpop.eup %2132  ;;  %v1377_v8 = vsub.f32 0.0, %v4299_v24  ;;  %v1401_v62 = vmul.f32 %v1369_v18, %v4291_v29  ;;  %2144 = vpow2.f32 %v1438_v30  ;;  %v1446_v16 = vmul.f32 1.442695, %v1397_v25 }
 0x212   : > { %v3319_v54 = vpop.eup %2134  ;;  %v1378_v19 = vsub.f32 0.0, %v4300_v17  ;;  %v1402_v6 = vmul.f32 %v1370_v37, %v4292_v21  ;;  %2146 = vpow2.f32 %v1440_v5  ;;  %v1448_v22 = vmul.f32 1.442695, %v1398_v49 }
 0x213   : > { %v2137_v14 = vpop.eup %2136  ;;  %v1379_v34 = vsub.f32 0.0, %v4301_v31  ;;  %v1403_v2 = vmul.f32 %v1371_v0, %v4293_v38  ;;  %2148 = vpow2.f32 %v1442_v20  ;;  %v1450_v51 = vmul.f32 1.442695, %v1399_v28 }
 0x214   : > { %v2139_v50 = vpop.eup %2138  ;;  %v1404_v29 = vmul.f32 %v1372_v23, %v4294_v40  ;;  %v1405_v18 = vmul.f32 %v1373_v60, %v4295_v33  ;;  %2150 = vpow2.f32 %v1444_v26  ;;  %v1452_v25 = vmul.f32 1.442695, %v1400_v10 }
 0x215   : > { %v2141_v30 = vpop.eup %2140  ;;  %v1406_v59 = vmul.f32 %v1374_v1, %v4296_v32  ;;  %v1407_v21 = vmul.f32 %v1375_v36, %v4297_v42  ;;  %2152 = vpow2.f32 %v1446_v16  ;;  %v1454_v37 = vmul.f32 1.442695, %v1401_v62 }
 0x216   : > { %v2143_v49 = vpop.eup %2142  ;;  %v1408_v5 = vmul.f32 %v1376_v55, %v4298_v11  ;;  %v1409_v38 = vmul.f32 %v1377_v8, %v4299_v24  ;;  %2154 = vpow2.f32 %v1448_v22  ;;  %v1456_v0 = vmul.f32 1.442695, %v1402_v6 }
 0x217   : > { %v2145_v28 = vpop.eup %2144  ;;  %v1410_v40 = vmul.f32 %v1378_v19, %v4300_v17  ;;  %v1411_v23 = vmul.f32 %v1379_v34, %v4301_v31  ;;  %2156 = vpow2.f32 %v1450_v51  ;;  %v1458_v33 = vmul.f32 1.442695, %v1403_v2 }
 0x218   : > { %v2147_v60 = vpop.eup %2146  ;;  %2158 = vpow2.f32 %v1452_v25  ;;  %v1460_v32 = vmul.f32 1.442695, %v1404_v29  ;;  %v3335_v1 = vmul.f32 %v3287_v39, %v3156_v35  ;;  %v3339_v42 = vmul.f32 %v3291_v27, %v3159_v13  ;;  %v4305_v29 = vld [vmem:[#allocation105_spill] sm:$0xff]  ;;  %v4307_v25 = vld [vmem:[#allocation107_spill] sm:$0xff] }
 0x219   : > { %v2149_v36 = vpop.eup %2148  ;;  %2160 = vpow2.f32 %v1454_v37  ;;  %v1462_v20 = vmul.f32 1.442695, %v1405_v18  ;;  %v1464_v11 = vmul.f32 1.442695, %v1406_v59  ;;  %v3343_v55 = vmul.f32 %v3295_v48, %v3162_v43 }
 0x21a   : > { %v2151_v10 = vpop.eup %2150  ;;  %2162 = vpow2.f32 %v1456_v0  ;;  %v1466_v26 = vmul.f32 1.442695, %v1407_v21  ;;  %v1468_v24 = vmul.f32 1.442695, %v1408_v5  ;;  %v3347_v35 = vmul.f32 %v3299_v45, %v3165_v52 }
 0x21b   : > { %v2153_v39 = vpop.eup %2152  ;;  %2164 = vpow2.f32 %v1458_v33  ;;  %v1470_v13 = vmul.f32 1.442695, %v1409_v38  ;;  %v1472_v27 = vmul.f32 1.442695, %v1410_v40  ;;  %v1474_v8 = vmul.f32 1.442695, %v1411_v23 }
 0x21c   : > { %v2155_v62 = vpop.eup %2154  ;;  %2166 = vpow2.f32 %v1460_v32  ;;  %v3351_v59 = vmul.f32 %v3303_v58, %v3168_v44  ;;  %v1508_v43 = vsub.f32 1.0, %v3335_v1  ;;  %v4055_v48 = vsub.f32 1.0, %v3339_v42  ;;  %v4310_v38 = vld [vmem:[#allocation101_spill] sm:$0xff] }
 0x21d   : > { %v2157_v16 = vpop.eup %2156  ;;  %2168 = vpow2.f32 %v1462_v20  ;;  %v3357_v52 = vmul.f32 %v3307_v4, %v3171_v47  ;;  %v3361_v45 = vmul.f32 %v3311_v41, %v3174_v7  ;;  %v4056_v17 = vsub.f32 1.0, %v3343_v55 }
 0x21e   : > { %v2159_v19 = vpop.eup %2158  ;;  %2170 = vpow2.f32 %v1464_v11  ;;  %v3366_v44 = vmul.f32 %v3315_v15, %v3177_v53  ;;  %v3370_v58 = vmul.f32 %v3319_v54, %v3180_v57  ;;  %v4057_v6 = vsub.f32 1.0, %v3347_v35  ;;  %v4316_v11 = vld [vmem:[#allocation114_spill] sm:$0xff] }
 0x21f   : > { %v2161_v47 = vpop.eup %2160  ;;  %2172 = vpow2.f32 %v1466_v26  ;;  %v3374_v4 = vmul.f32 %v2137_v14, %v3183_v3  ;;  %v3377_v7 = vmul.f32 %v2139_v50, %v3186_v63  ;;  %v3380_v41 = vmul.f32 %v2141_v30, %v3189_v12  ;;  %v4336_v26 = vld [vmem:[#allocation36_spill] sm:$0xff] }
 0x220   : > { %v2163_v22 = vpop.eup %2162  ;;  %2174 = vpow2.f32 %v1468_v24  ;;  %v3383_v53 = vmul.f32 %v2143_v49, %v3192_v46  ;;  %v3386_v57 = vmul.f32 %v2145_v28, %v3195_v61  ;;  %v4058_v54 = vsub.f32 1.0, %v3351_v59  ;;  %v4309_v49 = vld [vmem:[#allocation109_spill] sm:$0xff]  ;;  %v4312_v28 = vld [vmem:[#allocation102_spill] sm:$0xff] }
 0x221   : > { %4302 = vst [vmem:[#allocation104_spill] sm:$0xff] %v3380_v41  ;;  %v2165_v15 = vpop.eup %2164  ;;  %2176 = vpow2.f32 %v1470_v13  ;;  %v3390_v3 = vmul.f32 %v2147_v60, %v3198_v9  ;;  %v4059_v63 = vsub.f32 1.0, %v3357_v52  ;;  %v4060_v12 = vsub.f32 1.0, %v3361_v45  ;;  %v4313_v60 = vld [vmem:[#allocation106_spill] sm:$0xff] }
 0x222   : > { %4303 = vst [vmem:[#allocation108_spill] sm:$0xff] %v3383_v53  ;;  %v2167_v50 = vpop.eup %2166  ;;  %2178 = vpow2.f32 %v1472_v27  ;;  %v3395_v14 = vmul.f32 %v2149_v36, %v3202_v56  ;;  %v4061_v46 = vsub.f32 1.0, %v3366_v44  ;;  %v4062_v61 = vsub.f32 1.0, %v3370_v58  ;;  %v4314_v36 = vld [vmem:[#allocation111_spill] sm:$0xff] }
 0x223   : > { %v2169_v31 = vpop.eup %2168  ;;  %2180 = vpow2.f32 %v1474_v8  ;;  %v4064_v34 = vsub.f32 1.0, %v3374_v4  ;;  %v4063_v9 = vsub.f32 1.0, %v3377_v7  ;;  %v4065_v2 = vsub.f32 1.0, %v3380_v41  ;;  %v4319_v27 = vld [vmem:[#allocation123_spill] sm:$0xff] }
 0x224   : > { %4304 = vst [vmem:[#allocation110_spill] sm:$0xff] %v3395_v14  ;;  %v2171_v51 = vpop.eup %2170  ;;  %v3403_v18 = vmul.f32 %v2151_v10, %v4305_v29  ;;  %v3406_v30 = vmul.f32 %v2153_v39, %v4307_v25  ;;  %v4068_v56 = vsub.f32 1.0, %v3383_v53  ;;  %v4069_v21 = vsub.f32 1.0, %v3386_v57  ;;  %v4317_v39 = vld [vmem:[#allocation119_spill] sm:$0xff] }
 0x225   : > { %v2173_v37 = vpop.eup %2172  ;;  %v3411_v5 = vmul.f32 %v2155_v62, %v4309_v49  ;;  %v3414_v0 = vmul.f32 %v2157_v16, %v4310_v38  ;;  %v3417_v40 = vmul.f32 %v2159_v19, %v4312_v28  ;;  %v4070_v23 = vsub.f32 1.0, %v3390_v3  ;;  %v4320_v62 = vld [vmem:[#allocation125_spill] sm:$0xff]  ;;  %v4321_v19 = vld [vmem:[#allocation126_spill] sm:$0xff]  ;;  %v4325_v49 = vld [vmem:[#allocation99_spill] sm:$0xff] }
 0x226   : > { %4306 = vst [vmem:[#allocation62_spill] sm:$0xff] %v3403_v18  ;;  %v2175_v33 = vpop.eup %2174  ;;  %v3421_v32 = vmul.f32 %v2161_v47, %v4313_v60  ;;  %v3424_v20 = vmul.f32 %v2163_v22, %v4314_v36  ;;  %v3427_v10 = vmul.f32 %v2165_v15, %v4316_v11  ;;  %v3431_v13 = vmul.f32 %v2167_v50, %v4317_v39  ;;  %v4322_v22 = vld [vmem:[#allocation25_spill] sm:$0xff]  ;;  %v4323_v15 = vld [vmem:[#allocation98_spill] sm:$0xff]  ;;  %v4327_v60 = vld [vmem:[#allocation100_spill] sm:$0xff] }
 0x227   : > { %4308 = vst [vmem:[#allocation112_spill] sm:$0xff] %v3406_v30  ;;  %v2177_v24 = vpop.eup %2176  ;;  %v3434_v8 = vmul.f32 %v2169_v31, %v4319_v27  ;;  %v3437_v16 = vmul.f32 %v2171_v51, %v4320_v62  ;;  %v3440_v47 = vmul.f32 %v2173_v37, %v4321_v19  ;;  %vm1540_vm4 = vcmp.lt.f32.partialorder %v4322_v22, 0.0  ;;  %v4326_v28 = vld [vmem:[#allocation26_spill] sm:$0xff]  ;;  %v4328_v39 = vld [vmem:[#allocation27_spill] sm:$0xff]  ;;  %v4331_v37 = vld [vmem:[#allocation29_spill] sm:$0xff] }
 0x228   : > { %4311 = vst [vmem:[#allocation113_spill] sm:$0xff] %v3414_v0  ;;  %v2179_v29 = vpop.eup %2178  ;;  %v3444_v25 = vmul.f32 %v2175_v33, %v4323_v15  ;;  %v3447_v38 = vmul.f32 %v2177_v24, %v4325_v49  ;;  %vm1541_vm5 = vcmp.lt.f32.partialorder %v4326_v28, 0.0  ;;  %vm1542_vm6 = vcmp.lt.f32.partialorder %v4328_v39, 0.0  ;;  %v4329_v24 = vld [vmem:[#allocation103_spill] sm:$0xff]  ;;  %v4330_v49 = vld [vmem:[#allocation28_spill] sm:$0xff]  ;;  %v4334_v31 = vld [vmem:[#allocation33_spill] sm:$0xff] }
 0x229   : > { %4315 = vst [vmem:[#allocation63_spill] sm:$0xff] %v3424_v20  ;;  %v2181_v51 = vpop.eup %2180  ;;  %v3453_v36 = vmul.f32 %v2179_v29, %v4327_v60  ;;  %vm1543_vm7 = vcmp.lt.f32.partialorder %v4330_v49, 0.0  ;;  %vm1544_vm8 = vcmp.lt.f32.partialorder %v4331_v37, 0.0  ;;  %v4332_v62 = vld [vmem:[#allocation31_spill] sm:$0xff]  ;;  %v1572_v15 = vsub.f32 0.0, %v1508_v43  ;;  %v4333_v19 = vld [vmem:[#allocation32_spill] sm:$0xff] }
 0x22a   : > { %4318 = vst [vmem:[#allocation115_spill] sm:$0xff] %v3431_v13  ;;  %v3460_v27 = vmul.f32 %v2181_v51, %v4329_v24  ;;  %vm1545_vm9 = vcmp.lt.f32.partialorder %v4332_v62, 0.0  ;;  %v1573_v29 = vsub.f32 0.0, %v4055_v48  ;;  %vm1546_vm10 = vcmp.lt.f32.partialorder %v4333_v19, 0.0  ;;  %v4344_v22 = vld [vmem:[#allocation40_spill] sm:$0xff]  ;;  %v4350_v28 = vld [vmem:[#allocation41_spill] sm:$0xff] }
 0x22b   : > { %4324 = vst [vmem:[#allocation116_spill] sm:$0xff] %v3444_v25  ;;  %v1574_v33 = vsub.f32 0.0, %v4056_v17  ;;  %v1575_v51 = vsub.f32 0.0, %v4057_v6  ;;  %v1576_v24 = vsub.f32 0.0, %v4058_v54  ;;  %vm1547_vm11 = vcmp.lt.f32.partialorder %v4334_v31, 0.0  ;;  %v4335_v17 = vld [vmem:[#allocation35_spill] sm:$0xff] }
 0x22c   : > { %v1577_v48 = vsub.f32 0.0, %v4059_v63  ;;  %v1578_v60 = vsub.f32 0.0, %v4060_v12  ;;  %v1579_v50 = vsub.f32 0.0, %v4061_v46  ;;  %vm1548_vm12 = vcmp.lt.f32.partialorder %v4335_v17, 0.0  ;;  %v4380_v17 = vld [vmem:[#allocation49_spill] sm:$0xff] }
 0x22d   : > { %v1580_v6 = vsub.f32 0.0, %v4062_v61  ;;  %v1581_v54 = vsub.f32 0.0, %v4064_v34  ;;  %v1582_v11 = vsub.f32 0.0, %v4063_v9  ;;  %v1583_v63 = vsub.f32 0.0, %v4065_v2  ;;  %v4338_v34 = vld [vmem:[#allocation37_spill] sm:$0xff]  ;;  %v4339_v2 = vld [vmem:[#allocation39_spill] sm:$0xff] }
 0x22e   : > { %vm1549_vm13 = vcmp.lt.f32.partialorder %v4336_v26, 0.0  ;;  %v1584_v12 = vsub.f32 0.0, %v4068_v56  ;;  %v1585_v46 = vsub.f32 0.0, %v4069_v21  ;;  %v3510_v61 = vsub.f32 0.0, %v4070_v23  ;;  %v4385_v26 = vld [vmem:[#allocation50_spill] sm:$0xff] }
 0x22f   : > { %v1604_v9 = vsel %vm1540_vm4, %v1572_v15, %v1508_v43  ;;  %vm1550_vm14 = vcmp.lt.f32.partialorder %v4338_v34, 0.0  ;;  %vm1551_vm15 = vcmp.lt.f32.partialorder %v4339_v2, 0.0  ;;  %v4340_v41 = vsub.f32 1.0, %v3395_v14 }
 0x230   : > { %4337 = vst [vmem:[#allocation64_spill] sm:$0xff] %v3510_v61  ;;  %v4341_v56 = vsub.f32 1.0, %v3403_v18  ;;  %v4342_v23 = vsub.f32 1.0, %v3406_v30  ;;  %v4343_v1 = vsub.f32 1.0, %v3339_v42  ;;  %vm1552_vm0 = vcmp.lt.f32.partialorder %v4344_v22, 0.0  ;;  %v4391_v22 = vld [vmem:[#allocation7_spill] sm:$0xff] }
 0x231   : > { %v3520_v53 = vsub.f32 0.0, %v4340_v41  ;;  %v4345_v15 = vsub.f32 1.0, %v3411_v5  ;;  %v4346_v41 = vsub.f32 1.0, %v3414_v0  ;;  %vm1553_vm1 = vcmp.lt.f32.partialorder %v4350_v28, 0.0  ;;  %v4397_v28 = vld [vmem:[#allocation9_spill] sm:$0xff] }
 0x232   : > { %v3524_v21 = vsub.f32 0.0, %v4341_v56  ;;  %v3528_v61 = vsub.f32 0.0, %v4342_v23  ;;  %v1605_v43 = vsel %vm1541_vm5, %v1573_v29, %v4343_v1  ;;  %v4347_v56 = vsub.f32 1.0, %v3417_v40 }
 0x233   : > { %v3537_v14 = vsub.f32 0.0, %v4345_v15  ;;  %v3541_v18 = vsub.f32 0.0, %v4346_v41  ;;  %v4349_v23 = vsub.f32 1.0, %v3343_v55  ;;  %v4351_v29 = vsub.f32 1.0, %v3421_v32  ;;  %v4354_v55 = vld [vmem:[#allocation43_spill] sm:$0xff] }
 0x234   : > { %v3545_v30 = vsub.f32 0.0, %v4347_v56  ;;  %v4352_v15 = vsub.f32 1.0, %v3424_v20  ;;  %v4353_v41 = vsub.f32 1.0, %v3347_v35  ;;  %vm1554_vm2 = vcmp.lt.f32.partialorder %v4354_v55, 0.0 }
 0x235   : > { %v1606_v42 = vsel %vm1542_vm6, %v1574_v33, %v4349_v23  ;;  %v3554_v1 = vsub.f32 0.0, %v4351_v29  ;;  %v4355_v33 = vsub.f32 1.0, %v3427_v10  ;;  %v4356_v23 = vsub.f32 1.0, %v3431_v13  ;;  %v4362_v13 = vld [vmem:[#allocation44_spill] sm:$0xff] }
 0x236   : > { %4348 = vst [vmem:[#allocation117_spill] sm:$0xff] %v3545_v30  ;;  %v3558_v0 = vsub.f32 0.0, %v4352_v15  ;;  %v1607_v56 = vsel %vm1543_vm7, %v1575_v51, %v4353_v41  ;;  %v1636_v30 = vadd.f32 1.0, %v1604_v9  ;;  %v4358_v20 = vsub.f32 1.0, %v3351_v59 }
 0x237   : > { %v3567_v39 = vsub.f32 0.0, %v4355_v33  ;;  %v3571_v29 = vsub.f32 0.0, %v4356_v23  ;;  %v1637_v35 = vadd.f32 1.0, %v1605_v43  ;;  %v4359_v49 = vsub.f32 1.0, %v3434_v8 }
 0x238   : > { %v1608_v15 = vsel %vm1544_vm8, %v1576_v24, %v4358_v20  ;;  %v4360_v9 = vsub.f32 1.0, %v3437_v16  ;;  %v4361_v33 = vsub.f32 1.0, %v3357_v52  ;;  %vm1555_vm3 = vcmp.lt.f32.partialorder %v4362_v13, 0.0 }
 0x239   : > { %4357 = vst [vmem:[#allocation118_spill] sm:$0xff] %v3571_v29  ;;  %v3579_v51 = vsub.f32 0.0, %v4359_v49  ;;  %v1638_v29 = vadd.f32 1.0, %v1606_v42  ;;  %v4363_v59 = vsub.f32 1.0, %v3440_v47  ;;  %v4364_v37 = vsub.f32 1.0, %v3444_v25  ;;  %v4372_v25 = vld [vmem:[#allocation47_spill] sm:$0xff] }
 0x23a   : > { %v3583_v41 = vsub.f32 0.0, %v4360_v9  ;;  %v1609_v23 = vsel %vm1545_vm9, %v1577_v48, %v4361_v33  ;;  %v4366_v43 = vsub.f32 1.0, %v3361_v45  ;;  %v1639_v52 = vadd.f32 1.0, %v1607_v56  ;;  %v4367_v9 = vld [vmem:[#allocation45_spill] sm:$0xff] }
 0x23b   : > { %v3592_v20 = vsub.f32 0.0, %v4363_v59  ;;  %v3596_v24 = vsub.f32 0.0, %v4364_v37  ;;  %vm1556_vm4 = vcmp.lt.f32.partialorder %v4367_v9, 0.0  ;;  %v4368_v48 = vsub.f32 1.0, %v3447_v38  ;;  %v4371_v37 = vld [vmem:[#allocation2_spill] sm:$0xff] }
 0x23c   : > { %v1610_v49 = vsel %vm1546_vm10, %v1578_v60, %v4366_v43  ;;  %v4370_v42 = vsub.f32 1.0, %v3366_v44  ;;  %v1640_v59 = vadd.f32 1.0, %v1608_v15  ;;  %vm1557_vm5 = vcmp.lt.f32.partialorder %v4372_v25, 0.0 }
 0x23d   : > { %4365 = vst [vmem:[#allocation65_spill] sm:$0xff] %v3596_v24  ;;  %v3605_v62 = vsub.f32 0.0, %v4368_v48  ;;  %v1668_v24 = vmul.f32 %v1636_v30, %v4371_v37  ;;  %v4373_v45 = vsub.f32 1.0, %v3453_v36  ;;  %v4374_v60 = vsub.f32 1.0, %v3370_v58  ;;  %v4375_v48 = vld [vmem:[#allocation3_spill] sm:$0xff]  ;;  %v4379_v58 = vld [vmem:[#allocation4_spill] sm:$0xff] }
 0x23e   : > { %v1611_v33 = vsel %vm1547_vm11, %v1579_v50, %v4370_v42  ;;  %v1641_v43 = vadd.f32 1.0, %v1609_v23  ;;  %v1669_v44 = vmul.f32 %v1637_v35, %v4375_v48  ;;  %v4377_v50 = vsub.f32 1.0, %v3460_v27  ;;  %v4382_v23 = vld [vmem:[#allocation104_spill] sm:$0xff] }
 0x23f   : > { %4369 = vst [vmem:[#allocation120_spill] sm:$0xff] %v3605_v62  ;;  %v3615_v19 = vsub.f32 0.0, %v4373_v45  ;;  %v1612_v56 = vsel %vm1548_vm12, %v1580_v6, %v4374_v60  ;;  %v4376_v62 = vld [vmem:[#allocation48_spill] sm:$0xff]  ;;  %v4378_v31 = vsub.f32 1.0, %v3374_v4  ;;  %v1642_v42 = vadd.f32 1.0, %v1610_v49  ;;  %v4384_v4 = vld [vmem:[#allocation5_spill] sm:$0xff] }
 0x240   : > { %vm1558_vm6 = vcmp.lt.f32.partialorder %v4376_v62, 0.0  ;;  %v3625_v30 = vsub.f32 0.0, %v4377_v50  ;;  %v1670_v37 = vmul.f32 %v1638_v29, %v4379_v58  ;;  %vm1559_vm7 = vcmp.lt.f32.partialorder %v4380_v17, 0.0 }
 0x241   : > { %v1613_v15 = vsel %vm1549_vm13, %v1581_v54, %v4378_v31  ;;  %v4381_v6 = vsub.f32 1.0, %v3377_v7  ;;  %v4383_v45 = vsub.f32 1.0, %v4382_v23  ;;  %v1643_v48 = vadd.f32 1.0, %v1611_v33  ;;  %v4386_v54 = vld [vmem:[#allocation108_spill] sm:$0xff]  ;;  %v4388_v7 = vld [vmem:[#allocation6_spill] sm:$0xff] }
 0x242   : > { %v1671_v50 = vmul.f32 %v1639_v52, %v4384_v4  ;;  %vm1560_vm8 = vcmp.lt.f32.partialorder %v4385_v26, 0.0  ;;  %v4387_v49 = vsub.f32 1.0, %v4386_v54  ;;  %v1644_v31 = vadd.f32 1.0, %v1612_v56  ;;  %v4392_v56 = vld [vmem:[#allocation52_spill] sm:$0xff]  ;;  %v4396_v54 = vld [vmem:[#allocation53_spill] sm:$0xff] }
 0x243   : > { %v1614_v35 = vsel %vm1550_vm14, %v1582_v11, %v4381_v6  ;;  %v1615_v60 = vsel %vm1551_vm15, %v1583_v63, %v4383_v45  ;;  %v1672_v58 = vmul.f32 %v1640_v59, %v4388_v7  ;;  %v1700_v34 = vpack.c.bf16 %v1668_v24, %v1668_v24  ;;  %v4389_v63 = vld [vmem:[#allocation51_spill] sm:$0xff]  ;;  %v4394_v59 = vld [vmem:[#allocation64_spill] sm:$0xff] }
 0x244   : > { %v1616_v29 = vsel %vm1552_vm0, %v1584_v12, %v4387_v49  ;;  %vm1561_vm9 = vcmp.lt.f32.partialorder %v4389_v63, 0.0  ;;  %v4390_v2 = vsub.f32 1.0, %v3386_v57  ;;  %v1645_v52 = vadd.f32 1.0, %v1613_v15  ;;  %v4395_v45 = vld [vmem:[#allocation8_spill] sm:$0xff]  ;;  %v4398_v15 = vld [vmem:[#allocation54_spill] sm:$0xff] }
 0x245   : > { %v1673_v12 = vmul.f32 %v1641_v43, %v4391_v22  ;;  %v1701_v33 = vpack.c.bf16 %v1669_v44, %v1669_v44  ;;  %vm1562_vm10 = vcmp.lt.f32.partialorder %v4392_v56, 0.0  ;;  %v4393_v24 = vsub.f32 1.0, %v3390_v3  ;;  %v4399_v49 = vld [vmem:[#allocation110_spill] sm:$0xff] }
 0x246   : > { %v1617_v11 = vsel %vm1553_vm1, %v1585_v46, %v4390_v2  ;;  %v1646_v23 = vadd.f32 1.0, %v1614_v35  ;;  %v1674_v4 = vmul.f32 %v1642_v42, %v4395_v45  ;;  %v1702_v57 = vpack.c.bf16 %v1670_v37, %v1670_v37  ;;  %v4401_v42 = vld [vmem:[#allocation10_spill] sm:$0xff]  ;;  %v4409_v45 = vld [vmem:[#allocation12_spill] sm:$0xff] }
 0x247   : > { %v1618_v6 = vsel %vm1554_vm2, %v4394_v59, %v4393_v24  ;;  %vm1563_vm11 = vcmp.lt.f32.partialorder %v4396_v54, 0.0  ;;  %v1647_v46 = vadd.f32 1.0, %v1615_v60  ;;  %v1675_v43 = vmul.f32 %v1643_v48, %v4397_v28  ;;  %v4402_v60 = vld [vmem:[#allocation55_spill] sm:$0xff]  ;;  %v4403_v48 = vld [vmem:[#allocation62_spill] sm:$0xff]  ;;  %v4412_v28 = vld [vmem:[#allocation13_spill] sm:$0xff] }
 0x248   : > { %v1703_v44 = vpack.c.bf16 %v1671_v50, %v1671_v50  ;;  %vm1732_vm12 = vcmask 519168   ;;  %vm1564_vm13 = vcmp.lt.f32.partialorder %v4398_v15, 0.0  ;;  %v4400_v3 = vsub.f32 1.0, %v4399_v49  ;;  %v4405_v24 = vld [vmem:[#allocation11_spill] sm:$0xff]  ;;  %v4416_v49 = vld [vmem:[#allocation14_spill] sm:$0xff] }
 0x249   : > { %v1648_v35 = vadd.f32 1.0, %v1616_v29  ;;  %v1676_v37 = vmul.f32 %v1644_v31, %v4401_v42  ;;  %v1704_v7 = vpack.c.bf16 %v1672_v58, %v1672_v58  ;;  %1733 = vst.msk [vmem:[%s3653_s11] sm:$0xf] %vm1732_vm12, %v1700_v34  ;;  %vm1565_vm14 = vcmp.lt.f32.partialorder %v4402_v60, 0.0  ;;  %v4406_v29 = vld [vmem:[#allocation56_spill] sm:$0xff]  ;;  %v4420_v42 = vld [vmem:[#allocation15_spill] sm:$0xff] }
 0x24a   : > { %v1619_v55 = vsel %vm1555_vm3, %v3520_v53, %v4400_v3  ;;  %v4404_v50 = vsub.f32 1.0, %v4403_v48  ;;  %v1649_v22 = vadd.f32 1.0, %v1617_v11  ;;  %v1677_v13 = vmul.f32 %v1645_v52, %v4405_v24  ;;  %1734 = vst.msk [vmem:[%s3653_s11 + $0x4] sm:$0xf] %vm1732_vm12, %v1701_v33  ;;  %v4407_v31 = vld [vmem:[#allocation112_spill] sm:$0xff]  ;;  %v4410_v11 = vld [vmem:[#allocation57_spill] sm:$0xff] }
 0x24b   : > { %v1705_v53 = vpack.c.bf16 %v1673_v12, %v1673_v12  ;;  %vm1566_vm15 = vcmp.lt.f32.partialorder %v4406_v29, 0.0  ;;  %v4408_v58 = vsub.f32 1.0, %v4407_v31  ;;  %v1650_v59 = vadd.f32 1.0, %v1618_v6  ;;  %1735 = vst.msk [vmem:[%s3653_s11 + $0x8] sm:$0xf] %vm1732_vm12, %v1702_v57  ;;  %v4413_v6 = vld [vmem:[#allocation58_spill] sm:$0xff] }
 0x24c   : > { %v1620_v2 = vsel %vm1556_vm4, %v3524_v21, %v4404_v50  ;;  %v1678_v9 = vmul.f32 %v1646_v23, %v4409_v45  ;;  %v1706_v21 = vpack.c.bf16 %v1674_v4, %v1674_v4  ;;  %vm1567_vm0 = vcmp.lt.f32.partialorder %v4410_v11, 0.0  ;;  %1736 = vst.msk [vmem:[%s3653_s11 + $0xc] sm:$0xf] %vm1732_vm12, %v1703_v44  ;;  %v4414_v23 = vld [vmem:[#allocation113_spill] sm:$0xff]  ;;  %v4417_v3 = vld [vmem:[#allocation59_spill] sm:$0xff]  ;;  %v4421_v48 = vld [vmem:[#allocation60_spill] sm:$0xff] }
 0x24d   : > { %v1621_v34 = vsel %vm1557_vm5, %v3528_v61, %v4408_v58  ;;  %v4411_v52 = vsub.f32 1.0, %v3411_v5  ;;  %v1651_v33 = vadd.f32 1.0, %v1619_v55  ;;  %v1679_v25 = vmul.f32 %v1647_v46, %v4412_v28  ;;  %1737 = vst.msk [vmem:[%s3653_s11 + $0x10] sm:$0xf] %vm1732_vm12, %v1704_v7  ;;  %v4423_v7 = vld [vmem:[#allocation16_spill] sm:$0xff] }
 0x24e   : > { %v1707_v61 = vpack.c.bf16 %v1675_v43, %v1675_v43  ;;  %vm1568_vm1 = vcmp.lt.f32.partialorder %v4413_v6, 0.0  ;;  %v4415_v4 = vsub.f32 1.0, %v4414_v23  ;;  %v1652_v5 = vadd.f32 1.0, %v1620_v2  ;;  %v4419_v43 = vld [vmem:[#allocation117_spill] sm:$0xff]  ;;  %1738 = vst.msk [vmem:[%s3653_s11 + $0x14] sm:$0xf] %vm1732_vm12, %v1705_v53 }
 0x24f   : > { %v1622_v12 = vsel %vm1558_vm6, %v3537_v14, %v4411_v52  ;;  %v1680_v62 = vmul.f32 %v1648_v35, %v4416_v49  ;;  %v1708_v14 = vpack.c.bf16 %v1676_v37, %v1676_v37  ;;  %vm1569_vm2 = vcmp.lt.f32.partialorder %v4417_v3, 0.0  ;;  %1739 = vst.msk [vmem:[%s3653_s11 + $0x18] sm:$0xf] %vm1732_vm12, %v1706_v21  ;;  %v4424_v2 = vld [vmem:[#allocation61_spill] sm:$0xff]  ;;  %v4432_v21 = vld [vmem:[#allocation118_spill] sm:$0xff]  ;;  %v4445_v11 = vld [vmem:[#allocation120_spill] sm:$0xff] }
 0x250   : > { %v1623_v57 = vsel %vm1559_vm7, %v3541_v18, %v4415_v4  ;;  %v4418_v46 = vsub.f32 1.0, %v3417_v40  ;;  %v1653_v55 = vadd.f32 1.0, %v1621_v34  ;;  %v1681_v17 = vmul.f32 %v1649_v22, %v4420_v42  ;;  %v4425_v22 = vld [vmem:[#allocation63_spill] sm:$0xff]  ;;  %v4427_v53 = vld [vmem:[#allocation17_spill] sm:$0xff]  ;;  %1740 = vst.msk [vmem:[%s3653_s11 + $0x1c] sm:$0xf] %vm1732_vm12, %v1707_v61 }
 0x251   : > { %v1709_v18 = vpack.c.bf16 %v1677_v13, %v1677_v13  ;;  %vm1570_vm3 = vcmp.lt.f32.partialorder %v4421_v48, 0.0  ;;  %v4422_v35 = vsub.f32 1.0, %v3421_v32  ;;  %v1654_v37 = vadd.f32 1.0, %v1622_v12  ;;  %1741 = vst.msk [vmem:[%s3653_s11 + $0x20] sm:$0xf] %vm1732_vm12, %v1708_v14  ;;  %v4435_v61 = vld [vmem:[#allocation20_spill] sm:$0xff] }
 0x252   : > { %v1624_v44 = vsel %vm1560_vm8, %v4419_v43, %v4418_v46  ;;  %v1682_v26 = vmul.f32 %v1650_v59, %v4423_v7  ;;  %v1710_v50 = vpack.c.bf16 %v1678_v9, %v1678_v9  ;;  %vm1571_vm4 = vcmp.lt.f32.partialorder %v4424_v2, 0.0  ;;  %v4429_v59 = vld [vmem:[#allocation18_spill] sm:$0xff]  ;;  %v4437_v49 = vld [vmem:[#allocation21_spill] sm:$0xff] }
 0x253   : > { %v1625_v40 = vsel %vm1561_vm9, %v3554_v1, %v4422_v35  ;;  %v4426_v24 = vsub.f32 1.0, %v4425_v22  ;;  %v1655_v13 = vadd.f32 1.0, %v1623_v57  ;;  %v1683_v63 = vmul.f32 %v1651_v33, %v4427_v53  ;;  %v4433_v33 = vld [vmem:[#allocation19_spill] sm:$0xff]  ;;  %1742 = vst.msk [vmem:[%s3653_s11 + $0x24] sm:$0xf] %vm1732_vm12, %v1709_v18  ;;  %v4439_v46 = vld [vmem:[#allocation22_spill] sm:$0xff] }
 0x254   : > { %v1711_v31 = vpack.c.bf16 %v1679_v25, %v1679_v25  ;;  %v4428_v1 = vsub.f32 1.0, %v3427_v10  ;;  %v1656_v34 = vadd.f32 1.0, %v1624_v44  ;;  %v1684_v45 = vmul.f32 %v1652_v5, %v4429_v59  ;;  %1743 = vst.msk [vmem:[%s3653_s11 + $0x28] sm:$0xf] %vm1732_vm12, %v1710_v50  ;;  %v4442_v44 = vld [vmem:[#allocation65_spill] sm:$0xff] }
 0x255   : > { %v1626_v32 = vsel %vm1562_vm10, %v3558_v0, %v4426_v24  ;;  %v1712_v9 = vpack.c.bf16 %v1680_v62, %v1680_v62  ;;  %v4430_v0 = vld [vmem:[#allocation115_spill] sm:$0xff]  ;;  %v1657_v12 = vadd.f32 1.0, %v1625_v40  ;;  %v1685_v10 = vmul.f32 %v1653_v55, %v4433_v33  ;;  %v4448_v24 = vld [vmem:[#allocation94_spill] sm:$0xff] }
 0x256   : > { %v1627_v58 = vsel %vm1563_vm11, %v3567_v39, %v4428_v1  ;;  %v4431_v56 = vsub.f32 1.0, %v4430_v0  ;;  %v1713_v28 = vpack.c.bf16 %v1681_v17, %v1681_v17  ;;  %v4434_v39 = vsub.f32 1.0, %v3434_v8  ;;  %1744 = vst.msk [vmem:[%s3653_s11 + $0x2c] sm:$0xf] %vm1732_vm12, %v1711_v31  ;;  %v4443_v17 = vld [vmem:[#allocation23_spill] sm:$0xff] }
 0x257   : > { %v1658_v25 = vadd.f32 1.0, %v1626_v32  ;;  %v1686_v23 = vmul.f32 %v1654_v37, %v4435_v61  ;;  %v1714_v4 = vpack.c.bf16 %v1682_v26, %v1682_v26  ;;  %v4436_v15 = vsub.f32 1.0, %v3437_v16  ;;  %1745 = vst.msk [vmem:[%s3653_s11 + $0x30] sm:$0xf] %vm1732_vm12, %v1712_v9  ;;  %v4446_v37 = vld [vmem:[#allocation24_spill] sm:$0xff] }
 0x258   : > { %v1628_v52 = vsel %vm1564_vm13, %v4432_v21, %v4431_v56  ;;  %v1629_v54 = vsel %vm1565_vm14, %v3579_v51, %v4434_v39  ;;  %v1659_v5 = vadd.f32 1.0, %v1627_v58  ;;  %v1687_v8 = vmul.f32 %v1655_v13, %v4437_v49  ;;  %1746 = vst.msk [vmem:[%s3653_s11 + $0x34] sm:$0xf] %vm1732_vm12, %v1713_v28  ;;  %v4452_v58 = vld [vmem:[#allocation96_spill] sm:$0xff]  ;;  %v4455_v56 = vld [vmem:[#allocation38_spill] sm:$0xff] }
 0x259   : > { %v1630_v57 = vsel %vm1566_vm15, %v3583_v41, %v4436_v15  ;;  %v1715_v62 = vpack.c.bf16 %v1683_v63, %v1683_v63  ;;  %v4438_v51 = vsub.f32 1.0, %v3440_v47  ;;  %v1660_v14 = vadd.f32 1.0, %v1628_v52  ;;  %v4440_v41 = vld [vmem:[#allocation116_spill] sm:$0xff]  ;;  %1747 = vst.msk [vmem:[%s3653_s11 + $0x38] sm:$0xf] %vm1732_vm12, %v1714_v4  ;;  %v4450_v63 = vld [vmem:[#allocation95_spill] sm:$0xff] }
 0x25a   : > { %v1688_v16 = vmul.f32 %v1656_v34, %v4439_v46  ;;  %v1716_v43 = vpack.c.bf16 %v1684_v45, %v1684_v45  ;;  %v4441_v29 = vsub.f32 1.0, %v4440_v41  ;;  %v1661_v42 = vadd.f32 1.0, %v1629_v54 }
 0x25b   : > { %v1631_v60 = vsel %vm1567_vm0, %v3592_v20, %v4438_v51  ;;  %v1689_v47 = vmul.f32 %v1657_v12, %v4443_v17  ;;  %v1717_v18 = vpack.c.bf16 %v1685_v10, %v1685_v10  ;;  %v4444_v20 = vsub.f32 1.0, %v3447_v38  ;;  %1748 = vst.msk [vmem:[%s3653_s11 + $0x3c] sm:$0xf] %vm1732_vm12, %v1715_v62  ;;  %v4456_v10 = vld [vmem:[#allocation42_spill] sm:$0xff] }
 0x25c   : > { %v1632_v55 = vsel %vm1568_vm1, %v4442_v44, %v4441_v29  ;;  %v1662_v40 = vadd.f32 1.0, %v1630_v57  ;;  %v1690_v7 = vmul.f32 %v1658_v25, %v4446_v37  ;;  %v1718_v26 = vpack.c.bf16 %v1686_v23, %v1686_v23  ;;  %1749 = vst.msk [vmem:[%s3653_s11 + $0x40] sm:$0xf] %vm1732_vm12, %v1716_v43  ;;  %v4457_v25 = vld [vmem:[#allocation46_spill] sm:$0xff] }
 0x25d   : > { %v1633_v35 = vsel %vm1569_vm2, %v4445_v11, %v4444_v20  ;;  %v4447_v6 = vsub.f32 1.0, %v3453_v36  ;;  %v1663_v22 = vadd.f32 1.0, %v1631_v60  ;;  %v1691_v38 = vmul.f32 %v1659_v5, %v4448_v24  ;;  %1750 = vst.msk [vmem:[%s3653_s11 + $0x44] sm:$0xf] %vm1732_vm12, %v1717_v18 }
 0x25e   : > { %v1719_v32 = vpack.c.bf16 %v1687_v8, %v1687_v8  ;;  %v4449_v3 = vsub.f32 1.0, %v3460_v27  ;;  %v1664_v53 = vadd.f32 1.0, %v1632_v55  ;;  %v1692_v36 = vmul.f32 %v1660_v14, %v4450_v63  ;;  %v4453_v27 = vld [vmem:[#allocation34_spill] sm:$0xff]  ;;  %1751 = vst.msk [vmem:[%s3653_s11 + $0x48] sm:$0xf] %vm1732_vm12, %v1718_v26 }
 0x25f   : > { %v1634_v50 = vsel %vm1570_vm3, %v3615_v19, %v4447_v6  ;;  %v1720_v31 = vpack.c.bf16 %v1688_v16, %v1688_v16  ;;  %v4451_v19 = vld [vmem:[#allocation30_spill] sm:$0xff]  ;;  %v1665_v1 = vadd.f32 1.0, %v1633_v35  ;;  %v1693_v34 = vmul.f32 %v1661_v42, %v4452_v58 }
 0x260   : > { %v1635_v13 = vsel %vm1571_vm4, %v3625_v30, %v4449_v3  ;;  %v895_v48 = vmul.f32 0.5, %v4451_v19  ;;  %v1721_v59 = vpack.c.bf16 %v1689_v47, %v1689_v47  ;;  %v896_v45 = vmul.f32 0.5, %v4453_v27  ;;  %v4454_v30 = vld [vmem:[#allocation97_spill] sm:$0xff]  ;;  %1752 = vst.msk [vmem:[%s3653_s11 + $0x4c] sm:$0xf] %vm1732_vm12, %v1719_v32 }
 0x261   : > { %v1666_v2 = vadd.f32 1.0, %v1634_v50  ;;  %v1694_v9 = vmul.f32 %v1662_v40, %v4454_v30  ;;  %v1722_v0 = vpack.c.bf16 %v1690_v7, %v1690_v7  ;;  %v897_v21 = vmul.f32 0.5, %v4455_v56  ;;  %1753 = vst.msk [vmem:[%s3653_s11 + $0x50] sm:$0xf] %vm1732_vm12, %v1720_v31 }
 0x262   : > { %v1667_v52 = vadd.f32 1.0, %v1635_v13  ;;  %v1695_v12 = vmul.f32 %v1663_v22, %v895_v48  ;;  %v1723_v33 = vpack.c.bf16 %v1691_v38, %v1691_v38  ;;  %v898_v28 = vmul.f32 0.5, %v4456_v10  ;;  %1754 = vst.msk [vmem:[%s3653_s11 + $0x54] sm:$0xf] %vm1732_vm12, %v1721_v59 }
 0x263   : > { %v1696_v39 = vmul.f32 %v1664_v53, %v896_v45  ;;  %v1724_v54 = vpack.c.bf16 %v1692_v36, %v1692_v36  ;;  %v899_v61 = vmul.f32 0.5, %v4457_v25  ;;  %v1697_v23 = vmul.f32 %v1665_v1, %v897_v21  ;;  %1755 = vst.msk [vmem:[%s3653_s11 + $0x58] sm:$0xf] %vm1732_vm12, %v1722_v0 }
 0x264   : > { %v1725_v4 = vpack.c.bf16 %v1693_v34, %v1693_v34  ;;  %v1698_v15 = vmul.f32 %v1666_v2, %v898_v28  ;;  %v1726_v57 = vpack.c.bf16 %v1694_v9, %v1694_v9  ;;  %v1727_v49 = vpack.c.bf16 %v1695_v12, %v1695_v12  ;;  %1756 = vst.msk [vmem:[%s3653_s11 + $0x5c] sm:$0xf] %vm1732_vm12, %v1723_v33 }
 0x265   : > { %v1699_v5 = vmul.f32 %v1667_v52, %v899_v61  ;;  %v1728_v8 = vpack.c.bf16 %v1696_v39, %v1696_v39  ;;  %1757 = vst.msk [vmem:[%s3653_s11 + $0x60] sm:$0xf] %vm1732_vm12, %v1724_v54  ;;  %v1729_v62 = vpack.c.bf16 %v1697_v23, %v1697_v23 }
 0x266   : > { %1758 = vst.msk [vmem:[%s3653_s11 + $0x64] sm:$0xf] %vm1732_vm12, %v1725_v4  ;;  %v1730_v51 = vpack.c.bf16 %v1698_v15, %v1698_v15 }
 0x267   : > { %1759 = vst.msk [vmem:[%s3653_s11 + $0x68] sm:$0xf] %vm1732_vm12, %v1726_v57  ;;  %v1731_v60 = vpack.c.bf16 %v1699_v5, %v1699_v5 }
 0x268   : > { %1760 = vst.msk [vmem:[%s3653_s11 + $0x6c] sm:$0xf] %vm1732_vm12, %v1727_v49 }
 0x269   : > { %1761 = vst.msk [vmem:[%s3653_s11 + $0x70] sm:$0xf] %vm1732_vm12, %v1728_v8 }
 0x26a   : > { %1762 = vst.msk [vmem:[%s3653_s11 + $0x74] sm:$0xf] %vm1732_vm12, %v1729_v62 }
 0x26b   : > { %1763 = vst.msk [vmem:[%s3653_s11 + $0x78] sm:$0xf] %vm1732_vm12, %v1730_v51 }
 0x26c   : > { %1764 = vst.msk [vmem:[%s3653_s11 + $0x7c] sm:$0xf] %vm1732_vm12, %v1731_v60 }
 0x26d PF: > { %s14_s17 = sadd.s32 1, %s2204_s17   ;;  %s4458_s15 = smov %s2200_s16 }
 0x26e   : > { %p11_p5 = scmp.ge.s32.totalorder %s14_s17, 4   ;;  %s4459_s16 = smov %s4461_s18 }
 0x270   :  { %13 = sbr.rel (!%p11_p5) target bundleno = 2 (0x2), region = 75 }

// kernel: ffm_forward.7
= control target key start
LH: loop header
LB: loop body
LE: loop exit
PB: predicated region body
PF: predicated region fallthrough
CT: control target
= control target key end

     0   :  { %s3359_s27 = smov 0   ;;  %s3361_s28 = smov 0   ;;  %s5509_s0 = inlined_call_operand.vmem [shape: bf16[2,256,64], index: 0, kind: input, shape index: {}]   ;;  %s5510_s1 = inlined_call_operand.vmem [shape: bf16[2,256,64], index: 1, kind: input, shape index: {}]   ;;  %s5511_s2 = inlined_call_operand.vmem [shape: f32[1,64], index: 2, kind: input, shape index: {}]   ;;  %s5512_s3 = inlined_call_operand.vmem [shape: f32[1,64], index: 3, kind: input, shape index: {}]   ;;  %s5513_s4 = inlined_call_operand.vmem [shape: bf16[64,64], index: 4, kind: input, shape index: {}]   ;;  %s5514_s5 = inlined_call_operand.vmem [shape: bf16[64,64], index: 5, kind: input, shape index: {}]   ;;  %s5515_s6 = inlined_call_operand.vmem [shape: f32[1,64], index: 6, kind: input, shape index: {}]   ;;  %s5516_s7 = inlined_call_operand.vmem [shape: f32[1,64], index: 7, kind: input, shape index: {}]   ;;  %s5517_s8 = inlined_call_operand.vmem [shape: bf16[2,256,64], index: 8, kind: output, shape index: {}]  }
   0x1   :  { %s3363_s29 = smov 0  }
   0x2 LB: > { %s30_s30 = sadd.s32 1, %s3308_s28  ;;  %p2799_p0 = scmp.ge.s32.totalorder %s3312_s29, 1  ;;  %s3312_s29 = sphi %s3363_s29, %s18_s29   ;;  %s3308_s28 = sphi %s3361_s28, %s6114_s28   ;;  %s3304_s27 = sphi %s3359_s27, %s6113_s27  }
   0x3   : > { %p32_p1 = scmp.ge.s32.totalorder %s30_s30, 2  ;;  %p320_p2 = scmp.lt.s32.totalorder %s3312_s29, 3 }
   0x5   : > { %s6116_s30 = smov (%p32_p1, %s30_s30), 0  ;;  %p321_p3 = pnand %p2799_p0, %p320_p2 }
   0x7   : > { %324 = sbr.rel (%p321_p3) target bundleno = 786 (0x312), region = 52 }
   0xc   : > { %v3022_v0 = vld [vmem:[%s5513_s4 + $0x18] sm:$0xff]  ;;  %p376_p4 = scmp.lt.s32.totalorder %s3304_s27, 1  ;;  %v3021_v2 = vld [vmem:[%s5513_s4 + $0x10] sm:$0xff]  ;;  %v3020_v4 = vld [vmem:[%s5513_s4 + $0x8] sm:$0xff]  ;;  %vm477_vm0 = vcmask 523264   ;;  %vm832_vm4 = vcmask 519168  }
   0xd   : > { %v3042_v1 = vld [vmem:[%s5514_s5 + $0x18] sm:$0xff]  ;;  %1343 = vmatpush.bf16.msra.mxu1 %v3022_v0  ;;  %v3041_v3 = vld [vmem:[%s5514_s5 + $0x10] sm:$0xff]  ;;  %3126 = vmatpush.bf16.msra.mxu3 %v3022_v0  ;;  %v3040_v5 = vld [vmem:[%s5514_s5 + $0x8] sm:$0xff] }
   0xe   : > { %1102 = vmatpush.bf16.msra.mxu0 %v3042_v1  ;;  %s6118_s27 = smov (!%p376_p4, %s3304_s27), 1  ;;  %3122 = vmatpush.bf16.msra.mxu2 %v3042_v1  ;;  %v3019_v8 = vld [vmem:[%s5513_s4] sm:$0xff] }
   0xf   : > { %s3389_s17 = sshll.u32 %s6118_s27, 7  ;;  %v3039_v9 = vld [vmem:[%s5514_s5] sm:$0xff] }
  0x10   : > { %s3401_s24 = scalar_lea.vmem %s5510_s1, %s3389_s17  ;;  %s3412_s10 = scalar_lea.vmem %s5509_s0, %s3389_s17 }
  0x11   : > { %1344 = vmatpush.bf16.msra.mxu1 %v3021_v2  ;;  %3127 = vmatpush.bf16.msra.mxu3 %v3021_v2  ;;  %v3044_v6 = vld [vmem:[%s3401_s24] sm:$0xff]   ;;  %v3107_v7 = vld [vmem:[%s3401_s24 + $0x8] sm:$0xff]   ;;  %v3108_v14 = vld [vmem:[%s3401_s24 + $0x10] sm:$0xff]  }
  0x12   : > { %1103 = vmatpush.bf16.msra.mxu0 %v3041_v3  ;;  %3123 = vmatpush.bf16.msra.mxu2 %v3041_v3  ;;  %v3417_v10 = vunpack.c.l.bf16 %v3044_v6  ;;  %v3419_v11 = vunpack.c.h.bf16 %v3044_v6  ;;  %v3421_v12 = vunpack.c.l.bf16 %v3107_v7  ;;  %v3003_v13 = vld [vmem:[%s3412_s10] sm:$0xff]  ;;  %v3425_v15 = vunpack.c.h.bf16 %v3107_v7  ;;  %v3109_v20 = vld [vmem:[%s3401_s24 + $0x18] sm:$0xff]   ;;  %v3111_v35 = vld [vmem:[%s3401_s24 + $0x28] sm:$0xff]  }
  0x13   : > { %v3427_v16 = vunpack.c.l.bf16 %v3108_v14  ;;  %v3437_v22 = vunpack.c.h.bf16 %v3108_v14  ;;  %v3441_v25 = vunpack.c.l.bf16 %v3109_v20  ;;  %v3110_v27 = vld [vmem:[%s3401_s24 + $0x20] sm:$0xff]   ;;  %v3446_v29 = vunpack.c.h.bf16 %v3109_v20  ;;  %v3112_v46 = vld [vmem:[%s3401_s24 + $0x30] sm:$0xff]   ;;  %v3113_v60 = vld [vmem:[%s3401_s24 + $0x38] sm:$0xff]  }
  0x14   : > { %v478_v17 = vsel %vm477_vm0, %v3417_v10, 0.0  ;;  %v479_v18 = vsel %vm477_vm0, %v3419_v11, 0.0  ;;  %v481_v19 = vsel %vm477_vm0, %v3421_v12, 0.0  ;;  %v483_v23 = vsel %vm477_vm0, %v3425_v15, 0.0 }
  0x15   : > { %1345 = vmatpush.bf16.msra.mxu1 %v3020_v4  ;;  %3128 = vmatpush.bf16.msra.mxu3 %v3020_v4  ;;  %v480_v21 = vadd.f32 %v479_v18, %v478_v17  ;;  %v485_v26 = vsel %vm477_vm0, %v3427_v16, 0.0  ;;  %v487_v30 = vsel %vm477_vm0, %v3437_v22, 0.0  ;;  %v3450_v32 = vunpack.c.l.bf16 %v3110_v27 }
  0x16   : > { %1104 = vmatpush.bf16.msra.mxu0 %v3040_v5  ;;  %3124 = vmatpush.bf16.msra.mxu2 %v3040_v5  ;;  %v489_v33 = vsel %vm477_vm0, %v3441_v25, 0.0  ;;  %v547_v34 = vmul.f32 %v3417_v10, %v3417_v10  ;;  %v548_v37 = vmul.f32 %v3419_v11, %v3419_v11  ;;  %v549_v38 = vmul.f32 %v3421_v12, %v3421_v12 }
  0x17   : > { %v482_v24 = vadd.f32 %v481_v19, %v480_v21  ;;  %v3461_v39 = vunpack.c.h.bf16 %v3110_v27  ;;  %v491_v40 = vsel %vm477_vm0, %v3446_v29, 0.0  ;;  %v550_v42 = vmul.f32 %v3425_v15, %v3425_v15 }
  0x18   : > { %v3467_v43 = vunpack.c.l.bf16 %v3111_v35  ;;  %v493_v44 = vsel %vm477_vm0, %v3450_v32, 0.0  ;;  %v579_v45 = vsel %vm477_vm0, %v547_v34, 0.0  ;;  %v551_v48 = vmul.f32 %v3427_v16, %v3427_v16 }
  0x19   : > { %1346 = vmatpush.bf16.msra.mxu1 %v3019_v8  ;;  %3129 = vmatpush.bf16.msra.mxu3 %v3019_v8  ;;  %v484_v28 = vadd.f32 %v483_v23, %v482_v24  ;;  %v580_v49 = vsel %vm477_vm0, %v548_v37, 0.0  ;;  %v582_v50 = vsel %vm477_vm0, %v549_v38, 0.0  ;;  %v3477_v51 = vunpack.c.h.bf16 %v3111_v35 }
  0x1a   : > { %1105 = vmatpush.bf16.msra.mxu0 %v3039_v9  ;;  %3125 = vmatpush.bf16.msra.mxu2 %v3039_v9  ;;  %v495_v52 = vsel %vm477_vm0, %v3461_v39, 0.0  ;;  %v581_v53 = vadd.f32 %v580_v49, %v579_v45  ;;  %v552_v55 = vmul.f32 %v3437_v22, %v3437_v22  ;;  %v584_v56 = vsel %vm477_vm0, %v550_v42, 0.0  ;;  %v3114_v9 = vld [vmem:[%s3401_s24 + $0x40] sm:$0xff]  }
  0x1b   : > { %v486_v31 = vadd.f32 %v485_v26, %v484_v28  ;;  %v3484_v57 = vunpack.c.l.bf16 %v3112_v46  ;;  %v497_v58 = vsel %vm477_vm0, %v3467_v43, 0.0  ;;  %v553_v62 = vmul.f32 %v3441_v25, %v3441_v25 }
  0x1c   : > { %2982 = vmatmul.msk.bf16.vlgmr.msra.gmra.mxu1 %vm477_vm0, %v3003_v13  ;;  %v583_v59 = vadd.f32 %v582_v50, %v581_v53  ;;  %v586_v63 = vsel %vm477_vm0, %v551_v48, 0.0  ;;  %v3492_v0 = vunpack.c.h.bf16 %v3112_v46  ;;  %v499_v1 = vsel %vm477_vm0, %v3477_v51, 0.0  ;;  %v3116_v46 = vld [vmem:[%s3401_s24 + $0x50] sm:$0xff]  }
  0x1d   : > { %v488_v36 = vadd.f32 %v487_v30, %v486_v31  ;;  %v554_v4 = vmul.f32 %v3446_v29, %v3446_v29  ;;  %v588_v5 = vsel %vm477_vm0, %v552_v55, 0.0  ;;  %v3499_v6 = vunpack.c.l.bf16 %v3113_v60  ;;  %v3115_v30 = vld [vmem:[%s3401_s24 + $0x48] sm:$0xff]  }
  0x1e   : > { %v585_v2 = vadd.f32 %v584_v56, %v583_v59  ;;  %v501_v7 = vsel %vm477_vm0, %v3484_v57, 0.0  ;;  %v555_v14 = vmul.f32 %v3450_v32, %v3450_v32  ;;  %v590_v17 = vsel %vm477_vm0, %v553_v62, 0.0 }
  0x1f   : > { %v490_v41 = vadd.f32 %v489_v33, %v488_v36  ;;  %v3507_v18 = vunpack.c.h.bf16 %v3113_v60  ;;  %v503_v19 = vsel %vm477_vm0, %v3492_v0, 0.0  ;;  %v556_v23 = vmul.f32 %v3461_v39, %v3461_v39 }
  0x20   : > { %v587_v8 = vadd.f32 %v586_v63, %v585_v2  ;;  %v592_v24 = vsel %vm477_vm0, %v554_v4, 0.0  ;;  %v3514_v26 = vunpack.c.l.bf16 %v3114_v9  ;;  %v505_v27 = vsel %vm477_vm0, %v3499_v6, 0.0 }
  0x21   : > { %v492_v47 = vadd.f32 %v491_v40, %v490_v41  ;;  %v557_v33 = vmul.f32 %v3467_v43, %v3467_v43  ;;  %v594_v34 = vsel %vm477_vm0, %v555_v14, 0.0  ;;  %v3522_v35 = vunpack.c.h.bf16 %v3114_v9 }
  0x22   : > { %v589_v20 = vadd.f32 %v588_v5, %v587_v8  ;;  %v507_v36 = vsel %vm477_vm0, %v3507_v18, 0.0  ;;  %v558_v40 = vmul.f32 %v3477_v51, %v3477_v51  ;;  %v596_v41 = vsel %vm477_vm0, %v556_v23, 0.0 }
  0x23   : > { %v494_v54 = vadd.f32 %v493_v44, %v492_v47  ;;  %v3529_v42 = vunpack.c.l.bf16 %v3115_v30  ;;  %v509_v44 = vsel %vm477_vm0, %v3514_v26, 0.0  ;;  %v559_v48 = vmul.f32 %v3484_v57, %v3484_v57 }
  0x24   : > { %v591_v28 = vadd.f32 %v590_v17, %v589_v20  ;;  %v598_v49 = vsel %vm477_vm0, %v557_v33, 0.0  ;;  %v3537_v50 = vunpack.c.h.bf16 %v3115_v30  ;;  %v560_v55 = vmul.f32 %v3492_v0, %v3492_v0  ;;  %v3118_v17 = vld [vmem:[%s3401_s24 + $0x60] sm:$0xff]  }
  0x25   : > { %v496_v61 = vadd.f32 %v495_v52, %v494_v54  ;;  %v511_v52 = vsel %vm477_vm0, %v3522_v35, 0.0  ;;  %v600_v56 = vsel %vm477_vm0, %v558_v40, 0.0  ;;  %v513_v59 = vsel %vm477_vm0, %v3529_v42, 0.0 }
  0x26   : > { %v593_v37 = vadd.f32 %v592_v24, %v591_v28  ;;  %v561_v63 = vmul.f32 %v3499_v6, %v3499_v6  ;;  %v3552_v2 = vunpack.c.h.bf16 %v3116_v46  ;;  %v604_v8 = vsel %vm477_vm0, %v560_v55, 0.0  ;;  %v3120_v55 = vld [vmem:[%s3401_s24 + $0x70] sm:$0xff]  }
  0x27   : > { %v498_v3 = vadd.f32 %v497_v58, %v496_v61  ;;  %v3544_v58 = vunpack.c.l.bf16 %v3116_v46  ;;  %v3117_v61 = vld [vmem:[%s3401_s24 + $0x58] sm:$0xff]   ;;  %v563_v20 = vmul.f32 %v3514_v26, %v3514_v26  ;;  %v564_v30 = vmul.f32 %v3522_v35, %v3522_v35 }
  0x28   : > { %v595_v45 = vadd.f32 %v594_v34, %v593_v37  ;;  %v3559_v9 = vunpack.c.l.bf16 %v3117_v61  ;;  %v3567_v23 = vunpack.c.h.bf16 %v3117_v61  ;;  %v519_v24 = vsel %vm477_vm0, %v3552_v2, 0.0  ;;  %v3119_v37 = vld [vmem:[%s3401_s24 + $0x68] sm:$0xff]  }
  0x29   : > { %v500_v13 = vadd.f32 %v499_v1, %v498_v3  ;;  %v602_v1 = vsel %vm477_vm0, %v559_v48, 0.0  ;;  %v515_v3 = vsel %vm477_vm0, %v3537_v50, 0.0  ;;  %v3574_v33 = vunpack.c.l.bf16 %v3118_v17 }
  0x2a   : > { %v597_v53 = vadd.f32 %v596_v41, %v595_v45  ;;  %v521_v34 = vsel %vm477_vm0, %v3559_v9, 0.0  ;;  %v565_v40 = vmul.f32 %v3529_v42, %v3529_v42  ;;  %v610_v41 = vsel %vm477_vm0, %v563_v20, 0.0 }
  0x2b   : > { %v502_v21 = vadd.f32 %v501_v7, %v500_v13  ;;  %v562_v7 = vmul.f32 %v3507_v18, %v3507_v18  ;;  %v517_v13 = vsel %vm477_vm0, %v3544_v58, 0.0  ;;  %v523_v45 = vsel %vm477_vm0, %v3567_v23, 0.0 }
  0x2c   : > { %v599_v60 = vadd.f32 %v598_v49, %v597_v53  ;;  %v566_v48 = vmul.f32 %v3537_v50, %v3537_v50  ;;  %v612_v49 = vsel %vm477_vm0, %v564_v30, 0.0  ;;  %v525_v53 = vsel %vm477_vm0, %v3574_v33, 0.0 }
  0x2d   : > { %v504_v31 = vadd.f32 %v503_v19, %v502_v21  ;;  %v606_v21 = vsel %vm477_vm0, %v561_v63, 0.0  ;;  %v3597_v61 = vunpack.c.h.bf16 %v3119_v37  ;;  %v3612_v20 = vunpack.c.h.bf16 %v3120_v55 }
  0x2e   : > { %v601_v4 = vadd.f32 %v600_v56, %v599_v60  ;;  %v614_v60 = vsel %vm477_vm0, %v565_v40, 0.0 }
  0x2f   : > { %v506_v38 = vadd.f32 %v505_v27, %v504_v31  ;;  %v608_v31 = vsel %vm477_vm0, %v562_v7, 0.0 }
  0x30   : > { %v603_v14 = vadd.f32 %v602_v1, %v601_v4  ;;  %v616_v4 = vsel %vm477_vm0, %v566_v48, 0.0 }
  0x31   : > { %v508_v47 = vadd.f32 %v507_v36, %v506_v38 }
  0x32   : > { %v605_v27 = vadd.f32 %v604_v8, %v603_v14 }
  0x33   : > { %v510_v54 = vadd.f32 %v509_v44, %v508_v47  ;;  %v3582_v44 = vunpack.c.h.bf16 %v3118_v17  ;;  %v569_v17 = vmul.f32 %v3559_v9, %v3559_v9 }
  0x34   : > { %v607_v36 = vadd.f32 %v606_v21, %v605_v27  ;;  %v531_v21 = vsel %vm477_vm0, %v3597_v61, 0.0 }
  0x35   : > { %v512_v62 = vadd.f32 %v511_v52, %v510_v54  ;;  %v3589_v52 = vunpack.c.l.bf16 %v3119_v37  ;;  %v622_v40 = vsel %vm477_vm0, %v569_v17, 0.0  ;;  %v572_v48 = vmul.f32 %v3582_v44, %v3582_v44 }
  0x36   : > { %v609_v46 = vadd.f32 %v608_v31, %v607_v36 }
  0x37   : > { %v514_v5 = vadd.f32 %v513_v59, %v512_v62  ;;  %v567_v59 = vmul.f32 %v3544_v58, %v3544_v58  ;;  %v527_v62 = vsel %vm477_vm0, %v3582_v44, 0.0  ;;  %v529_v7 = vsel %vm477_vm0, %v3589_v52, 0.0 }
  0x38   : > { %v611_v54 = vadd.f32 %v610_v41, %v609_v46 }
  0x39   : > { %v516_v19 = vadd.f32 %v515_v3, %v514_v5  ;;  %v568_v3 = vmul.f32 %v3552_v2, %v3552_v2  ;;  %v3604_v5 = vunpack.c.l.bf16 %v3120_v55 }
  0x3a   : > { %v613_v63 = vadd.f32 %v612_v49, %v611_v54 }
  0x3b   : > { %v518_v28 = vadd.f32 %v517_v13, %v516_v19  ;;  %v3121_v13 = vld [vmem:[%s3401_s24 + $0x78] sm:$0xff]   ;;  %v618_v19 = vsel %vm477_vm0, %v567_v59, 0.0  ;;  %v620_v30 = vsel %vm477_vm0, %v568_v3, 0.0  ;;  %v628_v3 = vsel %vm477_vm0, %v572_v48, 0.0  ;;  %s5303_s24 = scalar_lea.vmem %s5517_s8, %s3389_s17 }
  0x3c   : > { %v615_v8 = vadd.f32 %v614_v60, %v613_v63  ;;  %v3619_v31 = vunpack.c.l.bf16 %v3121_v13  ;;  %v3626_v41 = vunpack.c.h.bf16 %v3121_v13 }
  0x3d   : > { %v520_v38 = vadd.f32 %v519_v24, %v518_v28  ;;  %v570_v28 = vmul.f32 %v3567_v23, %v3567_v23 }
  0x3e   : > { %v617_v24 = vadd.f32 %v616_v4, %v615_v8  ;;  %v539_v60 = vsel %vm477_vm0, %v3626_v41, 0.0  ;;  %v575_v8 = vmul.f32 %v3604_v5, %v3604_v5 }
  0x3f   : > { %v522_v47 = vadd.f32 %v521_v34, %v520_v38  ;;  %v533_v34 = vsel %vm477_vm0, %v3604_v5, 0.0  ;;  %v571_v38 = vmul.f32 %v3574_v33, %v3574_v33  ;;  %v624_v49 = vsel %vm477_vm0, %v570_v28, 0.0 }
  0x40   : > { %v619_v36 = vadd.f32 %v618_v19, %v617_v24  ;;  %v576_v19 = vmul.f32 %v3612_v20, %v3612_v20  ;;  %v577_v28 = vmul.f32 %v3619_v31, %v3619_v31 }
  0x41   : > { %v524_v56 = vadd.f32 %v523_v45, %v522_v47  ;;  %v535_v45 = vsel %vm477_vm0, %v3612_v20, 0.0  ;;  %v626_v59 = vsel %vm477_vm0, %v571_v38, 0.0 }
  0x42   : > { %v621_v46 = vadd.f32 %v620_v30, %v619_v36  ;;  %v634_v30 = vsel %vm477_vm0, %v575_v8, 0.0  ;;  %v636_v38 = vsel %vm477_vm0, %v576_v19, 0.0 }
  0x43   : > { %v526_v1 = vadd.f32 %v525_v53, %v524_v56  ;;  %v537_v53 = vsel %vm477_vm0, %v3619_v31, 0.0  ;;  %v573_v56 = vmul.f32 %v3589_v52, %v3589_v52 }
  0x44   : > { %v623_v54 = vadd.f32 %v622_v40, %v621_v46 }
  0x45   : > { %v528_v14 = vadd.f32 %v527_v62, %v526_v1  ;;  %v574_v1 = vmul.f32 %v3597_v61, %v3597_v61  ;;  %v630_v13 = vsel %vm477_vm0, %v573_v56, 0.0 }
  0x46   : > { %v625_v62 = vadd.f32 %v624_v49, %v623_v54 }
  0x47   : > { %v530_v27 = vadd.f32 %v529_v7, %v528_v14 }
  0x48   : > { %v627_v4 = vadd.f32 %v626_v59, %v625_v62 }
  0x49   : > { %v532_v37 = vadd.f32 %v531_v21, %v530_v27  ;;  %v632_v21 = vsel %vm477_vm0, %v574_v1, 0.0 }
  0x4a   : > { %v629_v14 = vadd.f32 %v628_v3, %v627_v4 }
  0x4b   : > { %v534_v47 = vadd.f32 %v533_v34, %v532_v37  ;;  %v578_v37 = vmul.f32 %v3626_v41, %v3626_v41 }
  0x4c   : > { %v631_v24 = vadd.f32 %v630_v13, %v629_v14 }
  0x4d   : > { %v536_v55 = vadd.f32 %v535_v45, %v534_v47  ;;  %v638_v45 = vsel %vm477_vm0, %v577_v28, 0.0  ;;  %v640_v48 = vsel %vm477_vm0, %v578_v37, 0.0 }
  0x4e   : > { %v633_v34 = vadd.f32 %v632_v21, %v631_v24 }
  0x4f   : > { %v538_v63 = vadd.f32 %v537_v53, %v536_v55 }
  0x50   : > { %v635_v40 = vadd.f32 %v634_v30, %v633_v34 }
  0x51   : > { %v540_v7 = vadd.f32 %v539_v60, %v538_v63 }
  0x52   : > { %v637_v47 = vadd.f32 %v636_v38, %v635_v40 }
  0x53   : > { %v541_v17 = vrot.slane %v540_v7, 4 }
  0x54   : > { %v639_v49 = vadd.f32 %v638_v45, %v637_v47 }
  0x55   : > { %v542_v27 = vadd.f32 %v541_v17, %v540_v7  ;;  %v3004_v17 = vld [vmem:[%s3412_s10 + $0x8] sm:$0xff] }
  0x56   : > { %v641_v54 = vadd.f32 %v640_v48, %v639_v49  ;;  %2983 = vmatmul.msk.bf16.gmra.mxu1 %vm477_vm0, %v3004_v17 }
  0x57   : > { %v543_v36 = vrot.slane %v542_v27, 2 }
  0x58   : > { %v642_v55 = vrot.slane %v641_v54, 4 }
  0x59   : > { %v544_v46 = vadd.f32 %v543_v36, %v542_v27 }
  0x5a   : > { %v643_v59 = vadd.f32 %v642_v55, %v641_v54 }
  0x5b   : > { %v545_v53 = vrot.slane %v544_v46, 1 }
  0x5c   : > { %v644_v60 = vrot.slane %v643_v59, 2 }
  0x5d   : > { %v546_v56 = vadd.f32 %v545_v53, %v544_v46 }
  0x5e   : > { %v645_v62 = vadd.f32 %v644_v60, %v643_v59  ;;  %v3011_v60 = vld [vmem:[%s3412_s10 + $0x40] sm:$0xff] }
  0x5f   : > { %v3657_v63 = vmul.f32 0.00390625, %v546_v56  ;;  %2990 = vmatmul.msk.bf16.vlgmr.msra.gmra.mxu3 %vm477_vm0, %v3011_v60 }
  0x60   : > { %v646_v1 = vrot.slane %v645_v62, 1 }
  0x61   : > { %v650_v4 = vmul.f32 %v3657_v63, %v3657_v63  ;;  %v653_v30 = vsub.f32 %v3417_v10, %v3657_v63  ;;  %v654_v34 = vsub.f32 %v3419_v11, %v3657_v63  ;;  %v655_v36 = vsub.f32 %v3421_v12, %v3657_v63  ;;  %v3678_v10 = vld [vmem:[%s5511_s2] ss:$0 sm:$0xff] }
  0x62   : > { %v647_v3 = vadd.f32 %v646_v1, %v645_v62  ;;  %v656_v37 = vsub.f32 %v3425_v15, %v3657_v63  ;;  %v669_v40 = vsub.f32 %v3514_v26, %v3657_v63  ;;  %v670_v45 = vsub.f32 %v3522_v35, %v3657_v63  ;;  %v3691_v35 = vld [vmem:[%s5512_s3] ss:$0 sm:$0xff]  ;;  %v3005_v62 = vld [vmem:[%s3412_s10 + $0x10] sm:$0xff] }
  0x63   : > { %v657_v12 = vsub.f32 %v3427_v16, %v3657_v63  ;;  %v658_v15 = vsub.f32 %v3437_v22, %v3657_v63  ;;  %v674_v60 = vsub.f32 %v3552_v2, %v3657_v63 }
  0x64   : > { %v649_v7 = vmul.f32 0.00390625, %v647_v3 }
  0x66   : > { %v651_v8 = vsub.f32 %v649_v7, %v650_v4  ;;  %2984 = vmatmul.msk.bf16.gmra.mxu1 %vm477_vm0, %v3005_v62  ;;  %v3006_v62 = vld [vmem:[%s3412_s10 + $0x18] sm:$0xff] }
  0x68   : > { %v652_v13 = vmax.f32 %v651_v8, 0.0 }
  0x6a   : > { %v685_v14 = vadd.f32 1e-05, %v652_v13 }
  0x6c   : > { %3158 = vrsqrt.f32 %v685_v14  ;;  %vm692_vm1 = vweird.f32 %v685_v14 }
  0x72   : > { %v3159_v19 = vpop.eup %3158 }
  0x73   : > { %v687_v21 = vmul.f32 %v3159_v19, %v685_v14  ;;  %vm693_vm2 = vweird.f32 %v3159_v19 }
  0x74   : > { %vm694_vm3 = vmor %vm692_vm1, %vm693_vm2 }
  0x75   : > { %v688_v24 = vmul.f32 %v3159_v19, %v687_v21 }
  0x76   : > { %2985 = vmatmul.msk.bf16.gmra.mxu1 %vm477_vm0, %v3006_v62  ;;  %v678_v62 = vsub.f32 %v3582_v44, %v3657_v63 }
  0x77   : > { %v689_v27 = vmul.f32 0.5, %v688_v24 }
  0x79   : > { %v690_v28 = vsub.f32 1.5, %v689_v27 }
  0x7b   : > { %v691_v38 = vmul.f32 %v3159_v19, %v690_v28 }
  0x7d   : > { %v3680_v11 = vsel %vm694_vm3, %v3159_v19, %v691_v38  ;;  %v671_v38 = vsub.f32 %v3529_v42, %v3657_v63 }
  0x7e   : > { %v696_v26 = vmul.f32 %v3680_v11, %v653_v30  ;;  %v697_v46 = vmul.f32 %v3680_v11, %v654_v34  ;;  %v698_v47 = vmul.f32 %v3680_v11, %v655_v36  ;;  %v699_v48 = vmul.f32 %v3680_v11, %v656_v37 }
  0x7f   : > { %v712_v49 = vmul.f32 %v3680_v11, %v669_v40  ;;  %v713_v16 = vmul.f32 %v3680_v11, %v670_v45  ;;  %v700_v53 = vmul.f32 %v3680_v11, %v657_v12  ;;  %v701_v22 = vmul.f32 %v3680_v11, %v658_v15 }
  0x80   : > { %v732_v54 = vmul.f32 %v3678_v10, %v696_v26  ;;  %v733_v55 = vmul.f32 %v3678_v10, %v697_v46  ;;  %v734_v56 = vmul.f32 %v3678_v10, %v698_v47  ;;  %v735_v59 = vmul.f32 %v3678_v10, %v699_v48 }
  0x81   : > { %v748_v1 = vmul.f32 %v3678_v10, %v712_v49  ;;  %v749_v3 = vmul.f32 %v3678_v10, %v713_v16  ;;  %v736_v4 = vmul.f32 %v3678_v10, %v700_v53  ;;  %v737_v7 = vmul.f32 %v3678_v10, %v701_v22 }
  0x82   : > { %v768_v8 = vadd.f32 %v3691_v35, %v732_v54  ;;  %v769_v13 = vadd.f32 %v3691_v35, %v733_v55  ;;  %v770_v14 = vadd.f32 %v3691_v35, %v734_v56  ;;  %v771_v17 = vadd.f32 %v3691_v35, %v735_v59 }
  0x83   : > { %v784_v19 = vadd.f32 %v3691_v35, %v748_v1  ;;  %v785_v21 = vadd.f32 %v3691_v35, %v749_v3  ;;  %v772_v30 = vadd.f32 %v3691_v35, %v736_v4  ;;  %v773_v36 = vadd.f32 %v3691_v35, %v737_v7 }
  0x84   : > { %v800_v24 = vpack.c.bf16 %v768_v8, %v768_v8  ;;  %v801_v27 = vpack.c.bf16 %v769_v13, %v769_v13  ;;  %v802_v28 = vpack.c.bf16 %v770_v14, %v770_v14  ;;  %v803_v34 = vpack.c.bf16 %v771_v17, %v771_v17 }
  0x85   : > { %v816_v37 = vpack.c.bf16 %v784_v19, %v784_v19  ;;  %v672_v40 = vsub.f32 %v3537_v50, %v3657_v63  ;;  %v817_v45 = vpack.c.bf16 %v785_v21, %v785_v21  ;;  %v804_v12 = vpack.c.bf16 %v772_v30, %v772_v30 }
  0x86   : > { %833 = vst.msk [vmem:[#allocation2] sm:$0xf] %vm832_vm4, %v800_v24  ;;  %v714_v15 = vmul.f32 %v3680_v11, %v671_v38  ;;  %v805_v46 = vpack.c.bf16 %v773_v36, %v773_v36  ;;  %v659_v49 = vsub.f32 %v3441_v25, %v3657_v63  ;;  %v660_v16 = vsub.f32 %v3446_v29, %v3657_v63  ;;  %v3012_v25 = vld [vmem:[%s3412_s10 + $0x48] sm:$0xff] }
  0x87   : > { %834 = vst.msk [vmem:[#allocation2 + $0x4] sm:$0xf] %vm832_vm4, %v801_v27  ;;  %v715_v26 = vmul.f32 %v3680_v11, %v672_v40  ;;  %v673_v59 = vsub.f32 %v3544_v58, %v3657_v63  ;;  %v717_v4 = vmul.f32 %v3680_v11, %v674_v60  ;;  %2991 = vmatmul.msk.bf16.gmra.mxu3 %vm477_vm0, %v3012_v25 }
  0x88   : > { %835 = vst.msk [vmem:[#allocation2 + $0x8] sm:$0xf] %vm832_vm4, %v802_v28  ;;  %v750_v42 = vmul.f32 %v3678_v10, %v714_v15  ;;  %v702_v55 = vmul.f32 %v3680_v11, %v659_v49  ;;  %v703_v56 = vmul.f32 %v3680_v11, %v660_v16  ;;  %v661_v30 = vsub.f32 %v3450_v32, %v3657_v63  ;;  %v3007_v15 = vld [vmem:[%s3412_s10 + $0x20] sm:$0xff] }
  0x89   : > { %836 = vst.msk [vmem:[#allocation2 + $0xc] sm:$0xf] %vm832_vm4, %v803_v34  ;;  %v751_v47 = vmul.f32 %v3678_v10, %v715_v26  ;;  %v716_v3 = vmul.f32 %v3680_v11, %v673_v59  ;;  %v753_v13 = vmul.f32 %v3678_v10, %v717_v4  ;;  %v662_v34 = vsub.f32 %v3461_v39, %v3657_v63 }
  0x8a   : > { %849 = vst.msk [vmem:[#allocation2 + $0x40] sm:$0xf] %vm832_vm4, %v816_v37  ;;  %v786_v50 = vadd.f32 %v3691_v35, %v750_v42  ;;  %v738_v29 = vmul.f32 %v3678_v10, %v702_v55  ;;  %v739_v1 = vmul.f32 %v3678_v10, %v703_v56  ;;  %v704_v36 = vmul.f32 %v3680_v11, %v661_v30 }
  0x8b   : > { %850 = vst.msk [vmem:[#allocation2 + $0x44] sm:$0xf] %vm832_vm4, %v817_v45  ;;  %v787_v48 = vadd.f32 %v3691_v35, %v751_v47  ;;  %v752_v8 = vmul.f32 %v3678_v10, %v716_v3  ;;  %v789_v21 = vadd.f32 %v3691_v35, %v753_v13  ;;  %v705_v37 = vmul.f32 %v3680_v11, %v662_v34  ;;  %v3008_v3 = vld [vmem:[%s3412_s10 + $0x28] sm:$0xff] }
  0x8c   : > { %837 = vst.msk [vmem:[#allocation2 + $0x10] sm:$0xf] %vm832_vm4, %v804_v12  ;;  %v818_v22 = vpack.c.bf16 %v786_v50, %v786_v50  ;;  %v774_v2 = vadd.f32 %v3691_v35, %v738_v29  ;;  %v775_v7 = vadd.f32 %v3691_v35, %v739_v1  ;;  %v675_v38 = vsub.f32 %v3559_v9, %v3657_v63  ;;  %v3013_v12 = vld [vmem:[%s3412_s10 + $0x50] sm:$0xff]  ;;  %v3014_v1 = vld [vmem:[%s3412_s10 + $0x58] sm:$0xff] }
  0x8d   : > { %838 = vst.msk [vmem:[#allocation2 + $0x14] sm:$0xf] %vm832_vm4, %v805_v46  ;;  %v819_v54 = vpack.c.bf16 %v787_v48, %v787_v48  ;;  %v788_v19 = vadd.f32 %v3691_v35, %v752_v8  ;;  %v821_v27 = vpack.c.bf16 %v789_v21, %v789_v21  ;;  %v676_v40 = vsub.f32 %v3567_v23, %v3657_v63 }
  0x8e   : > { %v3023_v53 = vld [vmem:[#allocation2] sm:$0xff]  ;;  %851 = vst.msk [vmem:[#allocation2 + $0x48] sm:$0xf] %vm832_vm4, %v818_v22  ;;  %v806_v14 = vpack.c.bf16 %v774_v2, %v774_v2  ;;  %v807_v17 = vpack.c.bf16 %v775_v7, %v775_v7  ;;  %v740_v32 = vmul.f32 %v3678_v10, %v704_v36  ;;  %v741_v26 = vmul.f32 %v3678_v10, %v705_v37 }
  0x8f   : > { %2886 = vmatmul.msk.bf16.vlgmr.msra.gmra.mxu0 %vm477_vm0, %v3023_v53  ;;  %852 = vst.msk [vmem:[#allocation2 + $0x4c] sm:$0xf] %vm832_vm4, %v819_v54  ;;  %v820_v24 = vpack.c.bf16 %v788_v19, %v788_v19  ;;  %v718_v39 = vmul.f32 %v3680_v11, %v675_v38  ;;  %v719_v46 = vmul.f32 %v3680_v11, %v676_v40  ;;  %v3015_v40 = vld [vmem:[%s3412_s10 + $0x60] sm:$0xff] }
  0x90   : > { %839 = vst.msk [vmem:[#allocation2 + $0x18] sm:$0xf] %vm832_vm4, %v806_v14  ;;  %v3024_v28 = vld [vmem:[#allocation2 + $0x8] sm:$0xff]  ;;  %2986 = vmatmul.msk.bf16.gmra.mxu1 %vm477_vm0, %v3007_v15  ;;  %v776_v9 = vadd.f32 %v3691_v35, %v740_v32  ;;  %v777_v23 = vadd.f32 %v3691_v35, %v741_v26  ;;  %v663_v55 = vsub.f32 %v3467_v43, %v3657_v63 }
  0x91   : > { %840 = vst.msk [vmem:[#allocation2 + $0x1c] sm:$0xf] %vm832_vm4, %v807_v17  ;;  %v754_v42 = vmul.f32 %v3678_v10, %v718_v39  ;;  %v755_v47 = vmul.f32 %v3678_v10, %v719_v46  ;;  %v664_v56 = vsub.f32 %v3477_v51, %v3657_v63  ;;  %v677_v25 = vsub.f32 %v3574_v33, %v3657_v63 }
  0x92   : > { %v3031_v58 = vld [vmem:[#allocation2 + $0x40] sm:$0xff]  ;;  %853 = vst.msk [vmem:[#allocation2 + $0x50] sm:$0xf] %vm832_vm4, %v820_v24  ;;  %v808_v50 = vpack.c.bf16 %v776_v9, %v776_v9  ;;  %v809_v48 = vpack.c.bf16 %v777_v23, %v777_v23  ;;  %v706_v59 = vmul.f32 %v3680_v11, %v663_v55  ;;  %v679_v36 = vsub.f32 %v3589_v52, %v3657_v63 }
  0x93   : > { %2894 = vmatmul.msk.bf16.vlgmr.msra.gmra.mxu2 %vm477_vm0, %v3031_v58  ;;  %854 = vst.msk [vmem:[#allocation2 + $0x54] sm:$0xf] %vm832_vm4, %v821_v27  ;;  %v790_v49 = vadd.f32 %v3691_v35, %v754_v42  ;;  %v791_v16 = vadd.f32 %v3691_v35, %v755_v47  ;;  %v707_v60 = vmul.f32 %v3680_v11, %v664_v56  ;;  %v3016_v56 = vld [vmem:[%s3412_s10 + $0x68] sm:$0xff] }
  0x94   : > { %841 = vst.msk [vmem:[#allocation2 + $0x20] sm:$0xf] %vm832_vm4, %v808_v50  ;;  %v3025_v54 = vld [vmem:[#allocation2 + $0x10] sm:$0xff]  ;;  %v742_v43 = vmul.f32 %v3678_v10, %v706_v59  ;;  %v720_v51 = vmul.f32 %v3680_v11, %v677_v25  ;;  %v721_v58 = vmul.f32 %v3680_v11, %v678_v62  ;;  %v665_v27 = vsub.f32 %v3484_v57, %v3657_v63  ;;  %v3010_v59 = vld [vmem:[%s3412_s10 + $0x38] sm:$0xff] }
  0x95   : > { %v822_v53 = vpack.c.bf16 %v790_v49, %v790_v49  ;;  %v823_v22 = vpack.c.bf16 %v791_v16, %v791_v16  ;;  %842 = vst.msk [vmem:[#allocation2 + $0x24] sm:$0xf] %vm832_vm4, %v809_v48  ;;  %v743_v4 = vmul.f32 %v3678_v10, %v707_v60  ;;  %v680_v37 = vsub.f32 %v3597_v61, %v3657_v63 }
  0x96   : > { %v3032_v45 = vld [vmem:[#allocation2 + $0x48] sm:$0xff]  ;;  %v778_v33 = vadd.f32 %v3691_v35, %v742_v43  ;;  %v756_v2 = vmul.f32 %v3678_v10, %v720_v51  ;;  %v757_v7 = vmul.f32 %v3678_v10, %v721_v58  ;;  %v708_v30 = vmul.f32 %v3680_v11, %v665_v27 }
  0x97   : > { %2992 = vmatmul.msk.bf16.gmra.mxu3 %vm477_vm0, %v3013_v12  ;;  %855 = vst.msk [vmem:[#allocation2 + $0x58] sm:$0xf] %vm832_vm4, %v822_v53  ;;  %v779_v44 = vadd.f32 %v3691_v35, %v743_v4  ;;  %v723_v15 = vmul.f32 %v3680_v11, %v680_v37  ;;  %v667_v48 = vsub.f32 %v3499_v6, %v3657_v63 }
  0x98   : > { %856 = vst.msk [vmem:[#allocation2 + $0x5c] sm:$0xf] %vm832_vm4, %v823_v22  ;;  %v810_v8 = vpack.c.bf16 %v778_v33, %v778_v33  ;;  %v792_v14 = vadd.f32 %v3691_v35, %v756_v2  ;;  %v793_v17 = vadd.f32 %v3691_v35, %v757_v7  ;;  %v3026_v24 = vld [vmem:[#allocation2 + $0x18] sm:$0xff]  ;;  %v744_v57 = vmul.f32 %v3678_v10, %v708_v30 }
  0x99   : > { %v811_v13 = vpack.c.bf16 %v779_v44, %v779_v44  ;;  %v759_v26 = vmul.f32 %v3678_v10, %v723_v15  ;;  %v668_v49 = vsub.f32 %v3507_v18, %v3657_v63  ;;  %v710_v16 = vmul.f32 %v3680_v11, %v667_v48 }
  0x9a   : > { %v3033_v29 = vld [vmem:[#allocation2 + $0x50] sm:$0xff]  ;;  %843 = vst.msk [vmem:[#allocation2 + $0x28] sm:$0xf] %vm832_vm4, %v810_v8  ;;  %v824_v19 = vpack.c.bf16 %v792_v14, %v792_v14  ;;  %v825_v21 = vpack.c.bf16 %v793_v17, %v793_v17  ;;  %v780_v52 = vadd.f32 %v3691_v35, %v744_v57  ;;  %v681_v22 = vsub.f32 %v3604_v5, %v3657_v63 }
  0x9b   : > { %844 = vst.msk [vmem:[#allocation2 + $0x2c] sm:$0xf] %vm832_vm4, %v811_v13  ;;  %v795_v23 = vadd.f32 %v3691_v35, %v759_v26  ;;  %v711_v53 = vmul.f32 %v3680_v11, %v668_v49  ;;  %v746_v6 = vmul.f32 %v3678_v10, %v710_v16  ;;  %v683_v44 = vsub.f32 %v3619_v31, %v3657_v63  ;;  %v3017_v8 = vld [vmem:[%s3412_s10 + $0x70] sm:$0xff] }
  0x9c   : > { %857 = vst.msk [vmem:[#allocation2 + $0x60] sm:$0xf] %vm832_vm4, %v824_v19  ;;  %v812_v39 = vpack.c.bf16 %v780_v52, %v780_v52  ;;  %v3027_v50 = vld [vmem:[#allocation2 + $0x20] sm:$0xff]  ;;  %v724_v18 = vmul.f32 %v3680_v11, %v681_v22  ;;  %v684_v2 = vsub.f32 %v3626_v41, %v3657_v63 }
  0x9d   : > { %858 = vst.msk [vmem:[#allocation2 + $0x64] sm:$0xf] %vm832_vm4, %v825_v21  ;;  %v827_v47 = vpack.c.bf16 %v795_v23, %v795_v23  ;;  %v747_v60 = vmul.f32 %v3678_v10, %v711_v53  ;;  %v782_v5 = vadd.f32 %v3691_v35, %v746_v6  ;;  %v726_v13 = vmul.f32 %v3680_v11, %v683_v44 }
  0x9e   : > { %845 = vst.msk [vmem:[#allocation2 + $0x30] sm:$0xf] %vm832_vm4, %v812_v39  ;;  %v760_v62 = vmul.f32 %v3678_v10, %v724_v18  ;;  %v727_v14 = vmul.f32 %v3680_v11, %v684_v2 }
  0x9f   : > { %2887 = vmatmul.msk.bf16.gmra.mxu0 %vm477_vm0, %v3024_v28  ;;  %v666_v28 = vsub.f32 %v3492_v0, %v3657_v63  ;;  %v3034_v38 = vld [vmem:[#allocation2 + $0x58] sm:$0xff]  ;;  %v722_v0 = vmul.f32 %v3680_v11, %v679_v36  ;;  %860 = vst.msk [vmem:[#allocation2 + $0x6c] sm:$0xf] %vm832_vm4, %v827_v47  ;;  %v762_v17 = vmul.f32 %v3678_v10, %v726_v13 }
  0xa0   : > { %2987 = vmatmul.msk.bf16.gmra.mxu1 %vm477_vm0, %v3008_v3  ;;  %v796_v43 = vadd.f32 %v3691_v35, %v760_v62  ;;  %v763_v19 = vmul.f32 %v3678_v10, %v727_v14 }
  0xa1   : > { %v709_v34 = vmul.f32 %v3680_v11, %v666_v28  ;;  %v758_v32 = vmul.f32 %v3678_v10, %v722_v0  ;;  %v798_v31 = vadd.f32 %v3691_v35, %v762_v17  ;;  %v3018_v28 = vld [vmem:[%s3412_s10 + $0x78] sm:$0xff] }
  0xa2   : > { %v828_v51 = vpack.c.bf16 %v796_v43, %v796_v43  ;;  %v3028_v33 = vld [vmem:[#allocation2 + $0x28] sm:$0xff]  ;;  %v799_v41 = vadd.f32 %v3691_v35, %v763_v19 }
  0xa3   : > { %2895 = vmatmul.msk.bf16.gmra.mxu2 %vm477_vm0, %v3032_v45  ;;  %v3009_v45 = vld [vmem:[%s3412_s10 + $0x30] sm:$0xff]  ;;  %v745_v12 = vmul.f32 %v3678_v10, %v709_v34  ;;  %v794_v9 = vadd.f32 %v3691_v35, %v758_v32 }
  0xa4   : > { %v3035_v55 = vld [vmem:[#allocation2 + $0x60] sm:$0xff]  ;;  %861 = vst.msk [vmem:[#allocation2 + $0x70] sm:$0xf] %vm832_vm4, %v828_v51  ;;  %v831_v21 = vpack.c.bf16 %v799_v41, %v799_v41 }
  0xa5   : > { %v781_v61 = vadd.f32 %v3691_v35, %v745_v12  ;;  %v826_v42 = vpack.c.bf16 %v794_v9, %v794_v9 }
  0xa6   : > { %864 = vst.msk [vmem:[#allocation2 + $0x7c] sm:$0xf] %vm832_vm4, %v831_v21 }
  0xa7   : > { %2993 = vmatmul.msk.bf16.gmra.mxu3 %vm477_vm0, %v3014_v1  ;;  %v813_v46 = vpack.c.bf16 %v781_v61, %v781_v61  ;;  %859 = vst.msk [vmem:[#allocation2 + $0x68] sm:$0xf] %vm832_vm4, %v826_v42  ;;  %v814_v1 = vpack.c.bf16 %v782_v5, %v782_v5 }
  0xa9   : > { %846 = vst.msk [vmem:[#allocation2 + $0x34] sm:$0xf] %vm832_vm4, %v813_v46 }
  0xaa   : > { %847 = vst.msk [vmem:[#allocation2 + $0x38] sm:$0xf] %vm832_vm4, %v814_v1 }
  0xae   : > { %v3036_v7 = vld [vmem:[#allocation2 + $0x68] sm:$0xff] }
  0xaf   : > { %2888 = vmatmul.msk.bf16.gmra.mxu0 %vm477_vm0, %v3025_v54  ;;  %v682_v54 = vsub.f32 %v3612_v20, %v3657_v63  ;;  %v783_v20 = vadd.f32 %v3691_v35, %v747_v60  ;;  %v830_v63 = vpack.c.bf16 %v798_v31, %v798_v31 }
  0xb0   : > { %2988 = vmatmul.msk.bf16.gmra.mxu1 %vm477_vm0, %v3009_v45 }
  0xb1   : > { %v725_v25 = vmul.f32 %v3680_v11, %v682_v54  ;;  %v815_v3 = vpack.c.bf16 %v783_v20, %v783_v20  ;;  %863 = vst.msk [vmem:[#allocation2 + $0x78] sm:$0xf] %vm832_vm4, %v830_v63  ;;  %v1348_v11 = vpop.f32.mrf.mxu1 }
  0xb3   : > { %2896 = vmatmul.msk.bf16.gmra.mxu2 %vm477_vm0, %v3033_v29  ;;  %v761_v29 = vmul.f32 %v3678_v10, %v725_v25  ;;  %848 = vst.msk [vmem:[#allocation2 + $0x3c] sm:$0xf] %vm832_vm4, %v815_v3 }
  0xb5   : > { %v797_v4 = vadd.f32 %v3691_v35, %v761_v29 }
  0xb7   : > { %2994 = vmatmul.msk.bf16.gmra.mxu3 %vm477_vm0, %v3015_v40  ;;  %v829_v58 = vpack.c.bf16 %v797_v4, %v797_v4 }
  0xb8   : > { %v3038_v35 = vld [vmem:[#allocation2 + $0x78] sm:$0xff] }
  0xb9   : > { %862 = vst.msk [vmem:[#allocation2 + $0x74] sm:$0xf] %vm832_vm4, %v829_v58  ;;  %v1350_v10 = vpop.f32.mrf.mxu1 }
  0xba   : > { %v3030_v30 = vld [vmem:[#allocation2 + $0x38] sm:$0xff] }
  0xbf   : > { %2889 = vmatmul.msk.bf16.gmra.mxu0 %vm477_vm0, %v3026_v24  ;;  %v3029_v24 = vld [vmem:[#allocation2 + $0x30] sm:$0xff] }
  0xc0   : > { %2989 = vmatmul.msk.bf16.gmra.mxu1 %vm477_vm0, %v3010_v59  ;;  %v3037_v27 = vld [vmem:[#allocation2 + $0x70] sm:$0xff] }
  0xc3   : > { %2897 = vmatmul.msk.bf16.gmra.mxu2 %vm477_vm0, %v3034_v38 }
  0xc7   : > { %2995 = vmatmul.msk.bf16.gmra.mxu3 %vm477_vm0, %v3016_v56 }
  0xcf   : > { %2890 = vmatmul.msk.bf16.gmra.mxu0 %vm477_vm0, %v3027_v50 }
  0xd3   : > { %2898 = vmatmul.msk.bf16.gmra.mxu2 %vm477_vm0, %v3035_v55  ;;  %v1353_v34 = vpop.f32.mrf.mxu1 }
  0xd7   : > { %2996 = vmatmul.msk.bf16.gmra.mxu3 %vm477_vm0, %v3017_v8 }
  0xdb   : > { %v1355_v38 = vpop.f32.mrf.mxu1 }
  0xdf   : > { %2891 = vmatmul.msk.bf16.gmra.mxu0 %vm477_vm0, %v3028_v33 }
  0xe2   : > { %v1388_v36 = vpop.f32.mrf.mxu3 }
  0xe3   : > { %2899 = vmatmul.msk.bf16.gmra.mxu2 %vm477_vm0, %v3036_v7  ;;  %v1358_v15 = vpop.f32.mrf.mxu1 }
  0xe7   : > { %2997 = vmatmul.msk.bf16.gmra.mxu3 %vm477_vm0, %v3018_v28 }
  0xea   : > { %v1390_v12 = vpop.f32.mrf.mxu3 }
  0xeb   : > { %v1360_v9 = vpop.f32.mrf.mxu1 }
  0xef   : > { %2892 = vmatmul.msk.bf16.gmra.mxu0 %vm477_vm0, %v3029_v24 }
  0xf3   : > { %2900 = vmatmul.msk.bf16.gmra.mxu2 %vm477_vm0, %v3037_v27  ;;  %v1363_v49 = vpop.f32.mrf.mxu1 }
  0xfb   : > { %v1365_v59 = vpop.f32.mrf.mxu1 }
  0xff   : > { %2893 = vmatmul.msk.bf16.gmra.mxu0 %vm477_vm0, %v3030_v30 }
 0x103   : > { %2901 = vmatmul.msk.bf16.gmra.mxu2 %vm477_vm0, %v3038_v35 }
 0x10a   : > { %v1393_v46 = vpop.f32.mrf.mxu3 }
 0x10c   : > { %v1107_v37 = vpop.f32.mrf.mxu0 }
 0x10d   : > { %v3911_v40 = vadd.f32 %v1348_v11, %v1107_v37  ;;  %v1368_v5 = vpop.f32.mrf.mxu1 }
 0x10f   : > { %v1497_v41 = vmul.f32 %v3911_v40, %v3911_v40  ;;  %v1428_v24 = vsel %vm477_vm0, %v3911_v40, 0.0 }
 0x111   : > { %v1529_v30 = vsel %vm477_vm0, %v1497_v41, 0.0 }
 0x112   : > { %v1395_v48 = vpop.f32.mrf.mxu3 }
 0x114   : > { %v1109_v45 = vpop.f32.mrf.mxu0 }
 0x115   : > { %v3913_v57 = vadd.f32 %v1350_v10, %v1109_v45  ;;  %v1370_v3 = vpop.f32.mrf.mxu1 }
 0x116   : > { %v1147_v0 = vpop.f32.mrf.mxu2 }
 0x117   : > { %v3915_v52 = vadd.f32 %v1388_v36, %v1147_v0  ;;  %v1498_v31 = vmul.f32 %v3913_v57, %v3913_v57  ;;  %v1429_v63 = vsel %vm477_vm0, %v3913_v57, 0.0 }
 0x118   : > { %v1430_v35 = vadd.f32 %v1429_v63, %v1428_v24 }
 0x119   : > { %v1530_v11 = vsel %vm477_vm0, %v1498_v31, 0.0 }
 0x11a   : > { %v1398_v55 = vpop.f32.mrf.mxu3 }
 0x11c   : > { %v1112_v61 = vpop.f32.mrf.mxu0 }
 0x11d   : > { %v3917_v32 = vadd.f32 %v1353_v34, %v1112_v61  ;;  %v1373_v58 = vpop.f32.mrf.mxu1 }
 0x11e   : > { %v1149_v26 = vpop.f32.mrf.mxu2 }
 0x11f   : > { %v3919_v39 = vadd.f32 %v1390_v12, %v1149_v26  ;;  %v1499_v21 = vmul.f32 %v3917_v32, %v3917_v32  ;;  %v1431_v27 = vsel %vm477_vm0, %v3917_v32, 0.0  ;;  %v1531_v12 = vadd.f32 %v1530_v11, %v1529_v30 }
 0x120   : > { %v1432_v0 = vadd.f32 %v1431_v27, %v1430_v35 }
 0x121   : > { %v1532_v36 = vsel %vm477_vm0, %v1499_v21, 0.0 }
 0x122   : > { %v3931_v25 = vpop.f32.mrf.mxu3 }
 0x124   : > { %v1114_v23 = vpop.f32.mrf.mxu0 }
 0x125   : > { %v3921_v42 = vadd.f32 %v1355_v38, %v1114_v23  ;;  %v1375_v8 = vpop.f32.mrf.mxu1 }
 0x126   : > { %v1152_v47 = vpop.f32.mrf.mxu2 }
 0x127   : > { %v3923_v50 = vadd.f32 %v1393_v46, %v1152_v47  ;;  %v1500_v28 = vmul.f32 %v3921_v42, %v3921_v42  ;;  %v1433_v37 = vsel %vm477_vm0, %v3921_v42, 0.0  ;;  %v1533_v47 = vadd.f32 %v1532_v36, %v1531_v12 }
 0x12a   : > { %v3937_v1 = vpop.f32.mrf.mxu3 }
 0x12c   : > { %v1117_v16 = vpop.f32.mrf.mxu0 }
 0x12d   : > { %v3925_v53 = vadd.f32 %v1358_v15, %v1117_v16  ;;  %v1378_v19 = vpop.f32.mrf.mxu1  ;;  %v1534_v15 = vsel %vm477_vm0, %v1500_v28, 0.0 }
 0x12e   : > { %v1154_v22 = vpop.f32.mrf.mxu2 }
 0x12f   : > { %v3927_v54 = vadd.f32 %v1395_v48, %v1154_v22  ;;  %v1501_v38 = vmul.f32 %v3925_v53, %v3925_v53  ;;  %v1435_v61 = vsel %vm477_vm0, %v3925_v53, 0.0  ;;  %v1434_v48 = vadd.f32 %v1433_v37, %v1432_v0 }
 0x131   : > { %v1536_v16 = vsel %vm477_vm0, %v1501_v38, 0.0 }
 0x132   : > { %v3941_v51 = vpop.f32.mrf.mxu3 }
 0x134   : > { %v1119_v56 = vpop.f32.mrf.mxu0 }
 0x135   : > { %v3966_v10 = vadd.f32 %v1360_v9, %v1119_v56 }
 0x136   : > { %v1157_v6 = vpop.f32.mrf.mxu2 }
 0x137   : > { %v3929_v60 = vadd.f32 %v1398_v55, %v1157_v6  ;;  %v1502_v26 = vmul.f32 %v3966_v10, %v3966_v10  ;;  %v1437_v22 = vsel %vm477_vm0, %v3966_v10, 0.0  ;;  %v1535_v6 = vadd.f32 %v1534_v15, %v1533_v47 }
 0x139   : > { %v1537_v63 = vadd.f32 %v1536_v16, %v1535_v6 }
 0x13a   : > { %v3945_v2 = vpop.f32.mrf.mxu3 }
 0x13c   : > { %v1122_v18 = vpop.f32.mrf.mxu0 }
 0x13d   : > { %v3974_v45 = vadd.f32 %v1363_v49, %v1122_v18  ;;  %v1380_v49 = vpop.f32.mrf.mxu1  ;;  %v1538_v18 = vsel %vm477_vm0, %v1502_v26, 0.0 }
 0x13e   : > { %v3933_v20 = vpop.f32.mrf.mxu2  ;;  %v1539_v28 = vadd.f32 %v1538_v18, %v1537_v63 }
 0x13f   : > { %v1503_v55 = vmul.f32 %v3974_v45, %v3974_v45 }
 0x141   : > { %v1540_v11 = vsel %vm477_vm0, %v1503_v55, 0.0 }
 0x142   : > { %v3949_v17 = vpop.f32.mrf.mxu3  ;;  %v1541_v37 = vadd.f32 %v1540_v11, %v1539_v28 }
 0x144   : > { %v1124_v62 = vpop.f32.mrf.mxu0 }
 0x145   : > { %v3981_v46 = vadd.f32 %v1365_v59, %v1124_v62  ;;  %v1436_v59 = vadd.f32 %v1435_v61, %v1434_v48  ;;  %v1439_v62 = vsel %vm477_vm0, %v3974_v45, 0.0 }
 0x146   : > { %v3935_v29 = vpop.f32.mrf.mxu2 }
 0x147   : > { %v1504_v31 = vmul.f32 %v3981_v46, %v3981_v46  ;;  %v1438_v21 = vadd.f32 %v1437_v22, %v1436_v59 }
 0x149   : > { %v1440_v30 = vadd.f32 %v1439_v62, %v1438_v21  ;;  %v1542_v35 = vsel %vm477_vm0, %v1504_v31, 0.0 }
 0x14a   : > { %v3985_v23 = vpop.f32.mrf.mxu3  ;;  %v1543_v26 = vadd.f32 %v1542_v35, %v1541_v37 }
 0x14c   : > { %v1127_v43 = vpop.f32.mrf.mxu0 }
 0x14d   : > { %v3992_v56 = vadd.f32 %v1368_v5, %v1127_v43  ;;  %v1441_v5 = vsel %vm477_vm0, %v3981_v46, 0.0 }
 0x14e   : > { %v3939_v4 = vpop.f32.mrf.mxu2  ;;  %v1442_v38 = vadd.f32 %v1441_v5, %v1440_v30 }
 0x14f   : > { %v1505_v43 = vmul.f32 %v3992_v56, %v3992_v56 }
 0x151   : > { %v1544_v12 = vsel %vm477_vm0, %v1505_v43, 0.0 }
 0x152   : > { %v4024_v61 = vpop.f32.mrf.mxu3  ;;  %v1545_v55 = vadd.f32 %v1544_v12, %v1543_v26 }
 0x154   : > { %v1129_v33 = vpop.f32.mrf.mxu0 }
 0x155   : > { %v3999_v41 = vadd.f32 %v1370_v3, %v1129_v33  ;;  %v1443_v3 = vsel %vm477_vm0, %v3992_v56, 0.0 }
 0x156   : > { %v3943_v44 = vpop.f32.mrf.mxu2  ;;  %v1444_v47 = vadd.f32 %v1443_v3, %v1442_v38 }
 0x157   : > { %v1506_v33 = vmul.f32 %v3999_v41, %v3999_v41 }
 0x15a   : > { %v4055_v12 = vpop.f32.mrf.mxu3 }
 0x15c   : > { %v1132_v7 = vpop.f32.mrf.mxu0 }
 0x15d   : > { %v4006_v27 = vadd.f32 %v1373_v58, %v1132_v7  ;;  %v1445_v58 = vsel %vm477_vm0, %v3999_v41, 0.0 }
 0x15e   : > { %v3947_v14 = vpop.f32.mrf.mxu2 }
 0x15f   : > { %v1507_v7 = vmul.f32 %v4006_v27, %v4006_v27  ;;  %v1447_v48 = vsel %vm477_vm0, %v4006_v27, 0.0 }
 0x161   : > { %v1548_v6 = vsel %vm477_vm0, %v1507_v7, 0.0 }
 0x164   : > { %v1134_v13 = vpop.f32.mrf.mxu0 }
 0x165   : > { %v4013_v36 = vadd.f32 %v1375_v8, %v1134_v13  ;;  %v1383_v8 = vpop.f32.mrf.mxu1  ;;  %v1546_v13 = vsel %vm477_vm0, %v1506_v33, 0.0 }
 0x166   : > { %v3983_v9 = vpop.f32.mrf.mxu2  ;;  %v1547_v31 = vadd.f32 %v1546_v13, %v1545_v55  ;;  %v1513_v55 = vmul.f32 %v3915_v52, %v3915_v52 }
 0x167   : > { %v1508_v16 = vmul.f32 %v4013_v36, %v4013_v36  ;;  %v1449_v59 = vsel %vm477_vm0, %v4013_v36, 0.0 }
 0x168   : > { %v1549_v11 = vadd.f32 %v1548_v6, %v1547_v31  ;;  %v1514_v31 = vmul.f32 %v3919_v39, %v3919_v39 }
 0x169   : > { %v1550_v21 = vsel %vm477_vm0, %v1508_v16, 0.0 }
 0x16a   : > { %v1551_v35 = vadd.f32 %v1550_v21, %v1549_v11  ;;  %v1461_v11 = vsel %vm477_vm0, %v3919_v39, 0.0 }
 0x16c   : > { %v1137_v34 = vpop.f32.mrf.mxu0 }
 0x16d   : > { %v4020_v0 = vadd.f32 %v1378_v19, %v1137_v34  ;;  %v1446_v19 = vadd.f32 %v1445_v58, %v1444_v47  ;;  %v1385_v26 = vpop.f32.mrf.mxu1 }
 0x16e   : > { %v4022_v15 = vpop.f32.mrf.mxu2 }
 0x16f   : > { %v1509_v18 = vmul.f32 %v4020_v0, %v4020_v0  ;;  %v1448_v63 = vadd.f32 %v1447_v48, %v1446_v19 }
 0x171   : > { %v1450_v5 = vadd.f32 %v1449_v59, %v1448_v63  ;;  %v1552_v43 = vsel %vm477_vm0, %v1509_v18, 0.0  ;;  %v1459_v18 = vsel %vm477_vm0, %v3915_v52, 0.0 }
 0x172   : > { %v1553_v58 = vadd.f32 %v1552_v43, %v1551_v35  ;;  %v1463_v35 = vsel %vm477_vm0, %v3923_v50, 0.0 }
 0x174   : > { %v1139_v24 = vpop.f32.mrf.mxu0 }
 0x175   : > { %v4031_v22 = vadd.f32 %v1380_v49, %v1139_v24  ;;  %v1451_v49 = vsel %vm477_vm0, %v4020_v0, 0.0 }
 0x176   : > { %v1452_v3 = vadd.f32 %v1451_v49, %v1450_v5  ;;  %v4053_v38 = vpop.f32.mrf.mxu2  ;;  %v1515_v5 = vmul.f32 %v3923_v50, %v3923_v50 }
 0x177   : > { %v1510_v24 = vmul.f32 %v4031_v22, %v4031_v22  ;;  %v1453_v28 = vsel %vm477_vm0, %v4031_v22, 0.0 }
 0x178   : > { %v1454_v7 = vadd.f32 %v1453_v28, %v1452_v3  ;;  %v1516_v3 = vmul.f32 %v3927_v54, %v3927_v54 }
 0x179   : > { %v1554_v33 = vsel %vm477_vm0, %v1510_v24, 0.0  ;;  %v1560_v24 = vsel %vm477_vm0, %v1513_v55, 0.0 }
 0x17a   : > { %v1555_v48 = vadd.f32 %v1554_v33, %v1553_v58  ;;  %v4083_v33 = vadd.f32 %v3931_v25, %v3933_v20  ;;  %v1420_v58 = vpop.f32.mrf.mxu3  ;;  %v1566_v25 = vsel %vm477_vm0, %v1516_v3, 0.0  ;;  %v1467_v20 = vsel %vm477_vm0, %v3929_v60, 0.0 }
 0x17c   : > { %v1142_v34 = vpop.f32.mrf.mxu0 }
 0x17d   : > { %v4038_v62 = vadd.f32 %v1383_v8, %v1142_v34 }
 0x17f   : > { %v1511_v30 = vmul.f32 %v4038_v62, %v4038_v62  ;;  %v1455_v37 = vsel %vm477_vm0, %v4038_v62, 0.0 }
 0x180   : > { %v1456_v16 = vadd.f32 %v1455_v37, %v1454_v7  ;;  %v1179_v37 = vpop.f32.mrf.mxu2 }
 0x181   : > { %v1556_v8 = vsel %vm477_vm0, %v1511_v30, 0.0  ;;  %v1562_v30 = vsel %vm477_vm0, %v1514_v31, 0.0 }
 0x182   : > { %v1557_v6 = vadd.f32 %v1556_v8, %v1555_v48  ;;  %v1465_v8 = vsel %vm477_vm0, %v3927_v54, 0.0  ;;  %v1517_v48 = vmul.f32 %v3929_v60, %v3929_v60  ;;  %v1423_v3 = vpop.f32.mrf.mxu3 }
 0x184   : > { %v1144_v47 = vpop.f32.mrf.mxu0  ;;  %v1568_v31 = vsel %vm477_vm0, %v1517_v48, 0.0 }
 0x185   : > { %v4058_v13 = vadd.f32 %v1385_v26, %v1144_v47  ;;  %v1564_v47 = vsel %vm477_vm0, %v1515_v5, 0.0 }
 0x187   : > { %v1457_v19 = vsel %vm477_vm0, %v4058_v13, 0.0  ;;  %v1512_v34 = vmul.f32 %v4058_v13, %v4058_v13 }
 0x188   : > { %v1458_v59 = vadd.f32 %v1457_v19, %v1456_v16  ;;  %v4092_v16 = vadd.f32 %v3937_v1, %v3935_v29  ;;  %v1469_v29 = vsel %vm477_vm0, %v4083_v33, 0.0 }
 0x189   : > { %v1558_v63 = vsel %vm477_vm0, %v1512_v34, 0.0  ;;  %v1518_v34 = vmul.f32 %v4083_v33, %v4083_v33 }
 0x18a   : > { %v1460_v21 = vadd.f32 %v1459_v18, %v1458_v59  ;;  %v1559_v49 = vadd.f32 %v1558_v63, %v1557_v6  ;;  %v4101_v6 = vadd.f32 %v3941_v51, %v3939_v4  ;;  %v1519_v1 = vmul.f32 %v4092_v16, %v4092_v16 }
 0x18b   : > { %v4110_v63 = vadd.f32 %v3945_v2, %v3943_v44  ;;  %v1471_v4 = vsel %vm477_vm0, %v4092_v16, 0.0 }
 0x18c   : > { %v1462_v43 = vadd.f32 %v1461_v11, %v1460_v21  ;;  %v1561_v28 = vadd.f32 %v1560_v24, %v1559_v49  ;;  %v1570_v24 = vsel %vm477_vm0, %v1518_v34, 0.0  ;;  %v1520_v51 = vmul.f32 %v4101_v6, %v4101_v6 }
 0x18d   : > { %v4119_v11 = vadd.f32 %v3949_v17, %v3947_v14  ;;  %v1473_v44 = vsel %vm477_vm0, %v4101_v6, 0.0  ;;  %v1521_v2 = vmul.f32 %v4110_v63, %v4110_v63  ;;  %v1475_v17 = vsel %vm477_vm0, %v4110_v63, 0.0 }
 0x18e   : > { %v1464_v7 = vadd.f32 %v1463_v35, %v1462_v43  ;;  %v1563_v26 = vadd.f32 %v1562_v30, %v1561_v28  ;;  %v1572_v28 = vsel %vm477_vm0, %v1519_v1, 0.0  ;;  %v4128_v30 = vadd.f32 %v3985_v23, %v3983_v9  ;;  %v1182_v35 = vpop.f32.mrf.mxu2 }
 0x18f   : > { %v1574_v14 = vsel %vm477_vm0, %v1520_v51, 0.0  ;;  %v1576_v9 = vsel %vm477_vm0, %v1521_v2, 0.0  ;;  %v1477_v23 = vsel %vm477_vm0, %v4119_v11, 0.0 }
 0x190   : > { %v1466_v55 = vadd.f32 %v1465_v8, %v1464_v7  ;;  %v1565_v19 = vadd.f32 %v1564_v47, %v1563_v26  ;;  %v1522_v47 = vmul.f32 %v4119_v11, %v4119_v11  ;;  %v4137_v8 = vadd.f32 %v4024_v61, %v4022_v15 }
 0x191   : > { %v1479_v15 = vsel %vm477_vm0, %v4128_v30, 0.0 }
 0x192   : > { %v1468_v59 = vadd.f32 %v1467_v20, %v1466_v55  ;;  %v1567_v18 = vadd.f32 %v1566_v25, %v1565_v19  ;;  %v1523_v19 = vmul.f32 %v4128_v30, %v4128_v30  ;;  %v4146_v25 = vadd.f32 %v4055_v12, %v4053_v38 }
 0x193   : > { %v1524_v61 = vmul.f32 %v4137_v8, %v4137_v8  ;;  %v1481_v38 = vsel %vm477_vm0, %v4137_v8, 0.0 }
 0x194   : > { %v1470_v21 = vadd.f32 %v1469_v29, %v1468_v59  ;;  %v1569_v49 = vadd.f32 %v1568_v31, %v1567_v18  ;;  %v1578_v59 = vsel %vm477_vm0, %v1522_v47, 0.0  ;;  %v4153_v18 = vadd.f32 %v1420_v58, %v1179_v37 }
 0x195   : > { %v1580_v1 = vsel %vm477_vm0, %v1523_v19, 0.0  ;;  %v1525_v12 = vmul.f32 %v4146_v25, %v4146_v25  ;;  %v1483_v37 = vsel %vm477_vm0, %v4146_v25, 0.0 }
 0x196   : > { %v1571_v5 = vadd.f32 %v1570_v24, %v1569_v49  ;;  %v1472_v43 = vadd.f32 %v1471_v4, %v1470_v21  ;;  %v4160_v24 = vadd.f32 %v1423_v3, %v1182_v35  ;;  %v1582_v4 = vsel %vm477_vm0, %v1524_v61, 0.0  ;;  %v1184_v51 = vpop.f32.mrf.mxu2 }
 0x197   : > { %v1526_v58 = vmul.f32 %v4153_v18, %v4153_v18  ;;  %v1485_v2 = vsel %vm477_vm0, %v4153_v18, 0.0 }
 0x198   : > { %v1474_v7 = vadd.f32 %v1473_v44, %v1472_v43  ;;  %v1573_v26 = vadd.f32 %v1572_v28, %v1571_v5  ;;  %v1425_v5 = vpop.f32.mrf.mxu3  ;;  %v1584_v44 = vsel %vm477_vm0, %v1525_v12, 0.0  ;;  %v1527_v3 = vmul.f32 %v4160_v24, %v4160_v24 }
 0x19a   : > { %v1476_v48 = vadd.f32 %v1475_v17, %v1474_v7  ;;  %v1575_v55 = vadd.f32 %v1574_v14, %v1573_v26  ;;  %v4172_v26 = vadd.f32 %v1425_v5, %v1184_v51  ;;  %v1586_v14 = vsel %vm477_vm0, %v1526_v58, 0.0 }
 0x19b   : > { %v1487_v17 = vsel %vm477_vm0, %v4160_v24, 0.0 }
 0x19c   : > { %v1478_v20 = vadd.f32 %v1477_v23, %v1476_v48  ;;  %v1577_v34 = vadd.f32 %v1576_v9, %v1575_v55  ;;  %v1588_v55 = vsel %vm477_vm0, %v1527_v3, 0.0  ;;  %v1489_v9 = vsel %vm477_vm0, %v4172_v26, 0.0 }
 0x19d   : > { %v1528_v23 = vmul.f32 %v4172_v26, %v4172_v26 }
 0x19e   : > { %v1480_v31 = vadd.f32 %v1479_v15, %v1478_v20  ;;  %v1579_v29 = vadd.f32 %v1578_v59, %v1577_v34 }
 0x19f   : > { %v1590_v34 = vsel %vm477_vm0, %v1528_v23, 0.0 }
 0x1a0   : > { %v1482_v21 = vadd.f32 %v1481_v38, %v1480_v31  ;;  %v1581_v49 = vadd.f32 %v1580_v1, %v1579_v29 }
 0x1a2   : > { %v1484_v43 = vadd.f32 %v1483_v37, %v1482_v21  ;;  %v1583_v28 = vadd.f32 %v1582_v4, %v1581_v49 }
 0x1a4   : > { %v1585_v7 = vadd.f32 %v1584_v44, %v1583_v28  ;;  %v1486_v35 = vadd.f32 %v1485_v2, %v1484_v43 }
 0x1a6   : > { %v1587_v47 = vadd.f32 %v1586_v14, %v1585_v7  ;;  %v1488_v48 = vadd.f32 %v1487_v17, %v1486_v35 }
 0x1a8   : > { %v1589_v19 = vadd.f32 %v1588_v55, %v1587_v47  ;;  %v1490_v20 = vadd.f32 %v1489_v9, %v1488_v48 }
 0x1aa   : > { %v1491_v59 = vrot.slane %v1490_v20, 4  ;;  %v1591_v15 = vadd.f32 %v1590_v34, %v1589_v19 }
 0x1ac   : > { %v1492_v61 = vadd.f32 %v1491_v59, %v1490_v20  ;;  %v1592_v31 = vrot.slane %v1591_v15, 4 }
 0x1ae   : > { %v1493_v29 = vrot.slane %v1492_v61, 2  ;;  %v1593_v1 = vadd.f32 %v1592_v31, %v1591_v15 }
 0x1b0   : > { %v1494_v38 = vadd.f32 %v1493_v29, %v1492_v61  ;;  %v1594_v12 = vrot.slane %v1593_v1, 2 }
 0x1b2   : > { %v1495_v21 = vrot.slane %v1494_v38, 1  ;;  %v1595_v49 = vadd.f32 %v1594_v12, %v1593_v1 }
 0x1b4   : > { %v1496_v4 = vadd.f32 %v1495_v21, %v1494_v38  ;;  %v1596_v37 = vrot.slane %v1595_v49, 1 }
 0x1b6   : > { %v1597_v58 = vadd.f32 %v1596_v37, %v1595_v49  ;;  %v4183_v51 = vmul.f32 0.00390625, %v1496_v4 }
 0x1b8   : > { %v1599_v5 = vmul.f32 0.00390625, %v1597_v58  ;;  %v1600_v43 = vmul.f32 %v4183_v51, %v4183_v51  ;;  %v1603_v47 = vsub.f32 %v3911_v40, %v4183_v51  ;;  %v1604_v48 = vsub.f32 %v3913_v57, %v4183_v51 }
 0x1b9   : > { %v1605_v55 = vsub.f32 %v3917_v32, %v4183_v51  ;;  %v1606_v9 = vsub.f32 %v3921_v42, %v4183_v51  ;;  %v1607_v23 = vsub.f32 %v3925_v53, %v4183_v51  ;;  %v1608_v19 = vsub.f32 %v3966_v10, %v4183_v51 }
 0x1ba   : > { %v1601_v28 = vsub.f32 %v1599_v5, %v1600_v43  ;;  %v1609_v20 = vsub.f32 %v3974_v45, %v4183_v51  ;;  %v1610_v40 = vsub.f32 %v3981_v46, %v4183_v51  ;;  %v1611_v57 = vsub.f32 %v3992_v56, %v4183_v51 }
 0x1bb   : > { %v1612_v32 = vsub.f32 %v3999_v41, %v4183_v51  ;;  %v1613_v42 = vsub.f32 %v4006_v27, %v4183_v51  ;;  %v1614_v53 = vsub.f32 %v4013_v36, %v4183_v51  ;;  %v1615_v10 = vsub.f32 %v4020_v0, %v4183_v51 }
 0x1bc   : > { %v1602_v44 = vmax.f32 %v1601_v28, 0.0  ;;  %v1616_v45 = vsub.f32 %v4031_v22, %v4183_v51  ;;  %v1617_v46 = vsub.f32 %v4038_v62, %v4183_v51  ;;  %v1618_v56 = vsub.f32 %v4058_v13, %v4183_v51 }
 0x1bd   : > { %v1619_v41 = vsub.f32 %v3915_v52, %v4183_v51  ;;  %v1620_v27 = vsub.f32 %v3919_v39, %v4183_v51  ;;  %v1621_v36 = vsub.f32 %v3923_v50, %v4183_v51  ;;  %v1622_v0 = vsub.f32 %v3927_v54, %v4183_v51 }
 0x1be   : > { %v1635_v2 = vadd.f32 1e-05, %v1602_v44  ;;  %v1623_v22 = vsub.f32 %v3929_v60, %v4183_v51  ;;  %v1624_v13 = vsub.f32 %v4083_v33, %v4183_v51  ;;  %v1625_v52 = vsub.f32 %v4092_v16, %v4183_v51 }
 0x1bf   : > { %v1626_v39 = vsub.f32 %v4101_v6, %v4183_v51  ;;  %v1627_v59 = vsub.f32 %v4110_v63, %v4183_v51  ;;  %v1628_v50 = vsub.f32 %v4119_v11, %v4183_v51  ;;  %v1629_v54 = vsub.f32 %v4128_v30, %v4183_v51 }
 0x1c0   : > { %3160 = vrsqrt.f32 %v1635_v2  ;;  %vm1642_vm6 = vweird.f32 %v1635_v2  ;;  %v1630_v60 = vsub.f32 %v4137_v8, %v4183_v51  ;;  %v1631_v33 = vsub.f32 %v4146_v25, %v4183_v51 }
 0x1c1   : > { %v1632_v16 = vsub.f32 %v4153_v18, %v4183_v51  ;;  %v1633_v6 = vsub.f32 %v4160_v24, %v4183_v51  ;;  %v1634_v63 = vsub.f32 %v4172_v26, %v4183_v51  ;;  %v3156_v26 = vld [vmem:[%s5515_s6] ss:$0 sm:$0xff] }
 0x1c6   : > { %v3161_v7 = vpop.eup %3160 }
 0x1c7   : > { %v1637_v35 = vmul.f32 %v3161_v7, %v1635_v2  ;;  %vm1643_vm5 = vweird.f32 %v3161_v7 }
 0x1c8   : > { %vm1644_vm7 = vmor %vm1642_vm6, %vm1643_vm5 }
 0x1c9   : > { %v1638_v3 = vmul.f32 %v3161_v7, %v1637_v35 }
 0x1cb   : > { %v1639_v14 = vmul.f32 0.5, %v1638_v3 }
 0x1cd   : > { %v1640_v17 = vsub.f32 1.5, %v1639_v14 }
 0x1cf   : > { %v1641_v34 = vmul.f32 %v3161_v7, %v1640_v17 }
 0x1d1   : > { %v1645_v62 = vsel %vm1644_vm7, %v3161_v7, %v1641_v34 }
 0x1d2   : > { %v1646_v15 = vmul.f32 %v1645_v62, %v1603_v47  ;;  %v1647_v11 = vmul.f32 %v1645_v62, %v1604_v48  ;;  %v1648_v61 = vmul.f32 %v1645_v62, %v1605_v55  ;;  %v1649_v31 = vmul.f32 %v1645_v62, %v1606_v9 }
 0x1d3   : > { %v1650_v30 = vmul.f32 %v1645_v62, %v1607_v23  ;;  %v1651_v29 = vmul.f32 %v1645_v62, %v1608_v19  ;;  %v1652_v1 = vmul.f32 %v1645_v62, %v1609_v20  ;;  %v1653_v8 = vmul.f32 %v1645_v62, %v1610_v40 }
 0x1d4   : > { %v1654_v38 = vmul.f32 %v1645_v62, %v1611_v57  ;;  %v1655_v12 = vmul.f32 %v1645_v62, %v1612_v32  ;;  %v1656_v25 = vmul.f32 %v1645_v62, %v1613_v42  ;;  %v1657_v21 = vmul.f32 %v1645_v62, %v1614_v53 }
 0x1d5   : > { %v1658_v49 = vmul.f32 %v1645_v62, %v1615_v10  ;;  %v1659_v18 = vmul.f32 %v1645_v62, %v1616_v45  ;;  %v1660_v4 = vmul.f32 %v1645_v62, %v1617_v46  ;;  %v1661_v37 = vmul.f32 %v1645_v62, %v1618_v56 }
 0x1d6   : > { %v1662_v24 = vmul.f32 %v1645_v62, %v1619_v41  ;;  %v1663_v58 = vmul.f32 %v1645_v62, %v1620_v27  ;;  %v1664_v51 = vmul.f32 %v1645_v62, %v1621_v36  ;;  %v1665_v5 = vmul.f32 %v1645_v62, %v1622_v0  ;;  %v4257_v0 = vld [vmem:[%s5516_s7] ss:$0 sm:$0xff] }
 0x1d7   : > { %v1666_v43 = vmul.f32 %v1645_v62, %v1623_v22  ;;  %v1667_v28 = vmul.f32 %v1645_v62, %v1624_v13  ;;  %v1668_v44 = vmul.f32 %v1645_v62, %v1625_v52  ;;  %v1669_v2 = vmul.f32 %v1645_v62, %v1626_v39 }
 0x1d8   : > { %v1670_v7 = vmul.f32 %v1645_v62, %v1627_v59  ;;  %v1671_v35 = vmul.f32 %v1645_v62, %v1628_v50  ;;  %v1672_v3 = vmul.f32 %v1645_v62, %v1629_v54  ;;  %v1673_v14 = vmul.f32 %v1645_v62, %v1630_v60 }
 0x1d9   : > { %v1674_v17 = vmul.f32 %v1645_v62, %v1631_v33  ;;  %v1675_v47 = vmul.f32 %v1645_v62, %v1632_v16  ;;  %v1676_v48 = vmul.f32 %v1645_v62, %v1633_v6  ;;  %v1677_v55 = vmul.f32 %v1645_v62, %v1634_v63 }
 0x1da   : > { %v1682_v9 = vmul.f32 %v3156_v26, %v1646_v15  ;;  %v1683_v23 = vmul.f32 %v3156_v26, %v1647_v11  ;;  %v1684_v19 = vmul.f32 %v3156_v26, %v1648_v61  ;;  %v1685_v20 = vmul.f32 %v3156_v26, %v1649_v31 }
 0x1db   : > { %v1686_v34 = vmul.f32 %v3156_v26, %v1650_v30  ;;  %v1687_v40 = vmul.f32 %v3156_v26, %v1651_v29  ;;  %v1688_v57 = vmul.f32 %v3156_v26, %v1652_v1  ;;  %v1689_v32 = vmul.f32 %v3156_v26, %v1653_v8 }
 0x1dc   : > { %v1690_v42 = vmul.f32 %v3156_v26, %v1654_v38  ;;  %v1691_v53 = vmul.f32 %v3156_v26, %v1655_v12  ;;  %v1692_v10 = vmul.f32 %v3156_v26, %v1656_v25  ;;  %v1693_v45 = vmul.f32 %v3156_v26, %v1657_v21 }
 0x1dd   : > { %v1694_v46 = vmul.f32 %v3156_v26, %v1658_v49  ;;  %v1695_v56 = vmul.f32 %v3156_v26, %v1659_v18  ;;  %v1696_v41 = vmul.f32 %v3156_v26, %v1660_v4  ;;  %v1697_v27 = vmul.f32 %v3156_v26, %v1661_v37 }
 0x1de   : > { %v1698_v36 = vmul.f32 %v3156_v26, %v1662_v24  ;;  %v1699_v22 = vmul.f32 %v3156_v26, %v1663_v58  ;;  %v1700_v62 = vmul.f32 %v3156_v26, %v1664_v51  ;;  %v1701_v13 = vmul.f32 %v3156_v26, %v1665_v5 }
 0x1df   : > { %v1702_v52 = vmul.f32 %v3156_v26, %v1666_v43  ;;  %v1703_v39 = vmul.f32 %v3156_v26, %v1667_v28  ;;  %v1704_v59 = vmul.f32 %v3156_v26, %v1668_v44  ;;  %v1705_v50 = vmul.f32 %v3156_v26, %v1669_v2 }
 0x1e0   : > { %v1706_v54 = vmul.f32 %v3156_v26, %v1670_v7  ;;  %v1707_v60 = vmul.f32 %v3156_v26, %v1671_v35  ;;  %v1708_v33 = vmul.f32 %v3156_v26, %v1672_v3  ;;  %v1709_v16 = vmul.f32 %v3156_v26, %v1673_v14 }
 0x1e1   : > { %v4259_v6 = vmul.f32 %v3156_v26, %v1674_v17  ;;  %v4261_v63 = vmul.f32 %v3156_v26, %v1675_v47  ;;  %v4263_v15 = vmul.f32 %v3156_v26, %v1676_v48  ;;  %v4265_v11 = vmul.f32 %v3156_v26, %v1677_v55 }
 0x1e2   : > { %v1718_v61 = vadd.f32 %v4257_v0, %v1682_v9  ;;  %v1719_v31 = vadd.f32 %v4257_v0, %v1683_v23  ;;  %v1720_v30 = vadd.f32 %v4257_v0, %v1684_v19  ;;  %v1721_v29 = vadd.f32 %v4257_v0, %v1685_v20 }
 0x1e3   : > { %v1722_v1 = vadd.f32 %v4257_v0, %v1686_v34  ;;  %v1723_v8 = vadd.f32 %v4257_v0, %v1687_v40  ;;  %v1724_v38 = vadd.f32 %v4257_v0, %v1688_v57  ;;  %v1725_v12 = vadd.f32 %v4257_v0, %v1689_v32 }
 0x1e4   : > { %v1726_v25 = vadd.f32 %v4257_v0, %v1690_v42  ;;  %v1727_v21 = vadd.f32 %v4257_v0, %v1691_v53  ;;  %v1728_v49 = vadd.f32 %v4257_v0, %v1692_v10  ;;  %v1729_v18 = vadd.f32 %v4257_v0, %v1693_v45 }
 0x1e5   : > { %v1730_v4 = vadd.f32 %v4257_v0, %v1694_v46  ;;  %v1731_v37 = vadd.f32 %v4257_v0, %v1695_v56  ;;  %v1732_v24 = vadd.f32 %v4257_v0, %v1696_v41  ;;  %v1733_v26 = vadd.f32 %v4257_v0, %v1697_v27 }
 0x1e6   : > { %v1734_v58 = vadd.f32 %v4257_v0, %v1698_v36  ;;  %v1735_v51 = vadd.f32 %v4257_v0, %v1699_v22  ;;  %v1736_v5 = vadd.f32 %v4257_v0, %v1700_v62  ;;  %v1737_v43 = vadd.f32 %v4257_v0, %v1701_v13 }
 0x1e7   : > { %v1738_v28 = vadd.f32 %v4257_v0, %v1702_v52  ;;  %v1739_v44 = vadd.f32 %v4257_v0, %v1703_v39  ;;  %v1740_v2 = vadd.f32 %v4257_v0, %v1704_v59  ;;  %v4291_v7 = vadd.f32 %v4257_v0, %v1705_v50 }
 0x1e8   : > { %v4294_v35 = vadd.f32 %v4257_v0, %v1706_v54  ;;  %v4296_v3 = vmul.f32 0.5, %v1718_v61  ;;  %v4298_v14 = vmul.f32 0.5, %v1719_v31  ;;  %v4300_v17 = vmul.f32 0.5, %v1720_v30 }
 0x1e9   : > { %v4302_v47 = vmul.f32 0.5, %v1721_v29  ;;  %v4304_v48 = vmul.f32 0.5, %v1722_v1  ;;  %v4306_v55 = vmul.f32 0.5, %v1723_v8  ;;  %v4308_v9 = vmul.f32 0.5, %v1724_v38 }
 0x1ea   : > { %5732 = vst [vmem:[#allocation3_spill] sm:$0xff] %v4296_v3  ;;  %v4310_v23 = vmul.f32 0.5, %v1725_v12  ;;  %v4312_v19 = vmul.f32 0.5, %v1726_v25  ;;  %v4314_v20 = vmul.f32 0.5, %v1727_v21  ;;  %v4316_v34 = vmul.f32 0.5, %v1728_v49 }
 0x1eb   : > { %5733 = vst [vmem:[#allocation4_spill] sm:$0xff] %v4298_v14  ;;  %v4318_v40 = vmul.f32 0.5, %v1729_v18  ;;  %v4320_v57 = vmul.f32 0.5, %v1730_v4  ;;  %v4322_v32 = vmul.f32 0.5, %v1731_v37  ;;  %v4324_v42 = vmul.f32 0.5, %v1732_v24 }
 0x1ec   : > { %5734 = vst [vmem:[#allocation5_spill] sm:$0xff] %v4300_v17  ;;  %v4326_v53 = vmul.f32 0.5, %v1733_v26  ;;  %v4328_v10 = vmul.f32 0.5, %v1734_v58  ;;  %v4330_v45 = vmul.f32 0.5, %v1735_v51  ;;  %v4332_v46 = vmul.f32 0.5, %v1736_v5 }
 0x1ed   : > { %5735 = vst [vmem:[#allocation6_spill] sm:$0xff] %v4302_v47  ;;  %v4334_v56 = vmul.f32 0.5, %v1737_v43  ;;  %v4336_v41 = vmul.f32 0.5, %v1738_v28  ;;  %v4338_v27 = vmul.f32 0.5, %v1739_v44  ;;  %v4340_v36 = vmul.f32 0.5, %v1740_v2 }
 0x1ee   : > { %5736 = vst [vmem:[#allocation7_spill] sm:$0xff] %v4304_v48  ;;  %v4342_v22 = vmul.f32 0.70710677, %v1718_v61  ;;  %v4345_v62 = vadd.f32 %v4257_v0, %v1707_v60  ;;  %v4347_v13 = vmul.f32 0.70710677, %v1719_v31  ;;  %v4354_v59 = vadd.f32 %v4257_v0, %v1708_v33 }
 0x1ef   : > { %5737 = vst [vmem:[#allocation8_spill] sm:$0xff] %v4306_v55  ;;  %v4349_v52 = vmul.f32 0.70710677, %v1720_v30  ;;  %v4351_v39 = vmul.f32 0.70710677, %v1721_v29  ;;  %v4363_v61 = vadd.f32 %v4257_v0, %v1709_v16  ;;  %v4373_v29 = vadd.f32 %v4257_v0, %v4259_v6 }
 0x1f0   : > { %5738 = vst [vmem:[#allocation9_spill] sm:$0xff] %v4308_v9  ;;  %v4356_v50 = vmul.f32 0.70710677, %v1722_v1  ;;  %v4358_v54 = vmul.f32 0.70710677, %v1723_v8  ;;  %v4383_v16 = vadd.f32 %v4257_v0, %v4261_v63  ;;  %v4393_v6 = vadd.f32 %v4257_v0, %v4263_v15 }
 0x1f1   : > { %5739 = vst [vmem:[#allocation10_spill] sm:$0xff] %v4310_v23  ;;  %v4365_v60 = vmul.f32 0.70710677, %v1725_v12  ;;  %v4367_v31 = vmul.f32 0.70710677, %v1726_v25  ;;  %v4403_v63 = vadd.f32 %v4257_v0, %v4265_v11 }
 0x1f2   : > { %5740 = vst [vmem:[#allocation11_spill] sm:$0xff] %v4312_v19  ;;  %v4369_v30 = vmul.f32 0.70710677, %v1727_v21  ;;  %v4375_v33 = vmul.f32 0.70710677, %v1728_v49 }
 0x1f3   : > { %5741 = vst [vmem:[#allocation12_spill] sm:$0xff] %v4314_v20  ;;  %v4377_v1 = vmul.f32 0.70710677, %v1729_v18  ;;  %v4379_v8 = vmul.f32 0.70710677, %v1730_v4 }
 0x1f4   : > { %5742 = vst [vmem:[#allocation13_spill] sm:$0xff] %v4316_v34  ;;  %v4387_v12 = vmul.f32 0.70710677, %v1732_v24  ;;  %v4389_v25 = vmul.f32 0.70710677, %v1733_v26 }
 0x1f5   : > { %5743 = vst [vmem:[#allocation14_spill] sm:$0xff] %v4318_v40  ;;  %v4395_v21 = vmul.f32 0.70710677, %v1734_v58  ;;  %v4397_v49 = vmul.f32 0.70710677, %v1735_v51 }
 0x1f6   : > { %5744 = vst [vmem:[#allocation15_spill] sm:$0xff] %v4320_v57  ;;  %v4399_v18 = vmul.f32 0.70710677, %v1736_v5  ;;  %v4405_v4 = vmul.f32 0.70710677, %v1737_v43 }
 0x1f7   : > { %5745 = vst [vmem:[#allocation16_spill] sm:$0xff] %v4322_v32  ;;  %v4409_v24 = vmul.f32 0.70710677, %v1739_v44  ;;  %v4411_v26 = vmul.f32 0.70710677, %v1740_v2 }
 0x1f8   : > { %5746 = vst [vmem:[#allocation17_spill] sm:$0xff] %v4324_v42  ;;  %v4414_v15 = vmul.f32 0.70710677, %v4291_v7  ;;  %v4417_v58 = vmul.f32 0.70710677, %v4294_v35 }
 0x1f9   : > { %5747 = vst [vmem:[#allocation18_spill] sm:$0xff] %v4326_v53  ;;  %v4420_v51 = vmul.f32 0.70710677, %v4345_v62  ;;  %v4423_v0 = vmul.f32 0.70710677, %v4354_v59 }
 0x1fa   : > { %5748 = vst [vmem:[#allocation19_spill] sm:$0xff] %v4328_v10  ;;  %v4426_v11 = vmul.f32 0.70710677, %v4363_v61  ;;  %v4429_v5 = vmul.f32 0.70710677, %v4373_v29 }
 0x1fb   : > { %5749 = vst [vmem:[#allocation20_spill] sm:$0xff] %v4330_v45  ;;  %v4432_v43 = vmul.f32 0.70710677, %v4383_v16  ;;  %v4438_v44 = vmul.f32 0.70710677, %v4403_v63 }
 0x1fc   : > { %5750 = vst [vmem:[#allocation21_spill] sm:$0xff] %v4332_v46  ;;  %v4441_v2 = vand.u32 2147483647, %v4342_v22  ;;  %v4468_v46 = vand.u32 2147483647, %v4369_v30 }
 0x1fd   : > { %5751 = vst [vmem:[#allocation22_spill] sm:$0xff] %v4334_v56  ;;  %v4465_v56 = vand.u32 2147483647, %v4367_v31  ;;  %v4471_v45 = vand.u32 2147483647, %v4375_v33 }
 0x1fe   : > { %5752 = vst [vmem:[#allocation23_spill] sm:$0xff] %v4336_v41  ;;  %v4462_v41 = vand.u32 2147483647, %v4365_v60  ;;  %v4474_v10 = vand.u32 2147483647, %v4377_v1 }
 0x1ff   : > { %5753 = vst [vmem:[#allocation24_spill] sm:$0xff] %v4338_v27  ;;  %v4360_v27 = vmul.f32 0.70710677, %v1724_v38  ;;  %v4385_v38 = vmul.f32 0.70710677, %v1731_v37 }
 0x200   : > { %5754 = vst [vmem:[#allocation25_spill] sm:$0xff] %v4340_v36  ;;  %v4407_v37 = vmul.f32 0.70710677, %v1738_v28  ;;  %v4435_v28 = vmul.f32 0.70710677, %v4393_v6 }
 0x201   : > { %5755 = vst [vmem:[#allocation26_spill] sm:$0xff] %v4342_v22  ;;  %v4444_v36 = vand.u32 2147483647, %v4347_v13  ;;  %v4477_v53 = vand.u32 2147483647, %v4379_v8 }
 0x202   : > { %5756 = vst [vmem:[#allocation27_spill] sm:$0xff] %v4347_v13  ;;  %v4480_v42 = vand.u32 2147483647, %v4385_v38  ;;  %v4483_v32 = vand.u32 2147483647, %v4387_v12 }
 0x203   : > { %5757 = vst [vmem:[#allocation28_spill] sm:$0xff] %v4349_v52  ;;  %v4486_v57 = vand.u32 2147483647, %v4389_v25  ;;  %v4489_v40 = vand.u32 2147483647, %v4395_v21 }
 0x204   : > { %5758 = vst [vmem:[#allocation29_spill] sm:$0xff] %v4351_v39  ;;  %v4492_v34 = vand.u32 2147483647, %v4397_v49  ;;  %v4495_v20 = vand.u32 2147483647, %v4399_v18 }
 0x205   : > { %5759 = vst [vmem:[#allocation30_spill] sm:$0xff] %v4356_v50  ;;  %v4498_v19 = vand.u32 2147483647, %v4405_v4  ;;  %v4501_v23 = vand.u32 2147483647, %v4407_v37 }
 0x206   : > { %5760 = vst [vmem:[#allocation31_spill] sm:$0xff] %v4358_v54  ;;  %v4504_v9 = vand.u32 2147483647, %v4409_v24  ;;  %v4507_v55 = vand.u32 2147483647, %v4411_v26 }
 0x207   : > { %5761 = vst [vmem:[#allocation32_spill] sm:$0xff] %v4360_v27  ;;  %v4510_v48 = vand.u32 2147483647, %v4414_v15  ;;  %v4513_v47 = vand.u32 2147483647, %v4417_v58 }
 0x208   : > { %5762 = vst [vmem:[#allocation33_spill] sm:$0xff] %v4363_v61  ;;  %v4447_v61 = vand.u32 2147483647, %v4349_v52  ;;  %v1846_v17 = vmul.f32 0.3275911, %v4441_v2 }
 0x209   : > { %5763 = vst [vmem:[#allocation34_spill] sm:$0xff] %v4365_v60  ;;  %v4517_v14 = vand.u32 2147483647, %v4420_v51  ;;  %v4534_v3 = vand.u32 2147483647, %v4435_v28 }
 0x20a   : > { %5764 = vst [vmem:[#allocation35_spill] sm:$0xff] %v4367_v31 }
 0x20b   : > { %5765 = vst [vmem:[#allocation36_spill] sm:$0xff] %v4369_v30 }
 0x20c   : > { %5766 = vst [vmem:[#allocation37_spill] sm:$0xff] %v4373_v29  ;;  %v4450_v29 = vand.u32 2147483647, %v4351_v39 }
 0x20d   : > { %5767 = vst [vmem:[#allocation38_spill] sm:$0xff] %v4375_v33  ;;  %v1864_v33 = vmul.f32 0.3275911, %v4495_v20 }
 0x20e   : > { %5768 = vst [vmem:[#allocation39_spill] sm:$0xff] %v4377_v1 }
 0x20f   : > { %5769 = vst [vmem:[#allocation40_spill] sm:$0xff] %v4379_v8 }
 0x210   : > { %5770 = vst [vmem:[#allocation41_spill] sm:$0xff] %v4383_v16  ;;  %v4453_v16 = vand.u32 2147483647, %v4356_v50 }
 0x211   : > { %5771 = vst [vmem:[#allocation42_spill] sm:$0xff] %v4385_v38  ;;  %v1857_v38 = vmul.f32 0.3275911, %v4474_v10 }
 0x212   : > { %5772 = vst [vmem:[#allocation43_spill] sm:$0xff] %v4387_v12  ;;  %v4555_v12 = vmul.f32 0.5, %v4354_v59  ;;  %v1861_v59 = vmul.f32 0.3275911, %v4486_v57 }
 0x213   : > { %5773 = vst [vmem:[#allocation44_spill] sm:$0xff] %v4389_v25  ;;  %v4550_v25 = vmul.f32 0.5, %v4345_v62  ;;  %v1859_v62 = vmul.f32 0.3275911, %v4480_v42 }
 0x214   : > { %5774 = vst [vmem:[#allocation45_spill] sm:$0xff] %v4393_v6  ;;  %v4456_v6 = vand.u32 2147483647, %v4358_v54  ;;  %v1871_v54 = vmul.f32 0.3275911, %v4517_v14 }
 0x215   : > { %5775 = vst [vmem:[#allocation46_spill] sm:$0xff] %v4395_v21  ;;  %v1891_v13 = vadd.f32 1.0, %v1859_v62 }
 0x216   : > { %5776 = vst [vmem:[#allocation47_spill] sm:$0xff] %v4397_v49  ;;  %v4545_v49 = vmul.f32 0.5, %v4294_v35  ;;  %v1856_v35 = vmul.f32 0.3275911, %v4471_v45 }
 0x217   : > { %5777 = vst [vmem:[#allocation48_spill] sm:$0xff] %v4399_v18  ;;  %v4541_v18 = vand.u32 2147483647, %v4438_v44 }
 0x218   : > { %5778 = vst [vmem:[#allocation49_spill] sm:$0xff] %v4403_v63  ;;  %v4459_v63 = vand.u32 2147483647, %v4360_v27  ;;  %v1870_v27 = vmul.f32 0.3275911, %v4513_v47 }
 0x219   : > { %5779 = vst [vmem:[#allocation50_spill] sm:$0xff] %v4405_v4  ;;  %v4524_v4 = vand.u32 2147483647, %v4426_v11 }
 0x21a   : > { %5780 = vst [vmem:[#allocation51_spill] sm:$0xff] %v4407_v37  ;;  %v4520_v37 = vand.u32 2147483647, %v4423_v0  ;;  %v1852_v21 = vmul.f32 0.3275911, %v4459_v63 }
 0x21b   : > { %5781 = vst [vmem:[#allocation52_spill] sm:$0xff] %v4409_v24  ;;  %v1847_v24 = vmul.f32 0.3275911, %v4444_v36 }
 0x21c   : > { %5782 = vst [vmem:[#allocation53_spill] sm:$0xff] %v4411_v26  ;;  %v4527_v26 = vand.u32 2147483647, %v4429_v5 }
 0x21d   : > { %5783 = vst [vmem:[#allocation54_spill] sm:$0xff] %v4414_v15  ;;  %v1848_v15 = vmul.f32 0.3275911, %v4447_v61 }
 0x21e   : > { %5784 = vst [vmem:[#allocation55_spill] sm:$0xff] %v4417_v58  ;;  %v4531_v58 = vand.u32 2147483647, %v4432_v43 }
 0x21f   : > { %5785 = vst [vmem:[#allocation56_spill] sm:$0xff] %v4420_v51  ;;  %v1849_v51 = vmul.f32 0.3275911, %v4450_v29 }
 0x220   : > { %5786 = vst [vmem:[#allocation57_spill] sm:$0xff] %v4423_v0  ;;  %v4538_v0 = vmul.f32 0.5, %v4291_v7  ;;  %v1853_v7 = vmul.f32 0.3275911, %v4462_v41 }
 0x221   : > { %5787 = vst [vmem:[#allocation58_spill] sm:$0xff] %v4426_v11  ;;  %v1850_v11 = vmul.f32 0.3275911, %v4453_v16 }
 0x222   : > { %5788 = vst [vmem:[#allocation59_spill] sm:$0xff] %v4429_v5  ;;  %v1878_v5 = vadd.f32 1.0, %v1846_v17  ;;  %v1855_v17 = vmul.f32 0.3275911, %v4468_v46  ;;  %v1885_v30 = vadd.f32 1.0, %v1853_v7  ;;  %v1888_v7 = vadd.f32 1.0, %v1856_v35 }
 0x223   : > { %5789 = vst [vmem:[#allocation60_spill] sm:$0xff] %v4432_v43  ;;  %v1851_v43 = vmul.f32 0.3275911, %v4456_v6  ;;  %v1882_v8 = vadd.f32 1.0, %v1850_v11  ;;  %v1865_v11 = vmul.f32 0.3275911, %v4498_v19 }
 0x224   : > { %5790 = vst [vmem:[#allocation61_spill] sm:$0xff] %v4435_v28  ;;  %v1879_v28 = vadd.f32 1.0, %v1847_v24  ;;  %v1858_v24 = vmul.f32 0.3275911, %v4477_v53  ;;  %3162 = vrcp.f32 %v1878_v5  ;;  %v1866_v5 = vmul.f32 0.3275911, %v4501_v23 }
 0x225   : > { %5791 = vst [vmem:[#allocation62_spill] sm:$0xff] %v4438_v44  ;;  %v1880_v44 = vadd.f32 1.0, %v1848_v15  ;;  %v1883_v1 = vadd.f32 1.0, %v1851_v43  ;;  %v1862_v15 = vmul.f32 0.3275911, %v4489_v40  ;;  %v1887_v60 = vadd.f32 1.0, %v1855_v17 }
 0x226   : > { %5792 = vst [vmem:[#allocation63_spill] sm:$0xff] %v4441_v2  ;;  %3164 = vrcp.f32 %v1879_v28  ;;  %v1867_v43 = vmul.f32 0.3275911, %v4504_v9  ;;  %v1868_v28 = vmul.f32 0.3275911, %v4507_v55  ;;  %v1890_v39 = vadd.f32 1.0, %v1858_v24 }
 0x227   : > { %5793 = vst [vmem:[#allocation64_spill] sm:$0xff] %v4444_v36  ;;  %3166 = vrcp.f32 %v1880_v44  ;;  %v1869_v44 = vmul.f32 0.3275911, %v4510_v48  ;;  %v1874_v17 = vmul.f32 0.3275911, %v4527_v26 }
 0x228   : > { %5794 = vst [vmem:[#allocation65_spill] sm:$0xff] %v4447_v61  ;;  %v1876_v35 = vmul.f32 0.3275911, %v4534_v3  ;;  %v1900_v62 = vadd.f32 1.0, %v1868_v28 }
 0x229   : > { %5795 = vst [vmem:[#allocation66_spill] sm:$0xff] %v4450_v29  ;;  %v1906_v28 = vadd.f32 1.0, %v1874_v17 }
 0x22a   : > { %5796 = vst [vmem:[#allocation67_spill] sm:$0xff] %v4453_v16 }
 0x22b   : > { %5797 = vst [vmem:[#allocation68_spill] sm:$0xff] %v4456_v6 }
 0x22c   : > { %5798 = vst [vmem:[#allocation69_spill] sm:$0xff] %v4459_v63 }
 0x22d   : > { %5799 = vst [vmem:[#allocation70_spill] sm:$0xff] %v4462_v41 }
 0x22e   : > { %5800 = vst [vmem:[#allocation71_spill] sm:$0xff] %v4465_v56 }
 0x22f   : > { %5801 = vst [vmem:[#allocation72_spill] sm:$0xff] %v4468_v46 }
 0x230   : > { %5802 = vst [vmem:[#allocation73_spill] sm:$0xff] %v4471_v45 }
 0x231   : > { %5803 = vst [vmem:[#allocation74_spill] sm:$0xff] %v4474_v10 }
 0x232   : > { %5804 = vst [vmem:[#allocation75_spill] sm:$0xff] %v4477_v53 }
 0x233   : > { %5805 = vst [vmem:[#allocation76_spill] sm:$0xff] %v4480_v42 }
 0x234   : > { %5806 = vst [vmem:[#allocation77_spill] sm:$0xff] %v4483_v32 }
 0x235   : > { %5807 = vst [vmem:[#allocation78_spill] sm:$0xff] %v4486_v57 }
 0x236   : > { %5808 = vst [vmem:[#allocation79_spill] sm:$0xff] %v4489_v40 }
 0x237   : > { %5809 = vst [vmem:[#allocation80_spill] sm:$0xff] %v4492_v34 }
 0x238   : > { %5810 = vst [vmem:[#allocation81_spill] sm:$0xff] %v4495_v20 }
 0x239   : > { %5811 = vst [vmem:[#allocation82_spill] sm:$0xff] %v4498_v19 }
 0x23a   : > { %5812 = vst [vmem:[#allocation83_spill] sm:$0xff] %v4501_v23 }
 0x23b   : > { %5813 = vst [vmem:[#allocation84_spill] sm:$0xff] %v4504_v9 }
 0x23c   : > { %5814 = vst [vmem:[#allocation85_spill] sm:$0xff] %v4507_v55 }
 0x23d   : > { %5815 = vst [vmem:[#allocation86_spill] sm:$0xff] %v4510_v48  ;;  %v1901_v48 = vadd.f32 1.0, %v1869_v44 }
 0x23e   : > { %5816 = vst [vmem:[#allocation87_spill] sm:$0xff] %v4513_v47  ;;  %v1898_v47 = vadd.f32 1.0, %v1866_v5 }
 0x23f   : > { %5817 = vst [vmem:[#allocation88_spill] sm:$0xff] %v4517_v14 }
 0x240   : > { %5818 = vst [vmem:[#allocation89_spill] sm:$0xff] %v4520_v37 }
 0x241   : > { %5819 = vst [vmem:[#allocation90_spill] sm:$0xff] %v4524_v4 }
 0x242   : > { %5820 = vst [vmem:[#allocation91_spill] sm:$0xff] %v4527_v26  ;;  %v1894_v26 = vadd.f32 1.0, %v1862_v15  ;;  %v1903_v15 = vadd.f32 1.0, %v1871_v54 }
 0x243   : > { %5821 = vst [vmem:[#allocation92_spill] sm:$0xff] %v4531_v58 }
 0x244   : > { %5822 = vst [vmem:[#allocation93_spill] sm:$0xff] %v4534_v3  ;;  %v1899_v3 = vadd.f32 1.0, %v1867_v43 }
 0x245   : > { %5823 = vst [vmem:[#allocation94_spill] sm:$0xff] %v4538_v0  ;;  %v1854_v0 = vmul.f32 0.3275911, %v4465_v56 }
 0x246   : > { %5824 = vst [vmem:[#allocation95_spill] sm:$0xff] %v4541_v18 }
 0x247   : > { %5825 = vst [vmem:[#allocation96_spill] sm:$0xff] %v4545_v49  ;;  %v1881_v49 = vadd.f32 1.0, %v1849_v51  ;;  %v1863_v51 = vmul.f32 0.3275911, %v4492_v34  ;;  %v1886_v31 = vadd.f32 1.0, %v1854_v0  ;;  %v1889_v0 = vadd.f32 1.0, %v1857_v38 }
 0x248   : > { %5826 = vst [vmem:[#allocation97_spill] sm:$0xff] %v4550_v25  ;;  %v1860_v25 = vmul.f32 0.3275911, %v4483_v32 }
 0x249   : > { %5827 = vst [vmem:[#allocation98_spill] sm:$0xff] %v4555_v12  ;;  %v1884_v12 = vadd.f32 1.0, %v1852_v21  ;;  %3168 = vrcp.f32 %v1881_v49  ;;  %v4571_v21 = vpop.eup %3162  ;;  %v1895_v24 = vadd.f32 1.0, %v1863_v51 }
 0x24a   : > { %3170 = vrcp.f32 %v1882_v8  ;;  %5828 = vst [vmem:[#allocation99_spill] sm:$0xff] %v4571_v21  ;;  %v4575_v49 = vpop.eup %3164  ;;  %v1872_v8 = vmul.f32 0.3275911, %v4520_v37  ;;  %v1892_v38 = vadd.f32 1.0, %v1860_v25  ;;  %v1893_v37 = vadd.f32 1.0, %v1861_v59 }
 0x24b   : > { %3172 = vrcp.f32 %v1883_v1  ;;  %v4579_v50 = vpop.eup %3166  ;;  %v1873_v1 = vmul.f32 0.3275911, %v4524_v4  ;;  %v1942_v25 = vmul.f32 1.0614054, %v4571_v21 }
 0x24c   : > { %3174 = vrcp.f32 %v1884_v12  ;;  %v1875_v12 = vmul.f32 0.3275911, %v4531_v58  ;;  %v1897_v58 = vadd.f32 1.0, %v1865_v11  ;;  %v1904_v11 = vadd.f32 1.0, %v1872_v8 }
 0x24d   : > { %3176 = vrcp.f32 %v1885_v30  ;;  %v1877_v30 = vmul.f32 0.3275911, %v4541_v18  ;;  %v1905_v5 = vadd.f32 1.0, %v1873_v1  ;;  %v1908_v18 = vadd.f32 1.0, %v1876_v35 }
 0x24e   : > { %3178 = vrcp.f32 %v1886_v31  ;;  %v1896_v31 = vadd.f32 1.0, %v1864_v33  ;;  %v1943_v33 = vmul.f32 1.0614054, %v4575_v49  ;;  %v1907_v54 = vadd.f32 1.0, %v1875_v12 }
 0x24f   : > { %v4583_v52 = vpop.eup %3168  ;;  %3180 = vrcp.f32 %v1887_v60 }
 0x250   : > { %5829 = vst [vmem:[#allocation100_spill] sm:$0xff] %v4583_v52  ;;  %v4587_v22 = vpop.eup %3170  ;;  %3182 = vrcp.f32 %v1888_v7  ;;  %v1902_v7 = vadd.f32 1.0, %v1870_v27  ;;  %v1975_v17 = vadd.f32 -1.4531521, %v1943_v33 }
 0x251   : > { %5830 = vst [vmem:[#allocation101_spill] sm:$0xff] %v4587_v22  ;;  %v4590_v4 = vpop.eup %3172  ;;  %3184 = vrcp.f32 %v1889_v0  ;;  %v1946_v44 = vmul.f32 1.0614054, %v4587_v22 }
 0x252   : > { %5831 = vst [vmem:[#allocation102_spill] sm:$0xff] %v4590_v4  ;;  %v4592_v14 = vpop.eup %3174  ;;  %3186 = vrcp.f32 %v1890_v39  ;;  %v1944_v39 = vmul.f32 1.0614054, %v4579_v50  ;;  %v1947_v0 = vmul.f32 1.0614054, %v4590_v4  ;;  %v4628_v34 = vmul.f32 %v4575_v49, %v1975_v17 }
 0x253   : > { %v4594_v60 = vpop.eup %3176  ;;  %3188 = vrcp.f32 %v1891_v13  ;;  %v1945_v13 = vmul.f32 1.0614054, %v4583_v52  ;;  %v1978_v23 = vadd.f32 -1.4531521, %v1946_v44 }
 0x254   : > { %5832 = vst [vmem:[#allocation103_spill] sm:$0xff] %v4594_v60  ;;  %v4597_v59 = vpop.eup %3178  ;;  %3190 = vrcp.f32 %v1892_v38  ;;  %v1974_v38 = vadd.f32 -1.4531521, %v1942_v25  ;;  %v1949_v1 = vmul.f32 1.0614054, %v4594_v60 }
 0x255   : > { %5833 = vst [vmem:[#allocation104_spill] sm:$0xff] %v4597_v59  ;;  %v4600_v51 = vpop.eup %3180  ;;  %3192 = vrcp.f32 %v1893_v37  ;;  %v1948_v37 = vmul.f32 1.0614054, %v4592_v14  ;;  %v1950_v55 = vmul.f32 1.0614054, %v4597_v59 }
 0x256   : > { %5834 = vst [vmem:[#allocation105_spill] sm:$0xff] %v4600_v51  ;;  %v4603_v43 = vpop.eup %3182  ;;  %3194 = vrcp.f32 %v1894_v26  ;;  %v1976_v9 = vadd.f32 -1.4531521, %v1944_v39  ;;  %v1977_v25 = vadd.f32 -1.4531521, %v1945_v13  ;;  %v4623_v33 = vmul.f32 %v4571_v21, %v1974_v38 }
 0x257   : > { %5835 = vst [vmem:[#allocation106_spill] sm:$0xff] %v4603_v43  ;;  %v4607_v27 = vpop.eup %3184  ;;  %3196 = vrcp.f32 %v1895_v24  ;;  %v1909_v24 = vadd.f32 1.0, %v1877_v30  ;;  %v1979_v20 = vadd.f32 -1.4531521, %v1947_v0  ;;  %v1981_v39 = vadd.f32 -1.4531521, %v1949_v1 }
 0x258   : > { %5836 = vst [vmem:[#allocation107_spill] sm:$0xff] %v4607_v27  ;;  %v4610_v8 = vpop.eup %3186  ;;  %3198 = vrcp.f32 %v1896_v31  ;;  %v1951_v31 = vmul.f32 1.0614054, %v4600_v51  ;;  %v1952_v30 = vmul.f32 1.0614054, %v4603_v43  ;;  %v4634_v13 = vmul.f32 %v4579_v50, %v1976_v9 }
 0x259   : > { %5837 = vst [vmem:[#allocation108_spill] sm:$0xff] %v4610_v8  ;;  %v4614_v26 = vpop.eup %3188  ;;  %3200 = vrcp.f32 %v1897_v58  ;;  %v1980_v58 = vadd.f32 -1.4531521, %v1948_v37  ;;  %v1953_v0 = vmul.f32 1.0614054, %v4607_v27  ;;  %v4643_v38 = vmul.f32 %v4587_v22, %v1978_v23 }
 0x25a   : > { %5838 = vst [vmem:[#allocation109_spill] sm:$0xff] %v4614_v26  ;;  %v4617_v12 = vpop.eup %3190  ;;  %3202 = vrcp.f32 %v1898_v47  ;;  %v4649_v9 = vmul.f32 %v4590_v4, %v1979_v20  ;;  %v4658_v23 = vmul.f32 %v4594_v60, %v1981_v39 }
 0x25b   : > { %5839 = vst [vmem:[#allocation110_spill] sm:$0xff] %v4617_v12  ;;  %v4619_v19 = vpop.eup %3192  ;;  %3204 = vrcp.f32 %v1899_v3  ;;  %v1982_v3 = vadd.f32 -1.4531521, %v1950_v55  ;;  %v1983_v55 = vadd.f32 -1.4531521, %v1951_v31  ;;  %v4655_v17 = vmul.f32 %v4592_v14, %v1980_v58 }
 0x25c   : > { %5840 = vst [vmem:[#allocation111_spill] sm:$0xff] %v4619_v19  ;;  %v4625_v35 = vpop.eup %3194  ;;  %3206 = vrcp.f32 %v1900_v62  ;;  %v4640_v62 = vmul.f32 %v4583_v52, %v1977_v25  ;;  %v1984_v31 = vadd.f32 -1.4531521, %v1952_v30  ;;  %v1985_v57 = vadd.f32 -1.4531521, %v1953_v0 }
 0x25d   : > { %5841 = vst [vmem:[#allocation112_spill] sm:$0xff] %v4625_v35  ;;  %v4630_v47 = vpop.eup %3196  ;;  %3208 = vrcp.f32 %v1901_v48  ;;  %v1954_v48 = vmul.f32 1.0614054, %v4610_v8  ;;  %v4664_v20 = vmul.f32 %v4597_v59, %v1982_v3  ;;  %v1958_v58 = vmul.f32 1.0614054, %v4625_v35 }
 0x25e   : > { %5842 = vst [vmem:[#allocation113_spill] sm:$0xff] %v4630_v47  ;;  %v4636_v44 = vpop.eup %3198  ;;  %3210 = vrcp.f32 %v1902_v7  ;;  %v1955_v7 = vmul.f32 1.0614054, %v4614_v26  ;;  %v1959_v39 = vmul.f32 1.0614054, %v4630_v47  ;;  %v4674_v42 = vmul.f32 %v4600_v51, %v1983_v55 }
 0x25f   : > { %5843 = vst [vmem:[#allocation114_spill] sm:$0xff] %v4636_v44  ;;  %v4645_v37 = vpop.eup %3200  ;;  %3212 = vrcp.f32 %v1903_v15  ;;  %v1956_v15 = vmul.f32 1.0614054, %v4617_v12  ;;  %v1960_v3 = vmul.f32 1.0614054, %v4636_v44  ;;  %v4684_v45 = vmul.f32 %v4603_v43, %v1984_v31 }
 0x260   : > { %5844 = vst [vmem:[#allocation115_spill] sm:$0xff] %v4645_v37  ;;  %v4651_v1 = vpop.eup %3202  ;;  %3214 = vrcp.f32 %v1904_v11  ;;  %v1957_v11 = vmul.f32 1.0614054, %v4619_v19  ;;  %v1987_v53 = vadd.f32 -1.4531521, %v1955_v7  ;;  %v2017_v56 = vmul.f32 %v4607_v27, %v1985_v57 }
 0x261   : > { %5845 = vst [vmem:[#allocation116_spill] sm:$0xff] %v4651_v1  ;;  %v4660_v25 = vpop.eup %3204  ;;  %3216 = vrcp.f32 %v1905_v5  ;;  %v1986_v5 = vadd.f32 -1.4531521, %v1954_v48  ;;  %v1962_v0 = vmul.f32 1.0614054, %v4651_v1 }
 0x262   : > { %5846 = vst [vmem:[#allocation117_spill] sm:$0xff] %v4660_v25  ;;  %v4666_v40 = vpop.eup %3206  ;;  %3218 = vrcp.f32 %v1906_v28  ;;  %v1961_v28 = vmul.f32 1.0614054, %v4645_v37  ;;  %v1963_v55 = vmul.f32 1.0614054, %v4660_v25 }
 0x263   : > { %5847 = vst [vmem:[#allocation118_spill] sm:$0xff] %v4666_v40  ;;  %v4670_v32 = vpop.eup %3208  ;;  %3220 = vrcp.f32 %v1907_v54  ;;  %v1988_v54 = vadd.f32 -1.4531521, %v1956_v15  ;;  %v1989_v46 = vadd.f32 -1.4531521, %v1957_v11  ;;  %v2018_v15 = vmul.f32 %v4610_v8, %v1986_v5 }
 0x264   : > { %5848 = vst [vmem:[#allocation119_spill] sm:$0xff] %v4670_v32  ;;  %v4676_v30 = vpop.eup %3210  ;;  %3222 = vrcp.f32 %v1908_v18  ;;  %v1990_v18 = vadd.f32 -1.4531521, %v1958_v58  ;;  %v1964_v7 = vmul.f32 1.0614054, %v4666_v40  ;;  %v2019_v11 = vmul.f32 %v4614_v26, %v1987_v53 }
 0x265   : > { %5849 = vst [vmem:[#allocation120_spill] sm:$0xff] %v4676_v30  ;;  %v4680_v10 = vpop.eup %3212  ;;  %3224 = vrcp.f32 %v1909_v24  ;;  %v1965_v24 = vmul.f32 1.0614054, %v4670_v32  ;;  %v1991_v63 = vadd.f32 -1.4531521, %v1959_v39  ;;  %v2020_v2 = vmul.f32 %v4617_v12, %v1988_v54 }
 0x266   : > { %5850 = vst [vmem:[#allocation121_spill] sm:$0xff] %v4680_v10  ;;  %v4686_v48 = vpop.eup %3214  ;;  %v1966_v31 = vmul.f32 1.0614054, %v4676_v30  ;;  %v1992_v16 = vadd.f32 -1.4531521, %v1960_v3  ;;  %v2021_v27 = vmul.f32 %v4619_v19, %v1989_v46  ;;  %v2022_v3 = vmul.f32 %v4625_v35, %v1990_v18 }
 0x267   : > { %5851 = vst [vmem:[#allocation122_spill] sm:$0xff] %v4686_v48  ;;  %v4690_v41 = vpop.eup %3216  ;;  %v1993_v29 = vadd.f32 -1.4531521, %v1961_v28  ;;  %v1967_v57 = vmul.f32 1.0614054, %v4680_v10  ;;  %v2023_v51 = vmul.f32 %v4630_v47, %v1991_v63 }
 0x268   : > { %5852 = vst [vmem:[#allocation123_spill] sm:$0xff] %v4690_v41  ;;  %v4695_v6 = vpop.eup %3218  ;;  %v1968_v61 = vmul.f32 1.0614054, %v4686_v48  ;;  %v1994_v36 = vadd.f32 -1.4531521, %v1962_v0  ;;  %v2024_v12 = vmul.f32 %v4636_v44, %v1992_v16 }
 0x269   : > { %5853 = vst [vmem:[#allocation124_spill] sm:$0xff] %v4695_v6  ;;  %v4699_v58 = vpop.eup %3220  ;;  %v1969_v5 = vmul.f32 1.0614054, %v4690_v41  ;;  %v1995_v8 = vadd.f32 -1.4531521, %v1963_v55  ;;  %v2025_v59 = vmul.f32 %v4645_v37, %v1993_v29 }
 0x26a   : > { %5854 = vst [vmem:[#allocation125_spill] sm:$0xff] %v4699_v58  ;;  %v4704_v39 = vpop.eup %3222  ;;  %v1970_v53 = vmul.f32 1.0614054, %v4695_v6  ;;  %v1996_v26 = vadd.f32 -1.4531521, %v1964_v7  ;;  %v2026_v18 = vmul.f32 %v4651_v1, %v1994_v36 }
 0x26b   : > { %v4709_v28 = vpop.eup %3224  ;;  %v1997_v43 = vadd.f32 -1.4531521, %v1965_v24  ;;  %v1971_v0 = vmul.f32 1.0614054, %v4699_v58  ;;  %v1998_v54 = vadd.f32 -1.4531521, %v1966_v31  ;;  %v2027_v7 = vmul.f32 %v4660_v25, %v1995_v8 }
 0x26c   : > { %5855 = vst [vmem:[#allocation126_spill] sm:$0xff] %v4709_v28  ;;  %v1972_v55 = vmul.f32 1.0614054, %v4704_v39  ;;  %v1999_v46 = vadd.f32 -1.4531521, %v1967_v57  ;;  %v2028_v31 = vmul.f32 %v4666_v40, %v1996_v26 }
 0x26d   : > { %v2000_v19 = vadd.f32 -1.4531521, %v1968_v61  ;;  %v1973_v35 = vmul.f32 1.0614054, %v4709_v28  ;;  %v2001_v60 = vadd.f32 -1.4531521, %v1969_v5  ;;  %v2029_v16 = vmul.f32 %v4670_v32, %v1997_v43 }
 0x26e   : > { %v2038_v63 = vadd.f32 1.4214138, %v4623_v33  ;;  %v2002_v24 = vadd.f32 -1.4531521, %v1970_v53  ;;  %v2039_v29 = vadd.f32 1.4214138, %v4628_v34  ;;  %v2030_v57 = vmul.f32 %v4676_v30, %v1998_v54 }
 0x26f   : > { %v2003_v37 = vadd.f32 -1.4531521, %v1971_v0  ;;  %v2040_v61 = vadd.f32 1.4214138, %v4634_v13  ;;  %v2041_v36 = vadd.f32 1.4214138, %v4640_v62  ;;  %v2031_v5 = vmul.f32 %v4680_v10, %v1999_v46 }
 0x270   : > { %v2004_v1 = vadd.f32 -1.4531521, %v1972_v55  ;;  %v2032_v8 = vmul.f32 %v4686_v48, %v2000_v19  ;;  %v2042_v33 = vadd.f32 1.4214138, %v4643_v38  ;;  %v2005_v53 = vadd.f32 -1.4531521, %v1973_v35 }
 0x271   : > { %v2033_v26 = vmul.f32 %v4690_v41, %v2001_v60  ;;  %v2043_v43 = vadd.f32 1.4214138, %v4649_v9  ;;  %v2044_v34 = vadd.f32 1.4214138, %v4655_v17  ;;  %v2034_v0 = vmul.f32 %v4695_v6, %v2002_v24 }
 0x272   : > { %v2045_v13 = vadd.f32 1.4214138, %v4658_v23  ;;  %v2046_v62 = vadd.f32 1.4214138, %v4664_v20  ;;  %v2047_v54 = vadd.f32 1.4214138, %v4674_v42  ;;  %v2035_v55 = vmul.f32 %v4699_v58, %v2003_v37 }
 0x273   : > { %v2048_v19 = vadd.f32 1.4214138, %v4684_v45  ;;  %v2049_v38 = vadd.f32 1.4214138, %v2017_v56  ;;  %v2050_v35 = vadd.f32 1.4214138, %v2018_v15  ;;  %v2036_v60 = vmul.f32 %v4704_v39, %v2004_v1 }
 0x274   : > { %v2051_v46 = vadd.f32 1.4214138, %v2019_v11  ;;  %v2052_v9 = vadd.f32 1.4214138, %v2020_v2  ;;  %v2053_v41 = vadd.f32 1.4214138, %v2021_v27  ;;  %v2037_v17 = vmul.f32 %v4709_v28, %v2005_v53 }
 0x275   : > { %v2054_v24 = vadd.f32 1.4214138, %v2022_v3  ;;  %v2055_v6 = vadd.f32 1.4214138, %v2023_v51  ;;  %v2056_v23 = vadd.f32 1.4214138, %v2024_v12  ;;  %v2070_v42 = vmul.f32 %v4571_v21, %v2038_v63 }
 0x276   : > { %v2057_v48 = vadd.f32 1.4214138, %v2025_v59  ;;  %v2058_v20 = vadd.f32 1.4214138, %v2026_v18  ;;  %v2059_v10 = vadd.f32 1.4214138, %v2027_v7  ;;  %v2071_v56 = vmul.f32 %v4575_v49, %v2039_v29 }
 0x277   : > { %v2060_v37 = vadd.f32 1.4214138, %v2028_v31  ;;  %v2061_v58 = vadd.f32 1.4214138, %v2029_v16  ;;  %v2062_v45 = vadd.f32 1.4214138, %v2030_v57  ;;  %v2072_v2 = vmul.f32 %v4579_v50, %v2040_v61 }
 0x278   : > { %v2063_v15 = vadd.f32 1.4214138, %v2031_v5  ;;  %v2064_v1 = vadd.f32 1.4214138, %v2032_v8  ;;  %v2065_v11 = vadd.f32 1.4214138, %v2033_v26  ;;  %v2073_v51 = vmul.f32 %v4583_v52, %v2041_v36 }
 0x279   : > { %v2066_v27 = vadd.f32 1.4214138, %v2034_v0  ;;  %v2067_v53 = vadd.f32 1.4214138, %v2035_v55  ;;  %v2068_v3 = vadd.f32 1.4214138, %v2036_v60  ;;  %v2074_v12 = vmul.f32 %v4587_v22, %v2042_v33 }
 0x27a   : > { %v2069_v59 = vadd.f32 1.4214138, %v2037_v17  ;;  %v2075_v18 = vmul.f32 %v4590_v4, %v2043_v43  ;;  %v2076_v7 = vmul.f32 %v4592_v14, %v2044_v34  ;;  %v5856_v63 = vld [vmem:[#allocation103_spill] sm:$0xff]  ;;  %v5857_v16 = vld [vmem:[#allocation104_spill] sm:$0xff]  ;;  %v5858_v57 = vld [vmem:[#allocation105_spill] sm:$0xff] }
 0x27b   : > { %v2077_v31 = vmul.f32 %v5856_v63, %v2045_v13  ;;  %v2078_v29 = vmul.f32 %v5857_v16, %v2046_v62  ;;  %v2079_v5 = vmul.f32 %v5858_v57, %v2047_v54  ;;  %v5859_v8 = vld [vmem:[#allocation106_spill] sm:$0xff]  ;;  %v5860_v26 = vld [vmem:[#allocation107_spill] sm:$0xff]  ;;  %v5861_v55 = vld [vmem:[#allocation108_spill] sm:$0xff]  ;;  %v2087_v13 = vmul.f32 %v4630_v47, %v2055_v6 }
 0x27c   : > { %v2080_v61 = vmul.f32 %v5859_v8, %v2048_v19  ;;  %v2081_v0 = vmul.f32 %v5860_v26, %v2049_v38  ;;  %v2082_v60 = vmul.f32 %v5861_v55, %v2050_v35  ;;  %v5862_v36 = vld [vmem:[#allocation109_spill] sm:$0xff]  ;;  %v5863_v52 = vld [vmem:[#allocation110_spill] sm:$0xff]  ;;  %v5864_v22 = vld [vmem:[#allocation111_spill] sm:$0xff]  ;;  %v2088_v62 = vmul.f32 %v4636_v44, %v2056_v23 }
 0x27d   : > { %v2083_v17 = vmul.f32 %v5862_v36, %v2051_v46  ;;  %v2084_v33 = vmul.f32 %v5863_v52, %v2052_v9  ;;  %v2085_v43 = vmul.f32 %v5864_v22, %v2053_v41  ;;  %v5865_v4 = vld [vmem:[#allocation112_spill] sm:$0xff]  ;;  %v5866_v16 = vld [vmem:[#allocation115_spill] sm:$0xff]  ;;  %v2091_v38 = vmul.f32 %v4660_v25, %v2059_v10  ;;  %v5868_v52 = vld [vmem:[#allocation121_spill] sm:$0xff] }
 0x27e   : > { %v2086_v34 = vmul.f32 %v5865_v4, %v2054_v24  ;;  %v2089_v54 = vmul.f32 %v5866_v16, %v2057_v48  ;;  %v5867_v57 = vld [vmem:[#allocation116_spill] sm:$0xff]  ;;  %v2092_v35 = vmul.f32 %v4666_v40, %v2060_v37  ;;  %v2093_v46 = vmul.f32 %v4670_v32, %v2061_v58  ;;  %v5869_v24 = vld [vmem:[#allocation122_spill] sm:$0xff]  ;;  %v5870_v6 = vld [vmem:[#allocation123_spill] sm:$0xff] }
 0x27f   : > { %v2090_v19 = vmul.f32 %v5867_v57, %v2058_v20  ;;  %v2094_v9 = vmul.f32 %v4676_v30, %v2062_v45  ;;  %v2095_v41 = vmul.f32 %v5868_v52, %v2063_v15  ;;  %v2102_v22 = vadd.f32 -0.28449672, %v2070_v42  ;;  %v5871_v23 = vld [vmem:[#allocation124_spill] sm:$0xff]  ;;  %v5872_v16 = vld [vmem:[#allocation125_spill] sm:$0xff] }
 0x280   : > { %v2096_v4 = vmul.f32 %v5869_v24, %v2064_v1  ;;  %v2097_v47 = vmul.f32 %v5870_v6, %v2065_v11  ;;  %v2098_v44 = vmul.f32 %v5871_v23, %v2066_v27  ;;  %v2103_v48 = vadd.f32 -0.28449672, %v2071_v56 }
 0x281   : > { %v2099_v20 = vmul.f32 %v5872_v16, %v2067_v53  ;;  %v2100_v10 = vmul.f32 %v4704_v39, %v2068_v3  ;;  %v2104_v25 = vadd.f32 -0.28449672, %v2072_v2  ;;  %v2105_v37 = vadd.f32 -0.28449672, %v2073_v51 }
 0x282   : > { %v2101_v58 = vmul.f32 %v4709_v28, %v2069_v59  ;;  %v2106_v32 = vadd.f32 -0.28449672, %v2074_v12  ;;  %v2107_v45 = vadd.f32 -0.28449672, %v2075_v18  ;;  %v2108_v30 = vadd.f32 -0.28449672, %v2076_v7 }
 0x283   : > { %v2109_v15 = vadd.f32 -0.28449672, %v2077_v31  ;;  %v2110_v42 = vadd.f32 -0.28449672, %v2078_v29  ;;  %v2111_v52 = vadd.f32 -0.28449672, %v2079_v5  ;;  %v2134_v1 = vmul.f32 %v4571_v21, %v2102_v22 }
 0x284   : > { %v2112_v11 = vadd.f32 -0.28449672, %v2080_v61  ;;  %v2113_v6 = vadd.f32 -0.28449672, %v2081_v0  ;;  %v2114_v27 = vadd.f32 -0.28449672, %v2082_v60  ;;  %v2135_v56 = vmul.f32 %v4575_v49, %v2103_v48 }
 0x285   : > { %v2115_v53 = vadd.f32 -0.28449672, %v2083_v17  ;;  %v2116_v16 = vadd.f32 -0.28449672, %v2084_v33  ;;  %v2117_v3 = vadd.f32 -0.28449672, %v2085_v43  ;;  %v2136_v2 = vmul.f32 %v4579_v50, %v2104_v25 }
 0x286   : > { %v2118_v51 = vadd.f32 -0.28449672, %v2086_v34  ;;  %v2119_v59 = vadd.f32 -0.28449672, %v2087_v13  ;;  %v2120_v12 = vadd.f32 -0.28449672, %v2088_v62  ;;  %v2140_v25 = vmul.f32 %v4592_v14, %v2108_v30 }
 0x287   : > { %v5873_v18 = vld [vmem:[#allocation100_spill] sm:$0xff]  ;;  %v2121_v31 = vadd.f32 -0.28449672, %v2089_v54  ;;  %v2122_v29 = vadd.f32 -0.28449672, %v2090_v19  ;;  %v5874_v28 = vld [vmem:[#allocation101_spill] sm:$0xff] }
 0x288   : > { %v2137_v7 = vmul.f32 %v5873_v18, %v2105_v37  ;;  %v2123_v5 = vadd.f32 -0.28449672, %v2091_v38  ;;  %v2138_v22 = vmul.f32 %v5874_v28, %v2106_v32  ;;  %v2124_v61 = vadd.f32 -0.28449672, %v2092_v35  ;;  %v5875_v21 = vld [vmem:[#allocation102_spill] sm:$0xff]  ;;  %v5876_v19 = vld [vmem:[#allocation104_spill] sm:$0xff] }
 0x289   : > { %v2125_v0 = vadd.f32 -0.28449672, %v2093_v46  ;;  %v2126_v60 = vadd.f32 -0.28449672, %v2094_v9  ;;  %v2139_v48 = vmul.f32 %v5875_v21, %v2107_v45  ;;  %v2127_v17 = vadd.f32 -0.28449672, %v2095_v41 }
 0x28a   : > { %v2128_v33 = vadd.f32 -0.28449672, %v2096_v4  ;;  %v2129_v43 = vadd.f32 -0.28449672, %v2097_v47  ;;  %v2130_v34 = vadd.f32 -0.28449672, %v2098_v44  ;;  %v2141_v37 = vmul.f32 %v5856_v63, %v2109_v15 }
 0x28b   : > { %v2131_v13 = vadd.f32 -0.28449672, %v2099_v20  ;;  %v2132_v62 = vadd.f32 -0.28449672, %v2100_v10  ;;  %v2133_v54 = vadd.f32 -0.28449672, %v2101_v58  ;;  %v2142_v38 = vmul.f32 %v5876_v19, %v2110_v42 }
 0x28c   : > { %v5877_v18 = vld [vmem:[#allocation105_spill] sm:$0xff]  ;;  %v2144_v35 = vmul.f32 %v5859_v8, %v2112_v11  ;;  %v2145_v46 = vmul.f32 %v5860_v26, %v2113_v6  ;;  %v2146_v9 = vmul.f32 %v5861_v55, %v2114_v27  ;;  %v2147_v4 = vmul.f32 %v5862_v36, %v2115_v53  ;;  %v5878_v47 = vld [vmem:[#allocation110_spill] sm:$0xff]  ;;  %v5879_v44 = vld [vmem:[#allocation111_spill] sm:$0xff] }
 0x28d   : > { %v2143_v32 = vmul.f32 %v5877_v18, %v2111_v52  ;;  %v2148_v30 = vmul.f32 %v5878_v47, %v2116_v16  ;;  %v2149_v41 = vmul.f32 %v5879_v44, %v2117_v3  ;;  %v5880_v20 = vld [vmem:[#allocation112_spill] sm:$0xff]  ;;  %v5881_v45 = vld [vmem:[#allocation113_spill] sm:$0xff]  ;;  %v5882_v15 = vld [vmem:[#allocation114_spill] sm:$0xff]  ;;  %v2154_v11 = vmul.f32 %v5867_v57, %v2122_v29 }
 0x28e   : > { %v2150_v10 = vmul.f32 %v5880_v20, %v2118_v51  ;;  %v2151_v58 = vmul.f32 %v5881_v45, %v2119_v59  ;;  %v2152_v42 = vmul.f32 %v5882_v15, %v2120_v12  ;;  %v5883_v19 = vld [vmem:[#allocation115_spill] sm:$0xff]  ;;  %v5884_v8 = vld [vmem:[#allocation117_spill] sm:$0xff]  ;;  %v2156_v27 = vmul.f32 %v4666_v40, %v2124_v61  ;;  %v5886_v36 = vld [vmem:[#allocation120_spill] sm:$0xff] }
 0x28f   : > { %v2153_v52 = vmul.f32 %v5883_v19, %v2121_v31  ;;  %v2155_v6 = vmul.f32 %v5884_v8, %v2123_v5  ;;  %v5885_v55 = vld [vmem:[#allocation119_spill] sm:$0xff]  ;;  %v2158_v16 = vmul.f32 %v5886_v36, %v2126_v60  ;;  %v5887_v47 = vld [vmem:[#allocation121_spill] sm:$0xff]  ;;  %v2166_v44 = vadd.f32 0.2548296, %v2134_v1  ;;  %v5890_v40 = vld [vmem:[#allocation126_spill] sm:$0xff] }
 0x290   : > { %v2157_v53 = vmul.f32 %v5885_v55, %v2125_v0  ;;  %v2159_v3 = vmul.f32 %v5887_v47, %v2127_v17  ;;  %v2160_v51 = vmul.f32 %v5869_v24, %v2128_v33  ;;  %v5888_v59 = vld [vmem:[#allocation123_spill] sm:$0xff]  ;;  %v2162_v12 = vmul.f32 %v5871_v23, %v2130_v34  ;;  %v5889_v19 = vld [vmem:[#allocation125_spill] sm:$0xff] }
 0x291   : > { %v2161_v45 = vmul.f32 %v5888_v59, %v2129_v43  ;;  %v2167_v31 = vadd.f32 0.2548296, %v2135_v56  ;;  %v2163_v29 = vmul.f32 %v5889_v19, %v2131_v13  ;;  %v2164_v5 = vmul.f32 %v4704_v39, %v2132_v62  ;;  %v5891_v33 = vld [vmem:[#allocation99_spill] sm:$0xff] }
 0x292   : > { %v2168_v8 = vadd.f32 0.2548296, %v2136_v2  ;;  %v2169_v61 = vadd.f32 0.2548296, %v2137_v7  ;;  %v2165_v0 = vmul.f32 %v5890_v40, %v2133_v54  ;;  %v2170_v55 = vadd.f32 0.2548296, %v2138_v22 }
 0x293   : > { %v2171_v60 = vadd.f32 0.2548296, %v2139_v48  ;;  %v2172_v36 = vadd.f32 0.2548296, %v2140_v25  ;;  %v2173_v17 = vadd.f32 0.2548296, %v2141_v37  ;;  %v4806_v24 = vmul.f32 %v5891_v33, %v2166_v44 }
 0x294   : > { %v2174_v1 = vadd.f32 0.2548296, %v2142_v38  ;;  %v2175_v47 = vadd.f32 0.2548296, %v2143_v32  ;;  %v2176_v43 = vadd.f32 0.2548296, %v2144_v35  ;;  %v4809_v13 = vmul.f32 %v4575_v49, %v2167_v31 }
 0x295   : > { %v2177_v34 = vadd.f32 0.2548296, %v2145_v46  ;;  %v2178_v56 = vadd.f32 0.2548296, %v2146_v9  ;;  %v2179_v62 = vadd.f32 0.2548296, %v2147_v4  ;;  %v4812_v54 = vmul.f32 %v4579_v50, %v2168_v8 }
 0x296   : > { %v2180_v2 = vadd.f32 0.2548296, %v2148_v30  ;;  %v2181_v7 = vadd.f32 0.2548296, %v2149_v41  ;;  %v2182_v22 = vadd.f32 0.2548296, %v2150_v10  ;;  %v4818_v46 = vmul.f32 %v5874_v28, %v2170_v55 }
 0x297   : > { %v2183_v48 = vadd.f32 0.2548296, %v2151_v58  ;;  %v2184_v25 = vadd.f32 0.2548296, %v2152_v42  ;;  %v5892_v37 = vld [vmem:[#allocation100_spill] sm:$0xff]  ;;  %v4821_v30 = vmul.f32 %v5875_v21, %v2171_v60  ;;  %v4824_v10 = vmul.f32 %v4592_v14, %v2172_v36  ;;  %v5894_v21 = vld [vmem:[#allocation106_spill] sm:$0xff] }
 0x298   : > { %v4815_v38 = vmul.f32 %v5892_v37, %v2169_v61  ;;  %v2185_v32 = vadd.f32 0.2548296, %v2153_v52  ;;  %v2186_v44 = vadd.f32 0.2548296, %v2154_v11  ;;  %v2187_v35 = vadd.f32 0.2548296, %v2155_v6 }
 0x299   : > { %v2188_v49 = vadd.f32 0.2548296, %v2156_v27  ;;  %v2189_v9 = vadd.f32 0.2548296, %v2157_v53  ;;  %v2190_v4 = vadd.f32 0.2548296, %v2158_v16  ;;  %v4827_v11 = vmul.f32 %v5856_v63, %v2173_v17 }
 0x29a   : > { %v2191_v50 = vadd.f32 0.2548296, %v2159_v3  ;;  %v2192_v8 = vadd.f32 0.2548296, %v2160_v51  ;;  %v2193_v41 = vadd.f32 0.2548296, %v2161_v45  ;;  %v4833_v27 = vmul.f32 %v5877_v18, %v2175_v47 }
 0x29b   : > { %v2194_v58 = vadd.f32 0.2548296, %v2162_v12  ;;  %v2195_v42 = vadd.f32 0.2548296, %v2163_v29  ;;  %v2196_v52 = vadd.f32 0.2548296, %v2164_v5  ;;  %v4836_v53 = vmul.f32 %v5894_v21, %v2176_v43 }
 0x29c   : > { %v2197_v28 = vadd.f32 0.2548296, %v2165_v0  ;;  %v5893_v55 = vld [vmem:[#allocation104_spill] sm:$0xff]  ;;  %v4839_v45 = vmul.f32 %v5860_v26, %v2177_v34  ;;  %v5896_v16 = vld [vmem:[#allocation109_spill] sm:$0xff]  ;;  %v5897_v63 = vld [vmem:[#allocation63_spill] sm:$0xff]  ;;  %v4855_v47 = vmul.f32 %v5880_v20, %v2182_v22  ;;  %v4862_v60 = vmul.f32 %v5882_v15, %v2184_v25 }
 0x29d   : > { %v4830_v6 = vmul.f32 %v5893_v55, %v2174_v1  ;;  %v5895_v14 = vld [vmem:[#allocation108_spill] sm:$0xff]  ;;  %v4845_v3 = vmul.f32 %v5896_v16, %v2179_v62  ;;  %v2230_v51 = vsub.f32 0.0, %v5897_v63  ;;  %v5898_v12 = vld [vmem:[#allocation110_spill] sm:$0xff]  ;;  %v5899_v29 = vld [vmem:[#allocation111_spill] sm:$0xff]  ;;  %v4869_v34 = vmul.f32 %v5867_v57, %v2186_v44 }
 0x29e   : > { %v4842_v36 = vmul.f32 %v5895_v14, %v2178_v56  ;;  %v4849_v31 = vmul.f32 %v5898_v12, %v2180_v2  ;;  %v4852_v18 = vmul.f32 %v5899_v29, %v2181_v7  ;;  %v5900_v5 = vld [vmem:[#allocation64_spill] sm:$0xff]  ;;  %v5901_v61 = vld [vmem:[#allocation113_spill] sm:$0xff]  ;;  %5903 = vst [vmem:[#allocation107_spill] sm:$0xff] %v4862_v60  ;;  %v5904_v17 = vld [vmem:[#allocation115_spill] sm:$0xff] }
 0x29f   : > { %v2231_v26 = vsub.f32 0.0, %v5900_v5  ;;  %v4859_v0 = vmul.f32 %v5901_v61, %v2183_v48  ;;  %v4865_v1 = vmul.f32 %v5904_v17, %v2185_v32  ;;  %v5906_v33 = vld [vmem:[#allocation65_spill] sm:$0xff]  ;;  %5907 = vst [vmem:[#allocation124_spill] sm:$0xff] %v4869_v34  ;;  %v5910_v20 = vld [vmem:[#allocation118_spill] sm:$0xff]  ;;  %v5913_v48 = vld [vmem:[#allocation119_spill] sm:$0xff]  ;;  %v2262_v21 = vmul.f32 %v2230_v51, %v5897_v63 }
 0x2a0   : > { %v2232_v43 = vsub.f32 0.0, %v5906_v33  ;;  %v5908_v56 = vld [vmem:[#allocation117_spill] sm:$0xff]  ;;  %v4875_v2 = vmul.f32 %v5910_v20, %v2188_v49  ;;  %v5912_v7 = vld [vmem:[#allocation66_spill] sm:$0xff]  ;;  %v4879_v37 = vmul.f32 %v5913_v48, %v2189_v9  ;;  %v5915_v15 = vld [vmem:[#allocation120_spill] sm:$0xff]  ;;  %v4895_v9 = vmul.f32 %v5888_v59, %v2193_v41 }
 0x2a1   : > { %5902 = vst [vmem:[#allocation103_spill] sm:$0xff] %v4859_v0  ;;  %v4872_v62 = vmul.f32 %v5908_v56, %v2187_v35  ;;  %v2233_v22 = vsub.f32 0.0, %v5912_v7  ;;  %v4882_v25 = vmul.f32 %v5915_v15, %v2190_v4  ;;  %v5917_v32 = vld [vmem:[#allocation67_spill] sm:$0xff]  ;;  %v5918_v57 = vld [vmem:[#allocation121_spill] sm:$0xff]  ;;  %v5920_v35 = vld [vmem:[#allocation122_spill] sm:$0xff]  ;;  %v2263_v12 = vmul.f32 %v2231_v26, %v5900_v5 }
 0x2a2   : > { %5905 = vst [vmem:[#allocation116_spill] sm:$0xff] %v4865_v1  ;;  %v2234_v55 = vsub.f32 0.0, %v5917_v32  ;;  %v4887_v44 = vmul.f32 %v5918_v57, %v2191_v50  ;;  %v4890_v14 = vmul.f32 %v5920_v35, %v2192_v8  ;;  %v5922_v49 = vld [vmem:[#allocation68_spill] sm:$0xff]  ;;  %v4898_v4 = vmul.f32 %v5871_v23, %v2194_v58  ;;  %v5925_v29 = vld [vmem:[#allocation69_spill] sm:$0xff]  ;;  %v5928_v51 = vld [vmem:[#allocation70_spill] sm:$0xff] }
 0x2a3   : > { %5909 = vst [vmem:[#allocation101_spill] sm:$0xff] %v4872_v62  ;;  %v2235_v16 = vsub.f32 0.0, %v5922_v49  ;;  %v2236_v61 = vsub.f32 0.0, %v5925_v29  ;;  %v2264_v63 = vmul.f32 %v2232_v43, %v5906_v33  ;;  %v4903_v50 = vmul.f32 %v5889_v19, %v2195_v42  ;;  %v5930_v41 = vld [vmem:[#allocation71_spill] sm:$0xff]  ;;  %v5931_v56 = vld [vmem:[#allocation72_spill] sm:$0xff]  ;;  %v5932_v43 = vld [vmem:[#allocation73_spill] sm:$0xff] }
 0x2a4   : > { %5911 = vst [vmem:[#allocation102_spill] sm:$0xff] %v4875_v2  ;;  %v4906_v8 = vmul.f32 %v4704_v39, %v2196_v52  ;;  %v2237_v17 = vsub.f32 0.0, %v5928_v51  ;;  %v2265_v5 = vmul.f32 %v2233_v22, %v5912_v7  ;;  %v4911_v59 = vmul.f32 %v5890_v40, %v2197_v28  ;;  %v5933_v52 = vld [vmem:[#allocation74_spill] sm:$0xff]  ;;  %v5934_v48 = vld [vmem:[#allocation75_spill] sm:$0xff]  ;;  %v5935_v28 = vld [vmem:[#allocation76_spill] sm:$0xff] }
 0x2a5   : > { %5914 = vst [vmem:[#allocation105_spill] sm:$0xff] %v4879_v37  ;;  %v2238_v23 = vsub.f32 0.0, %v5930_v41  ;;  %v2266_v58 = vmul.f32 %v2234_v55, %v5917_v32  ;;  %v2294_v26 = vmul.f32 1.442695, %v2262_v21  ;;  %v2239_v33 = vsub.f32 0.0, %v5931_v56  ;;  %v5936_v57 = vld [vmem:[#allocation77_spill] sm:$0xff] }
 0x2a6   : > { %5916 = vst [vmem:[#allocation112_spill] sm:$0xff] %v4882_v25  ;;  %v2240_v19 = vsub.f32 0.0, %v5932_v43  ;;  %v2267_v42 = vmul.f32 %v2235_v16, %v5922_v49  ;;  %v2296_v39 = vmul.f32 1.442695, %v2263_v12  ;;  %v2241_v20 = vsub.f32 0.0, %v5933_v52  ;;  %v5937_v21 = vld [vmem:[#allocation78_spill] sm:$0xff] }
 0x2a7   : > { %5919 = vst [vmem:[#allocation114_spill] sm:$0xff] %v4887_v44  ;;  %v2242_v15 = vsub.f32 0.0, %v5934_v48  ;;  %v2268_v7 = vmul.f32 %v2236_v61, %v5925_v29  ;;  %v2298_v40 = vmul.f32 1.442695, %v2264_v63  ;;  %v2243_v22 = vsub.f32 0.0, %v5935_v28  ;;  %v5938_v16 = vld [vmem:[#allocation79_spill] sm:$0xff] }
 0x2a8   : > { %5921 = vst [vmem:[#allocation123_spill] sm:$0xff] %v4890_v14  ;;  %v2244_v35 = vsub.f32 0.0, %v5936_v57  ;;  %v2269_v32 = vmul.f32 %v2237_v17, %v5928_v51  ;;  %v2300_v55 = vmul.f32 1.442695, %v2265_v5  ;;  %3226 = vpow2.f32 %v2294_v26  ;;  %v5939_v61 = vld [vmem:[#allocation80_spill] sm:$0xff]  ;;  %v5940_v51 = vld [vmem:[#allocation81_spill] sm:$0xff] }
 0x2a9   : > { %5923 = vst [vmem:[#allocation125_spill] sm:$0xff] %v4895_v9  ;;  %v2302_v49 = vmul.f32 1.442695, %v2266_v58  ;;  %v2246_v12 = vsub.f32 0.0, %v5938_v16  ;;  %3228 = vpow2.f32 %v2296_v39  ;;  %v2304_v29 = vmul.f32 1.442695, %v2267_v42 }
 0x2aa   : > { %5924 = vst [vmem:[#allocation126_spill] sm:$0xff] %v4898_v4  ;;  %v2247_v63 = vsub.f32 0.0, %v5939_v61  ;;  %v2272_v4 = vmul.f32 %v2240_v19, %v5932_v43  ;;  %3230 = vpow2.f32 %v2298_v40  ;;  %v2306_v9 = vmul.f32 1.442695, %v2268_v7  ;;  %v5943_v7 = vld [vmem:[#allocation84_spill] sm:$0xff] }
 0x2ab   : > { %5926 = vst [vmem:[#allocation99_spill] sm:$0xff] %v4903_v50  ;;  %v2271_v50 = vmul.f32 %v2239_v33, %v5931_v56  ;;  %v2248_v17 = vsub.f32 0.0, %v5940_v51  ;;  %v2273_v5 = vmul.f32 %v2241_v20, %v5933_v52  ;;  %3232 = vpow2.f32 %v2300_v55  ;;  %v5942_v33 = vld [vmem:[#allocation83_spill] sm:$0xff]  ;;  %v5944_v55 = vld [vmem:[#allocation85_spill] sm:$0xff] }
 0x2ac   : > { %5927 = vst [vmem:[#allocation100_spill] sm:$0xff] %v4906_v8  ;;  %v2270_v8 = vmul.f32 %v2238_v23, %v5930_v41  ;;  %v2308_v41 = vmul.f32 1.442695, %v2269_v32  ;;  %v5941_v23 = vld [vmem:[#allocation82_spill] sm:$0xff]  ;;  %v2274_v26 = vmul.f32 %v2242_v15, %v5934_v48  ;;  %3234 = vpow2.f32 %v2302_v49 }
 0x2ad   : > { %5929 = vst [vmem:[#allocation104_spill] sm:$0xff] %v4911_v59  ;;  %v2245_v59 = vsub.f32 0.0, %v5937_v21  ;;  %v2249_v58 = vsub.f32 0.0, %v5941_v23  ;;  %v2250_v42 = vsub.f32 0.0, %v5942_v33  ;;  %v2275_v39 = vmul.f32 %v2243_v22, %v5935_v28  ;;  %v5945_v28 = vld [vmem:[#allocation86_spill] sm:$0xff] }
 0x2ae   : > { %v2310_v56 = vmul.f32 1.442695, %v2270_v8  ;;  %3236 = vpow2.f32 %v2304_v29  ;;  %v2312_v43 = vmul.f32 1.442695, %v2271_v50  ;;  %v4936_v19 = vpop.eup %3226  ;;  %v2251_v40 = vsub.f32 0.0, %v5943_v7 }
 0x2af   : > { %v2276_v52 = vmul.f32 %v2244_v35, %v5936_v57  ;;  %3238 = vpow2.f32 %v2306_v9  ;;  %v2314_v20 = vmul.f32 1.442695, %v2272_v4  ;;  %v4940_v32 = vpop.eup %3228  ;;  %v2252_v48 = vsub.f32 0.0, %v5944_v55  ;;  %v5946_v9 = vld [vmem:[#allocation87_spill] sm:$0xff] }
 0x2b0   : > { %v2277_v8 = vmul.f32 %v2245_v59, %v5937_v21  ;;  %3240 = vpow2.f32 %v2308_v41  ;;  %v2316_v15 = vmul.f32 1.442695, %v2273_v5  ;;  %v4944_v49 = vpop.eup %3230  ;;  %v2253_v50 = vsub.f32 0.0, %v5945_v28  ;;  %v5947_v59 = vld [vmem:[#allocation88_spill] sm:$0xff] }
 0x2b1   : > { %v2278_v22 = vmul.f32 %v2246_v12, %v5938_v16  ;;  %3242 = vpow2.f32 %v2310_v56  ;;  %v2318_v29 = vmul.f32 1.442695, %v2274_v26  ;;  %v4948_v14 = vpop.eup %3232  ;;  %v2254_v4 = vsub.f32 0.0, %v5946_v9  ;;  %v5948_v16 = vld [vmem:[#allocation89_spill] sm:$0xff] }
 0x2b2   : > { %v2279_v57 = vmul.f32 %v2247_v63, %v5939_v61  ;;  %3244 = vpow2.f32 %v2312_v43  ;;  %v2320_v35 = vmul.f32 1.442695, %v2275_v39  ;;  %v4952_v44 = vpop.eup %3234  ;;  %v2255_v21 = vsub.f32 0.0, %v5947_v59  ;;  %v5949_v61 = vld [vmem:[#allocation90_spill] sm:$0xff] }
 0x2b3   : > { %v2280_v5 = vmul.f32 %v2248_v17, %v5940_v51  ;;  %3246 = vpow2.f32 %v2314_v20  ;;  %v2322_v41 = vmul.f32 1.442695, %v2276_v52  ;;  %v2256_v12 = vsub.f32 0.0, %v5948_v16  ;;  %v5950_v51 = vld [vmem:[#allocation91_spill] sm:$0xff] }
 0x2b4   : > { %v4956_v25 = vpop.eup %3236  ;;  %v2281_v26 = vmul.f32 %v2249_v58, %v5941_v23  ;;  %3248 = vpow2.f32 %v2316_v15  ;;  %v2324_v56 = vmul.f32 1.442695, %v2277_v8  ;;  %v2257_v63 = vsub.f32 0.0, %v5949_v61  ;;  %v5951_v23 = vld [vmem:[#allocation92_spill] sm:$0xff] }
 0x2b5   : > { %v4960_v37 = vpop.eup %3238  ;;  %v2282_v39 = vmul.f32 %v2250_v42, %v5942_v33  ;;  %3250 = vpow2.f32 %v2318_v29  ;;  %v2326_v43 = vmul.f32 1.442695, %v2278_v22  ;;  %v2258_v17 = vsub.f32 0.0, %v5950_v51  ;;  %v5952_v33 = vld [vmem:[#allocation93_spill] sm:$0xff] }
 0x2b6   : > { %v4964_v2 = vpop.eup %3240  ;;  %v2283_v52 = vmul.f32 %v2251_v40, %v5943_v7  ;;  %3252 = vpow2.f32 %v2320_v35  ;;  %v2328_v20 = vmul.f32 1.442695, %v2279_v57  ;;  %v2259_v58 = vsub.f32 0.0, %v5951_v23  ;;  %v5953_v7 = vld [vmem:[#allocation95_spill] sm:$0xff] }
 0x2b7   : > { %v4968_v62 = vpop.eup %3242  ;;  %v2284_v8 = vmul.f32 %v2252_v48, %v5944_v55  ;;  %3254 = vpow2.f32 %v2322_v41  ;;  %v2330_v15 = vmul.f32 1.442695, %v2280_v5  ;;  %v2260_v42 = vsub.f32 0.0, %v5952_v33 }
 0x2b8   : > { %v4972_v34 = vpop.eup %3244  ;;  %v2285_v22 = vmul.f32 %v2253_v50, %v5945_v28  ;;  %3256 = vpow2.f32 %v2324_v56  ;;  %v2332_v29 = vmul.f32 1.442695, %v2281_v26  ;;  %v2261_v40 = vsub.f32 0.0, %v5953_v7 }
 0x2b9   : > { %v3247_v1 = vpop.eup %3246  ;;  %v2286_v57 = vmul.f32 %v2254_v4, %v5946_v9  ;;  %3258 = vpow2.f32 %v2326_v43  ;;  %v2334_v35 = vmul.f32 1.442695, %v2282_v39  ;;  %v2287_v55 = vmul.f32 %v2255_v21, %v5947_v59 }
 0x2ba   : > { %v3249_v60 = vpop.eup %3248  ;;  %v2288_v48 = vmul.f32 %v2256_v12, %v5948_v16  ;;  %3260 = vpow2.f32 %v2328_v20  ;;  %v2336_v5 = vmul.f32 1.442695, %v2283_v52  ;;  %v2289_v0 = vmul.f32 %v2257_v63, %v5949_v61 }
 0x2bb   : > { %v3251_v41 = vpop.eup %3250  ;;  %v2290_v28 = vmul.f32 %v2258_v17, %v5950_v51  ;;  %3262 = vpow2.f32 %v2330_v15  ;;  %v2338_v50 = vmul.f32 1.442695, %v2284_v8  ;;  %v2291_v56 = vmul.f32 %v2259_v58, %v5951_v23 }
 0x2bc   : > { %v3253_v26 = vpop.eup %3252  ;;  %v2292_v9 = vmul.f32 %v2260_v42, %v5952_v33  ;;  %3264 = vpow2.f32 %v2332_v29  ;;  %v2340_v4 = vmul.f32 1.442695, %v2285_v22  ;;  %v2293_v59 = vmul.f32 %v2261_v40, %v5953_v7 }
 0x2bd   : > { %v3255_v39 = vpop.eup %3254  ;;  %3266 = vpow2.f32 %v2334_v35  ;;  %v2342_v21 = vmul.f32 1.442695, %v2286_v57  ;;  %v4987_v16 = vmul.f32 %v4936_v19, %v4806_v24  ;;  %v2344_v61 = vmul.f32 1.442695, %v2287_v55 }
 0x2be   : > { %v3257_v12 = vpop.eup %3256  ;;  %3268 = vpow2.f32 %v2336_v5  ;;  %v4991_v63 = vmul.f32 %v4940_v32, %v4809_v13  ;;  %v4995_v43 = vmul.f32 %v4944_v49, %v4812_v54  ;;  %v2346_v17 = vmul.f32 1.442695, %v2288_v48  ;;  %v5957_v48 = vld [vmem:[#allocation103_spill] sm:$0xff] }
 0x2bf   : > { %v3259_v51 = vpop.eup %3258  ;;  %3270 = vpow2.f32 %v2338_v50  ;;  %v2348_v52 = vmul.f32 1.442695, %v2289_v0  ;;  %v4999_v20 = vmul.f32 %v4948_v14, %v4815_v38  ;;  %v2350_v19 = vmul.f32 1.442695, %v2290_v28  ;;  %v5960_v50 = vld [vmem:[#allocation116_spill] sm:$0xff] }
 0x2c0   : > { %v3261_v24 = vpop.eup %3260  ;;  %3272 = vpow2.f32 %v2340_v4  ;;  %v2352_v23 = vmul.f32 1.442695, %v2291_v56  ;;  %v2354_v58 = vmul.f32 1.442695, %v2292_v9  ;;  %v2356_v13 = vmul.f32 1.442695, %v2293_v59 }
 0x2c1   : > { %v3263_v8 = vpop.eup %3262  ;;  %3274 = vpow2.f32 %v2342_v21  ;;  %v5003_v54 = vmul.f32 %v4952_v44, %v4818_v46  ;;  %v5709_v32 = vsub.f32 1.0, %v4987_v16  ;;  %v5008_v38 = vmul.f32 %v4956_v25, %v4821_v30  ;;  %v5961_v9 = vld [vmem:[#allocation124_spill] sm:$0xff]  ;;  %v5964_v21 = vld [vmem:[#allocation102_spill] sm:$0xff] }
 0x2c2   : > { %v3265_v49 = vpop.eup %3264  ;;  %3276 = vpow2.f32 %v2344_v61  ;;  %v5710_v0 = vsub.f32 1.0, %v4991_v63  ;;  %v5712_v14 = vsub.f32 1.0, %v4995_v43  ;;  %v5014_v33 = vmul.f32 %v4960_v37, %v4824_v10  ;;  %v5988_v61 = vld [vmem:[#allocation39_spill] sm:$0xff] }
 0x2c3   : > { %v3267_v15 = vpop.eup %3266  ;;  %3278 = vpow2.f32 %v2346_v17  ;;  %v5018_v46 = vmul.f32 %v4964_v2, %v4827_v11  ;;  %v5711_v44 = vsub.f32 1.0, %v4999_v20  ;;  %v5023_v30 = vmul.f32 %v4968_v62, %v4830_v6  ;;  %v5966_v17 = vld [vmem:[#allocation105_spill] sm:$0xff] }
 0x2c4   : > { %v3269_v42 = vpop.eup %3268  ;;  %3280 = vpow2.f32 %v2348_v52  ;;  %v5027_v25 = vmul.f32 %v4972_v34, %v4833_v27  ;;  %v5030_v22 = vmul.f32 %v3247_v1, %v4836_v53  ;;  %v5033_v11 = vmul.f32 %v3249_v60, %v4839_v45 }
 0x2c5   : > { %v3271_v10 = vpop.eup %3270  ;;  %3282 = vpow2.f32 %v2350_v19  ;;  %v5036_v2 = vmul.f32 %v3251_v41, %v4842_v36  ;;  %v5039_v37 = vmul.f32 %v3253_v26, %v4845_v3  ;;  %v5042_v62 = vmul.f32 %v3255_v39, %v4849_v31  ;;  %v5958_v41 = vld [vmem:[#allocation107_spill] sm:$0xff]  ;;  %v5962_v39 = vld [vmem:[#allocation101_spill] sm:$0xff] }
 0x2c6   : > { %5954 = vst [vmem:[#allocation106_spill] sm:$0xff] %v5030_v22  ;;  %v3273_v6 = vpop.eup %3272  ;;  %3284 = vpow2.f32 %v2352_v23  ;;  %v5713_v27 = vsub.f32 1.0, %v5003_v54  ;;  %v5714_v53 = vsub.f32 1.0, %v5008_v38  ;;  %v5047_v45 = vmul.f32 %v3257_v12, %v4852_v18  ;;  %v5968_v23 = vld [vmem:[#allocation114_spill] sm:$0xff] }
 0x2c7   : > { %5955 = vst [vmem:[#allocation108_spill] sm:$0xff] %v5036_v2  ;;  %v3275_v1 = vpop.eup %3274  ;;  %3286 = vpow2.f32 %v2354_v58  ;;  %v5715_v36 = vsub.f32 1.0, %v5014_v33  ;;  %v5716_v60 = vsub.f32 1.0, %v5018_v46  ;;  %v5717_v34 = vsub.f32 1.0, %v5023_v30 }
 0x2c8   : > { %5956 = vst [vmem:[#allocation109_spill] sm:$0xff] %v5042_v62  ;;  %v3277_v3 = vpop.eup %3276  ;;  %3288 = vpow2.f32 %v2356_v13  ;;  %v5720_v31 = vsub.f32 1.0, %v5027_v25  ;;  %v5722_v29 = vsub.f32 1.0, %v5030_v22  ;;  %v5055_v40 = vmul.f32 %v3259_v51, %v4855_v47 }
 0x2c9   : > { %v3279_v7 = vpop.eup %3278  ;;  %v5723_v57 = vsub.f32 1.0, %v5033_v11  ;;  %v5724_v18 = vsub.f32 1.0, %v5036_v2  ;;  %v5726_v35 = vsub.f32 1.0, %v5039_v37  ;;  %v5061_v5 = vmul.f32 %v3261_v24, %v5957_v48  ;;  %v5967_v24 = vld [vmem:[#allocation112_spill] sm:$0xff] }
 0x2ca   : > { %v3281_v55 = vpop.eup %3280  ;;  %v5064_v28 = vmul.f32 %v3263_v8, %v5958_v41  ;;  %v5067_v26 = vmul.f32 %v3265_v49, %v5960_v50  ;;  %v5071_v4 = vmul.f32 %v3267_v15, %v5961_v9  ;;  %v5074_v59 = vmul.f32 %v3269_v42, %v5962_v39  ;;  %v5969_v8 = vld [vmem:[#allocation123_spill] sm:$0xff]  ;;  %v5970_v15 = vld [vmem:[#allocation125_spill] sm:$0xff]  ;;  %v5973_v9 = vld [vmem:[#allocation100_spill] sm:$0xff] }
 0x2cb   : > { %v3283_v47 = vpop.eup %3282  ;;  %v5077_v12 = vmul.f32 %v3271_v10, %v5964_v21  ;;  %v5081_v52 = vmul.f32 %v3273_v6, %v5966_v17  ;;  %v5084_v19 = vmul.f32 %v3275_v1, %v5967_v24  ;;  %v5087_v58 = vmul.f32 %v3277_v3, %v5968_v23  ;;  %v5971_v10 = vld [vmem:[#allocation126_spill] sm:$0xff]  ;;  %v5972_v41 = vld [vmem:[#allocation99_spill] sm:$0xff]  ;;  %v5976_v17 = vld [vmem:[#allocation104_spill] sm:$0xff] }
 0x2cc   : > { %5959 = vst [vmem:[#allocation63_spill] sm:$0xff] %v5064_v28  ;;  %v3285_v51 = vpop.eup %3284  ;;  %v5090_v13 = vmul.f32 %v3279_v7, %v5969_v8  ;;  %v5093_v42 = vmul.f32 %v3281_v55, %v5970_v15  ;;  %v5096_v48 = vmul.f32 %v3283_v47, %v5971_v10  ;;  %v5975_v55 = vld [vmem:[#allocation26_spill] sm:$0xff]  ;;  %v5978_v8 = vld [vmem:[#allocation27_spill] sm:$0xff]  ;;  %v5980_v15 = vld [vmem:[#allocation29_spill] sm:$0xff]  ;;  %v2454_v7 = vsub.f32 0.0, %v5709_v32 }
 0x2cd   : > { %5963 = vst [vmem:[#allocation110_spill] sm:$0xff] %v5074_v59  ;;  %v3287_v49 = vpop.eup %3286  ;;  %v5099_v50 = vmul.f32 %v3285_v51, %v5972_v41  ;;  %vm2422_vm8 = vcmp.lt.f32.partialorder %v5975_v55, 0.0  ;;  %vm2423_vm9 = vcmp.lt.f32.partialorder %v5978_v8, 0.0  ;;  %vm2425_vm11 = vcmp.lt.f32.partialorder %v5980_v15, 0.0  ;;  %v5982_v21 = vld [vmem:[#allocation31_spill] sm:$0xff]  ;;  %v5983_v41 = vld [vmem:[#allocation32_spill] sm:$0xff] }
 0x2ce   : > { %5965 = vst [vmem:[#allocation111_spill] sm:$0xff] %v5077_v12  ;;  %v3289_v1 = vpop.eup %3288  ;;  %v5103_v39 = vmul.f32 %v3287_v49, %v5973_v9  ;;  %v5979_v49 = vld [vmem:[#allocation28_spill] sm:$0xff]  ;;  %vm2427_vm13 = vcmp.lt.f32.partialorder %v5982_v21, 0.0  ;;  %vm2428_vm14 = vcmp.lt.f32.partialorder %v5983_v41, 0.0  ;;  %v2456_v9 = vsub.f32 0.0, %v5712_v14  ;;  %v5984_v24 = vld [vmem:[#allocation34_spill] sm:$0xff] }
 0x2cf   : > { %v5110_v47 = vmul.f32 %v3289_v1, %v5976_v17  ;;  %vm2424_vm10 = vcmp.lt.f32.partialorder %v5979_v49, 0.0  ;;  %v5981_v17 = vld [vmem:[#allocation30_spill] sm:$0xff]  ;;  %v2455_v1 = vsub.f32 0.0, %v5710_v0  ;;  %v2457_v23 = vsub.f32 0.0, %v5711_v44  ;;  %v5985_v0 = vld [vmem:[#allocation35_spill] sm:$0xff]  ;;  %v5986_v6 = vld [vmem:[#allocation36_spill] sm:$0xff] }
 0x2d0   : > { %5974 = vst [vmem:[#allocation64_spill] sm:$0xff] %v5103_v39  ;;  %vm2426_vm12 = vcmp.lt.f32.partialorder %v5981_v17, 0.0  ;;  %vm2429_vm15 = vcmp.lt.f32.partialorder %v5984_v24, 0.0  ;;  %v2458_v32 = vsub.f32 0.0, %v5713_v27  ;;  %v2459_v10 = vsub.f32 0.0, %v5714_v53  ;;  %v5987_v53 = vld [vmem:[#allocation38_spill] sm:$0xff] }
 0x2d1   : > { %5977 = vst [vmem:[#allocation113_spill] sm:$0xff] %v5110_v47  ;;  %v2460_v3 = vsub.f32 0.0, %v5715_v36  ;;  %vm2430_vm0 = vcmp.lt.f32.partialorder %v5985_v0, 0.0  ;;  %vm2431_vm1 = vcmp.lt.f32.partialorder %v5986_v6, 0.0  ;;  %v2461_v44 = vsub.f32 0.0, %v5716_v60  ;;  %v6028_v24 = vld [vmem:[#allocation48_spill] sm:$0xff] }
 0x2d2   : > { %v2462_v51 = vsub.f32 0.0, %v5717_v34  ;;  %v2463_v14 = vsub.f32 0.0, %v5720_v31  ;;  %v2464_v27 = vsub.f32 0.0, %v5722_v29  ;;  %vm2432_vm2 = vcmp.lt.f32.partialorder %v5987_v53, 0.0  ;;  %v6036_v6 = vld [vmem:[#allocation4_spill] sm:$0xff] }
 0x2d3   : > { %vm2433_vm3 = vcmp.lt.f32.partialorder %v5988_v61, 0.0  ;;  %v2465_v36 = vsub.f32 0.0, %v5723_v57  ;;  %v2466_v56 = vsub.f32 0.0, %v5724_v18  ;;  %v2467_v60 = vsub.f32 0.0, %v5726_v35  ;;  %v5997_v35 = vld [vmem:[#allocation40_spill] sm:$0xff] }
 0x2d4   : > { %v5989_v34 = vsub.f32 1.0, %v5042_v62  ;;  %v5990_v31 = vsub.f32 1.0, %v5047_v45  ;;  %v5992_v29 = vsub.f32 1.0, %v5055_v40  ;;  %v5994_v61 = vsub.f32 1.0, %v5061_v5 }
 0x2d5   : > { %v5995_v18 = vsub.f32 1.0, %v5064_v28  ;;  %vm2434_vm5 = vcmp.lt.f32.partialorder %v5997_v35, 0.0  ;;  %v6004_v28 = vld [vmem:[#allocation43_spill] sm:$0xff]  ;;  %v6011_v8 = vsub.f32 1.0, %v5087_v58  ;;  %v6013_v49 = vsub.f32 1.0, %v5090_v13 }
 0x2d6   : > { %v2468_v47 = vsub.f32 0.0, %v5989_v34  ;;  %v5167_v22 = vsub.f32 0.0, %v5990_v31  ;;  %v5171_v53 = vsub.f32 0.0, %v5992_v29  ;;  %v5175_v57 = vsub.f32 0.0, %v5994_v61 }
 0x2d7   : > { %v5179_v2 = vsub.f32 0.0, %v5995_v18  ;;  %v5998_v34 = vsub.f32 1.0, %v5067_v26  ;;  %v6000_v31 = vsub.f32 1.0, %v5071_v4  ;;  %v6001_v29 = vsub.f32 1.0, %v5074_v59 }
 0x2d8   : > { %5991 = vst [vmem:[#allocation115_spill] sm:$0xff] %v5167_v22  ;;  %v6002_v61 = vsub.f32 1.0, %v4987_v16  ;;  %vm2436_vm7 = vcmp.lt.f32.partialorder %v6004_v28, 0.0  ;;  %v6014_v15 = vsub.f32 1.0, %v5093_v42 }
 0x2d9   : > { %5993 = vst [vmem:[#allocation65_spill] sm:$0xff] %v5171_v53  ;;  %v5184_v62 = vsub.f32 0.0, %v5998_v34  ;;  %v5188_v22 = vsub.f32 0.0, %v6000_v31  ;;  %v5192_v53 = vsub.f32 0.0, %v6001_v29  ;;  %v6005_v34 = vsub.f32 1.0, %v5077_v12 }
 0x2da   : > { %5996 = vst [vmem:[#allocation117_spill] sm:$0xff] %v5179_v2  ;;  %v2486_v18 = vsel %vm2422_vm8, %v2454_v7, %v6002_v61  ;;  %v6003_v2 = vld [vmem:[#allocation42_spill] sm:$0xff]  ;;  %v6006_v31 = vsub.f32 1.0, %v4991_v63  ;;  %v6007_v29 = vsub.f32 1.0, %v4995_v43  ;;  %v6008_v7 = vsub.f32 1.0, %v4999_v20 }
 0x2db   : > { %5999 = vst [vmem:[#allocation118_spill] sm:$0xff] %v5184_v62  ;;  %vm2435_vm6 = vcmp.lt.f32.partialorder %v6003_v2, 0.0  ;;  %v5202_v62 = vsub.f32 0.0, %v6005_v34  ;;  %v6009_v61 = vsub.f32 1.0, %v5081_v52  ;;  %v6010_v34 = vsub.f32 1.0, %v5084_v19  ;;  %v6053_v2 = vld [vmem:[#allocation10_spill] sm:$0xff] }
 0x2dc   : > { %v2487_v59 = vsel %vm2423_vm9, %v2455_v1, %v6006_v31  ;;  %v2488_v16 = vsel %vm2424_vm10, %v2456_v9, %v6007_v29  ;;  %v2489_v55 = vsel %vm2425_vm11, %v2457_v23, %v6008_v7  ;;  %v5226_v1 = vsub.f32 0.0, %v6011_v8 }
 0x2dd   : > { %v5218_v12 = vsub.f32 0.0, %v6009_v61  ;;  %v5222_v63 = vsub.f32 0.0, %v6010_v34  ;;  %v6012_v43 = vsub.f32 1.0, %v5003_v54  ;;  %v5234_v23 = vsub.f32 0.0, %v6013_v49  ;;  %v6016_v61 = vld [vmem:[#allocation44_spill] sm:$0xff] }
 0x2de   : > { %v5238_v9 = vsub.f32 0.0, %v6014_v15  ;;  %v6015_v31 = vsub.f32 1.0, %v5008_v38  ;;  %v2518_v7 = vadd.f32 1.0, %v2486_v18  ;;  %vm2437_vm8 = vcmp.lt.f32.partialorder %v6016_v61, 0.0 }
 0x2df   : > { %v2490_v20 = vsel %vm2426_vm12, %v2458_v32, %v6012_v43  ;;  %v6017_v54 = vsub.f32 1.0, %v5014_v33  ;;  %v2519_v17 = vadd.f32 1.0, %v2487_v59  ;;  %v2520_v34 = vadd.f32 1.0, %v2488_v16  ;;  %v6018_v43 = vld [vmem:[#allocation46_spill] sm:$0xff] }
 0x2e0   : > { %v2491_v29 = vsel %vm2427_vm13, %v2459_v10, %v6015_v31  ;;  %v2521_v8 = vadd.f32 1.0, %v2489_v55  ;;  %vm2438_vm9 = vcmp.lt.f32.partialorder %v6018_v43, 0.0  ;;  %v6019_v49 = vsub.f32 1.0, %v5096_v48 }
 0x2e1   : > { %v2492_v32 = vsel %vm2428_vm14, %v2460_v3, %v6017_v54  ;;  %v6020_v38 = vsub.f32 1.0, %v5099_v50  ;;  %v6022_v10 = vsub.f32 1.0, %v5018_v46  ;;  %v2522_v41 = vadd.f32 1.0, %v2490_v20  ;;  %v6023_v3 = vld [vmem:[#allocation47_spill] sm:$0xff] }
 0x2e2   : > { %v5252_v15 = vsub.f32 0.0, %v6019_v49  ;;  %vm2439_vm10 = vcmp.lt.f32.partialorder %v6023_v3, 0.0  ;;  %v6024_v59 = vsub.f32 1.0, %v5103_v39  ;;  %v6026_v16 = vsub.f32 1.0, %v5023_v30  ;;  %v6038_v39 = vld [vmem:[#allocation6_spill] sm:$0xff]  ;;  %v6042_v49 = vld [vmem:[#allocation108_spill] sm:$0xff] }
 0x2e3   : > { %v5256_v21 = vsub.f32 0.0, %v6020_v38  ;;  %v2493_v33 = vsel %vm2429_vm15, %v2461_v44, %v6022_v10  ;;  %v6027_v31 = vsub.f32 1.0, %v5027_v25  ;;  %v2523_v54 = vadd.f32 1.0, %v2491_v29  ;;  %v6029_v44 = vld [vmem:[#allocation106_spill] sm:$0xff] }
 0x2e4   : > { %v5265_v18 = vsub.f32 0.0, %v6024_v59  ;;  %v2494_v55 = vsel %vm2430_vm0, %v2462_v51, %v6026_v16  ;;  %vm2440_vm11 = vcmp.lt.f32.partialorder %v6028_v24, 0.0  ;;  %v6030_v20 = vsub.f32 1.0, %v6029_v44  ;;  %v6034_v59 = vld [vmem:[#allocation3_spill] sm:$0xff]  ;;  %v6035_v16 = vld [vmem:[#allocation50_spill] sm:$0xff] }
 0x2e5   : > { %6021 = vst [vmem:[#allocation66_spill] sm:$0xff] %v5256_v21  ;;  %v2495_v46 = vsel %vm2431_vm1, %v2463_v14, %v6027_v31  ;;  %v6032_v10 = vsub.f32 1.0, %v5033_v11  ;;  %v2524_v51 = vadd.f32 1.0, %v2492_v32  ;;  %v2550_v25 = vmul.f32 %v2518_v7, %v6034_v59  ;;  %v6037_v31 = vld [vmem:[#allocation5_spill] sm:$0xff]  ;;  %v6039_v21 = vld [vmem:[#allocation51_spill] sm:$0xff] }
 0x2e6   : > { %6025 = vst [vmem:[#allocation119_spill] sm:$0xff] %v5265_v18  ;;  %v2496_v38 = vsel %vm2432_vm2, %v2464_v27, %v6030_v20  ;;  %vm2441_vm12 = vcmp.lt.f32.partialorder %v6035_v16, 0.0  ;;  %v2525_v14 = vadd.f32 1.0, %v2493_v33  ;;  %v2551_v29 = vmul.f32 %v2519_v17, %v6036_v6  ;;  %v6040_v27 = vld [vmem:[#allocation113_spill] sm:$0xff] }
 0x2e7   : > { %v2497_v0 = vsel %vm2433_vm3, %v2465_v36, %v6032_v10  ;;  %v2552_v18 = vmul.f32 %v2520_v34, %v6037_v31  ;;  %v2553_v44 = vmul.f32 %v2521_v8, %v6038_v39  ;;  %vm2442_vm13 = vcmp.lt.f32.partialorder %v6039_v21, 0.0  ;;  %v6044_v10 = vld [vmem:[#allocation7_spill] sm:$0xff]  ;;  %v6045_v39 = vld [vmem:[#allocation52_spill] sm:$0xff]  ;;  %v6047_v8 = vld [vmem:[#allocation109_spill] sm:$0xff] }
 0x2e8   : > { %v6041_v20 = vsub.f32 1.0, %v6040_v27  ;;  %v6043_v36 = vsub.f32 1.0, %v6042_v49  ;;  %v2526_v32 = vadd.f32 1.0, %v2494_v55  ;;  %v2554_v33 = vmul.f32 %v2522_v41, %v6044_v10  ;;  %v6049_v55 = vld [vmem:[#allocation8_spill] sm:$0xff]  ;;  %v6050_v59 = vld [vmem:[#allocation53_spill] sm:$0xff] }
 0x2e9   : > { %vm2443_vm14 = vcmp.lt.f32.partialorder %v6045_v39, 0.0  ;;  %v6046_v17 = vsub.f32 1.0, %v5039_v37  ;;  %v6048_v30 = vsub.f32 1.0, %v6047_v8  ;;  %v2555_v41 = vmul.f32 %v2523_v54, %v6049_v55  ;;  %v6052_v37 = vld [vmem:[#allocation54_spill] sm:$0xff]  ;;  %v6056_v54 = vld [vmem:[#allocation115_spill] sm:$0xff] }
 0x2ea   : > { %v5292_v11 = vsub.f32 0.0, %v6041_v20  ;;  %v2498_v7 = vsel %vm2434_vm5, %v2466_v56, %v6043_v36  ;;  %v2527_v56 = vadd.f32 1.0, %v2495_v46  ;;  %vm2444_vm15 = vcmp.lt.f32.partialorder %v6050_v59, 0.0  ;;  %v6051_v20 = vld [vmem:[#allocation9_spill] sm:$0xff] }
 0x2eb   : > { %v2499_v34 = vsel %vm2435_vm6, %v2467_v60, %v6046_v17  ;;  %v2500_v35 = vsel %vm2436_vm7, %v2468_v47, %v6048_v30  ;;  %v2528_v6 = vadd.f32 1.0, %v2496_v38  ;;  %v2529_v31 = vadd.f32 1.0, %v2497_v0  ;;  %v6054_v47 = vld [vmem:[#allocation55_spill] sm:$0xff]  ;;  %v6058_v30 = vld [vmem:[#allocation56_spill] sm:$0xff] }
 0x2ec   : > { %v2556_v49 = vmul.f32 %v2524_v51, %v6051_v20  ;;  %v2582_v36 = vpack.c.bf16 %v2550_v25, %v2550_v25  ;;  %vm2445_vm0 = vcmp.lt.f32.partialorder %v6052_v37, 0.0  ;;  %v2557_v60 = vmul.f32 %v2525_v14, %v6053_v2  ;;  %v6057_v51 = vld [vmem:[#allocation11_spill] sm:$0xff]  ;;  %v6060_v14 = vld [vmem:[#allocation65_spill] sm:$0xff] }
 0x2ed   : > { %v2583_v10 = vpack.c.bf16 %v2551_v29, %v2551_v29  ;;  %v2584_v17 = vpack.c.bf16 %v2552_v18, %v2552_v18  ;;  %v2585_v28 = vpack.c.bf16 %v2553_v44, %v2553_v44  ;;  %vm2446_vm1 = vcmp.lt.f32.partialorder %v6054_v47, 0.0  ;;  %v6061_v44 = vld [vmem:[#allocation12_spill] sm:$0xff]  ;;  %v6064_v20 = vld [vmem:[#allocation13_spill] sm:$0xff] }
 0x2ee   : > { %v6055_v46 = vsub.f32 1.0, %v5047_v45  ;;  %v2530_v0 = vadd.f32 1.0, %v2498_v7  ;;  %v2558_v25 = vmul.f32 %v2526_v32, %v6057_v51  ;;  %v2586_v8 = vpack.c.bf16 %v2554_v33, %v2554_v33  ;;  %2615 = vst.msk [vmem:[%s5303_s24] sm:$0xf] %vm832_vm4, %v2582_v36  ;;  %v6062_v7 = vld [vmem:[#allocation57_spill] sm:$0xff]  ;;  %v6073_v51 = vld [vmem:[#allocation15_spill] sm:$0xff] }
 0x2ef   : > { %vm2447_vm2 = vcmp.lt.f32.partialorder %v6058_v30, 0.0  ;;  %v6059_v18 = vsub.f32 1.0, %v5055_v40  ;;  %v2531_v45 = vadd.f32 1.0, %v2499_v34  ;;  %v2559_v61 = vmul.f32 %v2527_v56, %v6061_v44  ;;  %2616 = vst.msk [vmem:[%s5303_s24 + $0x4] sm:$0xf] %vm832_vm4, %v2583_v10  ;;  %v6065_v34 = vld [vmem:[#allocation58_spill] sm:$0xff] }
 0x2f0   : > { %v2501_v38 = vsel %vm2437_vm8, %v6056_v54, %v6055_v46  ;;  %v2587_v55 = vpack.c.bf16 %v2555_v41, %v2555_v41  ;;  %vm2448_vm3 = vcmp.lt.f32.partialorder %v6062_v7, 0.0  ;;  %v6063_v32 = vsub.f32 1.0, %v5061_v5  ;;  %2617 = vst.msk [vmem:[%s5303_s24 + $0x8] sm:$0xf] %vm832_vm4, %v2584_v17  ;;  %v6066_v56 = vld [vmem:[#allocation63_spill] sm:$0xff]  ;;  %v6068_v2 = vld [vmem:[#allocation117_spill] sm:$0xff] }
 0x2f1   : > { %v2502_v29 = vsel %vm2438_vm9, %v6060_v14, %v6059_v18  ;;  %v2532_v40 = vadd.f32 1.0, %v2500_v35  ;;  %v2560_v43 = vmul.f32 %v2528_v6, %v6064_v20  ;;  %v2588_v36 = vpack.c.bf16 %v2556_v49, %v2556_v49  ;;  %v6069_v46 = vld [vmem:[#allocation14_spill] sm:$0xff]  ;;  %2618 = vst.msk [vmem:[%s5303_s24 + $0xc] sm:$0xf] %vm832_vm4, %v2585_v28  ;;  %v6070_v35 = vld [vmem:[#allocation59_spill] sm:$0xff]  ;;  %v6076_v28 = vld [vmem:[#allocation16_spill] sm:$0xff] }
 0x2f2   : > { %v2503_v33 = vsel %vm2439_vm10, %v5175_v57, %v6063_v32  ;;  %vm2449_vm5 = vcmp.lt.f32.partialorder %v6065_v34, 0.0  ;;  %v6067_v41 = vsub.f32 1.0, %v6066_v56  ;;  %v2533_v5 = vadd.f32 1.0, %v2501_v38  ;;  %v6072_v49 = vld [vmem:[#allocation118_spill] sm:$0xff]  ;;  %2619 = vst.msk [vmem:[%s5303_s24 + $0x10] sm:$0xf] %vm832_vm4, %v2586_v8 }
 0x2f3   : > { %v2561_v3 = vmul.f32 %v2529_v31, %v6069_v46  ;;  %v2589_v57 = vpack.c.bf16 %v2557_v60, %v2557_v60  ;;  %vm2450_vm6 = vcmp.lt.f32.partialorder %v6070_v35, 0.0  ;;  %v6071_v6 = vsub.f32 1.0, %v5067_v26  ;;  %v6074_v38 = vld [vmem:[#allocation60_spill] sm:$0xff]  ;;  %2620 = vst.msk [vmem:[%s5303_s24 + $0x14] sm:$0xf] %vm832_vm4, %v2587_v55  ;;  %v6080_v44 = vld [vmem:[#allocation17_spill] sm:$0xff] }
 0x2f4   : > { %v2504_v10 = vsel %vm2440_vm11, %v6068_v2, %v6067_v41  ;;  %v2534_v54 = vadd.f32 1.0, %v2502_v29  ;;  %v2562_v24 = vmul.f32 %v2530_v0, %v6073_v51  ;;  %v2590_v18 = vpack.c.bf16 %v2558_v25, %v2558_v25  ;;  %v6077_v29 = vld [vmem:[#allocation61_spill] sm:$0xff]  ;;  %v6078_v0 = vld [vmem:[#allocation110_spill] sm:$0xff]  ;;  %2621 = vst.msk [vmem:[%s5303_s24 + $0x18] sm:$0xf] %vm832_vm4, %v2588_v36  ;;  %v6086_v36 = vld [vmem:[#allocation19_spill] sm:$0xff] }
 0x2f5   : > { %v2505_v17 = vsel %vm2441_vm12, %v6072_v49, %v6071_v6  ;;  %vm2451_vm7 = vcmp.lt.f32.partialorder %v6074_v38, 0.0  ;;  %v6075_v31 = vsub.f32 1.0, %v5071_v4  ;;  %v2535_v26 = vadd.f32 1.0, %v2503_v33  ;;  %v6081_v32 = vld [vmem:[#allocation62_spill] sm:$0xff]  ;;  %2622 = vst.msk [vmem:[%s5303_s24 + $0x1c] sm:$0xf] %vm832_vm4, %v2589_v57 }
 0x2f6   : > { %v2563_v16 = vmul.f32 %v2531_v45, %v6076_v28  ;;  %v2591_v14 = vpack.c.bf16 %v2559_v61, %v2559_v61  ;;  %vm2452_vm8 = vcmp.lt.f32.partialorder %v6077_v29, 0.0  ;;  %v6079_v25 = vsub.f32 1.0, %v6078_v0  ;;  %v6082_v45 = vld [vmem:[#allocation111_spill] sm:$0xff]  ;;  %v6084_v20 = vld [vmem:[#allocation18_spill] sm:$0xff]  ;;  %2623 = vst.msk [vmem:[%s5303_s24 + $0x20] sm:$0xf] %vm832_vm4, %v2590_v18 }
 0x2f7   : > { %v2506_v60 = vsel %vm2442_vm13, %v5188_v22, %v6075_v31  ;;  %v2536_v8 = vadd.f32 1.0, %v2504_v10  ;;  %v2564_v21 = vmul.f32 %v2532_v40, %v6080_v44  ;;  %v2592_v22 = vpack.c.bf16 %v2560_v43, %v2560_v43  ;;  %v6090_v57 = vld [vmem:[#allocation21_spill] sm:$0xff]  ;;  %v6098_v34 = vld [vmem:[#allocation66_spill] sm:$0xff] }
 0x2f8   : > { %v2507_v4 = vsel %vm2443_vm14, %v5192_v53, %v6079_v25  ;;  %vm2453_vm9 = vcmp.lt.f32.partialorder %v6081_v32, 0.0  ;;  %v6083_v61 = vsub.f32 1.0, %v6082_v45  ;;  %v2537_v33 = vadd.f32 1.0, %v2505_v17  ;;  %2624 = vst.msk [vmem:[%s5303_s24 + $0x24] sm:$0xf] %vm832_vm4, %v2591_v14  ;;  %v6092_v17 = vld [vmem:[#allocation22_spill] sm:$0xff] }
 0x2f9   : > { %v2565_v39 = vmul.f32 %v2533_v5, %v6084_v20  ;;  %v2593_v56 = vpack.c.bf16 %v2561_v3, %v2561_v3  ;;  %v6085_v53 = vsub.f32 1.0, %v5081_v52  ;;  %v2538_v43 = vadd.f32 1.0, %v2506_v60  ;;  %v6088_v5 = vld [vmem:[#allocation20_spill] sm:$0xff]  ;;  %2625 = vst.msk [vmem:[%s5303_s24 + $0x28] sm:$0xf] %vm832_vm4, %v2592_v22  ;;  %v6099_v14 = vld [vmem:[#allocation25_spill] sm:$0xff] }
 0x2fa   : > { %v2508_v55 = vsel %vm2444_vm15, %v5202_v62, %v6083_v61  ;;  %v2566_v41 = vmul.f32 %v2534_v54, %v6086_v36  ;;  %v2594_v2 = vpack.c.bf16 %v2562_v24, %v2562_v24  ;;  %v6087_v62 = vsub.f32 1.0, %v5084_v19  ;;  %v6094_v24 = vld [vmem:[#allocation23_spill] sm:$0xff]  ;;  %v6096_v60 = vld [vmem:[#allocation24_spill] sm:$0xff]  ;;  %v6103_v44 = vld [vmem:[#allocation94_spill] sm:$0xff] }
 0x2fb   : > { %v2509_v40 = vsel %vm2445_vm0, %v5218_v12, %v6085_v53  ;;  %v2539_v10 = vadd.f32 1.0, %v2507_v4  ;;  %v2567_v52 = vmul.f32 %v2535_v26, %v6088_v5  ;;  %v2595_v46 = vpack.c.bf16 %v2563_v16, %v2563_v16  ;;  %2626 = vst.msk [vmem:[%s5303_s24 + $0x2c] sm:$0xf] %vm832_vm4, %v2593_v56  ;;  %v6102_v25 = vld [vmem:[#allocation119_spill] sm:$0xff]  ;;  %v6105_v61 = vld [vmem:[#allocation96_spill] sm:$0xff]  ;;  %v6106_v29 = vld [vmem:[#allocation33_spill] sm:$0xff] }
 0x2fc   : > { %v2510_v59 = vsel %vm2446_vm1, %v5222_v63, %v6087_v62  ;;  %v6089_v12 = vsub.f32 1.0, %v5087_v58  ;;  %v2540_v3 = vadd.f32 1.0, %v2508_v55  ;;  %v2568_v19 = vmul.f32 %v2536_v8, %v6090_v57  ;;  %2627 = vst.msk [vmem:[%s5303_s24 + $0x30] sm:$0xf] %vm832_vm4, %v2594_v2  ;;  %v6107_v56 = vld [vmem:[#allocation97_spill] sm:$0xff] }
 0x2fd   : > { %v2596_v6 = vpack.c.bf16 %v2564_v21, %v2564_v21  ;;  %v6091_v63 = vsub.f32 1.0, %v5090_v13  ;;  %v2541_v49 = vadd.f32 1.0, %v2509_v40  ;;  %v2569_v58 = vmul.f32 %v2537_v33, %v6092_v17  ;;  %2628 = vst.msk [vmem:[%s5303_s24 + $0x34] sm:$0xf] %vm832_vm4, %v2595_v46  ;;  %v6110_v2 = vld [vmem:[#allocation41_spill] sm:$0xff] }
 0x2fe   : > { %v2511_v37 = vsel %vm2447_vm2, %v5226_v1, %v6089_v12  ;;  %v2597_v54 = vpack.c.bf16 %v2565_v39, %v2565_v39  ;;  %v6093_v1 = vsub.f32 1.0, %v5093_v42  ;;  %v2542_v51 = vadd.f32 1.0, %v2510_v59 }
 0x2ff   : > { %v2512_v47 = vsel %vm2448_vm3, %v5234_v23, %v6091_v63  ;;  %v2570_v13 = vmul.f32 %v2538_v43, %v6094_v24  ;;  %v2598_v18 = vpack.c.bf16 %v2566_v41, %v2566_v41  ;;  %v6095_v23 = vsub.f32 1.0, %v5096_v48  ;;  %2629 = vst.msk [vmem:[%s5303_s24 + $0x38] sm:$0xf] %vm832_vm4, %v2596_v6 }
 0x300   : > { %v2513_v30 = vsel %vm2449_vm5, %v5238_v9, %v6093_v1  ;;  %v2543_v31 = vadd.f32 1.0, %v2511_v37  ;;  %v2571_v42 = vmul.f32 %v2539_v10, %v6096_v60  ;;  %v2599_v26 = vpack.c.bf16 %v2567_v52, %v2567_v52  ;;  %2630 = vst.msk [vmem:[%s5303_s24 + $0x3c] sm:$0xf] %vm832_vm4, %v2597_v54  ;;  %v6111_v52 = vld [vmem:[#allocation45_spill] sm:$0xff] }
 0x301   : > { %v2514_v7 = vsel %vm2450_vm6, %v5252_v15, %v6095_v23  ;;  %v6097_v9 = vsub.f32 1.0, %v5099_v50  ;;  %v2544_v16 = vadd.f32 1.0, %v2512_v47  ;;  %v2572_v48 = vmul.f32 %v2540_v3, %v6099_v14  ;;  %v6100_v15 = vld [vmem:[#allocation64_spill] sm:$0xff]  ;;  %2631 = vst.msk [vmem:[%s5303_s24 + $0x40] sm:$0xf] %vm832_vm4, %v2598_v18  ;;  %v6112_v3 = vld [vmem:[#allocation49_spill] sm:$0xff] }
 0x302   : > { %v2600_v0 = vpack.c.bf16 %v2568_v19, %v2568_v19  ;;  %v6101_v35 = vsub.f32 1.0, %v6100_v15  ;;  %v2545_v8 = vadd.f32 1.0, %v2513_v30  ;;  %v2573_v50 = vmul.f32 %v2541_v49, %v6103_v44  ;;  %2632 = vst.msk [vmem:[%s5303_s24 + $0x44] sm:$0xf] %vm832_vm4, %v2599_v26 }
 0x303   : > { %v2515_v28 = vsel %vm2451_vm7, %v6098_v34, %v6097_v9  ;;  %v2601_v21 = vpack.c.bf16 %v2569_v58, %v2569_v58  ;;  %v6104_v38 = vsub.f32 1.0, %v6040_v27  ;;  %v2546_v45 = vadd.f32 1.0, %v2514_v7  ;;  %v6108_v27 = vld [vmem:[#allocation37_spill] sm:$0xff] }
 0x304   : > { %v2516_v4 = vsel %vm2452_vm8, %v6102_v25, %v6101_v35  ;;  %v2574_v55 = vmul.f32 %v2542_v51, %v6105_v61  ;;  %v2602_v33 = vpack.c.bf16 %v2570_v13, %v2570_v13  ;;  %v1777_v20 = vmul.f32 0.5, %v6106_v29  ;;  %2633 = vst.msk [vmem:[%s5303_s24 + $0x48] sm:$0xf] %vm832_vm4, %v2600_v0 }
 0x305   : > { %v2517_v22 = vsel %vm2453_vm9, %v5292_v11, %v6104_v38  ;;  %v2547_v39 = vadd.f32 1.0, %v2515_v28  ;;  %v2575_v53 = vmul.f32 %v2543_v31, %v6107_v56  ;;  %v2603_v40 = vpack.c.bf16 %v2571_v42, %v2571_v42  ;;  %v6109_v11 = vld [vmem:[#allocation98_spill] sm:$0xff]  ;;  %2634 = vst.msk [vmem:[%s5303_s24 + $0x4c] sm:$0xf] %vm832_vm4, %v2601_v21 }
 0x306   : > { %v1778_v43 = vmul.f32 0.5, %v6108_v27  ;;  %v2548_v32 = vadd.f32 1.0, %v2516_v4  ;;  %v2576_v36 = vmul.f32 %v2544_v16, %v6109_v11  ;;  %v2604_v41 = vpack.c.bf16 %v2572_v48, %v2572_v48  ;;  %2635 = vst.msk [vmem:[%s5303_s24 + $0x50] sm:$0xf] %vm832_vm4, %v2602_v33 }
 0x307   : > { %v1779_v62 = vmul.f32 0.5, %v6110_v2  ;;  %v2549_v59 = vadd.f32 1.0, %v2517_v22  ;;  %v2577_v10 = vmul.f32 %v2545_v8, %v1777_v20  ;;  %v2605_v5 = vpack.c.bf16 %v2573_v50, %v2573_v50  ;;  %2636 = vst.msk [vmem:[%s5303_s24 + $0x54] sm:$0xf] %vm832_vm4, %v2603_v40 }
 0x308   : > { %v1780_v46 = vmul.f32 0.5, %v6111_v52  ;;  %v2578_v12 = vmul.f32 %v2546_v45, %v1778_v43  ;;  %v2606_v37 = vpack.c.bf16 %v2574_v55, %v2574_v55  ;;  %v1781_v57 = vmul.f32 0.5, %v6112_v3  ;;  %2637 = vst.msk [vmem:[%s5303_s24 + $0x58] sm:$0xf] %vm832_vm4, %v2604_v41 }
 0x309   : > { %v2579_v19 = vmul.f32 %v2547_v39, %v1779_v62  ;;  %v2607_v6 = vpack.c.bf16 %v2575_v53, %v2575_v53  ;;  %v2608_v47 = vpack.c.bf16 %v2576_v36, %v2576_v36  ;;  %v2609_v17 = vpack.c.bf16 %v2577_v10, %v2577_v10  ;;  %2638 = vst.msk [vmem:[%s5303_s24 + $0x5c] sm:$0xf] %vm832_vm4, %v2605_v5 }
 0x30a   : > { %v2580_v63 = vmul.f32 %v2548_v32, %v1780_v46  ;;  %v2581_v49 = vmul.f32 %v2549_v59, %v1781_v57  ;;  %v2610_v58 = vpack.c.bf16 %v2578_v12, %v2578_v12  ;;  %2639 = vst.msk [vmem:[%s5303_s24 + $0x60] sm:$0xf] %vm832_vm4, %v2606_v37 }
 0x30b   : > { %v2611_v54 = vpack.c.bf16 %v2579_v19, %v2579_v19  ;;  %2640 = vst.msk [vmem:[%s5303_s24 + $0x64] sm:$0xf] %vm832_vm4, %v2607_v6 }
 0x30c   : > { %v2612_v1 = vpack.c.bf16 %v2580_v63, %v2580_v63  ;;  %2641 = vst.msk [vmem:[%s5303_s24 + $0x68] sm:$0xf] %vm832_vm4, %v2608_v47  ;;  %v2613_v30 = vpack.c.bf16 %v2581_v49, %v2581_v49 }
 0x30d   : > { %2642 = vst.msk [vmem:[%s5303_s24 + $0x6c] sm:$0xf] %vm832_vm4, %v2609_v17 }
 0x30e   : > { %2643 = vst.msk [vmem:[%s5303_s24 + $0x70] sm:$0xf] %vm832_vm4, %v2610_v58 }
 0x30f   : > { %2644 = vst.msk [vmem:[%s5303_s24 + $0x74] sm:$0xf] %vm832_vm4, %v2611_v54 }
 0x310   : > { %2645 = vst.msk [vmem:[%s5303_s24 + $0x78] sm:$0xf] %vm832_vm4, %v2612_v1 }
 0x311   : > { %2646 = vst.msk [vmem:[%s5303_s24 + $0x7c] sm:$0xf] %vm832_vm4, %v2613_v30 }
 0x312 PF: > { %s18_s29 = sadd.s32 1, %s3312_s29   ;;  %s6113_s27 = smov %s3308_s28 }
 0x313   : > { %p15_p5 = scmp.ge.s32.totalorder %s18_s29, 4   ;;  %s6114_s28 = smov %s6116_s30 }
 0x315   :  { %17 = sbr.rel (!%p15_p5) target bundleno = 2 (0x2), region = 101 }

</bundles_post_ra>
